<compile_context>
chip_gen: v5e
topology: v5e:2x2
jax: 0.10.0
libtpu: 0.0.40
codegen_flags: <defaults>
</compile_context>

<pallas_src>
import functools

import jax
import jax.numpy as jnp
from jax.experimental import pallas as pl
from jax.experimental.pallas import tpu as pltpu


def _round_up(x, m):
    return (x + m - 1) // m * m


def _rbm_kernel(k, v_ref, w_ref, wt_ref, hb_ref, vb_ref, hu_ref, vu_ref, o_ref):
    """One batch tile of the k-step Gibbs chain.

    v_ref : (TB, NV)    f32   visible input tile            (batch-tiled)
    w_ref : (NV, NH)    bf16  weights                        (grid-resident)
    wt_ref: (NH, NV)    bf16  transposed weights             (grid-resident)
    hb_ref: (1, NH)     f32   hidden bias                    (grid-resident)
    vb_ref: (1, NV)     f32   visible bias                   (grid-resident)
    hu_ref: (k, TB, NH) f32   uniforms for hidden sampling   (batch-tiled)
    vu_ref: (k, TB, NV) f32   uniforms for visible sampling  (batch-tiled)
    o_ref : (TB, NV)    f32   negative-phase visible sample
    """
    tb = v_ref.shape[0]
    nv, nh = w_ref.shape

    # Hoist the (1,N)->(TB,N) bias broadcasts out of the chain (JAX does not CSE
    # broadcast_in_dim; without this they would be re-materialized every step).
    hb = jnp.broadcast_to(hb_ref[...], (tb, nh))
    vb = jnp.broadcast_to(vb_ref[...], (tb, nv))

    def v_to_h(v_bf16, u):
        # F.linear(v, W.t(), h_bias) == v @ W + h_bias
        pre = jnp.dot(v_bf16, w_ref[...], preferred_element_type=jnp.float32) + hb
        p_h = jax.nn.sigmoid(pre)                   # f32 elementwise math
        # relu(sign(p - u)) == (p > u); produce the sample directly in MXU dtype.
        return (p_h > u).astype(jnp.bfloat16)

    def h_to_v_prob(h_bf16):
        # F.linear(h, W, v_bias) == h @ W^T + v_bias  (resident W^T -> plain dot)
        pre = jnp.dot(h_bf16, wt_ref[...], preferred_element_type=jnp.float32) + vb
        return jax.nn.sigmoid(pre)

    # Initial v -> h sample.
    h = v_to_h(v_ref[...].astype(jnp.bfloat16), hu_ref[0])

    # k-1 full (h->v, v->h) steps.  fori_loop keeps vreg live ranges tight for
    # larger k instead of fully unrolling the chain.
    def body(t, h_carry):
        p_v = h_to_v_prob(h_carry)
        v_s = (p_v > vu_ref[t]).astype(jnp.bfloat16)
        return v_to_h(v_s, hu_ref[t + 1])

    h = jax.lax.fori_loop(0, k - 1, body, h)

    # Final h -> v.  The module's trailing v_to_h does not affect the returned
    # v_, so it is skipped (saves one matmul + sampling pass per tile).
    p_v = h_to_v_prob(h)
    o_ref[...] = (p_v > vu_ref[k - 1]).astype(jnp.float32)


def _pick_tile_b(batch, nv, nh, k, budget_bytes=40 * 1024 * 1024):
    """Largest batch tile (multiple of 8, <= 256) whose double-buffered blocks fit VMEM."""
    fixed = 2 * 2 * (nv * nh * 2) + 2 * 4 * (nv + nh)        # W + W^T (bf16) + biases
    per_row = 2 * 4 * (2 * nv + k * nh + k * nv)             # v in/out + uniforms, dbl-buffered
    tb = (budget_bytes - fixed) // per_row
    tb = max(8, min(256, (tb // 8) * 8))
    return min(tb, _round_up(batch, 8))


def rbm_forward(v, W, h_bias, v_bias, *, k=5, key=None, tile_b=None):
    """JAX/Pallas equivalent of RBM.forward: returns (v, v_)."""
    assert k >= 1
    if key is None:
        key = jax.random.PRNGKey(0)
    B, n_visible = v.shape
    n_hidden = W.shape[1]

    # Lane-align feature dims (e.g. 784 -> 896, 500 -> 512): dense tiles,
    # unmasked vector stores.  Zero-padded weight rows/cols make the padded
    # units inert, so valid outputs are unchanged.
    nv = _round_up(n_visible, 128)
    nh = _round_up(n_hidden, 128)

    if tile_b is None:
        tile_b = _pick_tile_b(B, nv, nh, k)
    tile_b = max(8, _round_up(tile_b, 8))
    b_pad = _round_up(max(B, tile_b), tile_b)
    grid = (b_pad // tile_b,)

    f32, bf16 = jnp.float32, jnp.bfloat16

    w_p = jnp.zeros((nv, nh), bf16).at[:n_visible, :n_hidden].set(W.astype(bf16))
    wt_p = w_p.T                                   # resident transposed copy
    hb_p = jnp.zeros((1, nh), f32).at[0, :n_hidden].set(h_bias.astype(f32))
    vb_p = jnp.zeros((1, nv), f32).at[0, :n_visible].set(v_bias.astype(f32))
    v_p = jnp.zeros((b_pad, nv), f32).at[:B, :n_visible].set(v.astype(f32))

    # torch.rand equivalents: one uniform per Bernoulli draw actually consumed
    # by the chain (k hidden-sampling rounds, k visible-sampling rounds).
    k_h, k_v = jax.random.split(key)
    hu = jax.random.uniform(k_h, (k, b_pad, nh), dtype=f32)
    vu = jax.random.uniform(k_v, (k, b_pad, nv), dtype=f32)

    kernel = functools.partial(_rbm_kernel, k)

    out = pl.pallas_call(
        kernel,
        out_shape=jax.ShapeDtypeStruct((b_pad, nv), f32),
        grid=grid,
        in_specs=[
            pl.BlockSpec((tile_b, nv), lambda i: (i, 0)),        # v        (batch-tiled)
            pl.BlockSpec((nv, nh), lambda i: (0, 0)),            # W        (resident)
            pl.BlockSpec((nh, nv), lambda i: (0, 0)),            # W^T      (resident)
            pl.BlockSpec((1, nh), lambda i: (0, 0)),             # h_bias   (resident)
            pl.BlockSpec((1, nv), lambda i: (0, 0)),             # v_bias   (resident)
            pl.BlockSpec((k, tile_b, nh), lambda i: (0, i, 0)),  # hidden uniforms
            pl.BlockSpec((k, tile_b, nv), lambda i: (0, i, 0)),  # visible uniforms
        ],
        out_specs=pl.BlockSpec((tile_b, nv), lambda i: (i, 0)),
        compiler_params=pltpu.CompilerParams(
            dimension_semantics=("parallel",),     # shard batch tiles across cores (v7x)
            vmem_limit_bytes=48 * 1024 * 1024,
        ),
    )(v_p, w_p, wt_p, hb_p, vb_p, hu, vu)

    return v, out[:B, :n_visible]


if __name__ == "__main__":
    # Module-default feature sizes, small batch / chain for the demo.
    B, N_VISIBLE, N_HIDDEN, K = 24, 784, 500, 5

    key = jax.random.PRNGKey(0)
    k_w, k_v, k_chain = jax.random.split(key, 3)

    # Mirrors RBM.__init__: W ~ randn * 0.01, zero biases.
    W = jax.random.normal(k_w, (N_VISIBLE, N_HIDDEN), dtype=jnp.float32) * 0.01
    v_bias = jnp.zeros((N_VISIBLE,), dtype=jnp.float32)
    h_bias = jnp.zeros((N_HIDDEN,), dtype=jnp.float32)

    # Binary visible input (binarized-MNIST-like).
    v = (jax.random.uniform(k_v, (B, N_VISIBLE)) > 0.5).astype(jnp.float32)

    # tile_b=16 forces a multi-step batch grid (grid=(2,)) plus batch padding,
    # exercising the tiled / pipelined path even at this small demo size.
    v_out, v_neg = rbm_forward(v, W, h_bias, v_bias, k=K, key=k_chain, tile_b=16)
    jax.block_until_ready(v_neg)

    assert v_out.shape == (B, N_VISIBLE) and v_neg.shape == (B, N_VISIBLE)
    assert v_neg.dtype == jnp.float32
    # Gibbs samples are Bernoulli draws -> values must be exactly 0.0 or 1.0.
    assert bool(jnp.all((v_neg == 0.0) | (v_neg == 1.0)))

    print("KERNEL_OK")
</pallas_src>

<mosaic_0001>
module attributes {stable_mosaic.version = 11 : i64} {
  func.func @_rbm_kernel(%arg0: i32, %arg1: memref<16x896xf32, #tpu.memory_space<vmem>>, %arg2: memref<896x512xbf16, #tpu.memory_space<vmem>>, %arg3: memref<512x896xbf16, #tpu.memory_space<vmem>>, %arg4: memref<1x512xf32, #tpu.memory_space<vmem>>, %arg5: memref<1x896xf32, #tpu.memory_space<vmem>>, %arg6: memref<5x16x512xf32, #tpu.memory_space<vmem>>, %arg7: memref<5x16x896xf32, #tpu.memory_space<vmem>>, %arg8: memref<16x896xf32, #tpu.memory_space<vmem>>) attributes {dimension_semantics = [#tpu.dimension_semantics<parallel>], iteration_bounds = array<i64: 2>, scalar_prefetch = 0 : i64, scratch_operands = 0 : i64, tpu.core_type = #tpu.core_type<tc>, window_params = [{transform_indices = @transform_0, window_bounds = array<i64: 16, 896>}, {pipeline_mode = #tpu.pipeline_mode<synchronous>, transform_indices = @transform_1, window_bounds = array<i64: 896, 512>}, {pipeline_mode = #tpu.pipeline_mode<synchronous>, transform_indices = @transform_2, window_bounds = array<i64: 512, 896>}, {pipeline_mode = #tpu.pipeline_mode<synchronous>, transform_indices = @transform_3, window_bounds = array<i64: 1, 512>}, {pipeline_mode = #tpu.pipeline_mode<synchronous>, transform_indices = @transform_4, window_bounds = array<i64: 1, 896>}, {transform_indices = @transform_5, window_bounds = array<i64: 5, 16, 512>}, {transform_indices = @transform_6, window_bounds = array<i64: 5, 16, 896>}, {transform_indices = @transform_7, window_bounds = array<i64: 16, 896>}]} {
    %c0 = arith.constant 0 : index
    %c0_0 = arith.constant 0 : index
    %0 = vector.load %arg4[%c0, %c0_0] : memref<1x512xf32, #tpu.memory_space<vmem>>, vector<1x512xf32>
    %1 = vector.shape_cast %0 : vector<1x512xf32> to vector<1x512xf32>
    %2 = vector.broadcast %1 : vector<1x512xf32> to vector<16x512xf32>
    %c0_1 = arith.constant 0 : index
    %c0_2 = arith.constant 0 : index
    %3 = vector.load %arg5[%c0_1, %c0_2] : memref<1x896xf32, #tpu.memory_space<vmem>>, vector<1x896xf32>
    %4 = vector.shape_cast %3 : vector<1x896xf32> to vector<1x896xf32>
    %5 = vector.broadcast %4 : vector<1x896xf32> to vector<16x896xf32>
    %c0_3 = arith.constant 0 : index
    %c0_4 = arith.constant 0 : index
    %6 = vector.load %arg1[%c0_3, %c0_4] : memref<16x896xf32, #tpu.memory_space<vmem>>, vector<16x896xf32>
    %7 = arith.truncf %6 : vector<16x896xf32> to vector<16x896xbf16>
    %c0_5 = arith.constant 0 : index
    %c0_6 = arith.constant 0 : index
    %c0_7 = arith.constant 0 : index
    %8 = vector.load %arg6[%c0_5, %c0_6, %c0_7] : memref<5x16x512xf32, #tpu.memory_space<vmem>>, vector<1x16x512xf32>
    %9 = vector.shape_cast %8 : vector<1x16x512xf32> to vector<16x512xf32>
    %c0_8 = arith.constant 0 : index
    %c0_9 = arith.constant 0 : index
    %10 = vector.load %arg2[%c0_8, %c0_9] : memref<896x512xbf16, #tpu.memory_space<vmem>>, vector<896x512xbf16>
    %cst = arith.constant dense<0.000000e+00> : vector<16x512xf32>
    %11 = tpu.matmul %7, %10, %cst {dimension_numbers = #tpu.dot_dimension_numbers<[1], [0], [0], [1], [0, 0, 1, 1], [], []>} : vector<16x896xbf16>, vector<896x512xbf16>, vector<16x512xf32> -> vector<16x512xf32>
    %12 = arith.addf %11, %2 : vector<16x512xf32>
    %13 = arith.negf %12 : vector<16x512xf32>
    %14 = math.exp %13 : vector<16x512xf32>
    %cst_10 = arith.constant 1.000000e+00 : f32
    %15 = vector.broadcast %cst_10 : f32 to vector<16x512xf32>
    %16 = arith.addf %15, %14 : vector<16x512xf32>
    %17 = arith.divf %15, %16 : vector<16x512xf32>
    %18 = arith.cmpf ogt, %17, %9 : vector<16x512xf32>
    %19 = arith.extui %18 : vector<16x512xi1> to vector<16x512xi32>
    %20 = arith.sitofp %19 : vector<16x512xi32> to vector<16x512xf32>
    %21 = arith.truncf %20 : vector<16x512xf32> to vector<16x512xbf16>
    %c0_i32 = arith.constant 0 : i32
    %c4_i32 = arith.constant 4 : i32
    %22 = arith.addi %c0_i32, %c4_i32 : i32
    %c1_i32 = arith.constant 1 : i32
    %23 = scf.for %arg9 = %c0_i32 to %22 step %c1_i32 iter_args(%arg10 = %21) -> (vector<16x512xbf16>)  : i32 {
      %c0_20 = arith.constant 0 : index
      %c0_21 = arith.constant 0 : index
      %38 = vector.load %arg3[%c0_20, %c0_21] : memref<512x896xbf16, #tpu.memory_space<vmem>>, vector<512x896xbf16>
      %cst_22 = arith.constant dense<0.000000e+00> : vector<16x896xf32>
      %39 = tpu.matmul %arg10, %38, %cst_22 {dimension_numbers = #tpu.dot_dimension_numbers<[1], [0], [0], [1], [0, 0, 1, 1], [], []>} : vector<16x512xbf16>, vector<512x896xbf16>, vector<16x896xf32> -> vector<16x896xf32>
      %40 = arith.addf %39, %5 : vector<16x896xf32>
      %41 = arith.negf %40 : vector<16x896xf32>
      %42 = math.exp %41 : vector<16x896xf32>
      %cst_23 = arith.constant 1.000000e+00 : f32
      %43 = vector.broadcast %cst_23 : f32 to vector<16x896xf32>
      %44 = arith.addf %43, %42 : vector<16x896xf32>
      %45 = arith.divf %43, %44 : vector<16x896xf32>
      %46 = arith.index_cast %arg9 : i32 to index
      %c0_24 = arith.constant 0 : index
      %c0_25 = arith.constant 0 : index
      %47 = vector.load %arg7[%46, %c0_24, %c0_25] : memref<5x16x896xf32, #tpu.memory_space<vmem>>, vector<1x16x896xf32>
      %48 = vector.shape_cast %47 : vector<1x16x896xf32> to vector<16x896xf32>
      %49 = arith.cmpf ogt, %45, %48 : vector<16x896xf32>
      %50 = arith.extui %49 : vector<16x896xi1> to vector<16x896xi32>
      %51 = arith.sitofp %50 : vector<16x896xi32> to vector<16x896xf32>
      %52 = arith.truncf %51 : vector<16x896xf32> to vector<16x896xbf16>
      %c1_i32_26 = arith.constant 1 : i32
      %53 = arith.addi %arg9, %c1_i32_26 : i32
      %54 = arith.index_cast %53 : i32 to index
      %c0_27 = arith.constant 0 : index
      %c0_28 = arith.constant 0 : index
      %55 = vector.load %arg6[%54, %c0_27, %c0_28] : memref<5x16x512xf32, #tpu.memory_space<vmem>>, vector<1x16x512xf32>
      %56 = vector.shape_cast %55 : vector<1x16x512xf32> to vector<16x512xf32>
      %c0_29 = arith.constant 0 : index
      %c0_30 = arith.constant 0 : index
      %57 = vector.load %arg2[%c0_29, %c0_30] : memref<896x512xbf16, #tpu.memory_space<vmem>>, vector<896x512xbf16>
      %cst_31 = arith.constant dense<0.000000e+00> : vector<16x512xf32>
      %58 = tpu.matmul %52, %57, %cst_31 {dimension_numbers = #tpu.dot_dimension_numbers<[1], [0], [0], [1], [0, 0, 1, 1], [], []>} : vector<16x896xbf16>, vector<896x512xbf16>, vector<16x512xf32> -> vector<16x512xf32>
      %59 = arith.addf %58, %2 : vector<16x512xf32>
      %60 = arith.negf %59 : vector<16x512xf32>
      %61 = math.exp %60 : vector<16x512xf32>
      %cst_32 = arith.constant 1.000000e+00 : f32
      %62 = vector.broadcast %cst_32 : f32 to vector<16x512xf32>
      %63 = arith.addf %62, %61 : vector<16x512xf32>
      %64 = arith.divf %62, %63 : vector<16x512xf32>
      %65 = arith.cmpf ogt, %64, %56 : vector<16x512xf32>
      %66 = arith.extui %65 : vector<16x512xi1> to vector<16x512xi32>
      %67 = arith.sitofp %66 : vector<16x512xi32> to vector<16x512xf32>
      %68 = arith.truncf %67 : vector<16x512xf32> to vector<16x512xbf16>
      scf.yield %68 : vector<16x512xbf16>
    }
    %c4_i32_11 = arith.constant 4 : i32
    %c0_12 = arith.constant 0 : index
    %c0_13 = arith.constant 0 : index
    %24 = vector.load %arg3[%c0_12, %c0_13] : memref<512x896xbf16, #tpu.memory_space<vmem>>, vector<512x896xbf16>
    %cst_14 = arith.constant dense<0.000000e+00> : vector<16x896xf32>
    %25 = tpu.matmul %23, %24, %cst_14 {dimension_numbers = #tpu.dot_dimension_numbers<[1], [0], [0], [1], [0, 0, 1, 1], [], []>} : vector<16x512xbf16>, vector<512x896xbf16>, vector<16x896xf32> -> vector<16x896xf32>
    %26 = arith.addf %25, %5 : vector<16x896xf32>
    %27 = arith.negf %26 : vector<16x896xf32>
    %28 = math.exp %27 : vector<16x896xf32>
    %cst_15 = arith.constant 1.000000e+00 : f32
    %29 = vector.broadcast %cst_15 : f32 to vector<16x896xf32>
    %30 = arith.addf %29, %28 : vector<16x896xf32>
    %31 = arith.divf %29, %30 : vector<16x896xf32>
    %c4 = arith.constant 4 : index
    %c0_16 = arith.constant 0 : index
    %c0_17 = arith.constant 0 : index
    %32 = vector.load %arg7[%c4, %c0_16, %c0_17] : memref<5x16x896xf32, #tpu.memory_space<vmem>>, vector<1x16x896xf32>
    %33 = vector.shape_cast %32 : vector<1x16x896xf32> to vector<16x896xf32>
    %34 = arith.cmpf ogt, %31, %33 : vector<16x896xf32>
    %35 = arith.extui %34 : vector<16x896xi1> to vector<16x896xi32>
    %36 = arith.sitofp %35 : vector<16x896xi32> to vector<16x896xf32>
    %c0_18 = arith.constant 0 : index
    %c0_19 = arith.constant 0 : index
    %37 = vector.load %arg8[%c0_18, %c0_19] : memref<16x896xf32, #tpu.memory_space<vmem>>, vector<16x896xf32>
    tpu.vector_store %arg8[%c0_18, %c0_19], %36 {strides = array<i32>} : memref<16x896xf32, #tpu.memory_space<vmem>>, vector<16x896xf32>,
    return
  }
  func.func @transform_0(%arg0: i32) -> (i32, i32) {
    %c0_i32 = arith.constant 0 : i32
    %c0_i32_0 = arith.constant 0 : i32
    return %arg0, %c0_i32 : i32, i32
  }
  func.func @transform_1(%arg0: i32) -> (i32, i32) {
    %c0_i32 = arith.constant 0 : i32
    %c0_i32_0 = arith.constant 0 : i32
    %c0_i32_1 = arith.constant 0 : i32
    return %c0_i32, %c0_i32_0 : i32, i32
  }
  func.func @transform_2(%arg0: i32) -> (i32, i32) {
    %c0_i32 = arith.constant 0 : i32
    %c0_i32_0 = arith.constant 0 : i32
    %c0_i32_1 = arith.constant 0 : i32
    return %c0_i32, %c0_i32_0 : i32, i32
  }
  func.func @transform_3(%arg0: i32) -> (i32, i32) {
    %c0_i32 = arith.constant 0 : i32
    %c0_i32_0 = arith.constant 0 : i32
    %c0_i32_1 = arith.constant 0 : i32
    return %c0_i32, %c0_i32_0 : i32, i32
  }
  func.func @transform_4(%arg0: i32) -> (i32, i32) {
    %c0_i32 = arith.constant 0 : i32
    %c0_i32_0 = arith.constant 0 : i32
    %c0_i32_1 = arith.constant 0 : i32
    return %c0_i32, %c0_i32_0 : i32, i32
  }
  func.func @transform_5(%arg0: i32) -> (i32, i32, i32) {
    %c0_i32 = arith.constant 0 : i32
    %c0_i32_0 = arith.constant 0 : i32
    %c0_i32_1 = arith.constant 0 : i32
    return %c0_i32, %arg0, %c0_i32_0 : i32, i32, i32
  }
  func.func @transform_6(%arg0: i32) -> (i32, i32, i32) {
    %c0_i32 = arith.constant 0 : i32
    %c0_i32_0 = arith.constant 0 : i32
    %c0_i32_1 = arith.constant 0 : i32
    return %c0_i32, %arg0, %c0_i32_0 : i32, i32, i32
  }
  func.func @transform_7(%arg0: i32) -> (i32, i32) {
    %c0_i32 = arith.constant 0 : i32
    %c0_i32_0 = arith.constant 0 : i32
    return %arg0, %c0_i32 : i32, i32
  }
}

</mosaic_0001>

<bundles_post_ra>
// kernel: tpu_custom_call.1
= control target key start
LH: loop header
LB: loop body
LE: loop exit
PB: predicated region body
PF: predicated region fallthrough
CT: control target
= control target key end

     0   :  { %s15544_s0 = inlined_call_operand.hbm [shape: f32[32,896], index: 0, kind: input, shape index: {}]   ;;  %s15545_s1 = inlined_call_operand.hbm [shape: bf16[896,512], index: 1, kind: input, shape index: {}]   ;;  %s15546_s2 = inlined_call_operand.hbm [shape: bf16[512,896], index: 2, kind: input, shape index: {}]   ;;  %s15547_s3 = inlined_call_operand.hbm [shape: f32[1,512], index: 3, kind: input, shape index: {}]   ;;  %s15548_s4 = inlined_call_operand.hbm [shape: f32[1,896], index: 4, kind: input, shape index: {}]   ;;  %s15549_s5 = inlined_call_operand.hbm [shape: f32[5,32,512], index: 5, kind: input, shape index: {}]   ;;  %s15550_s6 = inlined_call_operand.hbm [shape: f32[5,32,896], index: 6, kind: input, shape index: {}]   ;;  %s15551_s7 = inlined_call_operand.hbm [shape: f32[32,896], index: 7, kind: output, shape index: {}]  }
   0x1   :  { %15555 = sst [smem:[#allocation29_spill]] %s15545_s1 }
   0x2   :  { %15556 = sst [smem:[#allocation30_spill]] %s15547_s3 }
   0x3   :  { %12 = vsyncpa [#allocation3], 0 }
   0x4   :  { %14 = vsyncpa [#allocation3 + $0x1], 0 }
   0x5   :  { %15 = vsyncpa [#allocation6], 0 }
   0x6   :  { %16 = vsyncpa [#allocation9], 0 }
   0x7   :  { %17 = vsyncpa [#allocation12], 0 }
   0x8   :  { %19 = vsyncpa [#allocation12 + $0x1], 0 }
   0x9   :  { %20 = vsyncpa [#allocation4], 0 }
   0xa   :  { %22 = vsyncpa [#allocation4 + $0x1], 0  ;;  %s14274_s24 = smov 0   ;;  %s14276_s25 = smov 0  }
   0xb   :  { %s14278_s26 = smov 0   ;;  %s14280_s27 = smov 0  }
   0xc LB: > { %s14295_s28 = sadd.s32 4294967295, %s14185_s27   ;;  %s8910_s29 = sadd.s32 4294967294, %s14185_s27   ;;  %s14185_s27 = sphi %s14280_s27, %s15651_s27   ;;  %s14181_s26 = sphi %s14278_s26, %s15655_s26   ;;  %s14177_s25 = sphi %s14276_s25, %s15654_s25   ;;  %s14173_s24 = sphi %s14274_s24, %s15653_s24  }
   0xd   : > { %s14299_s30 = sadd.s32 1, %s14185_s27   ;;  %s35_s8 = sadd.s32 1, %s14181_s26 }
   0xe   : > { %15557 = sst [smem:[#allocation26_spill]] %s14299_s30  ;;  %s32_s9 = ssub.s32 %s14185_s27, %s14299_s30 }
   0xf   : > { %p42_p0 = scmp.ne.s32.totalorder %s14181_s26, %s14177_s25  ;;  %p33_p1 = scmp.eq.s32.totalorder %s32_s9, 0 }
  0x10   : > { %p43_p2 = scmp.eq.s32.totalorder %s14185_s27, 0  ;;  %p48_p3 = scmp.ne.s32.totalorder %s14177_s25, %s14173_s24 }
  0x11   : > { %p49_p4 = scmp.eq.s32.totalorder %s14295_s28, 0  ;;  %p208_p7 = scmp.eq.s32.totalorder %s14295_s28, 1 }
  0x12   : > { %s14311_s10 = scalar_select %p33_p1, %s14181_s26, %s35_s8  }
  0x13   : > { %p14313_p5 = por %p43_p2, %p42_p0  ;;  %p14319_p6 = por %p49_p4, %p48_p3 }
  0x14   : > { %15558 = sst [smem:[#allocation27_spill]] %s14311_s10  ;;  %p214_p8 = scmp.eq.s32.totalorder %s8910_s29, 1 }
  0x15   : > { %p8911_p9 = scmp.ge.s32.totalorder %s14185_s27, 1  ;;  %p221_p10 = scmp.lt.s32.totalorder %s14185_s27, 3 }
  0x16   : > { %p14326_p11 = por %p208_p7, %p42_p0  ;;  %p14330_p12 = por %p214_p8, %p48_p3 }
  0x17   : > { %p14334_p13 = pnand %p8911_p9, %p221_p10  ;;  %s15565_s1 = sld [smem:[#allocation29_spill]] }
  0x18   : > { %s15562_s14 = scalar_select %p14330_p12, 1, 0 }
  0x19   : > { %p13638_p1 = pneg %p14334_p13  ;;  %s14207_s19 = smov [#allocation5]  }
  0x1a   : > { %15563 = sst [smem:[#allocation28_spill]] %s15562_s14  ;;  %s234_s20 = sshll.u32 %s14207_s19, 4  ;;  %s235_s20 = int_to_ptr.vmem [resolvable:$true] %s234_s20 }
  0x1b   : > { %p14345_p0 = pnand %p13638_p1, %p49_p4  ;;  %s15567_s3 = sld [smem:[#allocation30_spill]] }
  0x1c   : > { %s14208_s8 = smov 256   ;;  %s14209_s9 = smov 16  }
  0x1d   : > { %s232_s18 = sshll.u32 %s15565_s1, 4  ;;  %s246_s19 = sshll.u32 %s15546_s2, 4  ;;  %s233_s18 = int_to_ptr.hbm [resolvable:$true] %s232_s18  ;;  %s247_s19 = int_to_ptr.hbm [resolvable:$true] %s246_s19 }
  0x1e   : > { %13641 = dma.hbm_to_vmem [thread:$0]  (!%p14345_p0), %s233_s18, 28672, %s235_s20, [#allocation6], %s14208_s8, %s14208_s8, %s14209_s9  }
  0x1f   : > { %s14210_s1 = smov [#allocation8]   ;;  %s14211_s22 = smov [#allocation7]  }
  0x20   : > { %s263_s10 = sshll.u32 %s14210_s1, 4  ;;  %s248_s23 = sshll.u32 %s14211_s22, 4  ;;  %s264_s10 = int_to_ptr.vmem [resolvable:$true] %s263_s10  ;;  %s249_s23 = int_to_ptr.vmem [resolvable:$true] %s248_s23 }
  0x21   : > { %s261_s29 = sshll.u32 %s15567_s3, 4  ;;  %s14212_s3 = smov 448   ;;  %s262_s29 = int_to_ptr.hbm [resolvable:$true] %s261_s29 }
  0x22   : > { %13647 = dma.hbm_to_vmem [thread:$0]  (!%p14345_p0), %s262_s29, 64, %s264_s10, [#allocation9]  }
  0x23   : > { %s14213_s30 = smov 28   ;;  %s273_s20 = sshll.u32 %s15548_s4, 4  ;;  %s274_s20 = int_to_ptr.hbm [resolvable:$true] %s273_s20 }
  0x24   : > { %13644 = dma.hbm_to_vmem [thread:$0]  (!%p14345_p0), %s247_s19, 28672, %s249_s23, [#allocation6], %s14212_s3, %s14212_s3, %s14213_s30  }
  0x25   : > { %s14214_s8 = smov [#allocation10]   ;;  %p8916_p2 = scmp.ge.s32.totalorder %s14185_s27, 2 }
  0x26   : > { %s275_s9 = sshll.u32 %s14214_s8, 4  ;;  %s14370_s1 = sand.u32 (!%p8916_p2), 1, %s14181_s26   ;;  %s276_s9 = int_to_ptr.vmem [resolvable:$true] %s275_s9 }
  0x27   : > { %13650 = dma.hbm_to_vmem [thread:$0]  (!%p14345_p0), %s274_s20, 112, %s276_s9, [#allocation9]  }
  0x28   : > { %282 = sbr.rel (%p8916_p2) target bundleno = 84 (0x54), region = 32  ;;  %s287_s19 = scalar_lea.sflag (!%p8916_p2), [#allocation3], %s14370_s1 }
  0x29   : > { %s13592_s3 = smul.u32 (!%p8916_p2), 112, %s14185_s27  ;;  %s14065_s8 = scalar_lea.hbm (!%p8916_p2), %s15544_s0, 224 }
  0x2a   : > { %s13591_s30 = smul.u32 (!%p8916_p2), 112, %s14370_s1 }
  0x2b   : > { %s296_s21 = scalar_lea.hbm (!%p8916_p2), %s15544_s0, %s13592_s3 }
  0x2c   : > { %s297_s29 = sshll.u32 (!%p8916_p2), %s296_s21, 4  ;;  %s290_s16 = scalar_lea.vmem (!%p8916_p2), [#allocation2], %s13591_s30  ;;  %s298_s29 = int_to_ptr.hbm [resolvable:$true] %s297_s29 }
  0x2d   : > { %s299_s17 = sshll.u32 %s290_s16, 4  ;;  %s14059_s22 = sshra.s32 %s298_s29, 4  ;;  %s300_s17 = int_to_ptr.vmem [resolvable:$true] %s299_s17  ;;  %s14060_s22 = int_to_ptr.hbm [resolvable:$true] %s14059_s22 }
  0x2e   : > { %s14061_s23 = scalar_lea.hbm %s14060_s22, 112  ;;  %p14066_p9 = scmp.lt.s32.totalorder %s14060_s22, %s15544_s0 }
  0x2f   : > { %p14062_p3 = scmp.ne.s32.totalorder %s14060_s22, %s14061_s23  ;;  %p14067_p10 = scmp.lt.s32.totalorder %s14065_s8, %s14061_s23 }
  0x31   : > { %p14063_p7 = pnand %p14062_p3, %p14313_p5  ;;  %p14068_p1 = por %p14067_p10, %p14066_p9 }
  0x33   : > { %p14064_p8 = pneg %p14063_p7 }
  0x35   : > { %p14069_p0 = pnand %p14068_p1, %p14064_p8 }
  0x37   : > { %14072 = shalt.err (!%p14069_p0)
}
  0x38   : > { %s14215_s30 = smov 896   ;;  %s14216_s14 = smov 56  }
  0x39   : > { %13608 = dma.hbm_to_vmem [thread:$0]  (%p14313_p5), %s298_s29, 1792, %s300_s17, %s287_s19, %s14215_s30, %s14215_s30, %s14216_s14  }
  0x3a   : > { %s309_s21 = sand.u32 1, %s14185_s27   ;;  %s13593_s16 = smul.u32 320, %s14370_s1 }
  0x3b   : > { %s12693_s18 = sshll.u32 %s14185_s27, 6  ;;  %s14217_s10 = smov 2048  }
  0x3c   : > { %s319_s20 = scalar_lea.hbm %s15549_s5, %s12693_s18  ;;  %s313_s29 = scalar_lea.vmem [#allocation11], %s13593_s16 }
  0x3d   : > { %s13609_s8 = scalar_select %p14313_p5, [#allocation0], [#allocation19] }
  0x3e   : > { %s332_s9 = sshll.u32 %s319_s20, 4  ;;  %s334_s17 = sshll.u32 %s313_s29, 4  ;;  %s333_s9 = int_to_ptr.hbm [resolvable:$true] %s332_s9  ;;  %s335_s17 = int_to_ptr.vmem [resolvable:$true] %s334_s17 }
  0x3f   : > { %s324_s19 = sld [smem:[%s13609_s8]]   ;;  %s14218_s30 = smov 1024  }
  0x40   : > { %13610 = sst [smem:[#allocation16]] (%p14313_p5), %s14217_s10  ;;  %s14219_s14 = smov 2  }
  0x41   : > { %13611 = sst [smem:[#allocation16 + $0x1]] (%p14313_p5), %s14218_s30  ;;  %s14220_s18 = smov 512  }
  0x42   : > { %13612 = sst [smem:[#allocation16 + $0x2]] (%p14313_p5), %s14219_s14  ;;  %s14221_s23 = smov 32  }
  0x43   : > { %13613 = sst [smem:[#allocation16 + $0x3]] (%p14313_p5), %s14220_s18  ;;  %s14410_s20 = scalar_lea.sflag [#allocation12], %s309_s21 }
  0x44   : > { %13614 = sst [smem:[#allocation16 + $0x4]] (%p14313_p5), %s14220_s18  ;;  %s14222_s8 = smov [#allocation15]  }
  0x45   : > { %s8923_s22 = sshll.u32 %s324_s19, 26  ;;  %13615 = sst [smem:[#allocation16 + $0x5]] (%p14313_p5), %s14221_s23 }
  0x46   : > { %s8924_s16 = sadd.s32 134217728, %s8923_s22 }
  0x47   : > { %13616 = dma.general (%p14313_p5), %s333_s9, 5120, %s335_s17, %s14410_s20, %s14222_s8, [#allocation16], %s8924_s16, 0  }
  0x48   : > { %s13594_s29 = smul.u32 560, %s14370_s1  ;;  %s367_s30 = scalar_lea.hbm %s15550_s6, %s13592_s3 }
  0x49   : > { %s13617_s21 = scalar_select %p14313_p5, [#allocation0], [#allocation20] }
  0x4a   : > { %s380_s14 = sshll.u32 %s367_s30, 4  ;;  %s361_s9 = scalar_lea.vmem [#allocation13], %s13594_s29  ;;  %s381_s14 = int_to_ptr.hbm [resolvable:$true] %s380_s14 }
  0x4b   : > { %s372_s18 = sld [smem:[%s13617_s21]]   ;;  %s382_s17 = sshll.u32 %s361_s9, 4  ;;  %s383_s17 = int_to_ptr.vmem [resolvable:$true] %s382_s17 }
  0x4c   : > { %s14223_s22 = smov 3584   ;;  %s14224_s1 = smov 1792  }
  0x4d   : > { %13618 = sst [smem:[#allocation18]] (%p14313_p5), %s14223_s22  ;;  %s14225_s3 = smov 2  }
  0x4e   : > { %13619 = sst [smem:[#allocation18 + $0x1]] (%p14313_p5), %s14224_s1  ;;  %s14226_s23 = smov 896  }
  0x4f   : > { %13620 = sst [smem:[#allocation18 + $0x2]] (%p14313_p5), %s14225_s3  ;;  %s14227_s29 = smov 56  }
  0x50   : > { %13621 = sst [smem:[#allocation18 + $0x3]] (%p14313_p5), %s14226_s23  ;;  %s14228_s19 = smov [#allocation17]  }
  0x51   : > { %s8928_s16 = sshll.u32 %s372_s18, 26  ;;  %13622 = sst [smem:[#allocation18 + $0x4]] (%p14313_p5), %s14226_s23 }
  0x52   : > { %s8929_s8 = sadd.s32 134217728, %s8928_s16  ;;  %13623 = sst [smem:[#allocation18 + $0x5]] (%p14313_p5), %s14227_s29 }
  0x53   : > { %13624 = dma.general (%p14313_p5), %s381_s14, 8960, %s383_s17, %s14410_s20, %s14228_s19, [#allocation18], %s8929_s8, 0  }
  0x54 PF: > { %407 = sbr.rel (%p14334_p13) target bundleno = 1610 (0x64a), region = 48  ;;  %s14441_s10 = sand.u32 (!%p14334_p13), 1, %s14177_s25  }
  0x55   : > { %s13596_s30 = smul.u32 (!%p14334_p13), 112, %s14441_s10  ;;  %s410_s21 = scalar_lea.sflag (!%p14334_p13), [#allocation3], %s14441_s10 }
  0x57   : > { %s14447_s18 = scalar_lea.vmem (!%p14334_p13), [#allocation2], %s13596_s30 }
  0x59   : > { %14152 = dma.done.wait (%p14319_p6), %s410_s21, 1792  }
  0x5a   : > { %14154 = vsyncadd (%p14319_p6), %s410_s21, 4294965504 }
  0x5b   : > { %14156 = dma.done.wait (%p49_p4), [#allocation6], 57344  }
  0x5c   : > { %14158 = vsyncadd (%p49_p4), [#allocation6], 4294909952 }
  0x5d   : > { %14160 = dma.done.wait (%p49_p4), [#allocation9], 176  }
  0x5e   : > { %14162 = vsyncadd (%p49_p4), [#allocation9], 4294967120  ;;  %s439_s11 = sand.u32 1, %s14295_s28   ;;  %s13597_s15 = smul.u32 320, %s14441_s10 }
  0x5f   : > { %s440_s20 = scalar_lea.sflag [#allocation12], %s439_s11 }
  0x60   : > { %s14463_s14 = scalar_lea.vmem [#allocation11], %s13597_s15 }
  0x61   : > { %14164 = dma.done.wait (%p14319_p6), %s440_s20, 14080  }
  0x62   : > { %14166 = vsyncadd (%p14319_p6), %s440_s20, 4294953216  ;;  %s13598_s9 = smul.u32 560, %s14441_s10  ;;  %v509_v0 = vld [vmem:[#allocation10] sm:$0xff]  ;;  %v9049_v1 = vld [vmem:[#allocation5 + $0xe0] sm:$0xf]  ;;  %s14625_s17 = scalar_lea.vmem [#allocation14], %s13596_s30 }
  0x63   : > { %v12724_v2 = vld [vmem:[#allocation5 + $0xec] sm:$0xf0]  ;;  %v14470_v3 = vperm.slane %v509_v0, 0  ;;  %v14472_v4 = vperm.slane %v509_v0, 1  ;;  %v14474_v5 = vperm.slane %v509_v0, 2  ;;  %v14476_v6 = vperm.slane %v509_v0, 3 }
  0x64   : > { %v9177_v7 = vld [vmem:[#allocation5 + $0x1e0] sm:$0xf]  ;;  %v14478_v8 = vperm.slane %v509_v0, 4  ;;  %v14480_v9 = vperm.slane %v509_v0, 5  ;;  %v14482_v10 = vperm.slane %v509_v0, 6  ;;  %v9050_v11 = vor.u32 %v12724_v2, %v9049_v1  ;;  %s14621_s12 = scalar_lea.vmem [#allocation13], %s13598_s9 }
  0x65   : > { %v12756_v12 = vld [vmem:[#allocation5 + $0x1ec] sm:$0xf0]  ;;  %v9305_v14 = vld [vmem:[#allocation5 + $0x2e0] sm:$0xf]  ;;  %s14641_s22 = smov 0  }
  0x66   : > { %v9178_v13 = vor.u32 %v12756_v12, %v9177_v7  ;;  %v12788_v15 = vld [vmem:[#allocation5 + $0x2ec] sm:$0xf0]  ;;  %v9433_v16 = vld [vmem:[#allocation5 + $0x3e0] sm:$0xf]  ;;  %1898 = vmatpush.bf16.msra.mxu0 %v9050_v11 }
  0x67   : > { %v9306_v17 = vor.u32 %v12788_v15, %v9305_v14  ;;  %v12820_v18 = vld [vmem:[#allocation5 + $0x3ec] sm:$0xf0]  ;;  %v9033_v19 = vld [vmem:[#allocation5 + $0xc0] sm:$0xf] }
  0x68   : > { %v12720_v20 = vld [vmem:[#allocation5 + $0xcc] sm:$0xf0]  ;;  %1912 = vmatpush.bf16.msra.mxu1 %v9178_v13  ;;  %v9434_v21 = vor.u32 %v12820_v18, %v9433_v16  ;;  %v9161_v23 = vld [vmem:[#allocation5 + $0x1c0] sm:$0xf] }
  0x69   : > { %v9034_v22 = vor.u32 %v12720_v20, %v9033_v19  ;;  %v12752_v24 = vld [vmem:[#allocation5 + $0x1cc] sm:$0xf0]  ;;  %v9289_v25 = vld [vmem:[#allocation5 + $0x2c0] sm:$0xf]  ;;  %1926 = vmatpush.bf16.msra.mxu2 %v9306_v17 }
  0x6a   : > { %v9162_v26 = vor.u32 %v12752_v24, %v9161_v23  ;;  %v12784_v27 = vld [vmem:[#allocation5 + $0x2cc] sm:$0xf0]  ;;  %v9417_v28 = vld [vmem:[#allocation5 + $0x3c0] sm:$0xf]  ;;  %1940 = vmatpush.bf16.msra.mxu3 %v9434_v21 }
  0x6b   : > { %v12816_v29 = vld [vmem:[#allocation5 + $0x3cc] sm:$0xf0]  ;;  %v9290_v30 = vor.u32 %v12784_v27, %v9289_v25  ;;  %v9017_v32 = vld [vmem:[#allocation5 + $0xa0] sm:$0xf]  ;;  %1899 = vmatpush.bf16.msra.mxu0 %v9034_v22 }
  0x6c   : > { %v9418_v31 = vor.u32 %v12816_v29, %v9417_v28  ;;  %v12716_v33 = vld [vmem:[#allocation5 + $0xac] sm:$0xf0]  ;;  %v9145_v34 = vld [vmem:[#allocation5 + $0x1a0] sm:$0xf]  ;;  %1913 = vmatpush.bf16.msra.mxu1 %v9162_v26 }
  0x6d   : > { %v9018_v35 = vor.u32 %v12716_v33, %v9017_v32  ;;  %v12748_v36 = vld [vmem:[#allocation5 + $0x1ac] sm:$0xf0]  ;;  %v9273_v37 = vld [vmem:[#allocation5 + $0x2a0] sm:$0xf]  ;;  %1927 = vmatpush.bf16.msra.mxu2 %v9290_v30 }
  0x6e   : > { %v12780_v38 = vld [vmem:[#allocation5 + $0x2ac] sm:$0xf0]  ;;  %v9146_v39 = vor.u32 %v12748_v36, %v9145_v34  ;;  %v9401_v40 = vld [vmem:[#allocation5 + $0x3a0] sm:$0xf]  ;;  %1941 = vmatpush.bf16.msra.mxu3 %v9418_v31 }
  0x6f   : > { %v12812_v41 = vld [vmem:[#allocation5 + $0x3ac] sm:$0xf0]  ;;  %v9001_v42 = vld [vmem:[#allocation5 + $0x80] sm:$0xf]  ;;  %v9274_v43 = vor.u32 %v12780_v38, %v9273_v37  ;;  %1900 = vmatpush.bf16.msra.mxu0 %v9018_v35 }
  0x70   : > { %v12712_v44 = vld [vmem:[#allocation5 + $0x8c] sm:$0xf0]  ;;  %v9129_v45 = vld [vmem:[#allocation5 + $0x180] sm:$0xf]  ;;  %v9402_v47 = vor.u32 %v12812_v41, %v9401_v40  ;;  %1914 = vmatpush.bf16.msra.mxu1 %v9146_v39 }
  0x71   : > { %v12744_v46 = vld [vmem:[#allocation5 + $0x18c] sm:$0xf0]  ;;  %v9257_v48 = vld [vmem:[#allocation5 + $0x280] sm:$0xf]  ;;  %v9002_v50 = vor.u32 %v12712_v44, %v9001_v42  ;;  %1928 = vmatpush.bf16.msra.mxu2 %v9274_v43 }
  0x72   : > { %v12776_v49 = vld [vmem:[#allocation5 + $0x28c] sm:$0xf0]  ;;  %v9385_v51 = vld [vmem:[#allocation5 + $0x380] sm:$0xf]  ;;  %v9130_v53 = vor.u32 %v12744_v46, %v9129_v45  ;;  %1942 = vmatpush.bf16.msra.mxu3 %v9402_v47 }
  0x73   : > { %v12808_v52 = vld [vmem:[#allocation5 + $0x38c] sm:$0xf0]  ;;  %v8985_v54 = vld [vmem:[#allocation5 + $0x60] sm:$0xf]  ;;  %v9258_v56 = vor.u32 %v12776_v49, %v9257_v48  ;;  %1901 = vmatpush.bf16.msra.mxu0 %v9002_v50 }
  0x74   : > { %v12708_v55 = vld [vmem:[#allocation5 + $0x6c] sm:$0xf0]  ;;  %v9113_v57 = vld [vmem:[#allocation5 + $0x160] sm:$0xf]  ;;  %v9386_v59 = vor.u32 %v12808_v52, %v9385_v51  ;;  %1915 = vmatpush.bf16.msra.mxu1 %v9130_v53  ;;  %v12722_v52 = vld [vmem:[#allocation5 + $0xe4] sm:$0xf] }
  0x75   : > { %v12740_v58 = vld [vmem:[#allocation5 + $0x16c] sm:$0xf0]  ;;  %v9241_v60 = vld [vmem:[#allocation5 + $0x260] sm:$0xf]  ;;  %v8986_v62 = vor.u32 %v12708_v55, %v8985_v54  ;;  %1929 = vmatpush.bf16.msra.mxu2 %v9258_v56  ;;  %v9051_v53 = vld [vmem:[#allocation5 + $0xf0] sm:$0xf0] }
  0x76   : > { %v12772_v61 = vld [vmem:[#allocation5 + $0x26c] sm:$0xf0]  ;;  %v9369_v63 = vld [vmem:[#allocation5 + $0x360] sm:$0xf]  ;;  %v9114_v1 = vor.u32 %v12740_v58, %v9113_v57  ;;  %1943 = vmatpush.bf16.msra.mxu3 %v9386_v59 }
  0x77   : > { %v12804_v0 = vld [vmem:[#allocation5 + $0x36c] sm:$0xf0]  ;;  %v8969_v2 = vld [vmem:[#allocation5 + $0x40] sm:$0xf]  ;;  %v9242_v11 = vor.u32 %v12772_v61, %v9241_v60  ;;  %1902 = vmatpush.bf16.msra.mxu0 %v8986_v62 }
  0x78   : > { %v12704_v7 = vld [vmem:[#allocation5 + $0x4c] sm:$0xf0]  ;;  %v9097_v12 = vld [vmem:[#allocation5 + $0x140] sm:$0xf]  ;;  %v9370_v14 = vor.u32 %v12804_v0, %v9369_v63  ;;  %1916 = vmatpush.bf16.msra.mxu1 %v9114_v1  ;;  %v9054_v63 = vor.u32 %v12722_v52, %v9051_v53  ;;  %v12718_v1 = vld [vmem:[#allocation5 + $0xc4] sm:$0xf] }
  0x79   : > { %v12736_v13 = vld [vmem:[#allocation5 + $0x14c] sm:$0xf0]  ;;  %v9225_v15 = vld [vmem:[#allocation5 + $0x240] sm:$0xf]  ;;  %v8970_v17 = vor.u32 %v12704_v7, %v8969_v2  ;;  %1930 = vmatpush.bf16.msra.mxu2 %v9242_v11  ;;  %v9035_v2 = vld [vmem:[#allocation5 + $0xd0] sm:$0xf0] }
  0x7a   : > { %v12768_v16 = vld [vmem:[#allocation5 + $0x24c] sm:$0xf0]  ;;  %v9353_v18 = vld [vmem:[#allocation5 + $0x340] sm:$0xf]  ;;  %v9098_v20 = vor.u32 %v12736_v13, %v9097_v12  ;;  %1944 = vmatpush.bf16.msra.mxu3 %v9370_v14 }
  0x7b   : > { %v12800_v19 = vld [vmem:[#allocation5 + $0x34c] sm:$0xf0]  ;;  %v8953_v21 = vld [vmem:[#allocation5 + $0x20] sm:$0xf]  ;;  %v9226_v23 = vor.u32 %v12768_v16, %v9225_v15  ;;  %1903 = vmatpush.bf16.msra.mxu0 %v8970_v17  ;;  %v532_v15 = vld [vmem:[%s14447_s18 + $0x38] sm:$0xff] }
  0x7c   : > { %v12700_v22 = vld [vmem:[#allocation5 + $0x2c] sm:$0xf0]  ;;  %v9081_v24 = vld [vmem:[#allocation5 + $0x120] sm:$0xf]  ;;  %v9354_v26 = vor.u32 %v12800_v19, %v9353_v18  ;;  %1917 = vmatpush.bf16.msra.mxu1 %v9098_v20  ;;  %v534_v17 = vld [vmem:[%s14447_s18 + $0x48] sm:$0xff] }
  0x7d   : > { %v12732_v25 = vld [vmem:[#allocation5 + $0x12c] sm:$0xf0]  ;;  %v9209_v27 = vld [vmem:[#allocation5 + $0x220] sm:$0xf]  ;;  %v8954_v30 = vor.u32 %v12700_v22, %v8953_v21  ;;  %1931 = vmatpush.bf16.msra.mxu2 %v9226_v23  ;;  %v9038_v23 = vor.u32 %v12718_v1, %v9035_v2 }
  0x7e   : > { %v12764_v28 = vld [vmem:[#allocation5 + $0x22c] sm:$0xf0]  ;;  %v9337_v29 = vld [vmem:[#allocation5 + $0x320] sm:$0xf]  ;;  %v9082_v34 = vor.u32 %v12732_v25, %v9081_v24  ;;  %1945 = vmatpush.bf16.msra.mxu3 %v9354_v26 }
  0x7f   : > { %v12796_v31 = vld [vmem:[#allocation5 + $0x32c] sm:$0xf0]  ;;  %v8937_v32 = vld [vmem:[#allocation5] sm:$0xf]  ;;  %v9210_v38 = vor.u32 %v12764_v28, %v9209_v27  ;;  %1904 = vmatpush.bf16.msra.mxu0 %v8954_v30  ;;  %v12714_v27 = vld [vmem:[#allocation5 + $0xa4] sm:$0xf] }
  0x80   : > { %v12696_v33 = vld [vmem:[#allocation5 + $0xc] sm:$0xf0]  ;;  %v9065_v35 = vld [vmem:[#allocation5 + $0x100] sm:$0xf]  ;;  %v9338_v42 = vor.u32 %v12796_v31, %v9337_v29  ;;  %1918 = vmatpush.bf16.msra.mxu1 %v9082_v34  ;;  %v9019_v28 = vld [vmem:[#allocation5 + $0xb0] sm:$0xf0] }
  0x81   : > { %v12728_v36 = vld [vmem:[#allocation5 + $0x10c] sm:$0xf0]  ;;  %v9193_v37 = vld [vmem:[#allocation5 + $0x200] sm:$0xf]  ;;  %v8938_v46 = vor.u32 %v12696_v33, %v8937_v32  ;;  %1932 = vmatpush.bf16.msra.mxu2 %v9210_v38  ;;  %v526_v29 = vld [vmem:[%s14447_s18 + $0x8] sm:$0xff]  ;;  %v9022_v38 = vor.u32 %v12714_v27, %v9019_v28 }
  0x82   : > { %v12760_v39 = vld [vmem:[#allocation5 + $0x20c] sm:$0xf0]  ;;  %v9561_v40 = vld [vmem:[#allocation5 + $0x4e0] sm:$0xf]  ;;  %v9066_v50 = vor.u32 %v12728_v36, %v9065_v35  ;;  %1946 = vmatpush.bf16.msra.mxu3 %v9338_v42 }
  0x83   : > { %v12852_v41 = vld [vmem:[#allocation5 + $0x4ec] sm:$0xf0]  ;;  %v9321_v43 = vld [vmem:[#allocation5 + $0x300] sm:$0xf]  ;;  %v9194_v54 = vor.u32 %v12760_v39, %v9193_v37  ;;  %1905 = vmatpush.bf16.msra.mxu0 %v8938_v46 }
  0x84   : > { %v9689_v44 = vld [vmem:[#allocation5 + $0x5e0] sm:$0xf]  ;;  %v12884_v45 = vld [vmem:[#allocation5 + $0x5ec] sm:$0xf0]  ;;  %v9562_v51 = vor.u32 %v12852_v41, %v9561_v40  ;;  %1919 = vmatpush.bf16.msra.mxu1 %v9066_v50  ;;  %v12710_v41 = vld [vmem:[#allocation5 + $0x84] sm:$0xf] }
  0x85   : > { %v12792_v47 = vld [vmem:[#allocation5 + $0x30c] sm:$0xf0]  ;;  %v9817_v48 = vld [vmem:[#allocation5 + $0x6e0] sm:$0xf]  ;;  %v9690_v55 = vor.u32 %v12884_v45, %v9689_v44  ;;  %1933 = vmatpush.bf16.msra.mxu2 %v9194_v54  ;;  %v528_v44 = vld [vmem:[%s14447_s18 + $0x18] sm:$0xff] }
  0x86   : > { %v12916_v49 = vld [vmem:[#allocation5 + $0x6ec] sm:$0xf0]  ;;  %v9545_v56 = vld [vmem:[#allocation5 + $0x4c0] sm:$0xf]  ;;  %v9322_v58 = vor.u32 %v12792_v47, %v9321_v43  ;;  %v9003_v43 = vld [vmem:[#allocation5 + $0x90] sm:$0xf0] }
  0x87   : > { %v12848_v57 = vld [vmem:[#allocation5 + $0x4cc] sm:$0xf0]  ;;  %v9818_v59 = vor.u32 %v12916_v49, %v9817_v48  ;;  %v9673_v60 = vld [vmem:[#allocation5 + $0x5c0] sm:$0xf]  ;;  %1954 = vmatpush.bf16.msrb.mxu0 %v9562_v51  ;;  %v9006_v53 = vor.u32 %v12710_v41, %v9003_v43  ;;  %v12786_v41 = vld [vmem:[#allocation5 + $0x2e4] sm:$0xf] }
  0x88   : > { %v12880_v61 = vld [vmem:[#allocation5 + $0x5cc] sm:$0xf0]  ;;  %v9801_v62 = vld [vmem:[#allocation5 + $0x6c0] sm:$0xf]  ;;  %v9546_v7 = vor.u32 %v12848_v57, %v9545_v56  ;;  %1968 = vmatpush.bf16.msrb.mxu1 %v9690_v55  ;;  %1947 = vmatpush.bf16.msra.mxu3 %v9322_v58  ;;  %v12706_v57 = vld [vmem:[#allocation5 + $0x64] sm:$0xf] }
  0x89   : > { %v12912_v0 = vld [vmem:[#allocation5 + $0x6cc] sm:$0xf0]  ;;  %v9529_v11 = vld [vmem:[#allocation5 + $0x4a0] sm:$0xf]  ;;  %v9674_v14 = vor.u32 %v12880_v61, %v9673_v60  ;;  %1982 = vmatpush.bf16.msrb.mxu2 %v9818_v59  ;;  %v8987_v58 = vld [vmem:[#allocation5 + $0x70] sm:$0xf0] }
  0x8a   : > { %v12844_v12 = vld [vmem:[#allocation5 + $0x4ac] sm:$0xf0]  ;;  %v9802_v18 = vor.u32 %v12912_v0, %v9801_v62  ;;  %v9657_v19 = vld [vmem:[#allocation5 + $0x5a0] sm:$0xf]  ;;  %v8990_v1 = vor.u32 %v12706_v57, %v8987_v58  ;;  %v9307_v43 = vld [vmem:[#allocation5 + $0x2f0] sm:$0xf0] }
  0x8b   : > { %v525_v13 = vld [vmem:[%s14447_s18] sm:$0xff]  ;;  %v527_v16 = vld [vmem:[%s14447_s18 + $0x10] sm:$0xff]  ;;  %1955 = vmatpush.bf16.msrb.mxu0 %v9546_v7  ;;  %v9530_v26 = vor.u32 %v12844_v12, %v9529_v11  ;;  %v9310_v57 = vor.u32 %v12786_v41, %v9307_v43  ;;  %v530_v58 = vld [vmem:[%s14447_s18 + $0x28] sm:$0xff] }
  0x8c   : > { %v12876_v20 = vld [vmem:[#allocation5 + $0x5ac] sm:$0xf0]  ;;  %v14488_v21 = vpack.c.bf16 %v532_v15, %v525_v13  ;;  %v14490_v22 = vpack.c.bf16 %v534_v17, %v527_v16  ;;  %1996 = vmatpush.bf16.msrb.mxu3 %v9054_v63  ;;  %v9785_v24 = vld [vmem:[#allocation5 + $0x6a0] sm:$0xf]  ;;  %1969 = vmatpush.bf16.msrb.mxu1 %v9674_v14  ;;  %v12702_v12 = vld [vmem:[#allocation5 + $0x44] sm:$0xf] }
  0x8d   : > { %v12908_v25 = vld [vmem:[#allocation5 + $0x6ac] sm:$0xf0]  ;;  %v9658_v30 = vor.u32 %v12876_v20, %v9657_v19  ;;  %v9513_v31 = vld [vmem:[#allocation5 + $0x480] sm:$0xf]  ;;  %1983 = vmatpush.bf16.msrb.mxu2 %v9802_v18  ;;  %v8971_v13 = vld [vmem:[#allocation5 + $0x50] sm:$0xf0] }
  0x8e   : > { %1934 = vmatmul.bf16.vlgmr.msra.gmra.mxu2 %v14490_v22  ;;  %v12840_v32 = vld [vmem:[#allocation5 + $0x48c] sm:$0xf0]  ;;  %1906 = vmatmul.bf16.vlgmr.msra.gmra.mxu0 %v14488_v21  ;;  %v9786_v34 = vor.u32 %v12908_v25, %v9785_v24  ;;  %v9641_v35 = vld [vmem:[#allocation5 + $0x580] sm:$0xf]  ;;  %v12698_v25 = vld [vmem:[#allocation5 + $0x24] sm:$0xf] }
  0x8f   : > { %v533_v33 = vld [vmem:[%s14447_s18 + $0x40] sm:$0xff]  ;;  %1956 = vmatpush.bf16.msrb.mxu0 %v9530_v26  ;;  %v9514_v42 = vor.u32 %v12840_v32, %v9513_v31  ;;  %v535_v45 = vld [vmem:[%s14447_s18 + $0x50] sm:$0xff] }
  0x90   : > { %v12872_v36 = vld [vmem:[#allocation5 + $0x58c] sm:$0xf0]  ;;  %v14496_v37 = vpack.c.bf16 %v533_v33, %v526_v29  ;;  %1997 = vmatpush.bf16.msrb.mxu3 %v9038_v23  ;;  %v9769_v39 = vld [vmem:[#allocation5 + $0x680] sm:$0xf]  ;;  %1970 = vmatpush.bf16.msrb.mxu1 %v9658_v30  ;;  %v14501_v49 = vpack.c.bf16 %v535_v45, %v528_v44  ;;  %v8974_v23 = vor.u32 %v12702_v12, %v8971_v13  ;;  %v8955_v26 = vld [vmem:[#allocation5 + $0x30] sm:$0xf0] }
  0x91   : > { %v12904_v40 = vld [vmem:[#allocation5 + $0x68c] sm:$0xf0]  ;;  %v9642_v46 = vor.u32 %v12872_v36, %v9641_v35  ;;  %v9497_v47 = vld [vmem:[#allocation5 + $0x460] sm:$0xf]  ;;  %1984 = vmatpush.bf16.msrb.mxu2 %v9786_v34  ;;  %v12694_v36 = vld [vmem:[#allocation5 + $0x4] sm:$0xf] }
  0x92   : > { %1920 = vmatmul.bf16.vlgmr.msra.gmra.mxu1 %v14496_v37  ;;  %v12836_v48 = vld [vmem:[#allocation5 + $0x46c] sm:$0xf0]  ;;  %v9770_v50 = vor.u32 %v12904_v40, %v9769_v39  ;;  %v9625_v51 = vld [vmem:[#allocation5 + $0x560] sm:$0xf]  ;;  %1948 = vmatmul.bf16.vlgmr.msra.gmra.mxu3 %v14501_v49  ;;  %v12754_v39 = vld [vmem:[#allocation5 + $0x1e4] sm:$0xf] }
  0x93   : > { %v12868_v52 = vld [vmem:[#allocation5 + $0x56c] sm:$0xf0]  ;;  %v9753_v54 = vld [vmem:[#allocation5 + $0x660] sm:$0xf]  ;;  %1957 = vmatpush.bf16.msrb.mxu0 %v9514_v42  ;;  %v9498_v56 = vor.u32 %v12836_v48, %v9497_v47  ;;  %v9179_v40 = vld [vmem:[#allocation5 + $0x1f0] sm:$0xf0]  ;;  %v8958_v42 = vor.u32 %v12698_v25, %v8955_v26 }
  0x94   : > { %1998 = vmatpush.bf16.msrb.mxu3 %v9022_v38  ;;  %v12900_v55 = vld [vmem:[#allocation5 + $0x66c] sm:$0xf0]  ;;  %1971 = vmatpush.bf16.msrb.mxu1 %v9642_v46  ;;  %v9626_v59 = vor.u32 %v12868_v52, %v9625_v51  ;;  %v9481_v60 = vld [vmem:[#allocation5 + $0x440] sm:$0xf]  ;;  %v8939_v38 = vld [vmem:[#allocation5 + $0x10] sm:$0xf0]  ;;  %v9182_v52 = vor.u32 %v12754_v39, %v9179_v40 }
  0x95   : > { %v12832_v61 = vld [vmem:[#allocation5 + $0x44c] sm:$0xf0]  ;;  %1985 = vmatpush.bf16.msrb.mxu2 %v9770_v50  ;;  %v9754_v62 = vor.u32 %v12900_v55, %v9753_v54  ;;  %v9609_v63 = vld [vmem:[#allocation5 + $0x540] sm:$0xf]  ;;  %v12818_v44 = vld [vmem:[#allocation5 + $0x3e4] sm:$0xf] }
  0x96   : > { %v12864_v0 = vld [vmem:[#allocation5 + $0x54c] sm:$0xf0]  ;;  %v9737_v2 = vld [vmem:[#allocation5 + $0x640] sm:$0xf]  ;;  %v9482_v11 = vor.u32 %v12832_v61, %v9481_v60  ;;  %v9435_v45 = vld [vmem:[#allocation5 + $0x3f0] sm:$0xf0]  ;;  %v8942_v61 = vor.u32 %v12694_v36, %v8939_v38 }
  0x97   : > { %v12896_v7 = vld [vmem:[#allocation5 + $0x64c] sm:$0xf0]  ;;  %1958 = vmatpush.bf16.msrb.mxu0 %v9498_v56  ;;  %v9610_v14 = vor.u32 %v12864_v0, %v9609_v63  ;;  %v9465_v15 = vld [vmem:[#allocation5 + $0x420] sm:$0xf]  ;;  %v12850_v47 = vld [vmem:[#allocation5 + $0x4e4] sm:$0xf] }
  0x98   : > { %1999 = vmatpush.bf16.msrb.mxu3 %v9006_v53  ;;  %1972 = vmatpush.bf16.msrb.mxu1 %v9626_v59  ;;  %v12828_v16 = vld [vmem:[#allocation5 + $0x42c] sm:$0xf0]  ;;  %v9738_v17 = vor.u32 %v12896_v7, %v9737_v2  ;;  %v9593_v18 = vld [vmem:[#allocation5 + $0x520] sm:$0xf]  ;;  %v9563_v48 = vld [vmem:[#allocation5 + $0x4f0] sm:$0xf0] }
  0x99   : > { %1986 = vmatpush.bf16.msrb.mxu2 %v9754_v62  ;;  %v12860_v19 = vld [vmem:[#allocation5 + $0x52c] sm:$0xf0]  ;;  %v9721_v20 = vld [vmem:[#allocation5 + $0x620] sm:$0xf]  ;;  %v9466_v27 = vor.u32 %v12828_v16, %v9465_v15  ;;  %v536_v53 = vld [vmem:[%s14447_s18 + $0x58] sm:$0xff]  ;;  %v9438_v62 = vor.u32 %v12818_v44, %v9435_v45  ;;  %v9566_v2 = vor.u32 %v12850_v47, %v9563_v48 }
  0x9a   : > { %v12892_v24 = vld [vmem:[#allocation5 + $0x62c] sm:$0xf0]  ;;  %v9449_v28 = vld [vmem:[#allocation5 + $0x400] sm:$0xf]  ;;  %v9594_v31 = vor.u32 %v12860_v19, %v9593_v18  ;;  %v538_v55 = vld [vmem:[%s14447_s18 + $0x68] sm:$0xff] }
  0x9b   : > { %1959 = vmatpush.bf16.msrb.mxu0 %v9482_v11  ;;  %v12824_v29 = vld [vmem:[#allocation5 + $0x40c] sm:$0xf0]  ;;  %v9577_v30 = vld [vmem:[#allocation5 + $0x500] sm:$0xf]  ;;  %v9722_v35 = vor.u32 %v12892_v24, %v9721_v20  ;;  %v12750_v60 = vld [vmem:[#allocation5 + $0x1c4] sm:$0xf] }
  0x9c   : > { %2000 = vmatpush.bf16.msrb.mxu3 %v8990_v1  ;;  %1973 = vmatpush.bf16.msrb.mxu1 %v9610_v14  ;;  %v12856_v32 = vld [vmem:[#allocation5 + $0x50c] sm:$0xf0]  ;;  %v9705_v33 = vld [vmem:[#allocation5 + $0x600] sm:$0xf]  ;;  %v9450_v46 = vor.u32 %v12824_v29, %v9449_v28  ;;  %v9163_v63 = vld [vmem:[#allocation5 + $0x1d0] sm:$0xf0] }
  0x9d   : > { %v12888_v34 = vld [vmem:[#allocation5 + $0x60c] sm:$0xf0]  ;;  %1987 = vmatpush.bf16.msrb.mxu2 %v9738_v17  ;;  %v9578_v51 = vor.u32 %v12856_v32, %v9577_v30  ;;  %v12782_v0 = vld [vmem:[#allocation5 + $0x2c4] sm:$0xf]  ;;  %v9291_v1 = vld [vmem:[#allocation5 + $0x2d0] sm:$0xf0]  ;;  %v9166_v17 = vor.u32 %v12750_v60, %v9163_v63 }
  0x9e   : > { %v529_v50 = vld [vmem:[%s14447_s18 + $0x20] sm:$0xff]  ;;  %v531_v54 = vld [vmem:[%s14447_s18 + $0x30] sm:$0xff]  ;;  %v9706_v56 = vor.u32 %v12888_v34, %v9705_v33  ;;  %v9294_v18 = vor.u32 %v12782_v0, %v9291_v1 }
  0x9f   : > { %1960 = vmatpush.bf16.msrb.mxu0 %v9466_v27  ;;  %v537_v59 = vld [vmem:[%s14447_s18 + $0x60] sm:$0xff]  ;;  %v14510_v7 = vpack.c.bf16 %v536_v53, %v529_v50  ;;  %v14512_v13 = vpack.c.bf16 %v538_v55, %v531_v54 }
  0xa0   : > { %2001 = vmatpush.bf16.msrb.mxu3 %v8974_v23  ;;  %1974 = vmatpush.bf16.msrb.mxu1 %v9594_v31  ;;  %v12814_v11 = vld [vmem:[#allocation5 + $0x3c4] sm:$0xf]  ;;  %v9419_v12 = vld [vmem:[#allocation5 + $0x3d0] sm:$0xf0]  ;;  %v14514_v14 = vpack.c.bf16 %v537_v59, %v530_v58 }
  0xa1   : > { %1988 = vmatpush.bf16.msrb.mxu2 %v9722_v35  ;;  %v12846_v15 = vld [vmem:[#allocation5 + $0x4c4] sm:$0xf]  ;;  %v9547_v16 = vld [vmem:[#allocation5 + $0x4d0] sm:$0xf0]  ;;  %v9422_v20 = vor.u32 %v12814_v11, %v9419_v12 }
  0xa2   : > { %v12746_v19 = vld [vmem:[#allocation5 + $0x1a4] sm:$0xf]  ;;  %v9147_v23 = vld [vmem:[#allocation5 + $0x1b0] sm:$0xf0]  ;;  %v9550_v26 = vor.u32 %v12846_v15, %v9547_v16 }
  0xa3   : > { %1961 = vmatpush.bf16.msrb.mxu0 %v9450_v46  ;;  %v12778_v24 = vld [vmem:[#allocation5 + $0x2a4] sm:$0xf]  ;;  %v9275_v25 = vld [vmem:[#allocation5 + $0x2b0] sm:$0xf0]  ;;  %v9150_v31 = vor.u32 %v12746_v19, %v9147_v23 }
  0xa4   : > { %2002 = vmatpush.bf16.msrb.mxu3 %v8958_v42  ;;  %1975 = vmatpush.bf16.msrb.mxu1 %v9578_v51  ;;  %v12810_v27 = vld [vmem:[#allocation5 + $0x3a4] sm:$0xf]  ;;  %v9403_v28 = vld [vmem:[#allocation5 + $0x3b0] sm:$0xf0]  ;;  %v9278_v32 = vor.u32 %v12778_v24, %v9275_v25 }
  0xa5   : > { %1989 = vmatpush.bf16.msrb.mxu2 %v9706_v56  ;;  %v12842_v29 = vld [vmem:[#allocation5 + $0x4a4] sm:$0xf]  ;;  %v9531_v30 = vld [vmem:[#allocation5 + $0x4b0] sm:$0xf0]  ;;  %v9406_v34 = vor.u32 %v12810_v27, %v9403_v28 }
  0xa6   : > { %1962 = vmatmul.bf16.vlgmr.msrb.gmra.mxu0 %v14510_v7  ;;  %v12742_v33 = vld [vmem:[#allocation5 + $0x184] sm:$0xf]  ;;  %v9131_v35 = vld [vmem:[#allocation5 + $0x190] sm:$0xf0]  ;;  %v9534_v39 = vor.u32 %v12842_v29, %v9531_v30 }
  0xa7   : > { %2010 = vmatpush.bf16.msra.mxu0 %v9182_v52  ;;  %1976 = vmatmul.bf16.vlgmr.msrb.gmra.mxu1 %v14514_v14  ;;  %v12774_v36 = vld [vmem:[#allocation5 + $0x284] sm:$0xf]  ;;  %v9259_v38 = vld [vmem:[#allocation5 + $0x290] sm:$0xf0]  ;;  %v9134_v44 = vor.u32 %v12742_v33, %v9131_v35 }
  0xa8   : > { %2024 = vmatpush.bf16.msra.mxu1 %v9310_v57  ;;  %2003 = vmatpush.bf16.msrb.mxu3 %v8942_v61  ;;  %v12806_v40 = vld [vmem:[#allocation5 + $0x384] sm:$0xf]  ;;  %v9387_v41 = vld [vmem:[#allocation5 + $0x390] sm:$0xf0]  ;;  %v9262_v45 = vor.u32 %v12774_v36, %v9259_v38 }
  0xa9   : > { %2038 = vmatpush.bf16.msra.mxu2 %v9438_v62  ;;  %v12838_v42 = vld [vmem:[#allocation5 + $0x484] sm:$0xf]  ;;  %v9515_v43 = vld [vmem:[#allocation5 + $0x490] sm:$0xf0]  ;;  %v9390_v47 = vor.u32 %v12806_v40, %v9387_v41 }
  0xaa   : > { %1990 = vmatmul.bf16.vlgmr.msrb.gmra.mxu2 %v14512_v13  ;;  %v12738_v46 = vld [vmem:[#allocation5 + $0x164] sm:$0xf]  ;;  %v9115_v48 = vld [vmem:[#allocation5 + $0x170] sm:$0xf0]  ;;  %v9518_v52 = vor.u32 %v12838_v42, %v9515_v43 }
  0xab   : > { %2011 = vmatpush.bf16.msra.mxu0 %v9166_v17  ;;  %2004 = vmatmul.bf16.vlgmr.msrb.gmra.mxu3 %v14488_v21  ;;  %v12770_v50 = vld [vmem:[#allocation5 + $0x264] sm:$0xf]  ;;  %v9243_v51 = vld [vmem:[#allocation5 + $0x270] sm:$0xf0]  ;;  %v9118_v57 = vor.u32 %v12738_v46, %v9115_v48  ;;  %v9057_v46 = vld [vmem:[#allocation5 + $0xe8] sm:$0xf] }
  0xac   : > { %2052 = vmatpush.bf16.msra.mxu3 %v9566_v2  ;;  %2025 = vmatpush.bf16.msra.mxu1 %v9294_v18  ;;  %v12802_v53 = vld [vmem:[#allocation5 + $0x364] sm:$0xf]  ;;  %v9371_v54 = vld [vmem:[#allocation5 + $0x370] sm:$0xf0]  ;;  %v9246_v58 = vor.u32 %v12770_v50, %v9243_v51  ;;  %v12725_v50 = vld [vmem:[#allocation5 + $0xf4] sm:$0xf0] }
  0xad   : > { %2039 = vmatpush.bf16.msra.mxu2 %v9422_v20  ;;  %v12834_v55 = vld [vmem:[#allocation5 + $0x464] sm:$0xf]  ;;  %v9499_v56 = vld [vmem:[#allocation5 + $0x470] sm:$0xf0]  ;;  %v9374_v60 = vor.u32 %v12802_v53, %v9371_v54  ;;  %v9185_v51 = vld [vmem:[#allocation5 + $0x1e8] sm:$0xf] }
  0xae   : > { %v12734_v59 = vld [vmem:[#allocation5 + $0x144] sm:$0xf]  ;;  %v9099_v61 = vld [vmem:[#allocation5 + $0x150] sm:$0xf0]  ;;  %v9502_v0 = vor.u32 %v12834_v55, %v9499_v56 }
  0xaf   : > { %2012 = vmatpush.bf16.msra.mxu0 %v9150_v31  ;;  %v12766_v62 = vld [vmem:[#allocation5 + $0x244] sm:$0xf]  ;;  %v9227_v63 = vld [vmem:[#allocation5 + $0x250] sm:$0xf0]  ;;  %v9102_v15 = vor.u32 %v12734_v59, %v9099_v61  ;;  %v9058_v59 = vor.u32 %v12725_v50, %v9057_v46  ;;  %v12709_v50 = vld [vmem:[#allocation5 + $0x74] sm:$0xf0] }
  0xb0   : > { %2053 = vmatpush.bf16.msra.mxu3 %v9550_v26  ;;  %2026 = vmatpush.bf16.msra.mxu1 %v9278_v32  ;;  %v12798_v1 = vld [vmem:[#allocation5 + $0x344] sm:$0xf]  ;;  %v9355_v2 = vld [vmem:[#allocation5 + $0x350] sm:$0xf0]  ;;  %v9230_v16 = vor.u32 %v12766_v62, %v9227_v63  ;;  %v9041_v63 = vld [vmem:[#allocation5 + $0xc8] sm:$0xf] }
  0xb1   : > { %2040 = vmatpush.bf16.msra.mxu2 %v9406_v34  ;;  %v12830_v11 = vld [vmem:[#allocation5 + $0x444] sm:$0xf]  ;;  %v9483_v12 = vld [vmem:[#allocation5 + $0x450] sm:$0xf0]  ;;  %v9358_v18 = vor.u32 %v12798_v1, %v9355_v2  ;;  %v9169_v1 = vld [vmem:[#allocation5 + $0x1c8] sm:$0xf] }
  0xb2   : > { %v12730_v17 = vld [vmem:[#allocation5 + $0x124] sm:$0xf]  ;;  %v9083_v19 = vld [vmem:[#allocation5 + $0x130] sm:$0xf0]  ;;  %v9486_v24 = vor.u32 %v12830_v11, %v9483_v12  ;;  %v12753_v2 = vld [vmem:[#allocation5 + $0x1d4] sm:$0xf0] }
  0xb3   : > { %2013 = vmatpush.bf16.msra.mxu0 %v9134_v44  ;;  %v12762_v20 = vld [vmem:[#allocation5 + $0x224] sm:$0xf]  ;;  %v9211_v23 = vld [vmem:[#allocation5 + $0x230] sm:$0xf0]  ;;  %v9086_v30 = vor.u32 %v12730_v17, %v9083_v19 }
  0xb4   : > { %2054 = vmatpush.bf16.msra.mxu3 %v9534_v39  ;;  %2027 = vmatpush.bf16.msra.mxu1 %v9262_v45  ;;  %v12794_v25 = vld [vmem:[#allocation5 + $0x324] sm:$0xf]  ;;  %v9339_v26 = vld [vmem:[#allocation5 + $0x330] sm:$0xf0]  ;;  %v9214_v31 = vor.u32 %v12762_v20, %v9211_v23  ;;  %v9025_v23 = vld [vmem:[#allocation5 + $0xa8] sm:$0xf] }
  0xb5   : > { %2041 = vmatpush.bf16.msra.mxu2 %v9390_v47  ;;  %v12826_v27 = vld [vmem:[#allocation5 + $0x424] sm:$0xf]  ;;  %v9467_v28 = vld [vmem:[#allocation5 + $0x430] sm:$0xf0]  ;;  %v9342_v35 = vor.u32 %v12794_v25, %v9339_v26  ;;  %v9153_v25 = vld [vmem:[#allocation5 + $0x1a8] sm:$0xf] }
  0xb6   : > { %v12726_v29 = vld [vmem:[#allocation5 + $0x104] sm:$0xf]  ;;  %v9067_v32 = vld [vmem:[#allocation5 + $0x110] sm:$0xf0]  ;;  %v9470_v40 = vor.u32 %v12826_v27, %v9467_v28  ;;  %v12749_v26 = vld [vmem:[#allocation5 + $0x1b4] sm:$0xf0] }
  0xb7   : > { %2014 = vmatpush.bf16.msra.mxu0 %v9118_v57  ;;  %v12758_v33 = vld [vmem:[#allocation5 + $0x204] sm:$0xf]  ;;  %v9195_v34 = vld [vmem:[#allocation5 + $0x210] sm:$0xf0]  ;;  %v9070_v47 = vor.u32 %v12726_v29, %v9067_v32  ;;  %v9154_v32 = vor.u32 %v12749_v26, %v9153_v25 }
  0xb8   : > { %2055 = vmatpush.bf16.msra.mxu3 %v9518_v52  ;;  %2028 = vmatpush.bf16.msra.mxu1 %v9246_v58  ;;  %v12790_v36 = vld [vmem:[#allocation5 + $0x304] sm:$0xf]  ;;  %v9323_v38 = vld [vmem:[#allocation5 + $0x310] sm:$0xf0]  ;;  %v9198_v48 = vor.u32 %v12758_v33, %v9195_v34  ;;  %v12757_v52 = vld [vmem:[#allocation5 + $0x1f4] sm:$0xf0] }
  0xb9   : > { %2042 = vmatpush.bf16.msra.mxu2 %v9374_v60  ;;  %v12822_v39 = vld [vmem:[#allocation5 + $0x404] sm:$0xf]  ;;  %v9451_v41 = vld [vmem:[#allocation5 + $0x410] sm:$0xf0]  ;;  %v9326_v53 = vor.u32 %v12790_v36, %v9323_v38  ;;  %v9186_v60 = vor.u32 %v12757_v52, %v9185_v51  ;;  %v12713_v36 = vld [vmem:[#allocation5 + $0x94] sm:$0xf0] }
  0xba   : > { %v12882_v42 = vld [vmem:[#allocation5 + $0x5e4] sm:$0xf]  ;;  %v9691_v43 = vld [vmem:[#allocation5 + $0x5f0] sm:$0xf0]  ;;  %v9454_v55 = vor.u32 %v12822_v39, %v9451_v41  ;;  %v9137_v38 = vld [vmem:[#allocation5 + $0x188] sm:$0xf] }
  0xbb   : > { %2015 = vmatpush.bf16.msra.mxu0 %v9102_v15  ;;  %v12914_v44 = vld [vmem:[#allocation5 + $0x6e4] sm:$0xf]  ;;  %v9819_v45 = vld [vmem:[#allocation5 + $0x6f0] sm:$0xf0]  ;;  %v9694_v54 = vor.u32 %v12882_v42, %v9691_v43  ;;  %v12745_v39 = vld [vmem:[#allocation5 + $0x194] sm:$0xf0] }
  0xbc   : > { %2056 = vmatpush.bf16.msra.mxu3 %v9502_v0  ;;  %2029 = vmatpush.bf16.msra.mxu1 %v9230_v16  ;;  %v9822_v56 = vor.u32 %v12914_v44, %v9819_v45  ;;  %v12878_v57 = vld [vmem:[#allocation5 + $0x5c4] sm:$0xf]  ;;  %v9675_v58 = vld [vmem:[#allocation5 + $0x5d0] sm:$0xf0]  ;;  %v12721_v0 = vld [vmem:[#allocation5 + $0xd4] sm:$0xf0]  ;;  %v9138_v45 = vor.u32 %v12745_v39, %v9137_v38 }
  0xbd   : > { %2043 = vmatpush.bf16.msra.mxu2 %v9358_v18  ;;  %v12910_v61 = vld [vmem:[#allocation5 + $0x6c4] sm:$0xf]  ;;  %v9803_v62 = vld [vmem:[#allocation5 + $0x6d0] sm:$0xf0]  ;;  %v9678_v11 = vor.u32 %v12878_v57, %v9675_v58  ;;  %v9042_v17 = vor.u32 %v12721_v0, %v9041_v63  ;;  %v9170_v18 = vor.u32 %v12753_v2, %v9169_v1  ;;  %v9121_v51 = vld [vmem:[#allocation5 + $0x168] sm:$0xf] }
  0xbe   : > { %v9806_v12 = vor.u32 %v12910_v61, %v9803_v62  ;;  %v12874_v15 = vld [vmem:[#allocation5 + $0x5a4] sm:$0xf]  ;;  %v9659_v16 = vld [vmem:[#allocation5 + $0x5b0] sm:$0xf0]  ;;  %v12741_v52 = vld [vmem:[#allocation5 + $0x174] sm:$0xf0] }
  0xbf   : > { %2016 = vmatpush.bf16.msra.mxu0 %v9086_v30  ;;  %v12906_v19 = vld [vmem:[#allocation5 + $0x6a4] sm:$0xf]  ;;  %v9787_v20 = vld [vmem:[#allocation5 + $0x6b0] sm:$0xf0]  ;;  %v9662_v27 = vor.u32 %v12874_v15, %v9659_v16  ;;  %v9122_v58 = vor.u32 %v12741_v52, %v9121_v51  ;;  %v8977_v61 = vld [vmem:[#allocation5 + $0x48] sm:$0xf] }
  0xc0   : > { %2057 = vmatpush.bf16.msra.mxu3 %v9486_v24  ;;  %2030 = vmatpush.bf16.msra.mxu1 %v9214_v31  ;;  %v12717_v24 = vld [vmem:[#allocation5 + $0xb4] sm:$0xf0]  ;;  %v9790_v28 = vor.u32 %v12906_v19, %v9787_v20  ;;  %v12870_v29 = vld [vmem:[#allocation5 + $0x584] sm:$0xf]  ;;  %v9643_v30 = vld [vmem:[#allocation5 + $0x590] sm:$0xf0] }
  0xc1   : > { %2044 = vmatpush.bf16.msra.mxu2 %v9342_v35  ;;  %v9026_v31 = vor.u32 %v12717_v24, %v9025_v23  ;;  %v12902_v33 = vld [vmem:[#allocation5 + $0x684] sm:$0xf]  ;;  %v9771_v34 = vld [vmem:[#allocation5 + $0x690] sm:$0xf0]  ;;  %v9009_v35 = vld [vmem:[#allocation5 + $0x88] sm:$0xf] }
  0xc2   : > { %v9774_v41 = vor.u32 %v12902_v33, %v9771_v34  ;;  %v12866_v42 = vld [vmem:[#allocation5 + $0x564] sm:$0xf]  ;;  %v9627_v43 = vld [vmem:[#allocation5 + $0x570] sm:$0xf0]  ;;  %v9010_v44 = vor.u32 %v12713_v36, %v9009_v35  ;;  %v12705_v62 = vld [vmem:[#allocation5 + $0x54] sm:$0xf0] }
  0xc3   : > { %2017 = vmatpush.bf16.msra.mxu0 %v9070_v47  ;;  %v12898_v46 = vld [vmem:[#allocation5 + $0x664] sm:$0xf]  ;;  %v9755_v47 = vld [vmem:[#allocation5 + $0x670] sm:$0xf0]  ;;  %v9105_v63 = vld [vmem:[#allocation5 + $0x148] sm:$0xf]  ;;  %v8978_v15 = vor.u32 %v12705_v62, %v8977_v61 }
  0xc4   : > { %2058 = vmatpush.bf16.msra.mxu3 %v9470_v40  ;;  %2031 = vmatpush.bf16.msra.mxu1 %v9198_v48  ;;  %v9646_v40 = vor.u32 %v12870_v29, %v9643_v30  ;;  %v8993_v48 = vld [vmem:[#allocation5 + $0x68] sm:$0xf]  ;;  %v12737_v0 = vld [vmem:[#allocation5 + $0x154] sm:$0xf0]  ;;  %v12854_v25 = vld [vmem:[#allocation5 + $0x504] sm:$0xf] }
  0xc5   : > { %2045 = vmatpush.bf16.msra.mxu2 %v9326_v53  ;;  %v9630_v53 = vor.u32 %v12866_v42, %v9627_v43  ;;  %v8994_v57 = vor.u32 %v12709_v50, %v8993_v48  ;;  %v9106_v16 = vor.u32 %v12737_v0, %v9105_v63  ;;  %v8961_v19 = vld [vmem:[#allocation5 + $0x28] sm:$0xf]  ;;  %v12701_v20 = vld [vmem:[#allocation5 + $0x34] sm:$0xf0]  ;;  %v12886_v29 = vld [vmem:[#allocation5 + $0x604] sm:$0xf] }
  0xc6   : > { %2018 = vmatmul.bf16.vlgmr.msra.gmra.mxu0 %v14496_v37  ;;  %v9089_v23 = vld [vmem:[#allocation5 + $0x128] sm:$0xf]  ;;  %v12733_v24 = vld [vmem:[#allocation5 + $0x134] sm:$0xf0]  ;;  %v9707_v30 = vld [vmem:[#allocation5 + $0x610] sm:$0xf0] }
  0xc7   : > { %2066 = vmatpush.bf16.msrb.mxu0 %v9694_v54  ;;  %2032 = vmatmul.bf16.vlgmr.msra.gmra.mxu1 %v14490_v22  ;;  %v9758_v54 = vor.u32 %v12898_v46, %v9755_v47  ;;  %v8945_v33 = vld [vmem:[#allocation5 + $0x8] sm:$0xf]  ;;  %v12697_v34 = vld [vmem:[#allocation5 + $0x14] sm:$0xf0] }
  0xc8   : > { %2059 = vmatpush.bf16.msra.mxu3 %v9454_v55  ;;  %2080 = vmatpush.bf16.msrb.mxu1 %v9822_v56  ;;  %v12862_v55 = vld [vmem:[#allocation5 + $0x544] sm:$0xf]  ;;  %v9611_v56 = vld [vmem:[#allocation5 + $0x550] sm:$0xf0]  ;;  %v9073_v35 = vld [vmem:[#allocation5 + $0x108] sm:$0xf]  ;;  %v8946_v48 = vor.u32 %v12697_v34, %v8945_v33 }
  0xc9   : > { %2094 = vmatpush.bf16.msrb.mxu2 %v9058_v59  ;;  %v12894_v59 = vld [vmem:[#allocation5 + $0x644] sm:$0xf]  ;;  %v9614_v1 = vor.u32 %v12862_v55, %v9611_v56  ;;  %v12729_v36 = vld [vmem:[#allocation5 + $0x114] sm:$0xf0]  ;;  %v9313_v38 = vld [vmem:[#allocation5 + $0x2e8] sm:$0xf] }
  0xca   : > { %2046 = vmatmul.bf16.vlgmr.msra.gmra.mxu2 %v14501_v49  ;;  %v12789_v39 = vld [vmem:[#allocation5 + $0x2f4] sm:$0xf0]  ;;  %v9569_v42 = vld [vmem:[#allocation5 + $0x4e8] sm:$0xf]  ;;  %v9074_v50 = vor.u32 %v12729_v36, %v9073_v35 }
  0xcb   : > { %2060 = vmatmul.bf16.vlgmr.msra.gmra.mxu3 %v14510_v7  ;;  %2067 = vmatpush.bf16.msrb.mxu0 %v9678_v11  ;;  %v12858_v11 = vld [vmem:[#allocation5 + $0x524] sm:$0xf]  ;;  %v9697_v46 = vld [vmem:[#allocation5 + $0x5e8] sm:$0xf]  ;;  %v12885_v47 = vld [vmem:[#allocation5 + $0x5f4] sm:$0xf0]  ;;  %v9314_v51 = vor.u32 %v12789_v39, %v9313_v38 }
  0xcc   : > { %2108 = vmatpush.bf16.msrb.mxu3 %v9186_v60  ;;  %2081 = vmatpush.bf16.msrb.mxu1 %v9806_v12  ;;  %v9739_v60 = vld [vmem:[#allocation5 + $0x650] sm:$0xf0]  ;;  %v9698_v56 = vor.u32 %v12885_v47, %v9697_v46  ;;  %v9681_v61 = vld [vmem:[#allocation5 + $0x5c8] sm:$0xf]  ;;  %v12881_v62 = vld [vmem:[#allocation5 + $0x5d4] sm:$0xf0] }
  0xcd   : > { %2095 = vmatpush.bf16.msrb.mxu2 %v9042_v17  ;;  %v9742_v2 = vor.u32 %v12894_v59, %v9739_v60  ;;  %v9595_v12 = vld [vmem:[#allocation5 + $0x530] sm:$0xf0]  ;;  %v12890_v17 = vld [vmem:[#allocation5 + $0x624] sm:$0xf]  ;;  %v9553_v59 = vld [vmem:[#allocation5 + $0x4c8] sm:$0xf] }
  0xce   : > { %v9598_v26 = vor.u32 %v12858_v11, %v9595_v12  ;;  %v12849_v60 = vld [vmem:[#allocation5 + $0x4d4] sm:$0xf0]  ;;  %v9682_v12 = vor.u32 %v12881_v62, %v9681_v61  ;;  %v9649_v33 = vld [vmem:[#allocation5 + $0x588] sm:$0xf] }
  0xcf   : > { %2068 = vmatpush.bf16.msrb.mxu0 %v9662_v27  ;;  %v9554_v11 = vor.u32 %v12849_v60, %v9553_v59  ;;  %v12873_v34 = vld [vmem:[#allocation5 + $0x594] sm:$0xf0]  ;;  %v9249_v38 = vld [vmem:[#allocation5 + $0x268] sm:$0xf] }
  0xd0   : > { %2109 = vmatpush.bf16.msrb.mxu3 %v9170_v18  ;;  %2082 = vmatpush.bf16.msrb.mxu1 %v9790_v28  ;;  %v9723_v18 = vld [vmem:[#allocation5 + $0x630] sm:$0xf0]  ;;  %v12773_v39 = vld [vmem:[#allocation5 + $0x274] sm:$0xf0]  ;;  %v9633_v46 = vld [vmem:[#allocation5 + $0x568] sm:$0xf] }
  0xd1   : > { %2096 = vmatpush.bf16.msrb.mxu2 %v9026_v31  ;;  %v9726_v27 = vor.u32 %v12890_v17, %v9723_v18  ;;  %v9579_v28 = vld [vmem:[#allocation5 + $0x510] sm:$0xf0]  ;;  %v8962_v31 = vor.u32 %v12701_v20, %v8961_v19  ;;  %v9537_v17 = vld [vmem:[#allocation5 + $0x4a8] sm:$0xf]  ;;  %v12845_v18 = vld [vmem:[#allocation5 + $0x4b4] sm:$0xf0] }
  0xd2   : > { %v9582_v43 = vor.u32 %v12854_v25, %v9579_v28  ;;  %v9665_v19 = vld [vmem:[#allocation5 + $0x5a8] sm:$0xf]  ;;  %v12877_v20 = vld [vmem:[#allocation5 + $0x5b4] sm:$0xf0] }
  0xd3   : > { %2069 = vmatpush.bf16.msrb.mxu0 %v9646_v40  ;;  %v9441_v40 = vld [vmem:[#allocation5 + $0x3e8] sm:$0xf]  ;;  %v9666_v28 = vor.u32 %v12877_v20, %v9665_v19  ;;  %v12869_v47 = vld [vmem:[#allocation5 + $0x574] sm:$0xf0] }
  0xd4   : > { %2110 = vmatpush.bf16.msrb.mxu3 %v9154_v32  ;;  %2083 = vmatpush.bf16.msrb.mxu1 %v9774_v41  ;;  %v9090_v32 = vor.u32 %v12733_v24, %v9089_v23  ;;  %v12821_v41 = vld [vmem:[#allocation5 + $0x3f4] sm:$0xf0]  ;;  %v9265_v25 = vld [vmem:[#allocation5 + $0x288] sm:$0xf] }
  0xd5   : > { %2097 = vmatpush.bf16.msrb.mxu2 %v9010_v44  ;;  %v9710_v44 = vor.u32 %v12886_v29, %v9707_v30  ;;  %v9442_v52 = vor.u32 %v12821_v41, %v9441_v40  ;;  %v9393_v29 = vld [vmem:[#allocation5 + $0x388] sm:$0xf]  ;;  %v12809_v30 = vld [vmem:[#allocation5 + $0x394] sm:$0xf0]  ;;  %v9650_v41 = vor.u32 %v12873_v34, %v9649_v33 }
  0xd6   : > { %v9394_v36 = vor.u32 %v12809_v30, %v9393_v29  ;;  %v9617_v59 = vld [vmem:[#allocation5 + $0x548] sm:$0xf]  ;;  %v12865_v60 = vld [vmem:[#allocation5 + $0x554] sm:$0xf0] }
  0xd7   : > { %2070 = vmatpush.bf16.msrb.mxu0 %v9630_v53  ;;  %v9297_v53 = vld [vmem:[#allocation5 + $0x2c8] sm:$0xf]  ;;  %v12825_v30 = vld [vmem:[#allocation5 + $0x414] sm:$0xf0] }
  0xd8   : > { %2111 = vmatpush.bf16.msrb.mxu3 %v9138_v45  ;;  %2084 = vmatpush.bf16.msrb.mxu1 %v9758_v54  ;;  %v12853_v45 = vld [vmem:[#allocation5 + $0x4f4] sm:$0xf0]  ;;  %v9201_v19 = vld [vmem:[#allocation5 + $0x208] sm:$0xf] }
  0xd9   : > { %2098 = vmatpush.bf16.msrb.mxu2 %v8994_v57  ;;  %v12785_v54 = vld [vmem:[#allocation5 + $0x2d4] sm:$0xf0]  ;;  %v9570_v55 = vor.u32 %v12853_v45, %v9569_v42  ;;  %v9425_v57 = vld [vmem:[#allocation5 + $0x3c8] sm:$0xf] }
  0xda   : > { %v9298_v63 = vor.u32 %v12785_v54, %v9297_v53  ;;  %v9377_v42 = vld [vmem:[#allocation5 + $0x368] sm:$0xf]  ;;  %v12837_v45 = vld [vmem:[#allocation5 + $0x474] sm:$0xf0]  ;;  %v9634_v54 = vor.u32 %v12869_v47, %v9633_v46 }
  0xdb   : > { %2071 = vmatpush.bf16.msrb.mxu0 %v9614_v1  ;;  %v9281_v1 = vld [vmem:[#allocation5 + $0x2a8] sm:$0xf]  ;;  %v12917_v34 = vld [vmem:[#allocation5 + $0x6f4] sm:$0xf0] }
  0xdc   : > { %2112 = vmatpush.bf16.msrb.mxu3 %v9122_v58  ;;  %2085 = vmatpush.bf16.msrb.mxu1 %v9742_v2  ;;  %v12817_v58 = vld [vmem:[#allocation5 + $0x3d4] sm:$0xf0]  ;;  %v9457_v29 = vld [vmem:[#allocation5 + $0x408] sm:$0xf] }
  0xdd   : > { %2099 = vmatpush.bf16.msrb.mxu2 %v8978_v15  ;;  %v9426_v0 = vor.u32 %v12817_v58, %v9425_v57  ;;  %v12781_v2 = vld [vmem:[#allocation5 + $0x2b4] sm:$0xf0]  ;;  %v9409_v15 = vld [vmem:[#allocation5 + $0x3a8] sm:$0xf] }
  0xde   : > { %v9282_v23 = vor.u32 %v12781_v2, %v9281_v1  ;;  %v9489_v57 = vld [vmem:[#allocation5 + $0x448] sm:$0xf]  ;;  %v12833_v58 = vld [vmem:[#allocation5 + $0x454] sm:$0xf0]  ;;  %v9618_v2 = vor.u32 %v12865_v60, %v9617_v59 }
  0xdf   : > { %2072 = vmatpush.bf16.msrb.mxu0 %v9598_v26  ;;  %v12777_v26 = vld [vmem:[#allocation5 + $0x294] sm:$0xf0]  ;;  %v9490_v1 = vor.u32 %v12833_v58, %v9489_v57  ;;  %v9825_v33 = vld [vmem:[#allocation5 + $0x6e8] sm:$0xf]  ;;  %v12783_v57 = vld [vmem:[#allocation5 + $0x2cc] sm:$0xf] }
  0xe0   : > { %2113 = vmatpush.bf16.msrb.mxu3 %v9106_v16  ;;  %2086 = vmatpush.bf16.msrb.mxu1 %v9726_v27  ;;  %v12813_v16 = vld [vmem:[#allocation5 + $0x3b4] sm:$0xf0]  ;;  %v9538_v27 = vor.u32 %v12845_v18, %v9537_v17  ;;  %v9266_v35 = vor.u32 %v12777_v26, %v9265_v25  ;;  %v9601_v17 = vld [vmem:[#allocation5 + $0x528] sm:$0xf]  ;;  %v9826_v46 = vor.u32 %v12917_v34, %v9825_v33  ;;  %v9299_v58 = vld [vmem:[#allocation5 + $0x2d8] sm:$0xf0] }
  0xe1   : > { %2100 = vmatpush.bf16.msrb.mxu2 %v8962_v31  ;;  %v9410_v24 = vor.u32 %v12813_v16, %v9409_v15  ;;  %v9521_v31 = vld [vmem:[#allocation5 + $0x488] sm:$0xf]  ;;  %v12829_v16 = vld [vmem:[#allocation5 + $0x434] sm:$0xf0] }
  0xe2   : > { %v9473_v15 = vld [vmem:[#allocation5 + $0x428] sm:$0xf]  ;;  %v12861_v18 = vld [vmem:[#allocation5 + $0x534] sm:$0xf0] }
  0xe3   : > { %2073 = vmatpush.bf16.msrb.mxu0 %v9582_v43  ;;  %v12805_v43 = vld [vmem:[#allocation5 + $0x374] sm:$0xf0]  ;;  %v9329_v25 = vld [vmem:[#allocation5 + $0x308] sm:$0xf] }
  0xe4   : > { %2114 = vmatpush.bf16.msrb.mxu3 %v9090_v32  ;;  %2087 = vmatpush.bf16.msrb.mxu1 %v9710_v44  ;;  %v12841_v32 = vld [vmem:[#allocation5 + $0x494] sm:$0xf0]  ;;  %v9505_v44 = vld [vmem:[#allocation5 + $0x468] sm:$0xf] }
  0xe5   : > { %2101 = vmatpush.bf16.msrb.mxu2 %v8946_v48  ;;  %v9522_v40 = vor.u32 %v12841_v32, %v9521_v31  ;;  %v9250_v48 = vor.u32 %v12773_v39, %v9249_v38  ;;  %v9506_v53 = vor.u32 %v12837_v45, %v9505_v44  ;;  %v12793_v26 = vld [vmem:[#allocation5 + $0x314] sm:$0xf0]  ;;  %v9585_v31 = vld [vmem:[#allocation5 + $0x508] sm:$0xf]  ;;  %v12755_v38 = vld [vmem:[#allocation5 + $0x1ec] sm:$0xf]  ;;  %v9458_v44 = vor.u32 %v12825_v30, %v9457_v29 }
  0xe6   : > { %2074 = vmatmul.bf16.vlgmr.msrb.gmra.mxu0 %v14514_v14  ;;  %v12857_v32 = vld [vmem:[#allocation5 + $0x514] sm:$0xf0]  ;;  %v9139_v29 = vld [vmem:[#allocation5 + $0x198] sm:$0xf0]  ;;  %v12775_v30 = vld [vmem:[#allocation5 + $0x28c] sm:$0xf] }
  0xe7   : > { %2122 = vmatpush.bf16.msra.mxu0 %v9314_v51  ;;  %2088 = vmatmul.bf16.vlgmr.msrb.gmra.mxu1 %v14512_v13  ;;  %v9233_v51 = vld [vmem:[#allocation5 + $0x248] sm:$0xf]  ;;  %v9586_v45 = vor.u32 %v12857_v32, %v9585_v31  ;;  %v9267_v31 = vld [vmem:[#allocation5 + $0x298] sm:$0xf0] }
  0xe8   : > { %2115 = vmatpush.bf16.msrb.mxu3 %v9074_v50  ;;  %2136 = vmatpush.bf16.msra.mxu1 %v9442_v52  ;;  %v9378_v50 = vor.u32 %v12805_v43, %v9377_v42  ;;  %v12769_v52 = vld [vmem:[#allocation5 + $0x254] sm:$0xf0]  ;;  %v12787_v42 = vld [vmem:[#allocation5 + $0x2ec] sm:$0xf]  ;;  %v9315_v43 = vld [vmem:[#allocation5 + $0x2f8] sm:$0xf0] }
  0xe9   : > { %2150 = vmatpush.bf16.msra.mxu2 %v9570_v55  ;;  %v9361_v55 = vld [vmem:[#allocation5 + $0x348] sm:$0xf]  ;;  %v9234_v61 = vor.u32 %v12769_v52, %v9233_v51  ;;  %v9318_v52 = vor.u32 %v12787_v42, %v9315_v43  ;;  %v12739_v42 = vld [vmem:[#allocation5 + $0x16c] sm:$0xf]  ;;  %v9123_v43 = vld [vmem:[#allocation5 + $0x178] sm:$0xf0] }
  0xea   : > { %2102 = vmatmul.bf16.vlgmr.msrb.gmra.mxu2 %v14488_v21 }
  0xeb   : > { %2116 = vmatmul.bf16.vlgmr.msrb.gmra.mxu3 %v14496_v37  ;;  %2123 = vmatpush.bf16.msra.mxu0 %v9298_v63  ;;  %v9217_v63 = vld [vmem:[#allocation5 + $0x228] sm:$0xf] }
  0xec   : > { %2164 = vmatpush.bf16.msra.mxu3 %v9698_v56  ;;  %2137 = vmatpush.bf16.msra.mxu1 %v9426_v0  ;;  %v12801_v56 = vld [vmem:[#allocation5 + $0x354] sm:$0xf0] }
  0xed   : > { %2151 = vmatpush.bf16.msra.mxu2 %v9554_v11  ;;  %v9362_v62 = vor.u32 %v12801_v56, %v9361_v55  ;;  %v12765_v0 = vld [vmem:[#allocation5 + $0x234] sm:$0xf0]  ;;  %v9345_v11 = vld [vmem:[#allocation5 + $0x328] sm:$0xf]  ;;  %v12751_v55 = vld [vmem:[#allocation5 + $0x1cc] sm:$0xf] }
  0xee   : > { %v9218_v20 = vor.u32 %v12765_v0, %v9217_v63  ;;  %v9171_v56 = vld [vmem:[#allocation5 + $0x1d8] sm:$0xf0]  ;;  %v9302_v0 = vor.u32 %v12783_v57, %v9299_v58  ;;  %v12735_v57 = vld [vmem:[#allocation5 + $0x14c] sm:$0xf] }
  0xef   : > { %2124 = vmatpush.bf16.msra.mxu0 %v9282_v23  ;;  %v9174_v63 = vor.u32 %v12751_v55, %v9171_v56  ;;  %v12703_v55 = vld [vmem:[#allocation5 + $0x4c] sm:$0xf]  ;;  %v8979_v56 = vld [vmem:[#allocation5 + $0x58] sm:$0xf0] }
  0xf0   : > { %2165 = vmatpush.bf16.msra.mxu3 %v9682_v12  ;;  %2138 = vmatpush.bf16.msra.mxu1 %v9410_v24  ;;  %v12797_v12 = vld [vmem:[#allocation5 + $0x334] sm:$0xf0] }
  0xf1   : > { %2152 = vmatpush.bf16.msra.mxu2 %v9538_v27  ;;  %v9346_v23 = vor.u32 %v12797_v12, %v9345_v11  ;;  %v12761_v24 = vld [vmem:[#allocation5 + $0x214] sm:$0xf0]  ;;  %v9474_v27 = vor.u32 %v12829_v16, %v9473_v15  ;;  %v12747_v11 = vld [vmem:[#allocation5 + $0x1ac] sm:$0xf]  ;;  %v9155_v12 = vld [vmem:[#allocation5 + $0x1b8] sm:$0xf0] }
  0xf2   : > { %v9202_v39 = vor.u32 %v12761_v24, %v9201_v19  ;;  %v12779_v15 = vld [vmem:[#allocation5 + $0x2ac] sm:$0xf]  ;;  %v9283_v16 = vld [vmem:[#allocation5 + $0x2b8] sm:$0xf0]  ;;  %v9777_v19 = vld [vmem:[#allocation5 + $0x688] sm:$0xf]  ;;  %v9158_v24 = vor.u32 %v12747_v11, %v9155_v12 }
  0xf3   : > { %2125 = vmatpush.bf16.msra.mxu0 %v9266_v35  ;;  %v12723_v35 = vld [vmem:[#allocation5 + $0xec] sm:$0xf]  ;;  %v12893_v11 = vld [vmem:[#allocation5 + $0x634] sm:$0xf0] }
  0xf4   : > { %2166 = vmatpush.bf16.msra.mxu3 %v9666_v28  ;;  %2139 = vmatpush.bf16.msra.mxu1 %v9394_v36  ;;  %v9602_v28 = vor.u32 %v12861_v18, %v9601_v17  ;;  %v9059_v36 = vld [vmem:[#allocation5 + $0xf8] sm:$0xf0] }
  0xf5   : > { %2153 = vmatpush.bf16.msra.mxu2 %v9522_v40  ;;  %v9330_v40 = vor.u32 %v12793_v26, %v9329_v25  ;;  %v9062_v47 = vor.u32 %v12723_v35, %v9059_v36  ;;  %v9286_v25 = vor.u32 %v12779_v15, %v9283_v16  ;;  %v12711_v26 = vld [vmem:[#allocation5 + $0x8c] sm:$0xf]  ;;  %v9761_v35 = vld [vmem:[#allocation5 + $0x668] sm:$0xf]  ;;  %v12901_v36 = vld [vmem:[#allocation5 + $0x674] sm:$0xf0] }
  0xf7   : > { %2126 = vmatpush.bf16.msra.mxu0 %v9250_v48  ;;  %v9809_v48 = vld [vmem:[#allocation5 + $0x6c8] sm:$0xf] }
  0xf8   : > { %2167 = vmatpush.bf16.msra.mxu3 %v9650_v41  ;;  %2140 = vmatpush.bf16.msra.mxu1 %v9378_v50  ;;  %v9187_v41 = vld [vmem:[#allocation5 + $0x1f8] sm:$0xf0]  ;;  %v12913_v50 = vld [vmem:[#allocation5 + $0x6d4] sm:$0xf0] }
  0xf9   : > { %2154 = vmatpush.bf16.msra.mxu2 %v9506_v53  ;;  %v9190_v51 = vor.u32 %v12755_v38, %v9187_v41  ;;  %v12719_v53 = vld [vmem:[#allocation5 + $0xcc] sm:$0xf]  ;;  %v9810_v59 = vor.u32 %v12913_v50, %v9809_v48  ;;  %v8995_v41 = vld [vmem:[#allocation5 + $0x78] sm:$0xf0]  ;;  %v9762_v48 = vor.u32 %v12901_v36, %v9761_v35 }
  0xfb   : > { %2127 = vmatpush.bf16.msra.mxu0 %v9234_v61  ;;  %v9793_v61 = vld [vmem:[#allocation5 + $0x6a8] sm:$0xf] }
  0xfc   : > { %2168 = vmatpush.bf16.msra.mxu3 %v9634_v54  ;;  %2141 = vmatpush.bf16.msra.mxu1 %v9362_v62  ;;  %v9043_v54 = vld [vmem:[#allocation5 + $0xd8] sm:$0xf0]  ;;  %v12909_v62 = vld [vmem:[#allocation5 + $0x6b4] sm:$0xf0] }
  0xfd   : > { %2155 = vmatpush.bf16.msra.mxu2 %v9490_v1  ;;  %v9046_v60 = vor.u32 %v12719_v53, %v9043_v54  ;;  %v12715_v1 = vld [vmem:[#allocation5 + $0xac] sm:$0xf]  ;;  %v9794_v17 = vor.u32 %v12909_v62, %v9793_v61  ;;  %v9126_v53 = vor.u32 %v12739_v42, %v9123_v43  ;;  %v9235_v61 = vld [vmem:[#allocation5 + $0x258] sm:$0xf0] }
  0xfe   : > { %v9203_v42 = vld [vmem:[#allocation5 + $0x218] sm:$0xf0]  ;;  %v12819_v43 = vld [vmem:[#allocation5 + $0x3ec] sm:$0xf] }
  0xff   : > { %2128 = vmatpush.bf16.msra.mxu0 %v9218_v20  ;;  %v12905_v20 = vld [vmem:[#allocation5 + $0x694] sm:$0xf0] }
 0x100   : > { %2169 = vmatpush.bf16.msra.mxu3 %v9618_v2  ;;  %2142 = vmatpush.bf16.msra.mxu1 %v9346_v23  ;;  %v9027_v2 = vld [vmem:[#allocation5 + $0xb8] sm:$0xf0]  ;;  %v14532_v23 = vld [vmem:[#allocation8] sm:$0xf]  ;;  %v9778_v33 = vor.u32 %v12905_v20, %v9777_v19  ;;  %v12731_v19 = vld [vmem:[#allocation5 + $0x12c] sm:$0xf] }
 0x101   : > { %2156 = vmatpush.bf16.msra.mxu2 %v9474_v27  ;;  %v9030_v18 = vor.u32 %v12715_v1, %v9027_v2  ;;  %v9011_v27 = vld [vmem:[#allocation5 + $0x98] sm:$0xf0]  ;;  %v14535_v32 = vperm.slane %v14532_v23, 0  ;;  %v8982_v1 = vor.u32 %v12703_v55, %v8979_v56  ;;  %v9729_v2 = vld [vmem:[#allocation5 + $0x628] sm:$0xf] }
 0x102   : > { %v9014_v34 = vor.u32 %v12711_v26, %v9011_v27  ;;  %v9091_v20 = vld [vmem:[#allocation5 + $0x138] sm:$0xf0]  ;;  %v9713_v27 = vld [vmem:[#allocation5 + $0x608] sm:$0xf]  ;;  %v12915_v55 = vld [vmem:[#allocation5 + $0x6ec] sm:$0xf] }
 0x103   : > { %2129 = vmatpush.bf16.msra.mxu0 %v9202_v39  ;;  %v9270_v39 = vor.u32 %v12775_v30, %v9267_v31  ;;  %v12889_v31 = vld [vmem:[#allocation5 + $0x614] sm:$0xf0]  ;;  %v9094_v35 = vor.u32 %v12731_v19, %v9091_v20  ;;  %v9827_v56 = vld [vmem:[#allocation5 + $0x6f8] sm:$0xf0] }
 0x104   : > { %2170 = vmatpush.bf16.msra.mxu3 %v9602_v28  ;;  %2143 = vmatpush.bf16.msra.mxu1 %v9330_v40  ;;  %v12743_v28 = vld [vmem:[#allocation5 + $0x18c] sm:$0xf]  ;;  %v9811_v19 = vld [vmem:[#allocation5 + $0x6d8] sm:$0xf0] }
 0x105   : > { %2157 = vmatpush.bf16.msra.mxu2 %v9458_v44  ;;  %v9142_v38 = vor.u32 %v12743_v28, %v9139_v29  ;;  %v12707_v40 = vld [vmem:[#allocation5 + $0x6c] sm:$0xf]  ;;  %v9730_v29 = vor.u32 %v12893_v11, %v9729_v2  ;;  %v9830_v2 = vor.u32 %v12915_v55, %v9827_v56 }
 0x106   : > { %2130 = vmatmul.bf16.vlgmr.msra.gmra.mxu0 %v14490_v22  ;;  %v12771_v44 = vld [vmem:[#allocation5 + $0x26c] sm:$0xf]  ;;  %v8998_v50 = vor.u32 %v12707_v40, %v8995_v41 }
 0x107   : > { %2178 = vmatpush.bf16.msrb.mxu0 %v9826_v46  ;;  %2144 = vmatmul.bf16.vlgmr.msra.gmra.mxu1 %v14501_v49  ;;  %v12759_v40 = vld [vmem:[#allocation5 + $0x20c] sm:$0xf] }
 0x108   : > { %2171 = vmatpush.bf16.msra.mxu3 %v9586_v45  ;;  %2192 = vmatpush.bf16.msrb.mxu1 %v9062_v47  ;;  %v9251_v45 = vld [vmem:[#allocation5 + $0x278] sm:$0xf0]  ;;  %v12847_v11 = vld [vmem:[#allocation5 + $0x4cc] sm:$0xf] }
 0x109   : > { %2206 = vmatpush.bf16.msrb.mxu2 %v9190_v51  ;;  %v9745_v51 = vld [vmem:[#allocation5 + $0x648] sm:$0xf]  ;;  %v9254_v54 = vor.u32 %v12771_v44, %v9251_v45  ;;  %v9443_v44 = vld [vmem:[#allocation5 + $0x3f8] sm:$0xf0] }
 0x10a   : > { %2158 = vmatmul.bf16.vlgmr.msra.gmra.mxu2 %v14510_v7 }
 0x10b   : > { %2172 = vmatmul.bf16.vlgmr.msra.gmra.mxu3 %v14514_v14  ;;  %2179 = vmatpush.bf16.msrb.mxu0 %v9810_v59  ;;  %v1907_v46 = vpop.f32.mrf.mxu0  ;;  %v9107_v59 = vld [vmem:[#allocation5 + $0x158] sm:$0xf0] }
 0x10c   : > { %2220 = vmatpush.bf16.msrb.mxu3 %v9318_v52  ;;  %2193 = vmatpush.bf16.msrb.mxu1 %v9046_v60  ;;  %v1908_v47 = vadd.f32 %v1907_v46, %v14535_v32  ;;  %v12897_v52 = vld [vmem:[#allocation5 + $0x654] sm:$0xf0]  ;;  %v12767_v60 = vld [vmem:[#allocation5 + $0x24c] sm:$0xf]  ;;  %v9110_v15 = vor.u32 %v12735_v57, %v9107_v59  ;;  %v9714_v46 = vor.u32 %v12889_v31, %v9713_v27 }
 0x10d   : > { %2207 = vmatpush.bf16.msrb.mxu2 %v9174_v63  ;;  %v9238_v16 = vor.u32 %v12767_v60, %v9235_v61  ;;  %v9206_v60 = vor.u32 %v12759_v40, %v9203_v42  ;;  %v9446_v61 = vor.u32 %v12819_v43, %v9443_v44  ;;  %v12807_v40 = vld [vmem:[#allocation5 + $0x38c] sm:$0xf] }
 0x10e   : > { %v12839_v44 = vld [vmem:[#allocation5 + $0x48c] sm:$0xf] }
 0x10f   : > { %2180 = vmatpush.bf16.msrb.mxu0 %v9794_v17  ;;  %v1921_v58 = vpop.f32.mrf.mxu1  ;;  %v12699_v17 = vld [vmem:[#allocation5 + $0x2c] sm:$0xf] }
 0x110   : > { %2221 = vmatpush.bf16.msrb.mxu3 %v9302_v0  ;;  %2194 = vmatpush.bf16.msrb.mxu1 %v9030_v18  ;;  %v1922_v62 = vadd.f32 %v1921_v58, %v1908_v47  ;;  %v9746_v0 = vor.u32 %v12897_v52, %v9745_v51  ;;  %v8963_v18 = vld [vmem:[#allocation5 + $0x38] sm:$0xf0]  ;;  %v12851_v47 = vld [vmem:[#allocation5 + $0x4ec] sm:$0xf] }
 0x111   : > { %2208 = vmatpush.bf16.msrb.mxu2 %v9158_v24  ;;  %v1935_v63 = vpop.f32.mrf.mxu2  ;;  %v12763_v24 = vld [vmem:[#allocation5 + $0x22c] sm:$0xf]  ;;  %v8966_v30 = vor.u32 %v12699_v17, %v8963_v18  ;;  %v9683_v17 = vld [vmem:[#allocation5 + $0x5d8] sm:$0xf0] }
 0x112   : > { %v1936_v12 = vadd.f32 %v1935_v63, %v1922_v62  ;;  %v12815_v63 = vld [vmem:[#allocation5 + $0x3cc] sm:$0xf] }
 0x113   : > { %2181 = vmatpush.bf16.msrb.mxu0 %v9778_v33  ;;  %v1909_v26 = vpop.f32.mrf.mxu0  ;;  %v12695_v33 = vld [vmem:[#allocation5 + $0xc] sm:$0xf] }
 0x114   : > { %2222 = vmatpush.bf16.msrb.mxu3 %v9286_v25  ;;  %2195 = vmatpush.bf16.msrb.mxu1 %v9014_v34  ;;  %v9219_v25 = vld [vmem:[#allocation5 + $0x238] sm:$0xf0]  ;;  %v1910_v28 = vadd.f32 %v1909_v26, %v14535_v32  ;;  %v12911_v18 = vld [vmem:[#allocation5 + $0x6cc] sm:$0xf] }
 0x115   : > { %2209 = vmatpush.bf16.msrb.mxu2 %v9142_v38  ;;  %v8947_v34 = vld [vmem:[#allocation5 + $0x18] sm:$0xf0]  ;;  %v9222_v36 = vor.u32 %v12763_v24, %v9219_v25  ;;  %v12727_v38 = vld [vmem:[#allocation5 + $0x10c] sm:$0xf]  ;;  %v1949_v52 = vpop.f32.mrf.mxu3  ;;  %v9814_v27 = vor.u32 %v12911_v18, %v9811_v19 }
 0x116   : > { %v1950_v58 = vadd.f32 %v1949_v52, %v1936_v12  ;;  %v12811_v24 = vld [vmem:[#allocation5 + $0x3ac] sm:$0xf]  ;;  %v9411_v25 = vld [vmem:[#allocation5 + $0x3b8] sm:$0xf0] }
 0x117   : > { %2182 = vmatpush.bf16.msrb.mxu0 %v9762_v48  ;;  %v1923_v41 = vpop.f32.mrf.mxu1  ;;  %v9571_v48 = vld [vmem:[#allocation5 + $0x4f8] sm:$0xf0]  ;;  %v12863_v19 = vld [vmem:[#allocation5 + $0x54c] sm:$0xf] }
 0x118   : > { %2223 = vmatpush.bf16.msrb.mxu3 %v9270_v39  ;;  %2196 = vmatpush.bf16.msrb.mxu1 %v8998_v50  ;;  %v9075_v39 = vld [vmem:[#allocation5 + $0x118] sm:$0xf0]  ;;  %v1924_v45 = vadd.f32 %v1923_v41, %v1910_v28  ;;  %v12883_v50 = vld [vmem:[#allocation5 + $0x5ec] sm:$0xf]  ;;  %v9574_v62 = vor.u32 %v12851_v47, %v9571_v48 }
 0x119   : > { %2210 = vmatpush.bf16.msrb.mxu2 %v9126_v53  ;;  %v1937_v51 = vpop.f32.mrf.mxu2  ;;  %v8950_v53 = vor.u32 %v12695_v33, %v8947_v34  ;;  %v9078_v59 = vor.u32 %v12727_v38, %v9075_v39  ;;  %v12843_v28 = vld [vmem:[#allocation5 + $0x4ac] sm:$0xf]  ;;  %v9667_v33 = vld [vmem:[#allocation5 + $0x5b8] sm:$0xf0]  ;;  %v9414_v38 = vor.u32 %v12811_v24, %v9411_v25 }
 0x11a   : > { %v1938_v57 = vadd.f32 %v1937_v51, %v1924_v45  ;;  %v12907_v34 = vld [vmem:[#allocation5 + $0x6ac] sm:$0xf]  ;;  %v9395_v41 = vld [vmem:[#allocation5 + $0x398] sm:$0xf0] }
 0x11b   : > { %2183 = vmatpush.bf16.msrb.mxu0 %v9746_v0  ;;  %v9427_v0 = vld [vmem:[#allocation5 + $0x3d8] sm:$0xf0]  ;;  %v12871_v45 = vld [vmem:[#allocation5 + $0x58c] sm:$0xf] }
 0x11c   : > { %2224 = vmatpush.bf16.msrb.mxu3 %v9254_v54  ;;  %2197 = vmatpush.bf16.msrb.mxu1 %v8982_v1  ;;  %v9699_v54 = vld [vmem:[#allocation5 + $0x5f8] sm:$0xf0]  ;;  %v9430_v12 = vor.u32 %v12815_v63, %v9427_v0  ;;  %v12903_v47 = vld [vmem:[#allocation5 + $0x68c] sm:$0xf] }
 0x11d   : > { %2211 = vmatpush.bf16.msrb.mxu2 %v9110_v15  ;;  %v9702_v1 = vor.u32 %v12883_v50, %v9699_v54  ;;  %v9555_v15 = vld [vmem:[#allocation5 + $0x4d8] sm:$0xf0]  ;;  %v1951_v31 = vpop.f32.mrf.mxu3  ;;  %v12899_v63 = vld [vmem:[#allocation5 + $0x66c] sm:$0xf] }
 0x11e   : > { %v9558_v20 = vor.u32 %v12847_v11, %v9555_v15  ;;  %v9779_v48 = vld [vmem:[#allocation5 + $0x698] sm:$0xf0]  ;;  %v12895_v24 = vld [vmem:[#allocation5 + $0x64c] sm:$0xf] }
 0x11f   : > { %2184 = vmatpush.bf16.msrb.mxu0 %v9730_v29  ;;  %v9539_v29 = vld [vmem:[#allocation5 + $0x4b8] sm:$0xf0]  ;;  %v9782_v56 = vor.u32 %v12903_v47, %v9779_v48 }
 0x120   : > { %2225 = vmatpush.bf16.msrb.mxu3 %v9238_v16  ;;  %2198 = vmatpush.bf16.msrb.mxu1 %v8966_v30  ;;  %v12879_v16 = vld [vmem:[#allocation5 + $0x5cc] sm:$0xf]  ;;  %v9542_v39 = vor.u32 %v12843_v28, %v9539_v29  ;;  %v9379_v54 = vld [vmem:[#allocation5 + $0x378] sm:$0xf0] }
 0x121   : > { %2212 = vmatpush.bf16.msrb.mxu2 %v9094_v35  ;;  %v9686_v26 = vor.u32 %v12879_v16, %v9683_v17  ;;  %v12875_v30 = vld [vmem:[#allocation5 + $0x5ac] sm:$0xf]  ;;  %v9795_v35 = vld [vmem:[#allocation5 + $0x6b8] sm:$0xf0] }
 0x122   : > { %v9670_v42 = vor.u32 %v12875_v30, %v9667_v33  ;;  %v9798_v43 = vor.u32 %v12907_v34, %v9795_v35  ;;  %v9763_v0 = vld [vmem:[#allocation5 + $0x678] sm:$0xf0]  ;;  %v12831_v17 = vld [vmem:[#allocation5 + $0x44c] sm:$0xf] }
 0x123   : > { %2185 = vmatpush.bf16.msrb.mxu0 %v9714_v46  ;;  %v9651_v46 = vld [vmem:[#allocation5 + $0x598] sm:$0xf0]  ;;  %v1963_v50 = vpop.f32.mrf.mxu0  ;;  %v9766_v16 = vor.u32 %v12899_v63, %v9763_v0  ;;  %v12795_v33 = vld [vmem:[#allocation5 + $0x32c] sm:$0xf]  ;;  %v14546_v63 = vperm.slane %v14532_v23, 1 }
 0x124   : > { %2226 = vmatpush.bf16.msrb.mxu3 %v9222_v36  ;;  %2199 = vmatpush.bf16.msrb.mxu1 %v8950_v53  ;;  %v1952_v36 = vadd.f32 %v1951_v31, %v1938_v57  ;;  %v1977_v52 = vpop.f32.mrf.mxu1  ;;  %v12803_v53 = vld [vmem:[#allocation5 + $0x36c] sm:$0xf]  ;;  %v9654_v55 = vor.u32 %v12871_v45, %v9651_v46  ;;  %v9363_v11 = vld [vmem:[#allocation5 + $0x358] sm:$0xf0] }
 0x125   : > { %2213 = vmatpush.bf16.msrb.mxu2 %v9078_v59  ;;  %v12835_v57 = vld [vmem:[#allocation5 + $0x46c] sm:$0xf]  ;;  %v9507_v59 = vld [vmem:[#allocation5 + $0x478] sm:$0xf0] }
 0x126   : > { %2186 = vmatmul.bf16.vlgmr.msrb.gmra.mxu0 %v14512_v13  ;;  %v9491_v18 = vld [vmem:[#allocation5 + $0x458] sm:$0xf0]  ;;  %v12791_v46 = vld [vmem:[#allocation5 + $0x30c] sm:$0xf] }
 0x127   : > { %2234 = vmatpush.bf16.msra.mxu0 %v9446_v61  ;;  %2200 = vmatmul.bf16.vlgmr.msrb.gmra.mxu1 %v14488_v21  ;;  %v1964_v21 = vadd.f32 %v1963_v50, %v1950_v58  ;;  %v9510_v58 = vor.u32 %v12835_v57, %v9507_v59  ;;  %v9747_v25 = vld [vmem:[#allocation5 + $0x658] sm:$0xf0]  ;;  %v9494_v30 = vor.u32 %v12831_v17, %v9491_v18 }
 0x128   : > { %2227 = vmatpush.bf16.msrb.mxu3 %v9206_v60  ;;  %2248 = vmatpush.bf16.msra.mxu1 %v9574_v62  ;;  %v12867_v60 = vld [vmem:[#allocation5 + $0x56c] sm:$0xf]  ;;  %v9635_v62 = vld [vmem:[#allocation5 + $0x578] sm:$0xf0] }
 0x129   : > { %2262 = vmatpush.bf16.msra.mxu2 %v9702_v1  ;;  %v1978_v61 = vadd.f32 %v1977_v52, %v1964_v21  ;;  %v9382_v1 = vor.u32 %v12803_v53, %v9379_v54  ;;  %v9638_v15 = vor.u32 %v12867_v60, %v9635_v62  ;;  %v9347_v34 = vld [vmem:[#allocation5 + $0x338] sm:$0xf0]  ;;  %v12823_v21 = vld [vmem:[#allocation5 + $0x40c] sm:$0xf] }
 0x12a   : > { %2214 = vmatmul.bf16.vlgmr.msrb.gmra.mxu2 %v14496_v37  ;;  %v9523_v37 = vld [vmem:[#allocation5 + $0x498] sm:$0xf0]  ;;  %v9350_v45 = vor.u32 %v12795_v33, %v9347_v34  ;;  %v12887_v54 = vld [vmem:[#allocation5 + $0x60c] sm:$0xf] }
 0x12b   : > { %2228 = vmatmul.bf16.vlgmr.msrb.gmra.mxu3 %v14490_v22  ;;  %2235 = vmatpush.bf16.msra.mxu0 %v9430_v12  ;;  %v9398_v22 = vor.u32 %v12807_v40, %v9395_v41  ;;  %v9526_v51 = vor.u32 %v12839_v44, %v9523_v37  ;;  %v9475_v40 = vld [vmem:[#allocation5 + $0x438] sm:$0xf0]  ;;  %v12859_v41 = vld [vmem:[#allocation5 + $0x52c] sm:$0xf] }
 0x12c   : > { %2276 = vmatpush.bf16.msra.mxu3 %v9830_v2  ;;  %2249 = vmatpush.bf16.msra.mxu1 %v9558_v20  ;;  %v12799_v2 = vld [vmem:[#allocation5 + $0x34c] sm:$0xf]  ;;  %v9619_v20 = vld [vmem:[#allocation5 + $0x558] sm:$0xf0]  ;;  %v1979_v31 = vpop.f32.mrf.mxu1 }
 0x12d   : > { %2263 = vmatpush.bf16.msra.mxu2 %v9686_v26  ;;  %v1991_v12 = vpop.f32.mrf.mxu2  ;;  %v9366_v29 = vor.u32 %v12799_v2, %v9363_v11  ;;  %v9622_v35 = vor.u32 %v12863_v19, %v9619_v20  ;;  %v12891_v44 = vld [vmem:[#allocation5 + $0x62c] sm:$0xf]  ;;  %v9731_v37 = vld [vmem:[#allocation5 + $0x638] sm:$0xf0] }
 0x12e   : > { %v14543_v26 = vadd.f32 %v1991_v12, %v1978_v61  ;;  %v9331_v47 = vld [vmem:[#allocation5 + $0x318] sm:$0xf0]  ;;  %v9734_v50 = vor.u32 %v12891_v44, %v9731_v37  ;;  %v2005_v62 = vpop.f32.mrf.mxu3 }
 0x12f   : > { %2236 = vmatpush.bf16.msra.mxu0 %v9414_v38  ;;  %v9750_v38 = vor.u32 %v12895_v24, %v9747_v25  ;;  %v9587_v53 = vld [vmem:[#allocation5 + $0x518] sm:$0xf0]  ;;  %v9334_v57 = vor.u32 %v12791_v46, %v9331_v47  ;;  %v2006_v0 = vadd.f32 %v2005_v62, %v14546_v63 }
 0x130   : > { %2277 = vmatpush.bf16.msra.mxu3 %v9814_v27  ;;  %2250 = vmatpush.bf16.msra.mxu1 %v9542_v39  ;;  %v1965_v27 = vpop.f32.mrf.mxu0  ;;  %v12827_v39 = vld [vmem:[#allocation5 + $0x42c] sm:$0xf]  ;;  %v9831_v12 = vmul.f32 -1.442695, %v14543_v26 }
 0x131   : > { %2264 = vmatpush.bf16.msra.mxu2 %v9670_v42  ;;  %v1966_v28 = vadd.f32 %v1965_v27, %v1952_v36  ;;  %v9478_v36 = vor.u32 %v12827_v39, %v9475_v40 }
 0x132   : > { %13763 = vpow2.f32 %v9831_v12 }
 0x133   : > { %2237 = vmatpush.bf16.msra.mxu0 %v9398_v22  ;;  %v1980_v42 = vadd.f32 %v1979_v31, %v1966_v28  ;;  %v9459_v22 = vld [vmem:[#allocation5 + $0x418] sm:$0xf0] }
 0x134   : > { %2278 = vmatpush.bf16.msra.mxu3 %v9798_v43  ;;  %2251 = vmatpush.bf16.msra.mxu1 %v9526_v51  ;;  %v9603_v43 = vld [vmem:[#allocation5 + $0x538] sm:$0xf0]  ;;  %v12855_v51 = vld [vmem:[#allocation5 + $0x50c] sm:$0xf]  ;;  %v9462_v59 = vor.u32 %v12823_v21, %v9459_v22 }
 0x135   : > { %2265 = vmatpush.bf16.msra.mxu2 %v9654_v55  ;;  %v9606_v48 = vor.u32 %v12859_v41, %v9603_v43  ;;  %v1993_v52 = vpop.f32.mrf.mxu2  ;;  %v9715_v55 = vld [vmem:[#allocation5 + $0x618] sm:$0xf0]  ;;  %v9590_v60 = vor.u32 %v12855_v51, %v9587_v53 }
 0x136   : > { %v9718_v61 = vor.u32 %v12887_v54, %v9715_v55 }
 0x137   : > { %2238 = vmatpush.bf16.msra.mxu0 %v9382_v1  ;;  %v2007_v1 = vpop.f32.mrf.mxu3 }
 0x138   : > { %2279 = vmatpush.bf16.msra.mxu3 %v9782_v56  ;;  %2252 = vmatpush.bf16.msra.mxu1 %v9510_v58  ;;  %v1994_v56 = vadd.f32 %v1993_v52, %v1980_v42 }
 0x139   : > { %2266 = vmatpush.bf16.msra.mxu2 %v9638_v15 }
 0x13b   : > { %2239 = vmatpush.bf16.msra.mxu0 %v9366_v29 }
 0x13c   : > { %2280 = vmatpush.bf16.msra.mxu3 %v9766_v16  ;;  %2253 = vmatpush.bf16.msra.mxu1 %v9494_v30 }
 0x13d   : > { %2267 = vmatpush.bf16.msra.mxu2 %v9622_v35 }
 0x13f   : > { %2240 = vmatpush.bf16.msra.mxu0 %v9350_v45 }
 0x140   : > { %2281 = vmatpush.bf16.msra.mxu3 %v9750_v38  ;;  %2254 = vmatpush.bf16.msra.mxu1 %v9478_v36 }
 0x141   : > { %2268 = vmatpush.bf16.msra.mxu2 %v9606_v48 }
 0x143   : > { %2241 = vmatpush.bf16.msra.mxu0 %v9334_v57  ;;  %v2019_v58 = vpop.f32.mrf.mxu0 }
 0x144   : > { %2282 = vmatpush.bf16.msra.mxu3 %v9734_v50  ;;  %2255 = vmatpush.bf16.msra.mxu1 %v9462_v59  ;;  %v2020_v2 = vadd.f32 %v2019_v58, %v2006_v0  ;;  %v2033_v11 = vpop.f32.mrf.mxu1 }
 0x145   : > { %2269 = vmatpush.bf16.msra.mxu2 %v9590_v60 }
 0x146   : > { %2242 = vmatmul.bf16.vlgmr.msra.gmra.mxu0 %v14501_v49  ;;  %v2034_v15 = vadd.f32 %v2033_v11, %v2020_v2  ;;  %v9835_v49 = vmul.f32 -1.442695, %v1994_v56  ;;  %v546_v11 = vld [vmem:[%s14463_s14] sm:$0xff] }
 0x147   : > { %2256 = vmatmul.bf16.vlgmr.msra.gmra.mxu1 %v14510_v7 }
 0x148   : > { %2283 = vmatpush.bf16.msra.mxu3 %v9718_v61  ;;  %2270 = vmatmul.bf16.vlgmr.msra.gmra.mxu2 %v14514_v14  ;;  %v13764_v14 = vpop.eup %13763  ;;  %13765 = vpow2.f32 %v9835_v49  ;;  %v547_v49 = vld [vmem:[%s14463_s14 + $0x8] sm:$0xff] }
 0x149   : > { %v2314_v24 = vadd.f32 1.0, %v13764_v14 }
 0x14b   : > { %2284 = vmatmul.bf16.vlgmr.msra.gmra.mxu3 %v14512_v13  ;;  %v2021_v7 = vpop.f32.mrf.mxu0  ;;  %v2008_v13 = vadd.f32 %v2007_v1, %v14546_v63  ;;  %13767 = vrcp.f32 %v2314_v24  ;;  %vm2327_vm0 = vweird.f32 %v2314_v24  ;;  %v2333_v55 = vand.u32 2147483648, %v2314_v24 }
 0x14c   : > { %v2035_v20 = vpop.f32.mrf.mxu1  ;;  %v2331_v57 = vand.u32 2147483647, %v2314_v24 }
 0x14d   : > { %v2047_v16 = vpop.f32.mrf.mxu2  ;;  %v2022_v25 = vadd.f32 %v2021_v7, %v2008_v13  ;;  %v2334_v0 = vor.u32 1.1754944e-38, %v2333_v55 }
 0x14e   : > { %v2048_v17 = vadd.f32 %v2047_v16, %v2034_v15  ;;  %v2061_v18 = vpop.f32.mrf.mxu3  ;;  %v13766_v30 = vpop.eup %13765  ;;  %vm2332_vm3 = vcmp.eq.f32.partialorder %v2331_v57, 8.507059e+37 }
 0x14f   : > { %v2036_v31 = vadd.f32 %v2035_v20, %v2022_v25  ;;  %v14555_v26 = vadd.f32 1.0, %v13766_v30 }
 0x150   : > { %v2062_v19 = vadd.f32 %v2061_v18, %v2048_v17 }
 0x151   : > { %v13768_v40 = vpop.eup %13767  ;;  %v2391_v16 = vand.u32 2147483647, %v14555_v26  ;;  %vm2387_vm7 = vweird.f32 %v14555_v26  ;;  %v2393_v12 = vand.u32 2147483648, %v14555_v26 }
 0x152   : > { %v2323_v44 = vmul.f32 %v13768_v40, %v2314_v24  ;;  %vm2328_vm1 = vweird.f32 %v13768_v40 }
 0x153   : > { %vm2329_vm2 = vmor %vm2327_vm0, %vm2328_vm1  ;;  %vm2392_vm12 = vcmp.eq.f32.partialorder %v2391_v16, 8.507059e+37  ;;  %v2394_v30 = vor.u32 1.1754944e-38, %v2393_v12  ;;  %v14594_v12 = vperm.slane %v14532_v23, 3 }
 0x154   : > { %v2324_v46 = vsub.f32 1.0, %v2323_v44 }
 0x155   : > { %v2049_v27 = vpop.f32.mrf.mxu2 }
 0x156   : > { %v2050_v34 = vadd.f32 %v2049_v27, %v2036_v31  ;;  %v2063_v38 = vpop.f32.mrf.mxu3  ;;  %v2325_v21 = vmul.f32 %v13768_v40, %v2324_v46 }
 0x158   : > { %v2064_v41 = vadd.f32 %v2063_v38, %v2050_v34  ;;  %v2326_v52 = vadd.f32 %v13768_v40, %v2325_v21  ;;  %v550_v38 = vld [vmem:[%s14463_s14 + $0x20] sm:$0xff] }
 0x15a   : > { %v2330_v60 = vsel %vm2329_vm2, %v13768_v40, %v2326_v52 }
 0x15b   : > { %v2335_v15 = vsel %vm2332_vm3, %v2334_v0, %v2330_v60 }
 0x15c   : > { %vm2442_vm9 = vcmp.gt.f32.partialorder %v2335_v15, %v546_v11 }
 0x163   : > { %v2075_v28 = vpop.f32.mrf.mxu0 }
 0x164   : > { %v2089_v29 = vpop.f32.mrf.mxu1  ;;  %v2076_v33 = vadd.f32 %v2075_v28, %v2062_v19  ;;  %v14229_v28 = vmov 0.0  }
 0x166   : > { %v2090_v35 = vadd.f32 %v2089_v29, %v2076_v33  ;;  %v14571_v29 = vsel %vm2442_vm9, 1.0, %v14229_v28 }
 0x168   : > { %v9832_v39 = vmul.f32 -1.442695, %v2090_v35 }
 0x16a   : > { %13769 = vpow2.f32 %v9832_v39 }
 0x16b   : > { %13771 = vrcp.f32 %v14555_v26  ;;  %v2077_v42 = vpop.f32.mrf.mxu0 }
 0x16c   : > { %v2091_v43 = vpop.f32.mrf.mxu1  ;;  %v2078_v37 = vadd.f32 %v2077_v42, %v2064_v41  ;;  %v551_v41 = vld [vmem:[%s14463_s14 + $0x28] sm:$0xff] }
 0x16d   : > { %v2103_v44 = vpop.f32.mrf.mxu2 }
 0x16e   : > { %v2092_v45 = vadd.f32 %v2091_v43, %v2078_v37 }
 0x170   : > { %v13770_v36 = vpop.eup %13769  ;;  %v9836_v47 = vmul.f32 -1.442695, %v2092_v45  ;;  %v2117_v45 = vpop.f32.mrf.mxu3 }
 0x171   : > { %v13772_v48 = vpop.eup %13771  ;;  %v2315_v50 = vadd.f32 1.0, %v13770_v36 }
 0x172   : > { %13773 = vpow2.f32 %v9836_v47  ;;  %v2383_v22 = vmul.f32 %v13772_v48, %v14555_v26  ;;  %vm2388_vm5 = vweird.f32 %v13772_v48 }
 0x173   : > { %13775 = vrcp.f32 %v2315_v50  ;;  %v2348_v1 = vand.u32 2147483648, %v2315_v50  ;;  %v2346_v2 = vand.u32 2147483647, %v2315_v50  ;;  %vm2342_vm6 = vweird.f32 %v2315_v50  ;;  %vm14564_vm11 = vmor %vm2387_vm7, %vm2388_vm5 }
 0x174   : > { %v2384_v53 = vsub.f32 1.0, %v2383_v22 }
 0x175   : > { %v2349_v7 = vor.u32 1.1754944e-38, %v2348_v1  ;;  %vm2347_vm10 = vcmp.eq.f32.partialorder %v2346_v2, 8.507059e+37 }
 0x176   : > { %v2385_v61 = vmul.f32 %v13772_v48, %v2384_v53 }
 0x178   : > { %v13774_v51 = vpop.eup %13773  ;;  %v2386_v17 = vadd.f32 %v13772_v48, %v2385_v61  ;;  %v2119_v21 = vpop.f32.mrf.mxu3 }
 0x179   : > { %v13776_v54 = vpop.eup %13775  ;;  %v2319_v56 = vadd.f32 1.0, %v13774_v51 }
 0x17a   : > { %v2338_v59 = vmul.f32 %v13776_v54, %v2315_v50  ;;  %vm2343_vm4 = vweird.f32 %v13776_v54  ;;  %v2390_v25 = vsel %vm14564_vm11, %v13772_v48, %v2386_v17  ;;  %v14589_v48 = vperm.slane %v14532_v23, 2  ;;  %v2105_v50 = vpop.f32.mrf.mxu2 }
 0x17b   : > { %13777 = vrcp.f32 %v2319_v56  ;;  %vm2344_vm8 = vmor %vm2342_vm6, %vm2343_vm4  ;;  %v2408_v33 = vand.u32 2147483648, %v2319_v56  ;;  %v2406_v26 = vand.u32 2147483647, %v2319_v56  ;;  %v2395_v39 = vsel %vm2392_vm12, %v2394_v30, %v2390_v25 }
 0x17c   : > { %v2339_v62 = vsub.f32 1.0, %v2338_v59  ;;  %vm2402_vm15 = vweird.f32 %v2319_v56  ;;  %vm2446_vm1 = vcmp.gt.f32.partialorder %v2395_v39, %v550_v38  ;;  %v2104_v51 = vadd.f32 %v2103_v44, %v14589_v48 }
 0x17d   : > { %v2409_v42 = vor.u32 1.1754944e-38, %v2408_v33  ;;  %vm2407_vm2 = vcmp.eq.f32.partialorder %v2406_v26, 8.507059e+37  ;;  %v14581_v36 = vsel %vm2446_vm1, 1.0, %v14229_v28  ;;  %v2106_v59 = vadd.f32 %v2105_v50, %v14589_v48 }
 0x17e   : > { %v2340_v58 = vmul.f32 %v13776_v54, %v2339_v62  ;;  %v2118_v53 = vadd.f32 %v2117_v45, %v2104_v51 }
 0x17f   : > { %v2120_v62 = vadd.f32 %v2119_v21, %v2106_v59 }
 0x180   : > { %v2341_v18 = vadd.f32 %v13776_v54, %v2340_v58 }
 0x181   : > { %v13778_v19 = vpop.eup %13777 }
 0x182   : > { %v2345_v20 = vsel %vm2344_vm8, %v13776_v54, %v2341_v18  ;;  %v2398_v14 = vmul.f32 %v13778_v19, %v2319_v56  ;;  %vm2403_vm14 = vweird.f32 %v13778_v19 }
 0x183   : > { %v2350_v24 = vsel %vm2347_vm10, %v2349_v7, %v2345_v20  ;;  %vm2404_vm0 = vmor %vm2402_vm15, %vm2403_vm14  ;;  %v2131_v22 = vpop.f32.mrf.mxu0 }
 0x184   : > { %vm2443_vm13 = vcmp.gt.f32.partialorder %v2350_v24, %v547_v49  ;;  %v2399_v27 = vsub.f32 1.0, %v2398_v14  ;;  %v2145_v52 = vpop.f32.mrf.mxu1  ;;  %v2132_v56 = vadd.f32 %v2131_v22, %v2118_v53 }
 0x185   : > { %v14574_v31 = vsel %vm2443_vm13, 1.0, %v14229_v28 }
 0x186   : > { %v2466_v34 = vpack.c.bf16 %v14574_v31, %v14571_v29   ;;  %v2400_v35 = vmul.f32 %v13778_v19, %v2399_v27  ;;  %v2146_v60 = vadd.f32 %v2145_v52, %v2132_v56 }
 0x188   : > { %v2401_v40 = vadd.f32 %v13778_v19, %v2400_v35 }
 0x18a   : > { %v2405_v43 = vsel %vm2404_vm0, %v13778_v19, %v2401_v40 }
 0x18b   : > { %v2410_v37 = vsel %vm2407_vm2, %v2409_v42, %v2405_v43  ;;  %v2133_v57 = vpop.f32.mrf.mxu0 }
 0x18c   : > { %vm2447_vm3 = vcmp.gt.f32.partialorder %v2410_v37, %v551_v41  ;;  %v2147_v61 = vpop.f32.mrf.mxu1  ;;  %v2134_v11 = vadd.f32 %v2133_v57, %v2120_v62 }
 0x18d   : > { %v14584_v46 = vsel %vm2447_vm3, 1.0, %v14229_v28  ;;  %v2159_v54 = vpop.f32.mrf.mxu2 }
 0x18e   : > { %v2468_v47 = vpack.c.bf16 %v14584_v46, %v14581_v36   ;;  %v2173_v55 = vpop.f32.mrf.mxu3  ;;  %v2160_v0 = vadd.f32 %v2159_v54, %v2146_v60  ;;  %v2148_v17 = vadd.f32 %v2147_v61, %v2134_v11 }
 0x190   : > { %v2174_v15 = vadd.f32 %v2173_v55, %v2160_v0 }
 0x195   : > { %v2161_v1 = vpop.f32.mrf.mxu2 }
 0x196   : > { %v2175_v58 = vpop.f32.mrf.mxu3  ;;  %v2162_v19 = vadd.f32 %v2161_v1, %v2148_v17 }
 0x198   : > { %v2176_v13 = vadd.f32 %v2175_v58, %v2162_v19 }
 0x1a3   : > { %v2187_v2 = vpop.f32.mrf.mxu0 }
 0x1a4   : > { %v2201_v16 = vpop.f32.mrf.mxu1  ;;  %v2188_v18 = vadd.f32 %v2187_v2, %v2174_v15 }
 0x1a5   : > { %v2202_v24 = vadd.f32 %v2201_v16, %v14594_v12 }
 0x1a6   : > { %v9833_v20 = vmul.f32 -1.442695, %v2188_v18 }
 0x1a8   : > { %13779 = vpow2.f32 %v9833_v20 }
 0x1ab   : > { %v2189_v14 = vpop.f32.mrf.mxu0 }
 0x1ac   : > { %v2190_v25 = vadd.f32 %v2189_v14, %v2176_v13  ;;  %v2203_v27 = vpop.f32.mrf.mxu1 }
 0x1ad   : > { %v2215_v49 = vpop.f32.mrf.mxu2  ;;  %v2204_v40 = vadd.f32 %v2203_v27, %v14594_v12 }
 0x1ae   : > { %v2229_v7 = vpop.f32.mrf.mxu3  ;;  %v2216_v30 = vadd.f32 %v2215_v49, %v2202_v24  ;;  %v9837_v33 = vmul.f32 -1.442695, %v2190_v25  ;;  %v13780_v38 = vpop.eup %13779 }
 0x1af   : > { %v2316_v42 = vadd.f32 1.0, %v13780_v38 }
 0x1b0   : > { %v2230_v39 = vadd.f32 %v2229_v7, %v2216_v30  ;;  %13781 = vpow2.f32 %v9837_v33 }
 0x1b1   : > { %13783 = vrcp.f32 %v2316_v42  ;;  %v2363_v13 = vand.u32 2147483648, %v2316_v42  ;;  %vm2357_vm5 = vweird.f32 %v2316_v42  ;;  %v2361_v25 = vand.u32 2147483647, %v2316_v42 }
 0x1b3   : > { %vm2362_vm7 = vcmp.eq.f32.partialorder %v2361_v25, 8.507059e+37 }
 0x1b5   : > { %v2217_v35 = vpop.f32.mrf.mxu2 }
 0x1b6   : > { %v2231_v26 = vpop.f32.mrf.mxu3  ;;  %v2218_v44 = vadd.f32 %v2217_v35, %v2204_v40  ;;  %v13782_v21 = vpop.eup %13781 }
 0x1b7   : > { %v14598_v55 = vadd.f32 1.0, %v13782_v21  ;;  %v13784_v57 = vpop.eup %13783 }
 0x1b8   : > { %v2232_v22 = vadd.f32 %v2231_v26, %v2218_v44  ;;  %v2353_v62 = vmul.f32 %v13784_v57, %v2316_v42  ;;  %vm2358_vm4 = vweird.f32 %v13784_v57  ;;  %v2364_v26 = vor.u32 1.1754944e-38, %v2363_v13 }
 0x1b9   : > { %vm2359_vm6 = vmor %vm2357_vm5, %vm2358_vm4  ;;  %vm2417_vm11 = vweird.f32 %v14598_v55 }
 0x1ba   : > { %v2354_v11 = vsub.f32 1.0, %v2353_v62 }
 0x1bc   : > { %v2355_v18 = vmul.f32 %v13784_v57, %v2354_v11  ;;  %v553_v11 = vld [vmem:[%s14463_s14 + $0x38] sm:$0xff] }
 0x1be   : > { %v2356_v7 = vadd.f32 %v13784_v57, %v2355_v18 }
 0x1c0   : > { %v2360_v30 = vsel %vm2359_vm6, %v13784_v57, %v2356_v7 }
 0x1c3   : > { %v2243_v23 = vpop.f32.mrf.mxu0 }
 0x1c4   : > { %v2244_v41 = vadd.f32 %v2243_v23, %v2230_v39  ;;  %v2257_v43 = vpop.f32.mrf.mxu1  ;;  %v548_v23 = vld [vmem:[%s14463_s14 + $0x10] sm:$0xff] }
 0x1c6   : > { %v2258_v37 = vadd.f32 %v2257_v43, %v2244_v41  ;;  %v2365_v41 = vsel %vm2362_vm7, %v2364_v26, %v2360_v30  ;;  %v2421_v43 = vand.u32 2147483647, %v14598_v55 }
 0x1c7   : > { %vm2444_vm13 = vcmp.gt.f32.partialorder %v2365_v41, %v548_v23 }
 0x1c8   : > { %vm2422_vm0 = vcmp.eq.f32.partialorder %v2421_v43, 8.507059e+37 }
 0x1cb   : > { %v2271_v45 = vpop.f32.mrf.mxu2  ;;  %v2245_v52 = vpop.f32.mrf.mxu0 }
 0x1cc   : > { %v2272_v51 = vadd.f32 %v2271_v45, %v2258_v37  ;;  %v2246_v54 = vadd.f32 %v2245_v52, %v2232_v22  ;;  %v2259_v59 = vpop.f32.mrf.mxu1  ;;  %v2423_v45 = vand.u32 2147483648, %v14598_v55 }
 0x1ce   : > { %v2285_v50 = vpop.f32.mrf.mxu3  ;;  %v2260_v60 = vadd.f32 %v2259_v59, %v2246_v54  ;;  %v2424_v57 = vor.u32 1.1754944e-38, %v2423_v45 }
 0x1cf   : > { %v2286_v53 = vadd.f32 %v2285_v50, %v2272_v51  ;;  %v549_v50 = vld [vmem:[%s14463_s14 + $0x18] sm:$0xff] }
 0x1d1   : > { %v9834_v56 = vmul.f32 -1.442695, %v2286_v53 }
 0x1d3   : > { %13785 = vpow2.f32 %v9834_v56  ;;  %v2273_v61 = vpop.f32.mrf.mxu2  ;;  %v9841_v56 = vsel %vm2444_vm13, 1.0, %v14229_v28 }
 0x1d4   : > { %13787 = vrcp.f32 %v14598_v55  ;;  %v2274_v0 = vadd.f32 %v2273_v61, %v2260_v60 }
 0x1d6   : > { %v2287_v1 = vpop.f32.mrf.mxu3 }
 0x1d7   : > { %v2288_v58 = vadd.f32 %v2287_v1, %v2274_v0  ;;  %v552_v1 = vld [vmem:[%s14463_s14 + $0x30] sm:$0xff] }
 0x1d9   : > { %v13786_v2 = vpop.eup %13785  ;;  %v9838_v15 = vmul.f32 -1.442695, %v2288_v58 }
 0x1da   : > { %v13788_v16 = vpop.eup %13787  ;;  %v2317_v17 = vadd.f32 1.0, %v13786_v2 }
 0x1db   : > { %13789 = vpow2.f32 %v9838_v15  ;;  %v2413_v19 = vmul.f32 %v13788_v16, %v14598_v55  ;;  %vm2418_vm9 = vweird.f32 %v13788_v16 }
 0x1dc   : > { %13791 = vrcp.f32 %v2317_v17  ;;  %v2378_v38 = vand.u32 2147483648, %v2317_v17  ;;  %v2376_v40 = vand.u32 2147483647, %v2317_v17  ;;  %vm2372_vm10 = vweird.f32 %v2317_v17  ;;  %vm14607_vm15 = vmor %vm2417_vm11, %vm2418_vm9 }
 0x1dd   : > { %v2414_v20 = vsub.f32 1.0, %v2413_v19 }
 0x1de   : > { %v2379_v21 = vor.u32 1.1754944e-38, %v2378_v38  ;;  %vm2377_vm14 = vcmp.eq.f32.partialorder %v2376_v40, 8.507059e+37 }
 0x1df   : > { %v2415_v33 = vmul.f32 %v13788_v16, %v2414_v20 }
 0x1e1   : > { %v13790_v49 = vpop.eup %13789  ;;  %v2416_v44 = vadd.f32 %v13788_v16, %v2415_v33 }
 0x1e2   : > { %v13792_v14 = vpop.eup %13791  ;;  %v2321_v24 = vadd.f32 1.0, %v13790_v49 }
 0x1e3   : > { %v2368_v27 = vmul.f32 %v13792_v14, %v2317_v17  ;;  %vm2373_vm8 = vweird.f32 %v13792_v14  ;;  %v2420_v54 = vsel %vm14607_vm15, %v13788_v16, %v2416_v44 }
 0x1e4   : > { %13793 = vrcp.f32 %v2321_v24  ;;  %vm2374_vm12 = vmor %vm2372_vm10, %vm2373_vm8  ;;  %v2438_v60 = vand.u32 2147483648, %v2321_v24  ;;  %v2436_v0 = vand.u32 2147483647, %v2321_v24  ;;  %v2425_v58 = vsel %vm2422_vm0, %v2424_v57, %v2420_v54 }
 0x1e5   : > { %v2369_v35 = vsub.f32 1.0, %v2368_v27  ;;  %vm2432_vm3 = vweird.f32 %v2321_v24  ;;  %vm2448_vm5 = vcmp.gt.f32.partialorder %v2425_v58, %v552_v1 }
 0x1e6   : > { %v2439_v15 = vor.u32 1.1754944e-38, %v2438_v60  ;;  %vm2437_vm6 = vcmp.eq.f32.partialorder %v2436_v0, 8.507059e+37  ;;  %v9845_v18 = vsel %vm2448_vm5, 1.0, %v14229_v28 }
 0x1e7   : > { %v2370_v39 = vmul.f32 %v13792_v14, %v2369_v35 }
 0x1e9   : > { %v2371_v42 = vadd.f32 %v13792_v14, %v2370_v39 }
 0x1ea   : > { %v13794_v37 = vpop.eup %13793 }
 0x1eb   : > { %v2375_v22 = vsel %vm2374_vm12, %v13792_v14, %v2371_v42  ;;  %v2428_v51 = vmul.f32 %v13794_v37, %v2321_v24  ;;  %vm2433_vm2 = vweird.f32 %v13794_v37 }
 0x1ec   : > { %v2380_v53 = vsel %vm2377_vm14, %v2379_v21, %v2375_v22  ;;  %vm2434_vm4 = vmor %vm2432_vm3, %vm2433_vm2 }
 0x1ed   : > { %vm2445_vm1 = vcmp.gt.f32.partialorder %v2380_v53, %v549_v50  ;;  %v2429_v55 = vsub.f32 1.0, %v2428_v51 }
 0x1ee   : > { %v9842_v59 = vsel %vm2445_vm1, 1.0, %v14229_v28 }
 0x1ef   : > { %v2467_v61 = vpack.c.bf16 %v9842_v59, %v9841_v56   ;;  %v2430_v62 = vmul.f32 %v13794_v37, %v2429_v55 }
 0x1f1   : > { %v2431_v2 = vadd.f32 %v13794_v37, %v2430_v62 }
 0x1f3   : > { %v2435_v16 = vsel %vm2434_vm4, %v13794_v37, %v2431_v2 }
 0x1f4   : > { %v2440_v17 = vsel %vm2437_vm6, %v2439_v15, %v2435_v16 }
 0x1f5   : > { %vm2449_vm7 = vcmp.gt.f32.partialorder %v2440_v17, %v553_v11 }
 0x1f6   : > { %v9846_v19 = vsel %vm2449_vm7, 1.0, %v14229_v28 }
 0x1f7   : > { %v2469_v49 = vpack.c.bf16 %v9846_v19, %v9845_v18  }
 0x1f8 LB: >> { %v10045_v29 = vld [vmem:[#allocation7 + $0x188] sm:$0xf]  ;;  %v12970_v31 = vld [vmem:[#allocation7 + $0x1a0] sm:$0xf0]  ;;  %v10017_v30 = vld [vmem:[#allocation7 + $0x150] sm:$0xf]  ;;  %s14205_s22 = sphi %s14641_s22, %s2475_s22   ;;  %v14201_v34 = vphi %v2466_v34, %v15641_v34   ;;  %v14197_v61 = vphi %v2467_v61, %v15640_v61   ;;  %v14193_v47 = vphi %v2468_v47, %v15639_v47   ;;  %v14189_v49 = vphi %v2469_v49, %v15638_v49  }
 0x1f9   : >> { %v10269_v36 = vld [vmem:[#allocation7 + $0x348] sm:$0xf]  ;;  %v10046_v46 = vor.u32 %v12970_v31, %v10045_v29  ;;  %v13026_v7 = vld [vmem:[#allocation7 + $0x360] sm:$0xf0]  ;;  %v12963_v35 = vld [vmem:[#allocation7 + $0x168] sm:$0xf0] }
 0x1fa   : >> { %v10493_v20 = vld [vmem:[#allocation7 + $0x508] sm:$0xf]  ;;  %v13082_v14 = vld [vmem:[#allocation7 + $0x520] sm:$0xf0]  ;;  %v10270_v13 = vor.u32 %v13026_v7, %v10269_v36  ;;  %v10241_v26 = vld [vmem:[#allocation7 + $0x310] sm:$0xf]  ;;  %v10018_v39 = vor.u32 %v12963_v35, %v10017_v30 }
 0x1fb   : >> { %v10494_v24 = vor.u32 %v13082_v14, %v10493_v20  ;;  %v10717_v25 = vld [vmem:[#allocation7 + $0x6c8] sm:$0xf]  ;;  %v13138_v27 = vld [vmem:[#allocation7 + $0x6e0] sm:$0xf0]  ;;  %3908 = vmatpush.bf16.msra.mxu0 %v10046_v46  ;;  %v13019_v38 = vld [vmem:[#allocation7 + $0x328] sm:$0xf0] }
 0x1fc   : >> { %v10718_v33 = vor.u32 %v13138_v27, %v10717_v25  ;;  %3922 = vmatpush.bf16.msra.mxu1 %v10270_v13  ;;  %v10242_v40 = vor.u32 %v13019_v38, %v10241_v26  ;;  %v10465_v23 = vld [vmem:[#allocation7 + $0x4d0] sm:$0xf]  ;;  %v13075_v41 = vld [vmem:[#allocation7 + $0x4e8] sm:$0xf0]  ;;  %v9989_v37 = vld [vmem:[#allocation7 + $0x118] sm:$0xf] }
 0x1fd   : >> { %3936 = vmatpush.bf16.msra.mxu2 %v10494_v24  ;;  %v10689_v43 = vld [vmem:[#allocation7 + $0x690] sm:$0xf]  ;;  %v10466_v44 = vor.u32 %v13075_v41, %v10465_v23  ;;  %v13131_v42 = vld [vmem:[#allocation7 + $0x6a8] sm:$0xf0]  ;;  %v12956_v45 = vld [vmem:[#allocation7 + $0x130] sm:$0xf0] }
 0x1fe   : >> { %3950 = vmatpush.bf16.msra.mxu3 %v10718_v33  ;;  %v10690_v50 = vor.u32 %v13131_v42, %v10689_v43  ;;  %v10213_v21 = vld [vmem:[#allocation7 + $0x2d8] sm:$0xf]  ;;  %v13012_v22 = vld [vmem:[#allocation7 + $0x2f0] sm:$0xf0]  ;;  %v9990_v52 = vor.u32 %v12956_v45, %v9989_v37  ;;  %v9961_v59 = vld [vmem:[#allocation7 + $0xe0] sm:$0xf] }
 0x1ff   : >> { %v10437_v51 = vld [vmem:[#allocation7 + $0x498] sm:$0xf]  ;;  %3909 = vmatpush.bf16.msra.mxu0 %v10018_v39  ;;  %v13068_v53 = vld [vmem:[#allocation7 + $0x4b0] sm:$0xf0]  ;;  %v10214_v56 = vor.u32 %v13012_v22, %v10213_v21  ;;  %v12949_v60 = vld [vmem:[#allocation7 + $0xf8] sm:$0xf0] }
 0x200   : >> { %v10661_v54 = vld [vmem:[#allocation7 + $0x658] sm:$0xf]  ;;  %v13124_v55 = vld [vmem:[#allocation7 + $0x670] sm:$0xf0]  ;;  %3923 = vmatpush.bf16.msra.mxu1 %v10242_v40  ;;  %v10438_v57 = vor.u32 %v13068_v53, %v10437_v51  ;;  %v10185_v62 = vld [vmem:[#allocation7 + $0x2a0] sm:$0xf]  ;;  %v9962_v16 = vor.u32 %v12949_v60, %v9961_v59 }
 0x201   : >> { %3937 = vmatpush.bf16.msra.mxu2 %v10466_v44  ;;  %v10662_v0 = vor.u32 %v13124_v55, %v10661_v54  ;;  %v13005_v1 = vld [vmem:[#allocation7 + $0x2b8] sm:$0xf0]  ;;  %v10409_v58 = vld [vmem:[#allocation7 + $0x460] sm:$0xf]  ;;  %v9933_v19 = vld [vmem:[#allocation7 + $0xa8] sm:$0xf] }
 0x202   : >> { %3951 = vmatpush.bf16.msra.mxu3 %v10690_v50  ;;  %v13061_v2 = vld [vmem:[#allocation7 + $0x478] sm:$0xf0]  ;;  %v10633_v11 = vld [vmem:[#allocation7 + $0x620] sm:$0xf]  ;;  %v10186_v17 = vor.u32 %v13005_v1, %v10185_v62  ;;  %v12942_v29 = vld [vmem:[#allocation7 + $0xc0] sm:$0xf0] }
 0x203   : >> { %v13117_v15 = vld [vmem:[#allocation7 + $0x638] sm:$0xf0]  ;;  %3910 = vmatpush.bf16.msra.mxu0 %v9990_v52  ;;  %v10410_v18 = vor.u32 %v13061_v2, %v10409_v58  ;;  %v10157_v31 = vld [vmem:[#allocation7 + $0x268] sm:$0xf]  ;;  %v12998_v46 = vld [vmem:[#allocation7 + $0x280] sm:$0xf0]  ;;  %v9934_v24 = vor.u32 %v12942_v29, %v9933_v19  ;;  %v2742_v19 = vunpack.c.l.b16 %v14197_v61 }
 0x204   : >> { %3924 = vmatpush.bf16.msra.mxu1 %v10214_v56  ;;  %v10634_v36 = vor.u32 %v13117_v15, %v10633_v11  ;;  %v10381_v7 = vld [vmem:[#allocation7 + $0x428] sm:$0xf]  ;;  %v13054_v20 = vld [vmem:[#allocation7 + $0x440] sm:$0xf0]  ;;  %v10158_v25 = vor.u32 %v12998_v46, %v10157_v31  ;;  %v9905_v30 = vld [vmem:[#allocation7 + $0x70] sm:$0xf] }
 0x205   : >> { %3938 = vmatpush.bf16.msra.mxu2 %v10438_v57  ;;  %v10605_v14 = vld [vmem:[#allocation7 + $0x5e8] sm:$0xf]  ;;  %v13110_v13 = vld [vmem:[#allocation7 + $0x600] sm:$0xf0]  ;;  %v10382_v27 = vor.u32 %v13054_v20, %v10381_v7  ;;  %v12935_v33 = vld [vmem:[#allocation7 + $0x88] sm:$0xf0]  ;;  %v2746_v7 = vunpack.c.l.b16 %v14189_v49  ;;  %v2740_v20 = vunpack.c.l.b16 %v14201_v34 }
 0x206   : >> { %3952 = vmatpush.bf16.msra.mxu3 %v10662_v0  ;;  %v10129_v35 = vld [vmem:[#allocation7 + $0x230] sm:$0xf]  ;;  %v10606_v26 = vor.u32 %v13110_v13, %v10605_v14  ;;  %v12991_v38 = vld [vmem:[#allocation7 + $0x248] sm:$0xf0]  ;;  %v9906_v43 = vor.u32 %v12935_v33, %v9905_v30  ;;  %v9877_v37 = vld [vmem:[#allocation7 + $0x38] sm:$0xf]  ;;  %v2744_v14 = vunpack.c.l.b16 %v14193_v47  ;;  %v2743_v30 = vunpack.c.h.b16 %v14197_v61 }
 0x207   : >> { %3911 = vmatpush.bf16.msra.mxu0 %v9962_v16  ;;  %v10353_v39 = vld [vmem:[#allocation7 + $0x3f0] sm:$0xf]  ;;  %v13047_v40 = vld [vmem:[#allocation7 + $0x408] sm:$0xf0]  ;;  %v10130_v44 = vor.u32 %v12991_v38, %v10129_v35  ;;  %v12928_v45 = vld [vmem:[#allocation7 + $0x50] sm:$0xf0]  ;;  %v2747_v33 = vunpack.c.h.b16 %v14189_v49  ;;  %v2741_v38 = vunpack.c.h.b16 %v14201_v34  ;;  %v14666_v61 = vpack.c.b16 %v2746_v7, %v2742_v19 }
 0x208   : >> { %3925 = vmatpush.bf16.msra.mxu1 %v10186_v17  ;;  %v10577_v23 = vld [vmem:[#allocation7 + $0x5b0] sm:$0xf]  ;;  %v13103_v41 = vld [vmem:[#allocation7 + $0x5c8] sm:$0xf0]  ;;  %v10354_v42 = vor.u32 %v13047_v40, %v10353_v39  ;;  %v10101_v50 = vld [vmem:[#allocation7 + $0x1f8] sm:$0xf]  ;;  %v9878_v55 = vor.u32 %v12928_v45, %v9877_v37  ;;  %v2745_v39 = vunpack.c.h.b16 %v14193_v47 }
 0x209   : >> { %3939 = vmatpush.bf16.msra.mxu2 %v10410_v18  ;;  %v10578_v21 = vor.u32 %v13103_v41, %v10577_v23  ;;  %v12984_v22 = vld [vmem:[#allocation7 + $0x210] sm:$0xf0]  ;;  %v10325_v51 = vld [vmem:[#allocation7 + $0x3b8] sm:$0xf]  ;;  %v9849_v56 = vld [vmem:[#allocation7] sm:$0xf]  ;;  %v14670_v34 = vpack.c.b16 %v2747_v33, %v2743_v30 }
 0x20a   : >> { %3953 = vmatpush.bf16.msra.mxu3 %v10634_v36  ;;  %v13040_v52 = vld [vmem:[#allocation7 + $0x3d0] sm:$0xf0]  ;;  %v10549_v53 = vld [vmem:[#allocation7 + $0x578] sm:$0xf]  ;;  %v12921_v57 = vld [vmem:[#allocation7 + $0x18] sm:$0xf0]  ;;  %v10102_v59 = vor.u32 %v12984_v22, %v10101_v50  ;;  %v14668_v22 = vpack.c.b16 %v2744_v14, %v2740_v20 }
 0x20b   : >> { %3912 = vmatpush.bf16.msra.mxu0 %v9934_v24  ;;  %v13096_v54 = vld [vmem:[#allocation7 + $0x590] sm:$0xf0]  ;;  %v10326_v60 = vor.u32 %v13040_v52, %v10325_v51  ;;  %v10073_v62 = vld [vmem:[#allocation7 + $0x1c0] sm:$0xf]  ;;  %v12977_v0 = vld [vmem:[#allocation7 + $0x1d8] sm:$0xf0]  ;;  %v9850_v29 = vor.u32 %v12921_v57, %v9849_v56  ;;  %v14672_v51 = vpack.c.b16 %v2745_v39, %v2741_v38 }
 0x20c   : >> { %3926 = vmatpush.bf16.msra.mxu1 %v10158_v25  ;;  %v10297_v1 = vld [vmem:[#allocation7 + $0x380] sm:$0xf]  ;;  %v10550_v58 = vor.u32 %v13096_v54, %v10549_v53  ;;  %v13033_v2 = vld [vmem:[#allocation7 + $0x398] sm:$0xf0]  ;;  %v12967_v16 = vld [vmem:[#allocation7 + $0x18c] sm:$0xf]  ;;  %v10074_v13 = vor.u32 %v12977_v0, %v10073_v62 }
 0x20d   : >> { %3940 = vmatpush.bf16.msra.mxu2 %v10382_v27  ;;  %v10521_v11 = vld [vmem:[#allocation7 + $0x540] sm:$0xf]  ;;  %v13089_v15 = vld [vmem:[#allocation7 + $0x558] sm:$0xf0]  ;;  %v10047_v17 = vld [vmem:[#allocation7 + $0x1a4] sm:$0xf0]  ;;  %v10298_v24 = vor.u32 %v13033_v2, %v10297_v1 }
 0x20e   : >> { %3954 = vmatpush.bf16.msra.mxu3 %v10606_v26  ;;  %v13023_v18 = vld [vmem:[#allocation7 + $0x34c] sm:$0xf]  ;;  %v10271_v31 = vld [vmem:[#allocation7 + $0x364] sm:$0xf0]  ;;  %v10522_v35 = vor.u32 %v13089_v15, %v10521_v11  ;;  %v10050_v26 = vor.u32 %v12967_v16, %v10047_v17  ;;  %v12960_v41 = vld [vmem:[#allocation7 + $0x154] sm:$0xf] }
 0x20f   : >> { %3913 = vmatpush.bf16.msra.mxu0 %v9906_v43  ;;  %v13079_v36 = vld [vmem:[#allocation7 + $0x50c] sm:$0xf]  ;;  %v10495_v46 = vld [vmem:[#allocation7 + $0x524] sm:$0xf0]  ;;  %v10274_v40 = vor.u32 %v13023_v18, %v10271_v31  ;;  %v10019_v43 = vld [vmem:[#allocation7 + $0x16c] sm:$0xf0] }
 0x210   : >> { %3927 = vmatpush.bf16.msra.mxu1 %v10130_v44  ;;  %v13135_v25 = vld [vmem:[#allocation7 + $0x6cc] sm:$0xf]  ;;  %v10719_v27 = vld [vmem:[#allocation7 + $0x6e4] sm:$0xf0]  ;;  %v10498_v23 = vor.u32 %v13079_v36, %v10495_v46  ;;  %v13016_v44 = vld [vmem:[#allocation7 + $0x314] sm:$0xf]  ;;  %v10022_v47 = vor.u32 %v12960_v41, %v10019_v43 }
 0x211   : >> { %3941 = vmatpush.bf16.msra.mxu2 %v10354_v42  ;;  %v10722_v42 = vor.u32 %v13135_v25, %v10719_v27  ;;  %v10243_v37 = vld [vmem:[#allocation7 + $0x32c] sm:$0xf0]  ;;  %v13072_v45 = vld [vmem:[#allocation7 + $0x4d4] sm:$0xf]  ;;  %v12953_v54 = vld [vmem:[#allocation7 + $0x11c] sm:$0xf] }
 0x212   : >> { %3955 = vmatpush.bf16.msra.mxu3 %v10578_v21  ;;  %v10467_v50 = vld [vmem:[#allocation7 + $0x4ec] sm:$0xf0]  ;;  %v13128_v49 = vld [vmem:[#allocation7 + $0x694] sm:$0xf]  ;;  %v10246_v52 = vor.u32 %v13016_v44, %v10243_v37  ;;  %v13009_v56 = vld [vmem:[#allocation7 + $0x2dc] sm:$0xf] }
 0x213   : >> { %3914 = vmatpush.bf16.msra.mxu0 %v9878_v55  ;;  %v10691_v21 = vld [vmem:[#allocation7 + $0x6ac] sm:$0xf0]  ;;  %v10470_v53 = vor.u32 %v13072_v45, %v10467_v50  ;;  %v9991_v55 = vld [vmem:[#allocation7 + $0x134] sm:$0xf0]  ;;  %v13121_v0 = vld [vmem:[#allocation7 + $0x65c] sm:$0xf] }
 0x214   : >> { %3928 = vmatpush.bf16.msra.mxu1 %v10102_v59  ;;  %v10694_v57 = vor.u32 %v13128_v49, %v10691_v21  ;;  %v10215_v59 = vld [vmem:[#allocation7 + $0x2f4] sm:$0xf0]  ;;  %v12946_v15 = vld [vmem:[#allocation7 + $0xe4] sm:$0xf]  ;;  %v9963_v16 = vld [vmem:[#allocation7 + $0xfc] sm:$0xf0] }
 0x215   : >> { %3942 = vmatpush.bf16.msra.mxu2 %v10326_v60  ;;  %v13065_v60 = vld [vmem:[#allocation7 + $0x49c] sm:$0xf]  ;;  %v10439_v62 = vld [vmem:[#allocation7 + $0x4b4] sm:$0xf0]  ;;  %v10218_v2 = vor.u32 %v13009_v56, %v10215_v59  ;;  %v13002_v17 = vld [vmem:[#allocation7 + $0x2a4] sm:$0xf]  ;;  %v9966_v7 = vor.u32 %v12946_v15, %v9963_v16 }
 0x216   : >> { %3956 = vmatpush.bf16.msra.mxu3 %v10550_v58  ;;  %v10663_v1 = vld [vmem:[#allocation7 + $0x674] sm:$0xf0]  ;;  %v9994_v58 = vor.u32 %v12953_v54, %v9991_v55  ;;  %v10442_v11 = vor.u32 %v13065_v60, %v10439_v62  ;;  %v10187_v19 = vld [vmem:[#allocation7 + $0x2bc] sm:$0xf0]  ;;  %v13114_v36 = vld [vmem:[#allocation7 + $0x624] sm:$0xf] }
 0x217   : >> { %3915 = vmatpush.bf16.msra.mxu0 %v9850_v29  ;;  %v10666_v18 = vor.u32 %v13121_v0, %v10663_v1  ;;  %v13058_v29 = vld [vmem:[#allocation7 + $0x464] sm:$0xf]  ;;  %v10411_v31 = vld [vmem:[#allocation7 + $0x47c] sm:$0xf0]  ;;  %v10190_v20 = vor.u32 %v13002_v17, %v10187_v19  ;;  %v12995_v25 = vld [vmem:[#allocation7 + $0x26c] sm:$0xf] }
 0x218   : >> { %3929 = vmatpush.bf16.msra.mxu1 %v10074_v13  ;;  %v10635_v46 = vld [vmem:[#allocation7 + $0x63c] sm:$0xf0]  ;;  %v10414_v14 = vor.u32 %v13058_v29, %v10411_v31  ;;  %v12939_v13 = vld [vmem:[#allocation7 + $0xac] sm:$0xf]  ;;  %v10159_v30 = vld [vmem:[#allocation7 + $0x284] sm:$0xf0] }
 0x219   : >> { %3943 = vmatpush.bf16.msra.mxu2 %v10298_v24  ;;  %v9935_v24 = vld [vmem:[#allocation7 + $0xc4] sm:$0xf0]  ;;  %v10638_v27 = vor.u32 %v13114_v36, %v10635_v46  ;;  %v13051_v33 = vld [vmem:[#allocation7 + $0x42c] sm:$0xf]  ;;  %v12932_v41 = vld [vmem:[#allocation7 + $0x74] sm:$0xf] }
 0x21a   : >> { %3957 = vmatpush.bf16.msra.mxu3 %v10522_v35  ;;  %3916 = vmatmul.bf16.vlgmr.msra.gmra.mxu0 %v14668_v22  ;;  %v10383_v35 = vld [vmem:[#allocation7 + $0x444] sm:$0xf0]  ;;  %v9938_v39 = vor.u32 %v12939_v13, %v9935_v24  ;;  %v9907_v43 = vld [vmem:[#allocation7 + $0x8c] sm:$0xf0]  ;;  %v12988_v44 = vld [vmem:[#allocation7 + $0x234] sm:$0xf] }
 0x21b   : >> { %3964 = vmatpush.bf16.msrb.mxu0 %v10050_v26  ;;  %3930 = vmatmul.bf16.vlgmr.msra.gmra.mxu1 %v14672_v51  ;;  %v13107_v26 = vld [vmem:[#allocation7 + $0x5ec] sm:$0xf]  ;;  %v10607_v38 = vld [vmem:[#allocation7 + $0x604] sm:$0xf0]  ;;  %v10131_v37 = vld [vmem:[#allocation7 + $0x24c] sm:$0xf0] }
 0x21c   : >> { %3978 = vmatpush.bf16.msrb.mxu1 %v10274_v40  ;;  %3944 = vmatmul.bf16.vlgmr.msra.gmra.mxu2 %v14666_v61  ;;  %v10162_v40 = vor.u32 %v12995_v25, %v10159_v30  ;;  %v13044_v45 = vld [vmem:[#allocation7 + $0x3f4] sm:$0xf]  ;;  %v10355_v50 = vld [vmem:[#allocation7 + $0x40c] sm:$0xf0]  ;;  %v12925_v54 = vld [vmem:[#allocation7 + $0x3c] sm:$0xf] }
 0x21d   : >> { %3992 = vmatpush.bf16.msrb.mxu2 %v10498_v23  ;;  %3958 = vmatmul.bf16.vlgmr.msra.gmra.mxu3 %v14670_v34  ;;  %v10386_v23 = vor.u32 %v13051_v33, %v10383_v35  ;;  %v13100_v49 = vld [vmem:[#allocation7 + $0x5b4] sm:$0xf]  ;;  %v10579_v21 = vld [vmem:[#allocation7 + $0x5cc] sm:$0xf0]  ;;  %v9879_v55 = vld [vmem:[#allocation7 + $0x54] sm:$0xf0] }
 0x21e   : >> { %4006 = vmatpush.bf16.msrb.mxu3 %v10722_v42  ;;  %v10610_v42 = vor.u32 %v13107_v26, %v10607_v38  ;;  %v12981_v56 = vld [vmem:[#allocation7 + $0x1fc] sm:$0xf]  ;;  %v10103_v59 = vld [vmem:[#allocation7 + $0x214] sm:$0xf0]  ;;  %v12974_v17 = vld [vmem:[#allocation7 + $0x1c4] sm:$0xf] }
 0x21f   : >> { %3965 = vmatpush.bf16.msrb.mxu0 %v10022_v47  ;;  %v9910_v47 = vor.u32 %v12932_v41, %v9907_v43  ;;  %v13037_v60 = vld [vmem:[#allocation7 + $0x3bc] sm:$0xf]  ;;  %v10327_v62 = vld [vmem:[#allocation7 + $0x3d4] sm:$0xf0]  ;;  %v10106_v15 = vor.u32 %v12981_v56, %v10103_v59  ;;  %v13030_v19 = vld [vmem:[#allocation7 + $0x384] sm:$0xf] }
 0x220   : >> { %3979 = vmatpush.bf16.msrb.mxu1 %v10246_v52  ;;  %v10134_v52 = vor.u32 %v12988_v44, %v10131_v37  ;;  %v13093_v0 = vld [vmem:[#allocation7 + $0x57c] sm:$0xf]  ;;  %v10551_v1 = vld [vmem:[#allocation7 + $0x594] sm:$0xf0]  ;;  %v10330_v16 = vor.u32 %v13037_v60, %v10327_v62  ;;  %v10299_v31 = vld [vmem:[#allocation7 + $0x39c] sm:$0xf0] }
 0x221   : >> { %3993 = vmatpush.bf16.msrb.mxu2 %v10470_v53  ;;  %v10358_v53 = vor.u32 %v13044_v45, %v10355_v50  ;;  %v10554_v29 = vor.u32 %v13093_v0, %v10551_v1  ;;  %v13086_v36 = vld [vmem:[#allocation7 + $0x544] sm:$0xf]  ;;  %v10523_v46 = vld [vmem:[#allocation7 + $0x55c] sm:$0xf0]  ;;  %v13027_v24 = vld [vmem:[#allocation7 + $0x368] sm:$0xf0]  ;;  %v10302_v33 = vor.u32 %v13030_v19, %v10299_v31 }
 0x222   : >> { %4007 = vmatpush.bf16.msrb.mxu3 %v10694_v57  ;;  %v10582_v57 = vor.u32 %v13100_v49, %v10579_v21  ;;  %v10501_v25 = vld [vmem:[#allocation7 + $0x510] sm:$0xf]  ;;  %v13139_v26 = vld [vmem:[#allocation7 + $0x6e8] sm:$0xf0]  ;;  %v10526_v38 = vor.u32 %v13086_v36, %v10523_v46  ;;  %v10025_v41 = vld [vmem:[#allocation7 + $0x158] sm:$0xf] }
 0x223   : >> { %3966 = vmatpush.bf16.msrb.mxu0 %v9994_v58  ;;  %v9882_v58 = vor.u32 %v12925_v54, %v9879_v55  ;;  %v10725_v35 = vld [vmem:[#allocation7 + $0x6d0] sm:$0xf]  ;;  %v12964_v43 = vld [vmem:[#allocation7 + $0x170] sm:$0xf0]  ;;  %v10249_v44 = vld [vmem:[#allocation7 + $0x318] sm:$0xf] }
 0x224   : >> { %3980 = vmatpush.bf16.msrb.mxu1 %v10218_v2  ;;  %v12918_v2 = vld [vmem:[#allocation7 + $0x4] sm:$0xf]  ;;  %v13020_v37 = vld [vmem:[#allocation7 + $0x330] sm:$0xf0]  ;;  %v10473_v45 = vld [vmem:[#allocation7 + $0x4d8] sm:$0xf] }
 0x225   : >> { %3994 = vmatpush.bf16.msrb.mxu2 %v10442_v11  ;;  %v9851_v11 = vld [vmem:[#allocation7 + $0x1c] sm:$0xf0]  ;;  %v13076_v50 = vld [vmem:[#allocation7 + $0x4f0] sm:$0xf0]  ;;  %v10697_v49 = vld [vmem:[#allocation7 + $0x698] sm:$0xf] }
 0x226   : >> { %4008 = vmatpush.bf16.msrb.mxu3 %v10666_v18  ;;  %v10075_v18 = vld [vmem:[#allocation7 + $0x1dc] sm:$0xf0]  ;;  %v9854_v13 = vor.u32 %v12918_v2, %v9851_v11  ;;  %v13132_v21 = vld [vmem:[#allocation7 + $0x6b0] sm:$0xf0]  ;;  %v12957_v55 = vld [vmem:[#allocation7 + $0x138] sm:$0xf0] }
 0x227   : >> { %3967 = vmatpush.bf16.msrb.mxu0 %v9966_v7  ;;  %v10053_v7 = vld [vmem:[#allocation7 + $0x190] sm:$0xf]  ;;  %v10078_v30 = vor.u32 %v12974_v17, %v10075_v18  ;;  %v9997_v54 = vld [vmem:[#allocation7 + $0x120] sm:$0xf]  ;;  %v13013_v59 = vld [vmem:[#allocation7 + $0x2f8] sm:$0xf0] }
 0x228   : >> { %3981 = vmatpush.bf16.msrb.mxu1 %v10190_v20  ;;  %v12971_v20 = vld [vmem:[#allocation7 + $0x1a8] sm:$0xf0]  ;;  %v10221_v56 = vld [vmem:[#allocation7 + $0x2e0] sm:$0xf]  ;;  %v13069_v62 = vld [vmem:[#allocation7 + $0x4b8] sm:$0xf0] }
 0x229   : >> { %3995 = vmatpush.bf16.msrb.mxu2 %v10414_v14  ;;  %v10277_v14 = vld [vmem:[#allocation7 + $0x350] sm:$0xf]  ;;  %v10445_v60 = vld [vmem:[#allocation7 + $0x4a0] sm:$0xf]  ;;  %v13125_v1 = vld [vmem:[#allocation7 + $0x678] sm:$0xf0]  ;;  %v10222_v2 = vor.u32 %v13013_v59, %v10221_v56 }
 0x22a   : >> { %4009 = vmatpush.bf16.msrb.mxu3 %v10638_v27  ;;  %v13083_v27 = vld [vmem:[#allocation7 + $0x528] sm:$0xf0]  ;;  %v10669_v0 = vld [vmem:[#allocation7 + $0x660] sm:$0xf]  ;;  %v10446_v11 = vor.u32 %v13069_v62, %v10445_v60  ;;  %v10193_v17 = vld [vmem:[#allocation7 + $0x2a8] sm:$0xf] }
 0x22b   : >> { %3968 = vmatpush.bf16.msrb.mxu0 %v9938_v39  ;;  %v10054_v39 = vor.u32 %v12971_v20, %v10053_v7  ;;  %v10670_v18 = vor.u32 %v13125_v1, %v10669_v0  ;;  %v13006_v19 = vld [vmem:[#allocation7 + $0x2c0] sm:$0xf0]  ;;  %v10641_v36 = vld [vmem:[#allocation7 + $0x628] sm:$0xf]  ;;  %v10109_v56 = vld [vmem:[#allocation7 + $0x200] sm:$0xf] }
 0x22c   : >> { %3982 = vmatpush.bf16.msrb.mxu1 %v10162_v40  ;;  %v10278_v40 = vor.u32 %v13027_v24, %v10277_v14  ;;  %v13062_v31 = vld [vmem:[#allocation7 + $0x480] sm:$0xf0]  ;;  %v10194_v20 = vor.u32 %v13006_v19, %v10193_v17  ;;  %v12943_v24 = vld [vmem:[#allocation7 + $0xc8] sm:$0xf0]  ;;  %v12985_v59 = vld [vmem:[#allocation7 + $0x218] sm:$0xf0] }
 0x22d   : >> { %3996 = vmatpush.bf16.msrb.mxu2 %v10386_v23  ;;  %v10502_v23 = vor.u32 %v13083_v27, %v10501_v25  ;;  %v13118_v46 = vld [vmem:[#allocation7 + $0x640] sm:$0xf0]  ;;  %v10165_v25 = vld [vmem:[#allocation7 + $0x270] sm:$0xf]  ;;  %v10333_v60 = vld [vmem:[#allocation7 + $0x3c0] sm:$0xf] }
 0x22e   : >> { %4010 = vmatpush.bf16.msrb.mxu3 %v10610_v42  ;;  %v10726_v42 = vor.u32 %v13139_v26, %v10725_v35  ;;  %v10642_v27 = vor.u32 %v13118_v46, %v10641_v36  ;;  %v13055_v35 = vld [vmem:[#allocation7 + $0x448] sm:$0xf0]  ;;  %v10613_v26 = vld [vmem:[#allocation7 + $0x5f0] sm:$0xf]  ;;  %v13041_v62 = vld [vmem:[#allocation7 + $0x3d8] sm:$0xf0] }
 0x22f   : >> { %3969 = vmatpush.bf16.msrb.mxu0 %v9910_v47  ;;  %v10026_v47 = vor.u32 %v12964_v43, %v10025_v41  ;;  %v9913_v41 = vld [vmem:[#allocation7 + $0x78] sm:$0xf]  ;;  %v12936_v43 = vld [vmem:[#allocation7 + $0x90] sm:$0xf0]  ;;  %v10557_v0 = vld [vmem:[#allocation7 + $0x580] sm:$0xf] }
 0x230   : >> { %3983 = vmatpush.bf16.msrb.mxu1 %v10134_v52  ;;  %v10250_v52 = vor.u32 %v13020_v37, %v10249_v44  ;;  %v10137_v44 = vld [vmem:[#allocation7 + $0x238] sm:$0xf]  ;;  %v12992_v37 = vld [vmem:[#allocation7 + $0x250] sm:$0xf0]  ;;  %v13097_v1 = vld [vmem:[#allocation7 + $0x598] sm:$0xf0] }
 0x231   : >> { %3997 = vmatpush.bf16.msrb.mxu2 %v10358_v53  ;;  %v10474_v53 = vor.u32 %v13076_v50, %v10473_v45  ;;  %v10361_v45 = vld [vmem:[#allocation7 + $0x3f8] sm:$0xf]  ;;  %v13048_v50 = vld [vmem:[#allocation7 + $0x410] sm:$0xf0]  ;;  %v10081_v17 = vld [vmem:[#allocation7 + $0x1c8] sm:$0xf] }
 0x232   : >> { %4011 = vmatpush.bf16.msrb.mxu3 %v10582_v57  ;;  %v10698_v57 = vor.u32 %v13132_v21, %v10697_v49  ;;  %v10585_v49 = vld [vmem:[#allocation7 + $0x5b8] sm:$0xf]  ;;  %v13104_v21 = vld [vmem:[#allocation7 + $0x5d0] sm:$0xf0]  ;;  %v10305_v19 = vld [vmem:[#allocation7 + $0x388] sm:$0xf] }
 0x233   : >> { %3970 = vmatpush.bf16.msrb.mxu0 %v9882_v58  ;;  %v9998_v58 = vor.u32 %v12957_v55, %v9997_v54  ;;  %v9885_v54 = vld [vmem:[#allocation7 + $0x40] sm:$0xf]  ;;  %v12929_v55 = vld [vmem:[#allocation7 + $0x58] sm:$0xf0]  ;;  %v10529_v36 = vld [vmem:[#allocation7 + $0x548] sm:$0xf] }
 0x234   : >> { %3984 = vmatpush.bf16.msrb.mxu1 %v10106_v15  ;;  %v9969_v15 = vld [vmem:[#allocation7 + $0xe8] sm:$0xf]  ;;  %v13090_v46 = vld [vmem:[#allocation7 + $0x560] sm:$0xf0]  ;;  %s13142_s1 = smul.u32 112, %s14205_s22  ;;  %s10772_s16 = sshll.u32 %s14205_s22, 6 }
 0x235   : >> { %3998 = vmatpush.bf16.msrb.mxu2 %v10330_v16  ;;  %v12950_v16 = vld [vmem:[#allocation7 + $0x100] sm:$0xf0]  ;;  %s15276_s23 = scalar_lea.vmem %s14463_s14, %s10772_s16 [#allocation11]  ;;  %s2475_s22 = sadd.s32 1, %s14205_s22  }
 0x236   : >> { %4012 = vmatpush.bf16.msrb.mxu3 %v10554_v29  ;;  %v10417_v29 = vld [vmem:[#allocation7 + $0x468] sm:$0xf]  ;;  %v9970_v7 = vor.u32 %v12950_v16, %v9969_v15  ;;  %v10110_v15 = vor.u32 %v12985_v59, %v10109_v56  ;;  %v10334_v16 = vor.u32 %v13041_v62, %v10333_v60  ;;  %v13010_v56 = vld [vmem:[#allocation7 + $0x2e4] sm:$0xf]  ;;  %v10223_v59 = vld [vmem:[#allocation7 + $0x2fc] sm:$0xf0]  ;;  %s14831_s3 = scalar_lea.vmem %s14621_s12, %s13142_s1 [#allocation13] }
 0x237   : >> { %3971 = vmatpush.bf16.msrb.mxu0 %v9854_v13  ;;  %v10418_v14 = vor.u32 %v13062_v31, %v10417_v29  ;;  %v9941_v13 = vld [vmem:[#allocation7 + $0xb0] sm:$0xf]  ;;  %v10558_v29 = vor.u32 %v13097_v1, %v10557_v0  ;;  %v13034_v31 = vld [vmem:[#allocation7 + $0x3a0] sm:$0xf0]  ;;  %v10447_v62 = vld [vmem:[#allocation7 + $0x4bc] sm:$0xf0] }
 0x238   : >> { %3985 = vmatpush.bf16.msrb.mxu1 %v10078_v30  ;;  %v12999_v30 = vld [vmem:[#allocation7 + $0x288] sm:$0xf0]  ;;  %v13066_v60 = vld [vmem:[#allocation7 + $0x4a4] sm:$0xf]  ;;  %v10671_v1 = vld [vmem:[#allocation7 + $0x67c] sm:$0xf0] }
 0x239   : >> { %3999 = vmatpush.bf16.msrb.mxu2 %v10302_v33  ;;  %v10389_v33 = vld [vmem:[#allocation7 + $0x430] sm:$0xf]  ;;  %v13122_v0 = vld [vmem:[#allocation7 + $0x664] sm:$0xf]  ;;  %p2472_p4 = scmp.ge.s32.totalorder %s2475_s22, 4  }
 0x23a   : >> { %4013 = vmatpush.bf16.msrb.mxu3 %v10526_v38  ;;  %3972 = vmatmul.bf16.vlgmr.msrb.gmra.mxu0 %v14668_v22  ;;  %v13111_v38 = vld [vmem:[#allocation7 + $0x608] sm:$0xf0]  ;;  %s13599_s8 = smul.u32 (%p2472_p4), 112, %s14295_s28  ;;  %s8731_s28 = sshll.u32 (%p2472_p4), %s14625_s17, 4  ;;  %s8732_s28 = int_to_ptr.vmem [resolvable:$true] %s8731_s28 }
 0x23b   : >> { %4020 = vmatpush.bf16.msra.mxu0 %v10054_v39  ;;  %3986 = vmatmul.bf16.vlgmr.msrb.gmra.mxu1 %v14672_v51  ;;  %v9942_v39 = vor.u32 %v12943_v24, %v9941_v13  ;;  %v10279_v24 = vld [vmem:[#allocation7 + $0x36c] sm:$0xf0]  ;;  %s8718_s18 = scalar_lea.sflag (%p2472_p4), [#allocation4], %s14441_s10  ;;  %s14107_s9 = scalar_lea.hbm (%p2472_p4), %s15551_s7, 224 }
 0x23c   : >> { %4034 = vmatpush.bf16.msra.mxu1 %v10278_v40  ;;  %4000 = vmatmul.bf16.vlgmr.msrb.gmra.mxu2 %v14666_v61  ;;  %v10166_v40 = vor.u32 %v12999_v30, %v10165_v25  ;;  %v13080_v25 = vld [vmem:[#allocation7 + $0x514] sm:$0xf]  ;;  %s8730_s30 = scalar_lea.hbm (%p2472_p4), %s15551_s7, %s13599_s8 }
 0x23d   : >> { %4048 = vmatpush.bf16.msra.mxu2 %v10502_v23  ;;  %4014 = vmatmul.bf16.vlgmr.msrb.gmra.mxu3 %v14670_v34  ;;  %v10390_v23 = vor.u32 %v13055_v35, %v10389_v33  ;;  %v10306_v33 = vor.u32 %v13034_v31, %v10305_v19  ;;  %v13136_v35 = vld [vmem:[#allocation7 + $0x6d4] sm:$0xf]  ;;  %v10195_v19 = vld [vmem:[#allocation7 + $0x2c4] sm:$0xf0]  ;;  %s8733_s21 = sshll.u32 (%p2472_p4), %s8730_s30, 4  ;;  %s8734_s21 = int_to_ptr.hbm [resolvable:$true] %s8733_s21 }
 0x23e   : >> { %4062 = vmatpush.bf16.msra.mxu3 %v10726_v42  ;;  %v10614_v42 = vor.u32 %v13111_v38, %v10613_v26  ;;  %v10727_v26 = vld [vmem:[#allocation7 + $0x6ec] sm:$0xf0]  ;;  %v10530_v38 = vor.u32 %v13090_v46, %v10529_v36  ;;  %v10419_v31 = vld [vmem:[#allocation7 + $0x484] sm:$0xf0]  ;;  %v13115_v36 = vld [vmem:[#allocation7 + $0x62c] sm:$0xf] }
 0x23f   : >> { %4021 = vmatpush.bf16.msra.mxu0 %v10026_v47  ;;  %v9914_v47 = vor.u32 %v12936_v43, %v9913_v41  ;;  %v12961_v41 = vld [vmem:[#allocation7 + $0x15c] sm:$0xf]  ;;  %v10027_v43 = vld [vmem:[#allocation7 + $0x174] sm:$0xf0]  ;;  %v10643_v46 = vld [vmem:[#allocation7 + $0x644] sm:$0xf0] }
 0x240   : >> { %4035 = vmatpush.bf16.msra.mxu1 %v10250_v52  ;;  %v10138_v52 = vor.u32 %v12992_v37, %v10137_v44  ;;  %v13017_v44 = vld [vmem:[#allocation7 + $0x31c] sm:$0xf]  ;;  %v10251_v37 = vld [vmem:[#allocation7 + $0x334] sm:$0xf0]  ;;  %s14101_s11 = sshra.s32 (%p2472_p4), %s8734_s21, 4  ;;  %s14102_s11 = int_to_ptr.hbm [resolvable:$true] %s14101_s11 }
 0x241   : >> { %4049 = vmatpush.bf16.msra.mxu2 %v10474_v53  ;;  %v10362_v53 = vor.u32 %v13048_v50, %v10361_v45  ;;  %v13073_v45 = vld [vmem:[#allocation7 + $0x4dc] sm:$0xf]  ;;  %v10475_v50 = vld [vmem:[#allocation7 + $0x4f4] sm:$0xf0]  ;;  %s14103_s15 = scalar_lea.hbm (%p2472_p4), %s14102_s11, 112  ;;  %p14108_p3 = scmp.lt.s32.totalorder (%p2472_p4), %s14102_s11, %s15551_s7 }
 0x242   : >> { %4063 = vmatpush.bf16.msra.mxu3 %v10698_v57  ;;  %v10586_v57 = vor.u32 %v13104_v21, %v10585_v49  ;;  %v13129_v49 = vld [vmem:[#allocation7 + $0x69c] sm:$0xf]  ;;  %v10699_v21 = vld [vmem:[#allocation7 + $0x6b4] sm:$0xf0]  ;;  %p14104_p5 = scmp.ne.s32.totalorder (%p2472_p4), %s14102_s11, %s14103_s15  ;;  %p14109_p7 = scmp.lt.s32.totalorder (%p2472_p4), %s14107_s9, %s14103_s15 }
 0x243   : >> { %4022 = vmatpush.bf16.msra.mxu0 %v9998_v58  ;;  %v9886_v58 = vor.u32 %v12929_v55, %v9885_v54  ;;  %v12954_v54 = vld [vmem:[#allocation7 + $0x124] sm:$0xf]  ;;  %v9999_v55 = vld [vmem:[#allocation7 + $0x13c] sm:$0xf0] }
 0x244   : >> { %4036 = vmatpush.bf16.msra.mxu1 %v10222_v2  ;;  %v9857_v2 = vld [vmem:[#allocation7 + $0x8] sm:$0xf]  ;;  %p14105_p6 = pnand (%p2472_p4), %p14104_p5, %p14326_p11  ;;  %p14110_p8 = por (%p2472_p4), %p14109_p7, %p14108_p3 }
 0x245   : >> { %4050 = vmatpush.bf16.msra.mxu2 %v10446_v11  ;;  %v12922_v11 = vld [vmem:[#allocation7 + $0x20] sm:$0xf0] }
 0x246   : >> { %4064 = vmatpush.bf16.msra.mxu3 %v10670_v18  ;;  %v12978_v18 = vld [vmem:[#allocation7 + $0x1e0] sm:$0xf0]  ;;  %v9858_v13 = vor.u32 %v12922_v11, %v9857_v2  ;;  %v10226_v2 = vor.u32 %v13010_v56, %v10223_v59  ;;  %v10450_v11 = vor.u32 %v13066_v60, %v10447_v62  ;;  %v10111_v59 = vld [vmem:[#allocation7 + $0x21c] sm:$0xf0]  ;;  %p14106_p13 = pneg (%p2472_p4), %p14105_p6 }
 0x247   : >> { %4023 = vmatpush.bf16.msra.mxu0 %v9970_v7  ;;  %v12968_v7 = vld [vmem:[#allocation7 + $0x194] sm:$0xf]  ;;  %v10082_v30 = vor.u32 %v12978_v18, %v10081_v17  ;;  %v13003_v17 = vld [vmem:[#allocation7 + $0x2ac] sm:$0xf]  ;;  %v10674_v18 = vor.u32 %v13122_v0, %v10671_v1  ;;  %v12982_v56 = vld [vmem:[#allocation7 + $0x204] sm:$0xf] }
 0x248   : >> { %4037 = vmatpush.bf16.msra.mxu1 %v10194_v20  ;;  %v10055_v20 = vld [vmem:[#allocation7 + $0x1ac] sm:$0xf0]  ;;  %v13038_v60 = vld [vmem:[#allocation7 + $0x3c4] sm:$0xf]  ;;  %v10335_v62 = vld [vmem:[#allocation7 + $0x3dc] sm:$0xf0]  ;;  %p14111_p9 = pnand (%p2472_p4), %p14110_p8, %p14106_p13 }
 0x249   : >> { %4051 = vmatpush.bf16.msra.mxu2 %v10418_v14  ;;  %v13024_v14 = vld [vmem:[#allocation7 + $0x354] sm:$0xf]  ;;  %v13094_v0 = vld [vmem:[#allocation7 + $0x584] sm:$0xf]  ;;  %v10559_v1 = vld [vmem:[#allocation7 + $0x59c] sm:$0xf0] }
 0x24a   : >> { %4065 = vmatpush.bf16.msra.mxu3 %v10642_v27  ;;  %v10503_v27 = vld [vmem:[#allocation7 + $0x52c] sm:$0xf0] }
 0x24b   : >> { %4024 = vmatpush.bf16.msra.mxu0 %v9942_v39  ;;  %v10058_v39 = vor.u32 %v12968_v7, %v10055_v20  ;;  %v10198_v20 = vor.u32 %v13003_v17, %v10195_v19  ;;  %v12975_v17 = vld [vmem:[#allocation7 + $0x1cc] sm:$0xf] }
 0x24c   : >> { %4038 = vmatpush.bf16.msra.mxu1 %v10166_v40  ;;  %v10282_v40 = vor.u32 %v13024_v14, %v10279_v24  ;;  %v9943_v24 = vld [vmem:[#allocation7 + $0xcc] sm:$0xf0]  ;;  %v13031_v19 = vld [vmem:[#allocation7 + $0x38c] sm:$0xf] }
 0x24d   : >> { %4052 = vmatpush.bf16.msra.mxu2 %v10390_v23  ;;  %v10506_v23 = vor.u32 %v13080_v25, %v10503_v27  ;;  %v12996_v25 = vld [vmem:[#allocation7 + $0x274] sm:$0xf]  ;;  %v10646_v27 = vor.u32 %v13115_v36, %v10643_v46  ;;  %v13087_v36 = vld [vmem:[#allocation7 + $0x54c] sm:$0xf]  ;;  %v10531_v46 = vld [vmem:[#allocation7 + $0x564] sm:$0xf0] }
 0x24e   : >> { %4066 = vmatpush.bf16.msra.mxu3 %v10614_v42  ;;  %v10730_v42 = vor.u32 %v13136_v35, %v10727_v26  ;;  %v10391_v35 = vld [vmem:[#allocation7 + $0x44c] sm:$0xf0]  ;;  %v13108_v26 = vld [vmem:[#allocation7 + $0x5f4] sm:$0xf] }
 0x24f   : >> { %4025 = vmatpush.bf16.msra.mxu0 %v9914_v47  ;;  %v10030_v47 = vor.u32 %v12961_v41, %v10027_v43  ;;  %v12933_v41 = vld [vmem:[#allocation7 + $0x7c] sm:$0xf]  ;;  %v9915_v43 = vld [vmem:[#allocation7 + $0x94] sm:$0xf0] }
 0x250   : >> { %4039 = vmatpush.bf16.msra.mxu1 %v10138_v52  ;;  %v10254_v52 = vor.u32 %v13017_v44, %v10251_v37  ;;  %v12989_v44 = vld [vmem:[#allocation7 + $0x23c] sm:$0xf]  ;;  %v10139_v37 = vld [vmem:[#allocation7 + $0x254] sm:$0xf0] }
 0x251   : >> { %4053 = vmatpush.bf16.msra.mxu2 %v10362_v53  ;;  %v10478_v53 = vor.u32 %v13073_v45, %v10475_v50  ;;  %v13045_v45 = vld [vmem:[#allocation7 + $0x3fc] sm:$0xf]  ;;  %v10363_v50 = vld [vmem:[#allocation7 + $0x414] sm:$0xf0] }
 0x252   : >> { %4067 = vmatpush.bf16.msra.mxu3 %v10586_v57  ;;  %v10702_v57 = vor.u32 %v13129_v49, %v10699_v21  ;;  %v13101_v49 = vld [vmem:[#allocation7 + $0x5bc] sm:$0xf]  ;;  %v10587_v21 = vld [vmem:[#allocation7 + $0x5d4] sm:$0xf0] }
 0x253   : >> { %4026 = vmatpush.bf16.msra.mxu0 %v9886_v58  ;;  %v10002_v58 = vor.u32 %v12954_v54, %v9999_v55  ;;  %v12926_v54 = vld [vmem:[#allocation7 + $0x44] sm:$0xf]  ;;  %v9887_v55 = vld [vmem:[#allocation7 + $0x5c] sm:$0xf0] }
 0x254   : >> { %4040 = vmatpush.bf16.msra.mxu1 %v10110_v15  ;;  %v12947_v15 = vld [vmem:[#allocation7 + $0xec] sm:$0xf] }
 0x255   : >> { %4054 = vmatpush.bf16.msra.mxu2 %v10334_v16  ;;  %v9971_v16 = vld [vmem:[#allocation7 + $0x104] sm:$0xf0] }
 0x256   : >> { %4068 = vmatpush.bf16.msra.mxu3 %v10558_v29  ;;  %v13059_v29 = vld [vmem:[#allocation7 + $0x46c] sm:$0xf]  ;;  %v9974_v7 = vor.u32 %v12947_v15, %v9971_v16  ;;  %v10114_v15 = vor.u32 %v12982_v56, %v10111_v59  ;;  %v10338_v16 = vor.u32 %v13038_v60, %v10335_v62  ;;  %v10229_v56 = vld [vmem:[#allocation7 + $0x2e8] sm:$0xf]  ;;  %v13014_v59 = vld [vmem:[#allocation7 + $0x300] sm:$0xf0] }
 0x257   : >> { %4027 = vmatpush.bf16.msra.mxu0 %v9858_v13  ;;  %v10422_v14 = vor.u32 %v13059_v29, %v10419_v31  ;;  %v12940_v13 = vld [vmem:[#allocation7 + $0xb4] sm:$0xf]  ;;  %v10562_v29 = vor.u32 %v13094_v0, %v10559_v1  ;;  %v10307_v31 = vld [vmem:[#allocation7 + $0x3a4] sm:$0xf0]  ;;  %v13070_v62 = vld [vmem:[#allocation7 + $0x4c0] sm:$0xf0] }
 0x258   : >> { %4041 = vmatpush.bf16.msra.mxu1 %v10082_v30  ;;  %v10167_v30 = vld [vmem:[#allocation7 + $0x28c] sm:$0xf0]  ;;  %v10453_v60 = vld [vmem:[#allocation7 + $0x4a8] sm:$0xf]  ;;  %v13126_v1 = vld [vmem:[#allocation7 + $0x680] sm:$0xf0] }
 0x259   : >> { %4055 = vmatpush.bf16.msra.mxu2 %v10306_v33  ;;  %v13052_v33 = vld [vmem:[#allocation7 + $0x434] sm:$0xf]  ;;  %v10677_v0 = vld [vmem:[#allocation7 + $0x668] sm:$0xf] }
 0x25a   : >> { %4069 = vmatpush.bf16.msra.mxu3 %v10530_v38  ;;  %4028 = vmatmul.bf16.vlgmr.msra.gmra.mxu0 %v14668_v22  ;;  %v10615_v38 = vld [vmem:[#allocation7 + $0x60c] sm:$0xf0] }
 0x25b   : >> { %4076 = vmatpush.bf16.msrb.mxu0 %v10058_v39  ;;  %4042 = vmatmul.bf16.vlgmr.msra.gmra.mxu1 %v14672_v51  ;;  %v9946_v39 = vor.u32 %v12940_v13, %v9943_v24  ;;  %v13028_v24 = vld [vmem:[#allocation7 + $0x370] sm:$0xf0] }
 0x25c   : >> { %4090 = vmatpush.bf16.msrb.mxu1 %v10282_v40  ;;  %4056 = vmatmul.bf16.vlgmr.msra.gmra.mxu2 %v14666_v61  ;;  %v10170_v40 = vor.u32 %v12996_v25, %v10167_v30  ;;  %v10509_v25 = vld [vmem:[#allocation7 + $0x518] sm:$0xf] }
 0x25d   : >> { %4104 = vmatpush.bf16.msrb.mxu2 %v10506_v23  ;;  %4070 = vmatmul.bf16.vlgmr.msra.gmra.mxu3 %v14670_v34  ;;  %v10394_v23 = vor.u32 %v13052_v33, %v10391_v35  ;;  %v10310_v33 = vor.u32 %v13031_v19, %v10307_v31  ;;  %v10733_v35 = vld [vmem:[#allocation7 + $0x6d8] sm:$0xf]  ;;  %v13007_v19 = vld [vmem:[#allocation7 + $0x2c8] sm:$0xf0] }
 0x25e   : >> { %4118 = vmatpush.bf16.msrb.mxu3 %v10730_v42  ;;  %v10618_v42 = vor.u32 %v13108_v26, %v10615_v38  ;;  %v13140_v26 = vld [vmem:[#allocation7 + $0x6f0] sm:$0xf0]  ;;  %v10534_v38 = vor.u32 %v13087_v36, %v10531_v46  ;;  %v13063_v31 = vld [vmem:[#allocation7 + $0x488] sm:$0xf0]  ;;  %v10649_v36 = vld [vmem:[#allocation7 + $0x630] sm:$0xf] }
 0x25f   : >> { %4077 = vmatpush.bf16.msrb.mxu0 %v10030_v47  ;;  %v9918_v47 = vor.u32 %v12933_v41, %v9915_v43  ;;  %v10033_v41 = vld [vmem:[#allocation7 + $0x160] sm:$0xf]  ;;  %v12965_v43 = vld [vmem:[#allocation7 + $0x178] sm:$0xf0]  ;;  %v13119_v46 = vld [vmem:[#allocation7 + $0x648] sm:$0xf0] }
 0x260   : >> { %4091 = vmatpush.bf16.msrb.mxu1 %v10254_v52  ;;  %v10142_v52 = vor.u32 %v12989_v44, %v10139_v37  ;;  %v10257_v44 = vld [vmem:[#allocation7 + $0x320] sm:$0xf]  ;;  %v13021_v37 = vld [vmem:[#allocation7 + $0x338] sm:$0xf0] }
 0x261   : >> { %4105 = vmatpush.bf16.msrb.mxu2 %v10478_v53  ;;  %v10366_v53 = vor.u32 %v13045_v45, %v10363_v50  ;;  %v10481_v45 = vld [vmem:[#allocation7 + $0x4e0] sm:$0xf]  ;;  %v13077_v50 = vld [vmem:[#allocation7 + $0x4f8] sm:$0xf0] }
 0x262   : >> { %4119 = vmatpush.bf16.msrb.mxu3 %v10702_v57  ;;  %v10590_v57 = vor.u32 %v13101_v49, %v10587_v21  ;;  %v10705_v49 = vld [vmem:[#allocation7 + $0x6a0] sm:$0xf]  ;;  %v13133_v21 = vld [vmem:[#allocation7 + $0x6b8] sm:$0xf0] }
 0x263   : >> { %4078 = vmatpush.bf16.msrb.mxu0 %v10002_v58  ;;  %v9890_v58 = vor.u32 %v12926_v54, %v9887_v55  ;;  %v10005_v54 = vld [vmem:[#allocation7 + $0x128] sm:$0xf]  ;;  %v12958_v55 = vld [vmem:[#allocation7 + $0x140] sm:$0xf0] }
 0x264   : >> { %4092 = vmatpush.bf16.msrb.mxu1 %v10226_v2  ;;  %v12919_v2 = vld [vmem:[#allocation7 + $0xc] sm:$0xf] }
 0x265   : >> { %4106 = vmatpush.bf16.msrb.mxu2 %v10450_v11  ;;  %v9859_v11 = vld [vmem:[#allocation7 + $0x24] sm:$0xf0] }
 0x266   : >> { %4120 = vmatpush.bf16.msrb.mxu3 %v10674_v18  ;;  %v10083_v18 = vld [vmem:[#allocation7 + $0x1e4] sm:$0xf0]  ;;  %v9862_v13 = vor.u32 %v12919_v2, %v9859_v11  ;;  %v10230_v2 = vor.u32 %v13014_v59, %v10229_v56  ;;  %v10454_v11 = vor.u32 %v13070_v62, %v10453_v60  ;;  %v12986_v59 = vld [vmem:[#allocation7 + $0x220] sm:$0xf0] }
 0x267   : >> { %4079 = vmatpush.bf16.msrb.mxu0 %v9974_v7  ;;  %v10061_v7 = vld [vmem:[#allocation7 + $0x198] sm:$0xf]  ;;  %v10086_v30 = vor.u32 %v12975_v17, %v10083_v18  ;;  %v10201_v17 = vld [vmem:[#allocation7 + $0x2b0] sm:$0xf]  ;;  %v10678_v18 = vor.u32 %v13126_v1, %v10677_v0  ;;  %v10117_v56 = vld [vmem:[#allocation7 + $0x208] sm:$0xf] }
 0x268   : >> { %4093 = vmatpush.bf16.msrb.mxu1 %v10198_v20  ;;  %v12972_v20 = vld [vmem:[#allocation7 + $0x1b0] sm:$0xf0]  ;;  %v10341_v60 = vld [vmem:[#allocation7 + $0x3c8] sm:$0xf]  ;;  %v13042_v62 = vld [vmem:[#allocation7 + $0x3e0] sm:$0xf0] }
 0x269   : >> { %4107 = vmatpush.bf16.msrb.mxu2 %v10422_v14  ;;  %v10285_v14 = vld [vmem:[#allocation7 + $0x358] sm:$0xf]  ;;  %v10565_v0 = vld [vmem:[#allocation7 + $0x588] sm:$0xf]  ;;  %v13098_v1 = vld [vmem:[#allocation7 + $0x5a0] sm:$0xf0] }
 0x26a   : >> { %4121 = vmatpush.bf16.msrb.mxu3 %v10646_v27  ;;  %v13084_v27 = vld [vmem:[#allocation7 + $0x530] sm:$0xf0] }
 0x26b   : >> { %4080 = vmatpush.bf16.msrb.mxu0 %v9946_v39  ;;  %v10062_v39 = vor.u32 %v12972_v20, %v10061_v7  ;;  %v10202_v20 = vor.u32 %v13007_v19, %v10201_v17  ;;  %v10089_v17 = vld [vmem:[#allocation7 + $0x1d0] sm:$0xf] }
 0x26c   : >> { %4094 = vmatpush.bf16.msrb.mxu1 %v10170_v40  ;;  %v10286_v40 = vor.u32 %v13028_v24, %v10285_v14  ;;  %v12944_v24 = vld [vmem:[#allocation7 + $0xd0] sm:$0xf0]  ;;  %v10313_v19 = vld [vmem:[#allocation7 + $0x390] sm:$0xf] }
 0x26d   : >> { %4108 = vmatpush.bf16.msrb.mxu2 %v10394_v23  ;;  %v10510_v23 = vor.u32 %v13084_v27, %v10509_v25  ;;  %v10173_v25 = vld [vmem:[#allocation7 + $0x278] sm:$0xf]  ;;  %v10650_v27 = vor.u32 %v13119_v46, %v10649_v36  ;;  %v10537_v36 = vld [vmem:[#allocation7 + $0x550] sm:$0xf]  ;;  %v13091_v46 = vld [vmem:[#allocation7 + $0x568] sm:$0xf0] }
 0x26e   : >> { %4122 = vmatpush.bf16.msrb.mxu3 %v10618_v42  ;;  %v10734_v42 = vor.u32 %v13140_v26, %v10733_v35  ;;  %v13056_v35 = vld [vmem:[#allocation7 + $0x450] sm:$0xf0]  ;;  %v10621_v26 = vld [vmem:[#allocation7 + $0x5f8] sm:$0xf] }
 0x26f   : >> { %4081 = vmatpush.bf16.msrb.mxu0 %v9918_v47  ;;  %v10034_v47 = vor.u32 %v12965_v43, %v10033_v41  ;;  %v9921_v41 = vld [vmem:[#allocation7 + $0x80] sm:$0xf]  ;;  %v12937_v43 = vld [vmem:[#allocation7 + $0x98] sm:$0xf0] }
 0x270   : >> { %4095 = vmatpush.bf16.msrb.mxu1 %v10142_v52  ;;  %v10258_v52 = vor.u32 %v13021_v37, %v10257_v44  ;;  %v10145_v44 = vld [vmem:[#allocation7 + $0x240] sm:$0xf]  ;;  %v12993_v37 = vld [vmem:[#allocation7 + $0x258] sm:$0xf0] }
 0x271   : >> { %4109 = vmatpush.bf16.msrb.mxu2 %v10366_v53  ;;  %v10482_v53 = vor.u32 %v13077_v50, %v10481_v45  ;;  %v10369_v45 = vld [vmem:[#allocation7 + $0x400] sm:$0xf]  ;;  %v13049_v50 = vld [vmem:[#allocation7 + $0x418] sm:$0xf0] }
 0x272   : >> { %4123 = vmatpush.bf16.msrb.mxu3 %v10590_v57  ;;  %v10706_v57 = vor.u32 %v13133_v21, %v10705_v49  ;;  %v10593_v49 = vld [vmem:[#allocation7 + $0x5c0] sm:$0xf]  ;;  %v13105_v21 = vld [vmem:[#allocation7 + $0x5d8] sm:$0xf0] }
 0x273   : >> { %4082 = vmatpush.bf16.msrb.mxu0 %v9890_v58  ;;  %v10006_v58 = vor.u32 %v12958_v55, %v10005_v54  ;;  %v9893_v54 = vld [vmem:[#allocation7 + $0x48] sm:$0xf]  ;;  %v12930_v55 = vld [vmem:[#allocation7 + $0x60] sm:$0xf0] }
 0x274   : >> { %4096 = vmatpush.bf16.msrb.mxu1 %v10114_v15  ;;  %v9977_v15 = vld [vmem:[#allocation7 + $0xf0] sm:$0xf] }
 0x275   : >> { %4110 = vmatpush.bf16.msrb.mxu2 %v10338_v16  ;;  %v12951_v16 = vld [vmem:[#allocation7 + $0x108] sm:$0xf0] }
 0x276   : >> { %4124 = vmatpush.bf16.msrb.mxu3 %v10562_v29  ;;  %v10425_v29 = vld [vmem:[#allocation7 + $0x470] sm:$0xf]  ;;  %v9978_v7 = vor.u32 %v12951_v16, %v9977_v15  ;;  %v10118_v15 = vor.u32 %v12986_v59, %v10117_v56  ;;  %v10342_v16 = vor.u32 %v13042_v62, %v10341_v60  ;;  %v13011_v56 = vld [vmem:[#allocation7 + $0x2ec] sm:$0xf]  ;;  %v10231_v59 = vld [vmem:[#allocation7 + $0x304] sm:$0xf0] }
 0x277   : >> { %4083 = vmatpush.bf16.msrb.mxu0 %v9862_v13  ;;  %v10426_v14 = vor.u32 %v13063_v31, %v10425_v29  ;;  %v9949_v13 = vld [vmem:[#allocation7 + $0xb8] sm:$0xf]  ;;  %v10566_v29 = vor.u32 %v13098_v1, %v10565_v0  ;;  %v13035_v31 = vld [vmem:[#allocation7 + $0x3a8] sm:$0xf0]  ;;  %v10455_v62 = vld [vmem:[#allocation7 + $0x4c4] sm:$0xf0] }
 0x278   : >> { %4097 = vmatpush.bf16.msrb.mxu1 %v10086_v30  ;;  %v13000_v30 = vld [vmem:[#allocation7 + $0x290] sm:$0xf0]  ;;  %v13067_v60 = vld [vmem:[#allocation7 + $0x4ac] sm:$0xf]  ;;  %v10679_v1 = vld [vmem:[#allocation7 + $0x684] sm:$0xf0] }
 0x279   : >> { %4111 = vmatpush.bf16.msrb.mxu2 %v10310_v33  ;;  %v10397_v33 = vld [vmem:[#allocation7 + $0x438] sm:$0xf]  ;;  %v13123_v0 = vld [vmem:[#allocation7 + $0x66c] sm:$0xf] }
 0x27a   : >> { %4125 = vmatpush.bf16.msrb.mxu3 %v10534_v38  ;;  %4084 = vmatmul.bf16.vlgmr.msrb.gmra.mxu0 %v14668_v22  ;;  %v13112_v38 = vld [vmem:[#allocation7 + $0x610] sm:$0xf0] }
 0x27b   : >> { %4132 = vmatpush.bf16.msra.mxu0 %v10062_v39  ;;  %4098 = vmatmul.bf16.vlgmr.msrb.gmra.mxu1 %v14672_v51  ;;  %v9950_v39 = vor.u32 %v12944_v24, %v9949_v13  ;;  %v10287_v24 = vld [vmem:[#allocation7 + $0x374] sm:$0xf0] }
 0x27c   : >> { %4146 = vmatpush.bf16.msra.mxu1 %v10286_v40  ;;  %4112 = vmatmul.bf16.vlgmr.msrb.gmra.mxu2 %v14666_v61  ;;  %v10174_v40 = vor.u32 %v13000_v30, %v10173_v25  ;;  %v13081_v25 = vld [vmem:[#allocation7 + $0x51c] sm:$0xf] }
 0x27d   : >> { %4160 = vmatpush.bf16.msra.mxu2 %v10510_v23  ;;  %4126 = vmatmul.bf16.vlgmr.msrb.gmra.mxu3 %v14670_v34  ;;  %v10398_v23 = vor.u32 %v13056_v35, %v10397_v33  ;;  %v10314_v33 = vor.u32 %v13035_v31, %v10313_v19  ;;  %v13137_v35 = vld [vmem:[#allocation7 + $0x6dc] sm:$0xf]  ;;  %v10203_v19 = vld [vmem:[#allocation7 + $0x2cc] sm:$0xf0] }
 0x27e   : >> { %4174 = vmatpush.bf16.msra.mxu3 %v10734_v42  ;;  %v10622_v42 = vor.u32 %v13112_v38, %v10621_v26  ;;  %v10735_v26 = vld [vmem:[#allocation7 + $0x6f4] sm:$0xf0]  ;;  %v10538_v38 = vor.u32 %v13091_v46, %v10537_v36  ;;  %v10427_v31 = vld [vmem:[#allocation7 + $0x48c] sm:$0xf0]  ;;  %v13116_v36 = vld [vmem:[#allocation7 + $0x634] sm:$0xf] }
 0x27f   : >> { %4133 = vmatpush.bf16.msra.mxu0 %v10034_v47  ;;  %v9922_v47 = vor.u32 %v12937_v43, %v9921_v41  ;;  %v12962_v41 = vld [vmem:[#allocation7 + $0x164] sm:$0xf]  ;;  %v10035_v43 = vld [vmem:[#allocation7 + $0x17c] sm:$0xf0]  ;;  %v10651_v46 = vld [vmem:[#allocation7 + $0x64c] sm:$0xf0] }
 0x280   : >> { %4147 = vmatpush.bf16.msra.mxu1 %v10258_v52  ;;  %v10146_v52 = vor.u32 %v12993_v37, %v10145_v44  ;;  %v13018_v44 = vld [vmem:[#allocation7 + $0x324] sm:$0xf]  ;;  %v10259_v37 = vld [vmem:[#allocation7 + $0x33c] sm:$0xf0] }
 0x281   : >> { %4161 = vmatpush.bf16.msra.mxu2 %v10482_v53  ;;  %v10370_v53 = vor.u32 %v13049_v50, %v10369_v45  ;;  %v13074_v45 = vld [vmem:[#allocation7 + $0x4e4] sm:$0xf]  ;;  %v10483_v50 = vld [vmem:[#allocation7 + $0x4fc] sm:$0xf0] }
 0x282   : >> { %4175 = vmatpush.bf16.msra.mxu3 %v10706_v57  ;;  %v10594_v57 = vor.u32 %v13105_v21, %v10593_v49  ;;  %v13130_v49 = vld [vmem:[#allocation7 + $0x6a4] sm:$0xf]  ;;  %v10707_v21 = vld [vmem:[#allocation7 + $0x6bc] sm:$0xf0] }
 0x283   : >> { %4134 = vmatpush.bf16.msra.mxu0 %v10006_v58  ;;  %v9894_v58 = vor.u32 %v12930_v55, %v9893_v54  ;;  %v12955_v54 = vld [vmem:[#allocation7 + $0x12c] sm:$0xf]  ;;  %v10007_v55 = vld [vmem:[#allocation7 + $0x144] sm:$0xf0] }
 0x284   : >> { %4148 = vmatpush.bf16.msra.mxu1 %v10230_v2  ;;  %v9865_v2 = vld [vmem:[#allocation7 + $0x10] sm:$0xf] }
 0x285   : >> { %4162 = vmatpush.bf16.msra.mxu2 %v10454_v11  ;;  %v12923_v11 = vld [vmem:[#allocation7 + $0x28] sm:$0xf0] }
 0x286   : >> { %4176 = vmatpush.bf16.msra.mxu3 %v10678_v18  ;;  %v12979_v18 = vld [vmem:[#allocation7 + $0x1e8] sm:$0xf0]  ;;  %v9866_v13 = vor.u32 %v12923_v11, %v9865_v2  ;;  %v10234_v2 = vor.u32 %v13011_v56, %v10231_v59  ;;  %v10458_v11 = vor.u32 %v13067_v60, %v10455_v62  ;;  %v9895_v62 = vld [vmem:[#allocation7 + $0x64] sm:$0xf0] }
 0x287   : >> { %4135 = vmatpush.bf16.msra.mxu0 %v9978_v7  ;;  %v12969_v7 = vld [vmem:[#allocation7 + $0x19c] sm:$0xf]  ;;  %v10090_v30 = vor.u32 %v12979_v18, %v10089_v17  ;;  %v13004_v17 = vld [vmem:[#allocation7 + $0x2b4] sm:$0xf]  ;;  %v10682_v18 = vor.u32 %v13123_v0, %v10679_v1  ;;  %v12927_v60 = vld [vmem:[#allocation7 + $0x4c] sm:$0xf] }
 0x288   : >> { %4149 = vmatpush.bf16.msra.mxu1 %v10202_v20  ;;  %v10063_v20 = vld [vmem:[#allocation7 + $0x1b4] sm:$0xf0]  ;;  %v12983_v0 = vld [vmem:[#allocation7 + $0x20c] sm:$0xf] }
 0x289   : >> { %4163 = vmatpush.bf16.msra.mxu2 %v10426_v14  ;;  %v13025_v14 = vld [vmem:[#allocation7 + $0x35c] sm:$0xf] }
 0x28a   : >> { %4177 = vmatpush.bf16.msra.mxu3 %v10650_v27  ;;  %v10511_v27 = vld [vmem:[#allocation7 + $0x534] sm:$0xf0] }
 0x28b   : >> { %4136 = vmatpush.bf16.msra.mxu0 %v9950_v39  ;;  %v10066_v39 = vor.u32 %v12969_v7, %v10063_v20 }
 0x28c   : >> { %4150 = vmatpush.bf16.msra.mxu1 %v10174_v40  ;;  %v10290_v40 = vor.u32 %v13025_v14, %v10287_v24  ;;  %v10206_v14 = vor.u32 %v13004_v17, %v10203_v19  ;;  %v12941_v24 = vld [vmem:[#allocation7 + $0xbc] sm:$0xf]  ;;  %v13095_v17 = vld [vmem:[#allocation7 + $0x58c] sm:$0xf] }
 0x28d   : >> { %4164 = vmatpush.bf16.msra.mxu2 %v10398_v23  ;;  %v10514_v23 = vor.u32 %v13081_v25, %v10511_v27  ;;  %v9951_v25 = vld [vmem:[#allocation7 + $0xd4] sm:$0xf0]  ;;  %v12997_v27 = vld [vmem:[#allocation7 + $0x27c] sm:$0xf] }
 0x28e   : >> { %4178 = vmatpush.bf16.msra.mxu3 %v10622_v42  ;;  %v10738_v42 = vor.u32 %v13137_v35, %v10735_v26  ;;  %v13053_v35 = vld [vmem:[#allocation7 + $0x43c] sm:$0xf]  ;;  %v10399_v26 = vld [vmem:[#allocation7 + $0x454] sm:$0xf0] }
 0x28f   : >> { %4137 = vmatpush.bf16.msra.mxu0 %v9922_v47  ;;  %v10038_v47 = vor.u32 %v12962_v41, %v10035_v43  ;;  %v10402_v43 = vor.u32 %v13053_v35, %v10399_v26  ;;  %v10539_v35 = vld [vmem:[#allocation7 + $0x56c] sm:$0xf0] }
 0x290   : >> { %4151 = vmatpush.bf16.msra.mxu1 %v10146_v52  ;;  %v10262_v52 = vor.u32 %v13018_v44, %v10259_v37  ;;  %v12934_v44 = vld [vmem:[#allocation7 + $0x84] sm:$0xf] }
 0x291   : >> { %4165 = vmatpush.bf16.msra.mxu2 %v10370_v53  ;;  %v10486_v53 = vor.u32 %v13074_v45, %v10483_v50  ;;  %v12990_v37 = vld [vmem:[#allocation7 + $0x244] sm:$0xf] }
 0x292   : >> { %4179 = vmatpush.bf16.msra.mxu3 %v10594_v57  ;;  %v10710_v57 = vor.u32 %v13130_v49, %v10707_v21  ;;  %v10147_v49 = vld [vmem:[#allocation7 + $0x25c] sm:$0xf0]  ;;  %v13046_v21 = vld [vmem:[#allocation7 + $0x404] sm:$0xf] }
 0x293   : >> { %4138 = vmatpush.bf16.msra.mxu0 %v9894_v58  ;;  %v10010_v58 = vor.u32 %v12955_v54, %v10007_v55  ;;  %v10595_v54 = vld [vmem:[#allocation7 + $0x5dc] sm:$0xf0] }
 0x294   : >> { %4152 = vmatpush.bf16.msra.mxu1 %v10118_v15  ;;  %v12948_v15 = vld [vmem:[#allocation7 + $0xf4] sm:$0xf] }
 0x295   : >> { %4166 = vmatpush.bf16.msra.mxu2 %v10342_v16  ;;  %v9979_v16 = vld [vmem:[#allocation7 + $0x10c] sm:$0xf0] }
 0x296   : >> { %4180 = vmatpush.bf16.msra.mxu3 %v10566_v29  ;;  %v13060_v29 = vld [vmem:[#allocation7 + $0x474] sm:$0xf]  ;;  %v9982_v7 = vor.u32 %v12948_v15, %v9979_v16  ;;  %v10343_v15 = vld [vmem:[#allocation7 + $0x3e4] sm:$0xf0] }
 0x297   : >> { %4139 = vmatpush.bf16.msra.mxu0 %v9866_v13  ;;  %v3917_v20 = vpop.f32.mrf.mxu0  ;;  %v10430_v13 = vor.u32 %v13060_v29, %v10427_v31  ;;  %v9898_v29 = vor.u32 %v12927_v60, %v9895_v62  ;;  %v12920_v31 = vld [vmem:[#allocation7 + $0x14] sm:$0xf] }
 0x298   : >> { %4153 = vmatpush.bf16.msra.mxu1 %v10090_v30  ;;  %v10654_v30 = vor.u32 %v13116_v36, %v10651_v46  ;;  %v3918_v50 = vadd.f32 %v3917_v20, %v14470_v3  ;;  %v9867_v36 = vld [vmem:[#allocation7 + $0x2c] sm:$0xf0] }
 0x299   : >> { %4167 = vmatpush.bf16.msra.mxu2 %v10314_v33  ;;  %v10175_v33 = vld [vmem:[#allocation7 + $0x294] sm:$0xf0] }
 0x29a   : >> { %4181 = vmatpush.bf16.msra.mxu3 %v10538_v38  ;;  %4140 = vmatmul.bf16.vlgmr.msra.gmra.mxu0 %v14668_v22  ;;  %v3931_v38 = vpop.f32.mrf.mxu1  ;;  %v10178_v41 = vor.u32 %v12997_v27, %v10175_v33  ;;  %v13088_v33 = vld [vmem:[#allocation7 + $0x554] sm:$0xf] }
 0x29b   : >> { %4188 = vmatpush.bf16.msrb.mxu0 %v10066_v39  ;;  %4154 = vmatmul.bf16.vlgmr.msra.gmra.mxu1 %v14672_v51  ;;  %v13109_v39 = vld [vmem:[#allocation7 + $0x5fc] sm:$0xf] }
 0x29c   : >> { %4202 = vmatpush.bf16.msrb.mxu1 %v10290_v40  ;;  %4168 = vmatmul.bf16.vlgmr.msra.gmra.mxu2 %v14666_v61  ;;  %v10623_v40 = vld [vmem:[#allocation7 + $0x614] sm:$0xf0] }
 0x29d   : >> { %4216 = vmatpush.bf16.msrb.mxu2 %v10514_v23  ;;  %4182 = vmatmul.bf16.vlgmr.msra.gmra.mxu3 %v14670_v34  ;;  %v9954_v23 = vor.u32 %v12941_v24, %v9951_v25  ;;  %v10626_v45 = vor.u32 %v13109_v39, %v10623_v40  ;;  %v13032_v24 = vld [vmem:[#allocation7 + $0x394] sm:$0xf]  ;;  %v12973_v39 = vld [vmem:[#allocation7 + $0x1b8] sm:$0xf0]  ;;  %v10293_v40 = vld [vmem:[#allocation7 + $0x360] sm:$0xf] }
 0x29e   : >> { %4230 = vmatpush.bf16.msrb.mxu3 %v10738_v42  ;;  %v9923_v42 = vld [vmem:[#allocation7 + $0x9c] sm:$0xf0] }
 0x29f   : >> { %4189 = vmatpush.bf16.msrb.mxu0 %v10038_v47  ;;  %v10371_v47 = vld [vmem:[#allocation7 + $0x41c] sm:$0xf0]  ;;  %v9926_v55 = vor.u32 %v12934_v44, %v9923_v42  ;;  %v3919_v56 = vpop.f32.mrf.mxu0  ;;  %v13085_v44 = vld [vmem:[#allocation7 + $0x538] sm:$0xf0] }
 0x2a0   : >> { %4203 = vmatpush.bf16.msrb.mxu1 %v10262_v52  ;;  %v3945_v52 = vpop.f32.mrf.mxu2  ;;  %v10374_v59 = vor.u32 %v13046_v21, %v10371_v47  ;;  %v3959_v16 = vpop.f32.mrf.mxu3  ;;  %v3920_v19 = vadd.f32 %v3919_v56, %v14470_v3  ;;  %v10542_v47 = vor.u32 %v13088_v33, %v10539_v35  ;;  %v10041_v56 = vld [vmem:[#allocation7 + $0x168] sm:$0xf] }
 0x2a1   : >> { %4217 = vmatpush.bf16.msrb.mxu2 %v10486_v53  ;;  %v13102_v53 = vld [vmem:[#allocation7 + $0x5c4] sm:$0xf] }
 0x2a2   : >> { %4231 = vmatpush.bf16.msrb.mxu3 %v10710_v57  ;;  %v10150_v57 = vor.u32 %v12990_v37, %v10147_v49  ;;  %v10598_v1 = vor.u32 %v13102_v53, %v10595_v54  ;;  %v3933_v46 = vpop.f32.mrf.mxu1  ;;  %v13141_v49 = vld [vmem:[#allocation7 + $0x6f8] sm:$0xf0] }
 0x2a3   : >> { %4190 = vmatpush.bf16.msrb.mxu0 %v10010_v58  ;;  %v3932_v58 = vadd.f32 %v3931_v38, %v3918_v50  ;;  %v3934_v26 = vadd.f32 %v3933_v46, %v3920_v19  ;;  %v10069_v38 = vld [vmem:[#allocation7 + $0x1a0] sm:$0xf] }
 0x2a4   : >> { %4204 = vmatpush.bf16.msrb.mxu1 %v10234_v2  ;;  %v10119_v2 = vld [vmem:[#allocation7 + $0x224] sm:$0xf0]  ;;  %v10741_v50 = vld [vmem:[#allocation7 + $0x6e0] sm:$0xf] }
 0x2a5   : >> { %4218 = vmatpush.bf16.msrb.mxu2 %v10458_v11  ;;  %v13039_v11 = vld [vmem:[#allocation7 + $0x3cc] sm:$0xf]  ;;  %v3946_v25 = vadd.f32 %v3945_v52, %v3932_v58  ;;  %v10070_v52 = vor.u32 %v12973_v39, %v10069_v38  ;;  %v10742_v60 = vor.u32 %v13141_v49, %v10741_v50  ;;  %v13078_v58 = vld [vmem:[#allocation7 + $0x500] sm:$0xf0]  ;;  %v10209_v38 = vld [vmem:[#allocation7 + $0x2b8] sm:$0xf] }
 0x2a6   : >> { %4232 = vmatpush.bf16.msrb.mxu3 %v10682_v18  ;;  %v10567_v18 = vld [vmem:[#allocation7 + $0x5a4] sm:$0xf0]  ;;  %v10346_v20 = vor.u32 %v13039_v11, %v10343_v15  ;;  %v13134_v11 = vld [vmem:[#allocation7 + $0x6c0] sm:$0xf0] }
 0x2a7   : >> { %4191 = vmatpush.bf16.msrb.mxu0 %v9982_v7  ;;  %v10122_v7 = vor.u32 %v12983_v0, %v10119_v2  ;;  %v10570_v27 = vor.u32 %v13095_v17, %v10567_v18  ;;  %v3960_v21 = vadd.f32 %v3959_v16, %v3946_v25  ;;  %v13022_v0 = vld [vmem:[#allocation7 + $0x340] sm:$0xf0]  ;;  %v10713_v2 = vld [vmem:[#allocation7 + $0x6a8] sm:$0xf] }
 0x2a8   : >> { %4205 = vmatpush.bf16.msrb.mxu1 %v10206_v14  ;;  %v12976_v14 = vld [vmem:[#allocation7 + $0x1d4] sm:$0xf]  ;;  %v3947_v42 = vpop.f32.mrf.mxu2  ;;  %v3961_v62 = vpop.f32.mrf.mxu3  ;;  %v10714_v46 = vor.u32 %v13134_v11, %v10713_v2 }
 0x2a9   : >> { %4219 = vmatpush.bf16.msrb.mxu2 %v10430_v13  ;;  %v10091_v13 = vld [vmem:[#allocation7 + $0x1ec] sm:$0xf0]  ;;  %v10743_v15 = vmul.f32 -1.442695, %v3960_v21 }
 0x2aa   : >> { %4233 = vmatpush.bf16.msrb.mxu3 %v10654_v30  ;;  %v10315_v30 = vld [vmem:[#allocation7 + $0x3ac] sm:$0xf0]  ;;  %v10094_v37 = vor.u32 %v12976_v14, %v10091_v13  ;;  %v13071_v14 = vld [vmem:[#allocation7 + $0x4c8] sm:$0xf0] }
 0x2ab   : >> { %4192 = vmatpush.bf16.msrb.mxu0 %v9954_v23  ;;  %v9870_v23 = vor.u32 %v12920_v31, %v9867_v36  ;;  %v12959_v31 = vld [vmem:[#allocation7 + $0x148] sm:$0xf0]  ;;  %v10237_v36 = vld [vmem:[#allocation7 + $0x2f0] sm:$0xf]  ;;  %13795 = vpow2.f32 %v10743_v15 }
 0x2ac   : >> { %4206 = vmatpush.bf16.msrb.mxu1 %v10178_v41  ;;  %v13029_v41 = vld [vmem:[#allocation7 + $0x378] sm:$0xf0]  ;;  %v10685_v13 = vld [vmem:[#allocation7 + $0x670] sm:$0xf] }
 0x2ad   : >> { %4220 = vmatpush.bf16.msrb.mxu2 %v10402_v43  ;;  %v10517_v43 = vld [vmem:[#allocation7 + $0x520] sm:$0xf]  ;;  %v10294_v53 = vor.u32 %v13029_v41, %v10293_v40  ;;  %v13008_v40 = vld [vmem:[#allocation7 + $0x2d0] sm:$0xf0] }
 0x2ae   : >> { %4234 = vmatpush.bf16.msrb.mxu3 %v10626_v45  ;;  %v10318_v45 = vor.u32 %v13032_v24, %v10315_v30  ;;  %v10518_v54 = vor.u32 %v13085_v44, %v10517_v43  ;;  %v13127_v24 = vld [vmem:[#allocation7 + $0x688] sm:$0xf0]  ;;  %v13064_v41 = vld [vmem:[#allocation7 + $0x490] sm:$0xf0]  ;;  %v10657_v43 = vld [vmem:[#allocation7 + $0x638] sm:$0xf] }
 0x2af   : >> { %4193 = vmatpush.bf16.msrb.mxu0 %v9926_v55  ;;  %v3948_v55 = vadd.f32 %v3947_v42, %v3934_v26  ;;  %v12952_v26 = vld [vmem:[#allocation7 + $0x110] sm:$0xf0]  ;;  %v10686_v39 = vor.u32 %v13127_v24, %v10685_v13  ;;  %v13106_v13 = vld [vmem:[#allocation7 + $0x5e0] sm:$0xf0] }
 0x2b0   : >> { %4207 = vmatpush.bf16.msrb.mxu1 %v10150_v57  ;;  %v12966_v57 = vld [vmem:[#allocation7 + $0x180] sm:$0xf0]  ;;  %v13120_v44 = vld [vmem:[#allocation7 + $0x650] sm:$0xf0] }
 0x2b1   : >> { %4221 = vmatpush.bf16.msrb.mxu2 %v10374_v59  ;;  %v10265_v59 = vld [vmem:[#allocation7 + $0x328] sm:$0xf]  ;;  %v10042_v16 = vor.u32 %v12966_v57, %v10041_v56  ;;  %v3962_v17 = vadd.f32 %v3961_v62, %v3948_v55  ;;  %v10658_v55 = vor.u32 %v13120_v44, %v10657_v43  ;;  %v13001_v56 = vld [vmem:[#allocation7 + $0x298] sm:$0xf0]  ;;  %v10405_v57 = vld [vmem:[#allocation7 + $0x440] sm:$0xf] }
 0x2b2   : >> { %4235 = vmatpush.bf16.msrb.mxu3 %v10598_v1  ;;  %v10489_v1 = vld [vmem:[#allocation7 + $0x4e8] sm:$0xf]  ;;  %v10266_v18 = vor.u32 %v13022_v0, %v10265_v59  ;;  %v13057_v59 = vld [vmem:[#allocation7 + $0x458] sm:$0xf0]  ;;  %v10629_v62 = vld [vmem:[#allocation7 + $0x600] sm:$0xf] }
 0x2b3   : >> { %4194 = vmatpush.bf16.msrb.mxu0 %v9898_v29  ;;  %v10490_v19 = vor.u32 %v13078_v58, %v10489_v1  ;;  %v10013_v29 = vld [vmem:[#allocation7 + $0x130] sm:$0xf]  ;;  %v10750_v30 = vmul.f32 -1.442695, %v3962_v17  ;;  %v13113_v0 = vld [vmem:[#allocation7 + $0x618] sm:$0xf0]  ;;  %v10406_v15 = vor.u32 %v13057_v59, %v10405_v57 }
 0x2b4   : >> { %4208 = vmatpush.bf16.msrb.mxu1 %v10122_v7  ;;  %v13015_v7 = vld [vmem:[#allocation7 + $0x308] sm:$0xf0]  ;;  %v10014_v25 = vor.u32 %v12959_v31, %v10013_v29  ;;  %v9929_v58 = vld [vmem:[#allocation7 + $0x88] sm:$0xf]  ;;  %v12938_v17 = vld [vmem:[#allocation7 + $0xa0] sm:$0xf0] }
 0x2b5   : >> { %4222 = vmatpush.bf16.msrb.mxu2 %v10346_v20  ;;  %v10461_v20 = vld [vmem:[#allocation7 + $0x4b0] sm:$0xf]  ;;  %v10238_v33 = vor.u32 %v13015_v7, %v10237_v36  ;;  %13797 = vpow2.f32 %v10750_v30  ;;  %v12994_v36 = vld [vmem:[#allocation7 + $0x260] sm:$0xf0]  ;;  %v12980_v57 = vld [vmem:[#allocation7 + $0x1f0] sm:$0xf0] }
 0x2b6   : >> { %4236 = vmatpush.bf16.msrb.mxu3 %v10570_v27  ;;  %v9985_v27 = vld [vmem:[#allocation7 + $0xf8] sm:$0xf]  ;;  %v10462_v35 = vor.u32 %v13071_v14, %v10461_v20  ;;  %v13050_v7 = vld [vmem:[#allocation7 + $0x420] sm:$0xf0]  ;;  %v10601_v14 = vld [vmem:[#allocation7 + $0x5c8] sm:$0xf] }
 0x2b7   : >> { %4195 = vmatpush.bf16.msrb.mxu0 %v9870_v23  ;;  %v10433_v23 = vld [vmem:[#allocation7 + $0x478] sm:$0xf]  ;;  %v9986_v42 = vor.u32 %v12952_v26, %v9985_v27  ;;  %v9901_v30 = vld [vmem:[#allocation7 + $0x50] sm:$0xf] }
 0x2b8   : >> { %4209 = vmatpush.bf16.msrb.mxu1 %v10094_v37  ;;  %v3973_v37 = vpop.f32.mrf.mxu0  ;;  %v10434_v50 = vor.u32 %v13064_v41, %v10433_v23  ;;  %v3987_v21 = vpop.f32.mrf.mxu1  ;;  %v12987_v23 = vld [vmem:[#allocation7 + $0x228] sm:$0xf0]  ;;  %v10349_v41 = vld [vmem:[#allocation7 + $0x3d0] sm:$0xf] }
 0x2b9   : >> { %4223 = vmatpush.bf16.msrb.mxu2 %v10318_v45  ;;  %v10210_v45 = vor.u32 %v13008_v40, %v10209_v38  ;;  %v3974_v49 = vadd.f32 %v3973_v37, %v14472_v4  ;;  %v10125_v40 = vld [vmem:[#allocation7 + $0x210] sm:$0xf]  ;;  %v13043_v37 = vld [vmem:[#allocation7 + $0x3e8] sm:$0xf0] }
 0x2ba   : >> { %4237 = vmatpush.bf16.msrb.mxu3 %v10542_v47  ;;  %4196 = vmatmul.bf16.vlgmr.msrb.gmra.mxu0 %v14668_v22  ;;  %v9957_v47 = vld [vmem:[#allocation7 + $0xc0] sm:$0xf] }
 0x2bb   : >> { %4244 = vmatpush.bf16.msra.mxu0 %v10070_v52  ;;  %4210 = vmatmul.bf16.vlgmr.msrb.gmra.mxu1 %v14672_v51  ;;  %v12945_v52 = vld [vmem:[#allocation7 + $0xd8] sm:$0xf0] }
 0x2bc   : >> { %4258 = vmatpush.bf16.msra.mxu1 %v10294_v53  ;;  %4224 = vmatmul.bf16.vlgmr.msrb.gmra.mxu2 %v14666_v61  ;;  %v10181_v53 = vld [vmem:[#allocation7 + $0x280] sm:$0xf]  ;;  %v9958_v1 = vor.u32 %v12945_v52, %v9957_v47  ;;  %v9873_v47 = vld [vmem:[#allocation7 + $0x18] sm:$0xf]  ;;  %v10126_v52 = vor.u32 %v12987_v23, %v10125_v40  ;;  %v13201_v23 = vld [vmem:[#allocation5 + $0x1cc] sm:$0xf0] }
 0x2bd   : >> { %4272 = vmatpush.bf16.msra.mxu2 %v10518_v54  ;;  %4238 = vmatmul.bf16.vlgmr.msrb.gmra.mxu3 %v14670_v34  ;;  %v13796_v54 = vpop.eup %13795  ;;  %v10182_v11 = vor.u32 %v13001_v56, %v10181_v53  ;;  %v10350_v53 = vor.u32 %v13043_v37, %v10349_v41  ;;  %v10097_v56 = vld [vmem:[#allocation7 + $0x1d8] sm:$0xf]  ;;  %v11007_v40 = vld [vmem:[#allocation5 + $0x1c0] sm:$0xf]  ;;  %v13269_v41 = vld [vmem:[#allocation5 + $0x3ec] sm:$0xf0] }
 0x2be   : >> { %4286 = vmatpush.bf16.msra.mxu3 %v10742_v60  ;;  %v3988_v60 = vadd.f32 %v3987_v21, %v3974_v49  ;;  %v14701_v2 = vadd.f32 1.0, %v13796_v54  ;;  %v13798_v20 = vpop.eup %13797  ;;  %v13099_v49 = vld [vmem:[#allocation7 + $0x5a8] sm:$0xf0] }
 0x2bf   : >> { %4245 = vmatpush.bf16.msra.mxu0 %v10042_v16  ;;  %v4001_v16 = vpop.f32.mrf.mxu2  ;;  %v14705_v43 = vadd.f32 1.0, %v13798_v20 }
 0x2c0   : >> { %4259 = vmatpush.bf16.msra.mxu1 %v10266_v18  ;;  %v10153_v18 = vld [vmem:[#allocation7 + $0x248] sm:$0xf]  ;;  %v4002_v29 = vadd.f32 %v4001_v16, %v3988_v60  ;;  %v4015_v31 = vpop.f32.mrf.mxu3  ;;  %v3975_v27 = vpop.f32.mrf.mxu0  ;;  %13799 = vrcp.f32 %v14701_v2  ;;  %v10895_v16 = vld [vmem:[#allocation5 + $0xe0] sm:$0xf]  ;;  %vm4361_vm8 = vweird.f32 %v14701_v2 }
 0x2c1   : >> { %4273 = vmatpush.bf16.msra.mxu2 %v10490_v19  ;;  %v10630_v19 = vor.u32 %v13113_v0, %v10629_v62  ;;  %v3976_v38 = vadd.f32 %v3975_v27, %v14472_v4  ;;  %v10321_v0 = vld [vmem:[#allocation7 + $0x398] sm:$0xf]  ;;  %v11151_v27 = vld [vmem:[#allocation5 + $0x2e0] sm:$0xf]  ;;  %vm4466_vm11 = vweird.f32 %v14705_v43 }
 0x2c2   : >> { %4287 = vmatpush.bf16.msra.mxu3 %v10714_v46  ;;  %v10377_v46 = vld [vmem:[#allocation7 + $0x408] sm:$0xf]  ;;  %v4016_v24 = vadd.f32 %v4015_v31, %v4002_v29  ;;  %v11023_v29 = vld [vmem:[#allocation5 + $0x1e0] sm:$0xf]  ;;  %v13205_v31 = vld [vmem:[#allocation5 + $0x1ec] sm:$0xf0] }
 0x2c3   : >> { %4246 = vmatpush.bf16.msra.mxu0 %v10014_v25  ;;  %v9930_v25 = vor.u32 %v12938_v17, %v9929_v58  ;;  %v10378_v26 = vor.u32 %v13050_v7, %v10377_v46  ;;  %v10545_v58 = vld [vmem:[#allocation7 + $0x558] sm:$0xf]  ;;  %v13173_v17 = vld [vmem:[#allocation5 + $0xec] sm:$0xf0]  ;;  %v10879_v7 = vld [vmem:[#allocation5 + $0xc0] sm:$0xf] }
 0x2c4   : >> { %4260 = vmatpush.bf16.msra.mxu1 %v10238_v33  ;;  %v12931_v33 = vld [vmem:[#allocation7 + $0x68] sm:$0xf0]  ;;  %v10744_v44 = vmul.f32 -1.442695, %v4016_v24 }
 0x2c5   : >> { %4274 = vmatpush.bf16.msra.mxu2 %v10462_v35  ;;  %v10154_v35 = vor.u32 %v12994_v36, %v10153_v18  ;;  %v9902_v21 = vor.u32 %v12931_v33, %v9901_v30  ;;  %v10098_v36 = vor.u32 %v12980_v57, %v10097_v56  ;;  %v13237_v30 = vld [vmem:[#allocation5 + $0x2ec] sm:$0xf0]  ;;  %v10991_v56 = vld [vmem:[#allocation5 + $0x1a0] sm:$0xf] }
 0x2c6   : >> { %4288 = vmatpush.bf16.msra.mxu3 %v10686_v39  ;;  %v3989_v39 = vpop.f32.mrf.mxu1  ;;  %13801 = vpow2.f32 %v10744_v44  ;;  %v10863_v44 = vld [vmem:[#allocation5 + $0xa0] sm:$0xf]  ;;  %v13197_v57 = vld [vmem:[#allocation5 + $0x1ac] sm:$0xf0] }
 0x2c7   : >> { %4247 = vmatpush.bf16.msra.mxu0 %v9986_v42  ;;  %v10602_v42 = vor.u32 %v13106_v13, %v10601_v14  ;;  %v4003_v54 = vpop.f32.mrf.mxu2  ;;  %13803 = vrcp.f32 %v14705_v43 }
 0x2c8   : >> { %4261 = vmatpush.bf16.msra.mxu1 %v10210_v45  ;;  %v3990_v45 = vadd.f32 %v3989_v39, %v3976_v38  ;;  %v4017_v62 = vpop.f32.mrf.mxu3  ;;  %v11279_v38 = vld [vmem:[#allocation5 + $0x3e0] sm:$0xf] }
 0x2c9   : >> { %4275 = vmatpush.bf16.msra.mxu2 %v10434_v50  ;;  %v10573_v50 = vld [vmem:[#allocation7 + $0x590] sm:$0xf] }
 0x2ca   : >> { %4289 = vmatpush.bf16.msra.mxu3 %v10658_v55  ;;  %v12924_v55 = vld [vmem:[#allocation7 + $0x30] sm:$0xf0]  ;;  %v10574_v59 = vor.u32 %v13099_v49, %v10573_v50  ;;  %v4004_v60 = vadd.f32 %v4003_v54, %v3990_v45  ;;  %v11280_v50 = vor.u32 %v13269_v41, %v11279_v38  ;;  %v11135_v49 = vld [vmem:[#allocation5 + $0x2c0] sm:$0xf] }
 0x2cb   : >> { %4248 = vmatpush.bf16.msra.mxu0 %v9958_v1  ;;  %v13036_v1 = vld [vmem:[#allocation7 + $0x3b0] sm:$0xf0]  ;;  %v11263_v54 = vld [vmem:[#allocation5 + $0x3c0] sm:$0xf] }
 0x2cc   : >> { %4262 = vmatpush.bf16.msra.mxu1 %v10182_v11  ;;  %v14708_v11 = vpop.eup %13799  ;;  %v4018_v18 = vadd.f32 %v4017_v62, %v4004_v60  ;;  %v10322_v46 = vor.u32 %v13036_v1, %v10321_v0  ;;  %v4365_v60 = vand.u32 2147483647, %v14701_v2  ;;  %v4470_v62 = vand.u32 2147483647, %v14705_v43  ;;  %v11103_v41 = vld [vmem:[#allocation5 + $0x280] sm:$0xf] }
 0x2cd   : >> { %4276 = vmatpush.bf16.msra.mxu2 %v10406_v15  ;;  %v13092_v15 = vld [vmem:[#allocation7 + $0x570] sm:$0xf0]  ;;  %v13802_v20 = vpop.eup %13801  ;;  %v4357_v14 = vmul.f32 %v14708_v11, %v14701_v2  ;;  %vm4362_vm9 = vweird.f32 %v14708_v11 }
 0x2ce   : >> { %4290 = vmatpush.bf16.msra.mxu3 %v10630_v19  ;;  %v9874_v19 = vor.u32 %v12924_v55, %v9873_v47  ;;  %v10751_v13 = vmul.f32 -1.442695, %v4018_v18  ;;  %v10546_v24 = vor.u32 %v13092_v15, %v10545_v58  ;;  %v14712_v33 = vadd.f32 1.0, %v13802_v20  ;;  %v14714_v39 = vpop.eup %13803  ;;  %v13265_v55 = vld [vmem:[#allocation5 + $0x3cc] sm:$0xf0]  ;;  %vm14753_vm10 = vmor %vm4361_vm8, %vm4362_vm9 }
 0x2cf   : >> { %4249 = vmatpush.bf16.msra.mxu0 %v9930_v25  ;;  %v10896_v25 = vor.u32 %v13173_v17, %v10895_v16  ;;  %v4358_v37 = vsub.f32 1.0, %v4357_v14  ;;  %v4462_v47 = vmul.f32 %v14714_v39, %v14705_v43  ;;  %v13161_v58 = vld [vmem:[#allocation5 + $0x8c] sm:$0xf0]  ;;  %v11119_v15 = vld [vmem:[#allocation5 + $0x2a0] sm:$0xf]  ;;  %v4367_v20 = vand.u32 2147483648, %v14701_v2 }
 0x2d0   : >> { %4263 = vmatpush.bf16.msra.mxu1 %v10154_v35  ;;  %v11024_v35 = vor.u32 %v13205_v31, %v11023_v29  ;;  %13805 = vpow2.f32 %v10751_v13  ;;  %v11247_v29 = vld [vmem:[#allocation5 + $0x3a0] sm:$0xf]  ;;  %v13261_v31 = vld [vmem:[#allocation5 + $0x3ac] sm:$0xf0]  ;;  %v4472_v14 = vand.u32 2147483648, %v14705_v43  ;;  %vm4467_vm12 = vweird.f32 %v14714_v39 }
 0x2d1   : >> { %4277 = vmatpush.bf16.msra.mxu2 %v10378_v26  ;;  %v13169_v26 = vld [vmem:[#allocation5 + $0xcc] sm:$0xf0]  ;;  %13807 = vrcp.f32 %v14712_v33  ;;  %v4463_v17 = vsub.f32 1.0, %v4462_v47  ;;  %v14739_v13 = vld [vmem:[#allocation5 + $0x60] sm:$0xf]  ;;  %vm14771_vm13 = vcmp.eq.f32.partialorder %v4365_v60, 8.507059e+37  ;;  %vm14799_vm15 = vmor %vm4466_vm11, %vm4467_vm12  ;;  %vm4376_vm0 = vweird.f32 %v14712_v33 }
 0x2d2   : >> { %4291 = vmatpush.bf16.msra.mxu3 %v10602_v42  ;;  %v11152_v42 = vor.u32 %v13237_v30, %v11151_v27  ;;  %v10880_v45 = vor.u32 %v13169_v26, %v10879_v7  ;;  %v13193_v7 = vld [vmem:[#allocation5 + $0x18c] sm:$0xf0]  ;;  %vm14775_vm14 = vcmp.eq.f32.partialorder %v4470_v62, 8.507059e+37  ;;  %v4380_v62 = vand.u32 2147483647, %v14712_v33 }
 0x2d3   : >> { %4250 = vmatpush.bf16.msra.mxu0 %v9902_v21  ;;  %v13233_v21 = vld [vmem:[#allocation5 + $0x2cc] sm:$0xf0] }
 0x2d4   : >> { %4264 = vmatpush.bf16.msra.mxu1 %v10126_v52  ;;  %v11008_v52 = vor.u32 %v13201_v23, %v11007_v40  ;;  %v11248_v23 = vor.u32 %v13261_v31, %v11247_v29  ;;  %v13257_v47 = vld [vmem:[#allocation5 + $0x38c] sm:$0xf0]  ;;  %vm14841_vm5 = vcmp.eq.f32.partialorder %v4380_v62, 8.507059e+37  ;;  %v4569_v31 = vld [vmem:[%s14831_s3] sm:$0xff] }
 0x2d5   : >> { %4278 = vmatpush.bf16.msra.mxu2 %v10350_v53  ;;  %v13165_v53 = vld [vmem:[#allocation5 + $0xac] sm:$0xf0] }
 0x2d6   : >> { %4292 = vmatpush.bf16.msra.mxu3 %v10574_v59  ;;  %v14723_v59 = vld [vmem:[#allocation5 + $0x80] sm:$0xf]  ;;  %v13806_v0 = vpop.eup %13805  ;;  %v10864_v1 = vor.u32 %v13165_v53, %v10863_v44  ;;  %v13225_v44 = vld [vmem:[#allocation5 + $0x28c] sm:$0xf0]  ;;  %v14763_v53 = vor.u32 1.1754944e-38, %v4367_v20 }
 0x2d7   : >> { %4251 = vmatpush.bf16.msra.mxu0 %v9874_v19  ;;  %v14729_v16 = vpop.eup %13807  ;;  %v14731_v18 = vadd.f32 1.0, %v13806_v0  ;;  %v10992_v19 = vor.u32 %v13197_v57, %v10991_v56  ;;  %v4029_v26 = vpop.f32.mrf.mxu0  ;;  %v14761_v2 = vld [vmem:[#allocation5 + $0x4c] sm:$0xf0]  ;;  %v11104_v0 = vor.u32 %v13225_v44, %v11103_v41 }
 0x2d8   : >> { %4265 = vmatpush.bf16.msra.mxu1 %v10098_v36  ;;  %v4372_v36 = vmul.f32 %v14729_v16, %v14712_v33  ;;  %v14810_v43 = vld [vmem:[#allocation5 + $0x2c] sm:$0xf0]  ;;  %vm4377_vm1 = vweird.f32 %v14729_v16 }
 0x2d9   : >> { %4279 = vmatpush.bf16.msra.mxu2 %v10322_v46  ;;  %v10975_v46 = vld [vmem:[#allocation5 + $0x180] sm:$0xf]  ;;  %13809 = vrcp.f32 %v14731_v18  ;;  %vm4481_vm2 = vweird.f32 %v14731_v18  ;;  %vm14837_vm4 = vmor %vm4376_vm0, %vm4377_vm1 }
 0x2da   : >> { %4293 = vmatpush.bf16.msra.mxu3 %v10546_v24  ;;  %4252 = vmatmul.bf16.vlgmr.msra.gmra.mxu0 %v14668_v22  ;;  %v11136_v22 = vor.u32 %v13233_v21, %v11135_v49  ;;  %v14741_v24 = vld [vmem:[#allocation5 + $0x6c] sm:$0xf0]  ;;  %v4373_v30 = vsub.f32 1.0, %v4372_v36  ;;  %v4464_v49 = vmul.f32 %v14714_v39, %v4463_v17  ;;  %v11231_v21 = vld [vmem:[#allocation5 + $0x380] sm:$0xf]  ;;  %v4382_v36 = vand.u32 2147483648, %v14712_v33 }
 0x2db   : >> { %5988 = vmatpush.bf16.msrb.mxu0 %v10896_v25  ;;  %4266 = vmatmul.bf16.vlgmr.msra.gmra.mxu1 %v14672_v51  ;;  %v4359_v51 = vmul.f32 %v14708_v11, %v4358_v37  ;;  %v14743_v25 = vld [vmem:[#allocation5 + $0x160] sm:$0xf]  ;;  %v4030_v37 = vadd.f32 %v4029_v26, %v14474_v5  ;;  %v10832_v56 = vor.u32 %v14741_v24, %v14739_v13  ;;  %v13185_v24 = vld [vmem:[#allocation5 + $0x14c] sm:$0xf0]  ;;  %v13167_v33 = vld [vmem:[#allocation5 + $0xc4] sm:$0xf] }
 0x2dc   : >> { %6002 = vmatpush.bf16.msrb.mxu1 %v11024_v35  ;;  %4280 = vmatmul.bf16.vlgmr.msra.gmra.mxu2 %v14666_v61  ;;  %v11264_v61 = vor.u32 %v13265_v55, %v11263_v54  ;;  %v10848_v35 = vor.u32 %v13161_v58, %v14723_v59  ;;  %v14767_v54 = vor.u32 1.1754944e-38, %v4472_v14  ;;  %v14781_v58 = vld [vmem:[#allocation5 + $0x140] sm:$0xf]  ;;  %v14793_v29 = vadd.f32 %v14714_v39, %v4464_v49 }
 0x2dd   : >> { %4294 = vmatmul.bf16.vlgmr.msra.gmra.mxu3 %v14670_v34  ;;  %6016 = vmatpush.bf16.msrb.mxu2 %v11152_v42  ;;  %v13229_v34 = vld [vmem:[#allocation5 + $0x2ac] sm:$0xf0]  ;;  %v14747_v38 = vadd.f32 %v14708_v11, %v4359_v51  ;;  %v10976_v42 = vor.u32 %v13193_v7, %v10975_v46  ;;  %v11232_v51 = vor.u32 %v13257_v47, %v11231_v21  ;;  %v11215_v46 = vld [vmem:[#allocation5 + $0x360] sm:$0xf] }
 0x2de   : >> { %6030 = vmatpush.bf16.msrb.mxu3 %v11280_v50  ;;  %v11120_v27 = vor.u32 %v13229_v34, %v11119_v15  ;;  %v13189_v50 = vld [vmem:[#allocation5 + $0x16c] sm:$0xf0]  ;;  %v10944_v49 = vor.u32 %v13185_v24, %v14781_v58  ;;  %v11183_v24 = vld [vmem:[#allocation5 + $0x320] sm:$0xf]  ;;  %v11465_v58 = vld [vmem:[#allocation5 + $0x558] sm:$0xf0] }
 0x2df   : >> { %5989 = vmatpush.bf16.msrb.mxu0 %v10880_v45  ;;  %v4043_v45 = vpop.f32.mrf.mxu1  ;;  %v4364_v60 = vsel %vm14753_vm10, %v14708_v11, %v14747_v38  ;;  %v13221_v15 = vld [vmem:[#allocation5 + $0x26c] sm:$0xf0]  ;;  %v14788_v34 = vpop.eup %13809  ;;  %v4570_v11 = vld [vmem:[%s14831_s3 + $0x8] sm:$0xff]  ;;  %v4577_v38 = vld [vmem:[%s14831_s3 + $0x40] sm:$0xff] }
 0x2e0   : >> { %6003 = vmatpush.bf16.msrb.mxu1 %v11008_v52  ;;  %v14759_v52 = vld [vmem:[#allocation5 + $0x40] sm:$0xf]  ;;  %v4044_v55 = vadd.f32 %v4043_v45, %v4030_v37  ;;  %v4057_v17 = vpop.f32.mrf.mxu2  ;;  %v13253_v7 = vld [vmem:[#allocation5 + $0x36c] sm:$0xf0]  ;;  %v4477_v20 = vmul.f32 %v14788_v34, %v14731_v18  ;;  %v4071_v13 = vpop.f32.mrf.mxu3  ;;  %vm4482_vm3 = vweird.f32 %v14788_v34 }
 0x2e1   : >> { %6017 = vmatpush.bf16.msrb.mxu2 %v11136_v22  ;;  %v4374_v22 = vmul.f32 %v14729_v16, %v4373_v30  ;;  %v4485_v30 = vand.u32 2147483647, %v14731_v18  ;;  %v4031_v44 = vpop.f32.mrf.mxu0  ;;  %v11216_v37 = vor.u32 %v13253_v7, %v11215_v46  ;;  %v11071_v45 = vld [vmem:[#allocation5 + $0x240] sm:$0xf]  ;;  %vm14850_vm6 = vmor %vm4481_vm2, %vm4482_vm3 }
 0x2e2   : >> { %6031 = vmatpush.bf16.msrb.mxu3 %v11264_v61  ;;  %v11087_v61 = vld [vmem:[#allocation5 + $0x260] sm:$0xf]  ;;  %v4058_v14 = vadd.f32 %v4057_v17, %v4044_v55  ;;  %v4032_v21 = vadd.f32 %v4031_v44, %v14474_v5  ;;  %v13171_v55 = vld [vmem:[#allocation5 + $0xe4] sm:$0xf] }
 0x2e3   : >> { %5990 = vmatpush.bf16.msrb.mxu0 %v10864_v1  ;;  %v10960_v1 = vor.u32 %v13189_v50, %v14743_v25  ;;  %v14808_v25 = vld [vmem:[#allocation5 + $0x20] sm:$0xf]  ;;  %v11088_v26 = vor.u32 %v13221_v15, %v11087_v61  ;;  %v13217_v50 = vld [vmem:[#allocation5 + $0x24c] sm:$0xf0]  ;;  %vm14854_vm7 = vcmp.eq.f32.partialorder %v4485_v30, 8.507059e+37 }
 0x2e4   : >> { %6004 = vmatpush.bf16.msrb.mxu1 %v10992_v19  ;;  %v10816_v19 = vor.u32 %v14761_v2, %v14759_v52  ;;  %v4072_v41 = vadd.f32 %v4071_v13, %v4058_v14  ;;  %v10800_v52 = vor.u32 %v14810_v43, %v14808_v25  ;;  %v4469_v2 = vsel %vm14799_vm15, %v14714_v39, %v14793_v29  ;;  %v10783_v29 = vld [vmem:[#allocation5] sm:$0xf]  ;;  %v13245_v25 = vld [vmem:[#allocation5 + $0x32c] sm:$0xf0] }
 0x2e5   : >> { %6018 = vmatpush.bf16.msrb.mxu2 %v11120_v27  ;;  %v4375_v27 = vadd.f32 %v14729_v16, %v4374_v22  ;;  %v13249_v22 = vld [vmem:[#allocation5 + $0x34c] sm:$0xf0]  ;;  %v4383_v39 = vor.u32 1.1754944e-38, %v4382_v36  ;;  %v11072_v17 = vor.u32 %v13217_v50, %v11071_v45  ;;  %v11055_v7 = vld [vmem:[#allocation5 + $0x220] sm:$0xf] }
 0x2e6   : >> { %6032 = vmatpush.bf16.msrb.mxu3 %v11248_v23  ;;  %v4478_v23 = vsub.f32 1.0, %v4477_v20  ;;  %v13213_v20 = vld [vmem:[#allocation5 + $0x22c] sm:$0xf0]  ;;  %v11039_v59 = vld [vmem:[#allocation5 + $0x200] sm:$0xf] }
 0x2e7   : >> { %5991 = vmatpush.bf16.msrb.mxu0 %v10848_v35  ;;  %v4487_v35 = vand.u32 2147483648, %v14731_v18  ;;  %v4045_v47 = vpop.f32.mrf.mxu1  ;;  %v4379_v36 = vsel %vm14837_vm4, %v14729_v16, %v4375_v27  ;;  %v13177_v16 = vld [vmem:[#allocation5 + $0x10c] sm:$0xf0]  ;;  %v4369_v27 = vsel %vm14771_vm13, %v14763_v53, %v4364_v60  ;;  %v11056_v57 = vor.u32 %v13213_v20, %v11055_v7 }
 0x2e8   : >> { %6005 = vmatpush.bf16.msrb.mxu1 %v10976_v42  ;;  %v14817_v42 = vld [vmem:[#allocation5 + $0x120] sm:$0xf]  ;;  %v4046_v61 = vadd.f32 %v4045_v47, %v4032_v21  ;;  %v4059_v13 = vpop.f32.mrf.mxu2  ;;  %v4073_v30 = vpop.f32.mrf.mxu3  ;;  %v4384_v44 = vsel %vm14841_vm5, %v4383_v39, %v4379_v36  ;;  %vm4583_vm8 = vcmp.gt.f32.partialorder %v4369_v27, %v4569_v31  ;;  %v13241_v45 = vld [vmem:[#allocation5 + $0x30c] sm:$0xf0]  ;;  %v14230_v15 = vmov 1.0|1.0  }
 0x2e9   : >> { %6019 = vmatpush.bf16.msrb.mxu2 %v11104_v0  ;;  %v10745_v0 = vmul.f32 -1.442695, %v4072_v41  ;;  %v4488_v62 = vor.u32 1.1754944e-38, %v4487_v35  ;;  %v10911_v35 = vld [vmem:[#allocation5 + $0x100] sm:$0xf]  ;;  %vm4584_vm10 = vcmp.gt.f32.partialorder %v4384_v44, %v4570_v11 }
 0x2ea   : >> { %6033 = vmatpush.bf16.msrb.mxu3 %v11232_v51  ;;  %v4479_v51 = vmul.f32 %v14788_v34, %v4478_v23  ;;  %v4060_v43 = vadd.f32 %v4059_v13, %v4046_v61  ;;  %v4576_v23 = vld [vmem:[%s14831_s3 + $0x38] sm:$0xff]  ;;  %v11407_v21 = vld [vmem:[#allocation5 + $0x4e0] sm:$0xf]  ;;  %v13297_v61 = vld [vmem:[#allocation5 + $0x4cc] sm:$0xf0] }
 0x2eb   : >> { %5992 = vmatpush.bf16.msrb.mxu0 %v10832_v56  ;;  %v11199_v56 = vld [vmem:[#allocation5 + $0x340] sm:$0xf]  ;;  %13811 = vpow2.f32 %v10745_v0  ;;  %v10865_v13 = vld [vmem:[#allocation5 + $0xb0] sm:$0xf0] }
 0x2ec   : >> { %6006 = vmatpush.bf16.msrb.mxu1 %v10960_v1  ;;  %v13181_v1 = vld [vmem:[#allocation5 + $0x12c] sm:$0xf0]  ;;  %v4480_v18 = vadd.f32 %v14788_v34, %v4479_v51  ;;  %v11200_v46 = vor.u32 %v13249_v22, %v11199_v56  ;;  %v4074_v53 = vadd.f32 %v4073_v30, %v4060_v43  ;;  %v11391_v51 = vld [vmem:[#allocation5 + $0x4c0] sm:$0xf] }
 0x2ed   : >> { %6020 = vmatpush.bf16.msrb.mxu2 %v11088_v26  ;;  %v10928_v14 = vor.u32 %v13181_v1, %v14817_v42  ;;  %v4474_v26 = vsel %vm14775_vm14, %v14767_v54, %v4469_v2  ;;  %v11184_v54 = vor.u32 %v13245_v25, %v11183_v24  ;;  %v13209_v42 = vld [vmem:[#allocation5 + $0x20c] sm:$0xf0]  ;;  %v10897_v1 = vld [vmem:[#allocation5 + $0xf0] sm:$0xf0]  ;;  %v11375_v36 = vld [vmem:[#allocation5 + $0x4a0] sm:$0xf] }
 0x2ee   : >> { %6034 = vmatpush.bf16.msrb.mxu3 %v11216_v37  ;;  %v4484_v41 = vsel %vm14850_vm6, %v14788_v34, %v4480_v18  ;;  %v10912_v37 = vor.u32 %v13177_v16, %v10911_v35  ;;  %vm4590_vm9 = vcmp.gt.f32.partialorder %v4474_v26, %v4576_v23  ;;  %v11167_v34 = vld [vmem:[#allocation5 + $0x300] sm:$0xf]  ;;  %v13301_v2 = vld [vmem:[#allocation5 + $0x4ec] sm:$0xf0]  ;;  %v10900_v39 = vor.u32 %v13171_v55, %v10897_v1  ;;  %v13159_v23 = vld [vmem:[#allocation5 + $0x84] sm:$0xf] }
 0x2ef   : >> { %5993 = vmatpush.bf16.msrb.mxu0 %v10816_v19  ;;  %v13145_v19 = vld [vmem:[#allocation5 + $0xc] sm:$0xf0]  ;;  %v4489_v40 = vsel %vm14854_vm7, %v4488_v62, %v4484_v41  ;;  %vm14889_vm12 = vmpackc.low %vm4590_vm9, %vm4583_vm8  ;;  %v11168_v22 = vor.u32 %v13241_v45, %v11167_v34  ;;  %v11408_v0 = vor.u32 %v13301_v2, %v11407_v21  ;;  %v11392_v62 = vor.u32 %v13297_v61, %v11391_v51  ;;  %v11359_v30 = vld [vmem:[#allocation5 + $0x480] sm:$0xf] }
 0x2f0   : >> { %6007 = vmatpush.bf16.msrb.mxu1 %v10944_v49  ;;  %v10784_v60 = vor.u32 %v13145_v19, %v10783_v29  ;;  %v10752_v49 = vmul.f32 -1.442695, %v4074_v53  ;;  %vm4591_vm11 = vcmp.gt.f32.partialorder %v4489_v40, %v4577_v38  ;;  %v13293_v18 = vld [vmem:[#allocation5 + $0x4ac] sm:$0xf0]  ;;  %v10849_v41 = vld [vmem:[#allocation5 + $0x90] sm:$0xf0] }
 0x2f1   : >> { %6021 = vmatpush.bf16.msrb.mxu2 %v11072_v17  ;;  %v13812_v50 = vpop.eup %13811  ;;  %vm14896_vm13 = vmpackc.low %vm4591_vm11, %vm4584_vm10  ;;  %v10881_v17 = vld [vmem:[#allocation5 + $0xd0] sm:$0xf0]  ;;  %v13289_v35 = vld [vmem:[#allocation5 + $0x48c] sm:$0xf0] }
 0x2f2   : >> { %6035 = vmatpush.bf16.msrb.mxu3 %v11200_v46  ;;  %v14885_v47 = vadd.f32 1.0, %v13812_v50  ;;  %13813 = vpow2.f32 %v10752_v49  ;;  %v10884_v29 = vor.u32 %v13167_v33, %v10881_v17  ;;  %v13163_v46 = vld [vmem:[#allocation5 + $0xa4] sm:$0xf]  ;;  %v11360_v26 = vor.u32 %v13289_v35, %v11359_v30  ;;  %v10833_v50 = vld [vmem:[#allocation5 + $0x70] sm:$0xf0] }
 0x2f3   : >> { %5994 = vmatpush.bf16.msrb.mxu0 %v10800_v52  ;;  %v11040_v52 = vor.u32 %v13209_v42, %v11039_v59  ;;  %v10868_v24 = vor.u32 %v13163_v46, %v10865_v13  ;;  %v13155_v59 = vld [vmem:[#allocation5 + $0x64] sm:$0xf]  ;;  %v11327_v33 = vld [vmem:[#allocation5 + $0x440] sm:$0xf]  ;;  %v13352_v34 = vld [vmem:[#allocation5 + $0x68c] sm:$0xf] }
 0x2f4   : >> { %6008 = vmatpush.bf16.msrb.mxu1 %v10928_v14  ;;  %13815 = vrcp.f32 %v14885_v47  ;;  %v11376_v14 = vor.u32 %v13293_v18, %v11375_v36  ;;  %vm4391_vm14 = vweird.f32 %v14885_v47  ;;  %v4395_v40 = vand.u32 2147483647, %v14885_v47  ;;  %v13151_v36 = vld [vmem:[#allocation5 + $0x44] sm:$0xf]  ;;  %v10817_v18 = vld [vmem:[#allocation5 + $0x50] sm:$0xf0] }
 0x2f5   : >> { %6022 = vmatpush.bf16.msrb.mxu2 %v11056_v57  ;;  %v4397_v38 = vand.u32 2147483648, %v14885_v47  ;;  %v10852_v57 = vor.u32 %v13159_v23, %v10849_v41  ;;  %v10820_v30 = vor.u32 %v13151_v36, %v10817_v18  ;;  %v4578_v41 = vld [vmem:[%s14831_s3 + $0x48] sm:$0xff]  ;;  %v13195_v36 = vld [vmem:[#allocation5 + $0x1a4] sm:$0xf] }
 0x2f6   : >> { %6036 = vmatpush.bf16.msrb.mxu3 %v11184_v54  ;;  %v13285_v54 = vld [vmem:[#allocation5 + $0x46c] sm:$0xf0]  ;;  %vm14925_vm1 = vcmp.eq.f32.partialorder %v4395_v40, 8.507059e+37  ;;  %v10801_v40 = vld [vmem:[#allocation5 + $0x30] sm:$0xf0] }
 0x2f7   : >> { %5995 = vmatpush.bf16.msrb.mxu0 %v10784_v60  ;;  %v4085_v43 = vpop.f32.mrf.mxu0  ;;  %v11343_v60 = vld [vmem:[#allocation5 + $0x460] sm:$0xf]  ;;  %v4398_v55 = vor.u32 1.1754944e-38, %v4397_v38 }
 0x2f8   : >> { %6009 = vmatpush.bf16.msrb.mxu1 %v10912_v37  ;;  %v13814_v31 = vpop.eup %13813  ;;  %v4086_v16 = vadd.f32 %v4085_v43, %v14476_v6  ;;  %v4099_v27 = vpop.f32.mrf.mxu1  ;;  %v11344_v45 = vor.u32 %v13285_v54, %v11343_v60  ;;  %v4571_v43 = vld [vmem:[%s14831_s3 + $0x10] sm:$0xff]  ;;  %v11295_v54 = vld [vmem:[#allocation5 + $0x400] sm:$0xf] }
 0x2f9   : >> { %6023 = vmatpush.bf16.msrb.mxu2 %v11040_v52  ;;  %v14908_v20 = vadd.f32 1.0, %v13814_v31 }
 0x2fa   : >> { %11678 = vmatmul.msk.bf16.vlgmr.msrb.gmra.mxu0 %vm14889_vm12, %v14230_v15  ;;  %6037 = vmatpush.bf16.msrb.mxu3 %v11168_v22  ;;  %v14906_v7 = vpop.eup %13815  ;;  %v4100_v11 = vadd.f32 %v4099_v27, %v4086_v16  ;;  %v11311_v16 = vld [vmem:[#allocation5 + $0x420] sm:$0xf]  ;;  %v13277_v27 = vld [vmem:[#allocation5 + $0x42c] sm:$0xf0] }
 0x2fb   : >> { %6044 = vmatpush.bf16.msra.mxu0 %v11408_v0  ;;  %11680 = vmatmul.msk.bf16.vlgmr.msrb.gmra.mxu1 %vm14896_vm13, %v14230_v15  ;;  %v4387_v19 = vmul.f32 %v14906_v7, %v14885_v47  ;;  %13817 = vrcp.f32 %v14908_v20  ;;  %vm4392_vm15 = vweird.f32 %v14906_v7  ;;  %v4500_v2 = vand.u32 2147483647, %v14908_v20 }
 0x2fc   : >> { %vm14920_vm0 = vmor %vm4391_vm14, %vm4392_vm15  ;;  %vm4496_vm2 = vweird.f32 %v14908_v20  ;;  %v4502_v22 = vand.u32 2147483648, %v14908_v20  ;;  %v10836_v0 = vor.u32 %v13155_v59, %v10833_v50  ;;  %v13273_v59 = vld [vmem:[#allocation5 + $0x40c] sm:$0xf0]  ;;  %v10785_v50 = vld [vmem:[#allocation5 + $0x10] sm:$0xf0] }
 0x2fd   : >> { %v4388_v25 = vsub.f32 1.0, %v4387_v19  ;;  %vm14936_vm4 = vcmp.eq.f32.partialorder %v4500_v2, 8.507059e+37  ;;  %v13333_v2 = vld [vmem:[#allocation5 + $0x5ec] sm:$0xf0] }
 0x2fe   : >> { %6086 = vmatpush.bf16.msra.mxu3 %v10900_v39 }
 0x2ff   : >> { %6045 = vmatpush.bf16.msra.mxu0 %v11392_v62  ;;  %v4389_v44 = vmul.f32 %v14906_v7, %v4388_v25  ;;  %v4113_v37 = vpop.f32.mrf.mxu2  ;;  %v4087_v51 = vpop.f32.mrf.mxu0  ;;  %v13281_v62 = vld [vmem:[#allocation5 + $0x44c] sm:$0xf0]  ;;  %v4503_v25 = vor.u32 1.1754944e-38, %v4502_v22 }
 0x300   : >> { %v4114_v21 = vadd.f32 %v4113_v37, %v4100_v11  ;;  %v4127_v47 = vpop.f32.mrf.mxu3  ;;  %v4088_v17 = vadd.f32 %v4087_v51, %v14476_v6  ;;  %v11328_v31 = vor.u32 %v13281_v62, %v11327_v33  ;;  %v13143_v37 = vld [vmem:[#allocation5 + $0x4] sm:$0xf]  ;;  %v13329_v51 = vld [vmem:[#allocation5 + $0x5cc] sm:$0xf0]  ;;  %v11009_v33 = vld [vmem:[#allocation5 + $0x1d0] sm:$0xf0] }
 0x301   : >> { %v4390_v53 = vadd.f32 %v14906_v7, %v4389_v44  ;;  %v13818_v42 = vpop.eup %13817  ;;  %v11312_v44 = vor.u32 %v13277_v27, %v11311_v16  ;;  %v10788_v52 = vor.u32 %v13143_v37, %v10785_v50  ;;  %v13191_v16 = vld [vmem:[#allocation5 + $0x184] sm:$0xf]  ;;  %v10961_v37 = vld [vmem:[#allocation5 + $0x170] sm:$0xf0] }
 0x302   : >> { %6087 = vmatpush.bf16.msra.mxu3 %v10884_v29  ;;  %v4492_v49 = vmul.f32 %v13818_v42, %v14908_v20  ;;  %v4128_v39 = vadd.f32 %v4127_v47, %v4114_v21  ;;  %vm4497_vm3 = vweird.f32 %v13818_v42  ;;  %v4101_v29 = vpop.f32.mrf.mxu1  ;;  %v11535_v21 = vld [vmem:[#allocation5 + $0x5e0] sm:$0xf] }
 0x303   : >> { %6046 = vmatpush.bf16.msra.mxu0 %v11376_v14  ;;  %v4394_v61 = vsel %vm14920_vm0, %v14906_v7, %v4390_v53  ;;  %v4102_v19 = vadd.f32 %v4101_v29, %v4088_v17  ;;  %vm14944_vm5 = vmor %vm4496_vm2, %vm4497_vm3  ;;  %v11536_v22 = vor.u32 %v13333_v2, %v11535_v21  ;;  %v11503_v29 = vld [vmem:[#allocation5 + $0x5a0] sm:$0xf] }
 0x304   : >> { %v4493_v1 = vsub.f32 1.0, %v4492_v49  ;;  %v10746_v46 = vmul.f32 -1.442695, %v4128_v39  ;;  %v4399_v7 = vsel %vm14925_vm1, %v4398_v55, %v4394_v61  ;;  %v13203_v55 = vld [vmem:[#allocation5 + $0x1e4] sm:$0xf] }
 0x305   : >> { %vm4585_vm6 = vcmp.gt.f32.partialorder %v4399_v7, %v4571_v43  ;;  %6058 = vmatpush.bf16.msra.mxu1 %v11536_v22  ;;  %v13199_v61 = vld [vmem:[#allocation5 + $0x1c4] sm:$0xf] }
 0x306   : >> { %6088 = vmatpush.bf16.msra.mxu3 %v10868_v24  ;;  %v4494_v14 = vmul.f32 %v13818_v42, %v4493_v1  ;;  %13819 = vpow2.f32 %v10746_v46  ;;  %v11519_v1 = vld [vmem:[#allocation5 + $0x5c0] sm:$0xf]  ;;  %v11012_v17 = vor.u32 %v13199_v61, %v11009_v33 }
 0x307   : >> { %6047 = vmatpush.bf16.msra.mxu0 %v11360_v26  ;;  %v13147_v26 = vld [vmem:[#allocation5 + $0x24] sm:$0xf]  ;;  %v4115_v23 = vpop.f32.mrf.mxu2  ;;  %v11520_v62 = vor.u32 %v13329_v51, %v11519_v1  ;;  %v11455_v1 = vld [vmem:[#allocation5 + $0x540] sm:$0xf] }
 0x308   : >> { %v4495_v35 = vadd.f32 %v13818_v42, %v4494_v14  ;;  %v4116_v11 = vadd.f32 %v4115_v23, %v4102_v19  ;;  %v4129_v20 = vpop.f32.mrf.mxu3  ;;  %v10804_v53 = vor.u32 %v13147_v26, %v10801_v40  ;;  %v10993_v14 = vld [vmem:[#allocation5 + $0x1b0] sm:$0xf0] }
 0x309   : >> { %6059 = vmatpush.bf16.msra.mxu1 %v11520_v62  ;;  %v10996_v24 = vor.u32 %v13195_v36, %v10993_v14  ;;  %v10977_v40 = vld [vmem:[#allocation5 + $0x190] sm:$0xf0] }
 0x30a   : >> { %6089 = vmatpush.bf16.msra.mxu3 %v10852_v57  ;;  %v4499_v38 = vsel %vm14944_vm5, %v13818_v42, %v4495_v35  ;;  %v4130_v60 = vadd.f32 %v4129_v20, %v4116_v11  ;;  %v13321_v35 = vld [vmem:[#allocation5 + $0x58c] sm:$0xf0]  ;;  %v10980_v20 = vor.u32 %v13191_v16, %v10977_v40  ;;  %v11439_v16 = vld [vmem:[#allocation5 + $0x520] sm:$0xf] }
 0x30b   : >> { %6048 = vmatpush.bf16.msra.mxu0 %v11344_v45  ;;  %v4504_v57 = vsel %vm14936_vm4, %v4503_v25, %v4499_v38  ;;  %v11296_v45 = vor.u32 %v13273_v59, %v11295_v54  ;;  %v11487_v25 = vld [vmem:[#allocation5 + $0x580] sm:$0xf] }
 0x30c   : >> { %vm4592_vm7 = vcmp.gt.f32.partialorder %v4504_v57, %v4578_v41  ;;  %v13820_v49 = vpop.eup %13819  ;;  %v10753_v42 = vmul.f32 -1.442695, %v4130_v60  ;;  %v11471_v57 = vld [vmem:[#allocation5 + $0x560] sm:$0xf]  ;;  %v13187_v60 = vld [vmem:[#allocation5 + $0x164] sm:$0xf] }
 0x30d   : >> { %vm14954_vm8 = vmpackc.low %vm4592_vm7, %vm4585_vm6  ;;  %v4345_v47 = vadd.f32 1.0, %v13820_v49  ;;  %v10964_v22 = vor.u32 %v13187_v60, %v10961_v37  ;;  %v13305_v37 = vld [vmem:[#allocation5 + $0x50c] sm:$0xf0] }
 0x30e   : >> { %6090 = vmatpush.bf16.msra.mxu3 %v10836_v0  ;;  %11682 = vmatmul.msk.bf16.vlgmr.msrb.gmra.mxu2 %vm14954_vm8, %v14230_v15  ;;  %13821 = vpow2.f32 %v10753_v42  ;;  %v11025_v0 = vld [vmem:[#allocation5 + $0x1f0] sm:$0xf0]  ;;  %v13295_v42 = vld [vmem:[#allocation5 + $0x4c4] sm:$0xf] }
 0x30f   : >> { %6049 = vmatpush.bf16.msra.mxu0 %v11328_v31  ;;  %13823 = vrcp.f32 %v4345_v47  ;;  %v11028_v39 = vor.u32 %v13203_v55, %v11025_v0  ;;  %v13325_v31 = vld [vmem:[#allocation5 + $0x5ac] sm:$0xf0]  ;;  %v4410_v23 = vand.u32 2147483647, %v4345_v47  ;;  %v4412_v41 = vand.u32 2147483648, %v4345_v47 }
 0x310   : >> { %v11504_v46 = vor.u32 %v13325_v31, %v11503_v29  ;;  %vm4406_vm9 = vweird.f32 %v4345_v47  ;;  %v13183_v29 = vld [vmem:[#allocation5 + $0x144] sm:$0xf]  ;;  %v10945_v31 = vld [vmem:[#allocation5 + $0x150] sm:$0xf0] }
 0x311   : >> { %vm14975_vm14 = vcmp.eq.f32.partialorder %v4410_v23, 8.507059e+37  ;;  %v4413_v21 = vor.u32 1.1754944e-38, %v4412_v41 }
 0x312   : >> { %6091 = vmatpush.bf16.msra.mxu3 %v10820_v30  ;;  %6060 = vmatpush.bf16.msra.mxu1 %v11504_v46 }
 0x313   : >> { %6050 = vmatpush.bf16.msra.mxu0 %v11312_v44  ;;  %v11488_v44 = vor.u32 %v13321_v35, %v11487_v25  ;;  %v4572_v25 = vld [vmem:[%s14831_s3 + $0x18] sm:$0xff] }
 0x314   : >> { %v13822_v18 = vpop.eup %13821 }
 0x315   : >> { %v14961_v13 = vpop.eup %13823  ;;  %v14963_v19 = vadd.f32 1.0, %v13822_v18 }
 0x316   : >> { %6092 = vmatpush.bf16.msra.mxu3 %v10804_v53  ;;  %v4402_v7 = vmul.f32 %v14961_v13, %v4345_v47  ;;  %vm4407_vm10 = vweird.f32 %v14961_v13  ;;  %v13317_v53 = vld [vmem:[#allocation5 + $0x56c] sm:$0xf0]  ;;  %6061 = vmatpush.bf16.msra.mxu1 %v11488_v44  ;;  %v10929_v44 = vld [vmem:[#allocation5 + $0x130] sm:$0xf0] }
 0x317   : >> { %6051 = vmatpush.bf16.msra.mxu0 %v11296_v45  ;;  %13825 = vrcp.f32 %v14963_v19  ;;  %v4141_v30 = vpop.f32.mrf.mxu0  ;;  %v11472_v59 = vor.u32 %v13317_v53, %v11471_v57  ;;  %vm14971_vm11 = vmor %vm4406_vm9, %vm4407_vm10  ;;  %v4517_v55 = vand.u32 2147483648, %v14963_v19  ;;  %vm4511_vm15 = vweird.f32 %v14963_v19 }
 0x318   : >> { %v4403_v43 = vsub.f32 1.0, %v4402_v7  ;;  %v4142_v27 = vadd.f32 %v4141_v30, %v14478_v8  ;;  %v4155_v26 = vpop.f32.mrf.mxu1  ;;  %v4515_v0 = vand.u32 2147483647, %v14963_v19 }
 0x31a   : >> { %6093 = vmatpush.bf16.msra.mxu3 %v10788_v52  ;;  %v4404_v11 = vmul.f32 %v14961_v13, %v4403_v43  ;;  %v4156_v38 = vadd.f32 %v4155_v26, %v4142_v27  ;;  %6062 = vmatpush.bf16.msra.mxu1 %v11472_v59  ;;  %v13299_v43 = vld [vmem:[#allocation5 + $0x4e4] sm:$0xf]  ;;  %v13309_v27 = vld [vmem:[#allocation5 + $0x52c] sm:$0xf0]  ;;  %vm4516_vm2 = vcmp.eq.f32.partialorder %v4515_v0, 8.507059e+37 }
 0x31b   : >> { %6100 = vmatpush.bf16.msrb.mxu0 %v11028_v39  ;;  %v13313_v39 = vld [vmem:[#allocation5 + $0x54c] sm:$0xf0]  ;;  %v13179_v26 = vld [vmem:[#allocation5 + $0x124] sm:$0xf]  ;;  %v11440_v41 = vor.u32 %v13309_v27, %v11439_v16  ;;  %v11423_v59 = vld [vmem:[#allocation5 + $0x500] sm:$0xf] }
 0x31c   : >> { %v4405_v54 = vadd.f32 %v14961_v13, %v4404_v11  ;;  %v4579_v11 = vld [vmem:[%s14831_s3 + $0x50] sm:$0xff]  ;;  %v10932_v53 = vor.u32 %v13179_v26, %v10929_v44  ;;  %v11663_v0 = vld [vmem:[#allocation5 + $0x6e0] sm:$0xf]  ;;  %v13227_v16 = vld [vmem:[#allocation5 + $0x2a4] sm:$0xf] }
 0x31d   : >> { %v13826_v45 = vpop.eup %13825  ;;  %v13283_v26 = vld [vmem:[#allocation5 + $0x464] sm:$0xf] }
 0x31e   : >> { %v4507_v47 = vmul.f32 %v13826_v45, %v14963_v19  ;;  %vm4512_vm0 = vweird.f32 %v13826_v45  ;;  %v4409_v62 = vsel %vm14971_vm11, %v14961_v13, %v4405_v54  ;;  %v10948_v13 = vor.u32 %v13183_v29, %v10945_v31  ;;  %v11409_v19 = vld [vmem:[#allocation5 + $0x4f0] sm:$0xf0] }
 0x31f   : >> { %6101 = vmatpush.bf16.msrb.mxu0 %v11012_v17  ;;  %v4169_v50 = vpop.f32.mrf.mxu2  ;;  %v4143_v33 = vpop.f32.mrf.mxu0  ;;  %v11456_v17 = vor.u32 %v13313_v39, %v11455_v1  ;;  %vm14990_vm1 = vmor %vm4511_vm15, %vm4512_vm0  ;;  %v4414_v35 = vsel %vm14975_vm14, %v4413_v21, %v4409_v62  ;;  %v11412_v54 = vor.u32 %v13299_v43, %v11409_v19  ;;  %v11393_v21 = vld [vmem:[#allocation5 + $0x4d0] sm:$0xf0]  ;;  %v13365_v1 = vld [vmem:[#allocation5 + $0x6ec] sm:$0xf0] }
 0x320   : >> { %v4170_v52 = vadd.f32 %v4169_v50, %v4156_v38  ;;  %v4183_v2 = vpop.f32.mrf.mxu3  ;;  %v4508_v51 = vsub.f32 1.0, %v4507_v47  ;;  %v4144_v36 = vadd.f32 %v4143_v33, %v14478_v8  ;;  %v4157_v18 = vpop.f32.mrf.mxu1  ;;  %vm4586_vm3 = vcmp.gt.f32.partialorder %v4414_v35, %v4572_v25  ;;  %v13175_v50 = vld [vmem:[#allocation5 + $0x104] sm:$0xf]  ;;  %v11153_v62 = vld [vmem:[#allocation5 + $0x2f0] sm:$0xf0] }
 0x321   : >> { %6063 = vmatpush.bf16.msra.mxu1 %v11456_v17  ;;  %v11424_v47 = vor.u32 %v13305_v37, %v11423_v59  ;;  %v13235_v33 = vld [vmem:[#allocation5 + $0x2e4] sm:$0xf]  ;;  %v11377_v29 = vld [vmem:[#allocation5 + $0x4b0] sm:$0xf0]  ;;  %v13357_v35 = vld [vmem:[#allocation5 + $0x6ac] sm:$0xf0] }
 0x322   : >> { %v4184_v61 = vadd.f32 %v4183_v2, %v4170_v52  ;;  %v4509_v14 = vmul.f32 %v13826_v45, %v4508_v51  ;;  %v4158_v30 = vadd.f32 %v4157_v18, %v4144_v36  ;;  %v10913_v52 = vld [vmem:[#allocation5 + $0x110] sm:$0xf0]  ;;  %v11396_v51 = vor.u32 %v13295_v42, %v11393_v21  ;;  %v13291_v17 = vld [vmem:[#allocation5 + $0x4a4] sm:$0xf]  ;;  %v11647_v36 = vld [vmem:[#allocation5 + $0x6c0] sm:$0xf] }
 0x323   : >> { %6102 = vmatpush.bf16.msrb.mxu0 %v10996_v24  ;;  %v4518_v24 = vor.u32 1.1754944e-38, %v4517_v55  ;;  %v11156_v31 = vor.u32 %v13235_v33, %v11153_v62  ;;  %v13361_v18 = vld [vmem:[#allocation5 + $0x6cc] sm:$0xf0]  ;;  %v13287_v25 = vld [vmem:[#allocation5 + $0x484] sm:$0xf] }
 0x324   : >> { %v10747_v46 = vmul.f32 -1.442695, %v4184_v61  ;;  %v4510_v23 = vadd.f32 %v13826_v45, %v4509_v14  ;;  %v11664_v61 = vor.u32 %v13365_v1, %v11663_v0  ;;  %v11380_v14 = vor.u32 %v13291_v17, %v11377_v29  ;;  %v11361_v43 = vld [vmem:[#allocation5 + $0x490] sm:$0xf0]  ;;  %v11599_v1 = vld [vmem:[#allocation5 + $0x660] sm:$0xf] }
 0x325   : >> { %6064 = vmatpush.bf16.msra.mxu1 %v11440_v41  ;;  %v11648_v7 = vor.u32 %v13361_v18, %v11647_v36  ;;  %v11121_v41 = vld [vmem:[#allocation5 + $0x2b0] sm:$0xf0]  ;;  %v10985_v2 = vld [vmem:[#allocation5 + $0x198] sm:$0xf0] }
 0x326   : >> { %13827 = vpow2.f32 %v10747_v46  ;;  %v4514_v57 = vsel %vm14990_vm1, %v13826_v45, %v4510_v23  ;;  %6072 = vmatpush.bf16.msra.mxu2 %v11664_v61  ;;  %v13231_v46 = vld [vmem:[#allocation5 + $0x2c4] sm:$0xf]  ;;  %v11345_v23 = vld [vmem:[#allocation5 + $0x470] sm:$0xf0] }
 0x327   : >> { %6103 = vmatpush.bf16.msrb.mxu0 %v10980_v20  ;;  %v4171_v40 = vpop.f32.mrf.mxu2  ;;  %v4519_v60 = vsel %vm4516_vm2, %v4518_v24, %v4514_v57  ;;  %v11137_v24 = vld [vmem:[#allocation5 + $0x2d0] sm:$0xf0]  ;;  %v11615_v57 = vld [vmem:[#allocation5 + $0x680] sm:$0xf]  ;;  %v13219_v61 = vld [vmem:[#allocation5 + $0x264] sm:$0xf] }
 0x328   : >> { %v4172_v20 = vadd.f32 %v4171_v40, %v4158_v30  ;;  %v4185_v38 = vpop.f32.mrf.mxu3  ;;  %vm4593_vm4 = vcmp.gt.f32.partialorder %v4519_v60, %v4579_v11  ;;  %v11631_v30 = vld [vmem:[#allocation5 + $0x6a0] sm:$0xf]  ;;  %v11364_v11 = vor.u32 %v13287_v25, %v11361_v43  ;;  %v13223_v60 = vld [vmem:[#allocation5 + $0x284] sm:$0xf]  ;;  %v11105_v59 = vld [vmem:[#allocation5 + $0x290] sm:$0xf0] }
 0x329   : >> { %vm15001_vm5 = vmpackc.low %vm4593_vm4, %vm4586_vm3  ;;  %6065 = vmatpush.bf16.msra.mxu1 %v11424_v47  ;;  %v11632_v19 = vor.u32 %v13357_v35, %v11631_v30  ;;  %v11108_v21 = vor.u32 %v13223_v60, %v11105_v59  ;;  %v11089_v17 = vld [vmem:[#allocation5 + $0x270] sm:$0xf0]  ;;  %v11583_v35 = vld [vmem:[#allocation5 + $0x640] sm:$0xf] }
 0x32a   : >> { %v4186_v49 = vadd.f32 %v4185_v38, %v4172_v20  ;;  %11684 = vmatmul.msk.bf16.vlgmr.msrb.gmra.mxu3 %vm15001_vm5, %v14230_v15  ;;  %6073 = vmatpush.bf16.msra.mxu2 %v11648_v7  ;;  %v11124_v20 = vor.u32 %v13227_v16, %v11121_v41  ;;  %v11092_v36 = vor.u32 %v13219_v61, %v11089_v17  ;;  %v13275_v7 = vld [vmem:[#allocation5 + $0x424] sm:$0xf]  ;;  %v13345_v16 = vld [vmem:[#allocation5 + $0x64c] sm:$0xf0]  ;;  %v11297_v60 = vld [vmem:[#allocation5 + $0x410] sm:$0xf0] }
 0x32b   : >> { %6104 = vmatpush.bf16.msrb.mxu0 %v10964_v22  ;;  %v10916_v22 = vor.u32 %v13175_v50, %v10913_v52  ;;  %6142 = vmatpush.bf16.msrb.mxu3 %v11412_v54  ;;  %v11348_v54 = vor.u32 %v13283_v26, %v11345_v23  ;;  %v11584_v41 = vor.u32 %v13345_v16, %v11583_v35  ;;  %v13211_v61 = vld [vmem:[#allocation5 + $0x224] sm:$0xf]  ;;  %v11249_v17 = vld [vmem:[#allocation5 + $0x3b0] sm:$0xf0] }
 0x32c   : >> { %v13828_v45 = vpop.eup %13827  ;;  %v10754_v55 = vmul.f32 -1.442695, %v4186_v49  ;;  %v13279_v49 = vld [vmem:[#allocation5 + $0x444] sm:$0xf] }
 0x32d   : >> { %v15008_v39 = vadd.f32 1.0, %v13828_v45  ;;  %6114 = vmatpush.bf16.msrb.mxu1 %v11156_v31  ;;  %v11329_v45 = vld [vmem:[#allocation5 + $0x450] sm:$0xf0] }
 0x32e   : >> { %13829 = vpow2.f32 %v10754_v55  ;;  %6074 = vmatpush.bf16.msra.mxu2 %v11632_v19  ;;  %v11537_v31 = vld [vmem:[#allocation5 + $0x5f0] sm:$0xf0] }
 0x32f   : >> { %6105 = vmatpush.bf16.msrb.mxu0 %v10948_v13  ;;  %13831 = vrcp.f32 %v15008_v39  ;;  %6143 = vmatpush.bf16.msrb.mxu3 %v11396_v51  ;;  %v11140_v13 = vor.u32 %v13231_v46, %v11137_v24  ;;  %vm4421_vm6 = vweird.f32 %v15008_v39  ;;  %v4425_v55 = vand.u32 2147483647, %v15008_v39  ;;  %v13349_v51 = vld [vmem:[#allocation5 + $0x66c] sm:$0xf0]  ;;  %v11313_v24 = vld [vmem:[#allocation5 + $0x430] sm:$0xf0] }
 0x330   : >> { %v11600_v62 = vor.u32 %v13349_v51, %v11599_v1 }
 0x331   : >> { %6115 = vmatpush.bf16.msrb.mxu1 %v11140_v13  ;;  %vm15036_vm10 = vcmp.eq.f32.partialorder %v4425_v55, 8.507059e+37 }
 0x333   : >> { %6106 = vmatpush.bf16.msrb.mxu0 %v10932_v53  ;;  %6144 = vmatpush.bf16.msrb.mxu3 %v11380_v14  ;;  %v13353_v53 = vld [vmem:[#allocation5 + $0x68c] sm:$0xf0]  ;;  %v11332_v14 = vor.u32 %v13279_v49, %v11329_v45  ;;  %v11031_v49 = vld [vmem:[#allocation5 + $0x1e8] sm:$0xf] }
 0x334   : >> { %v13830_v27 = vpop.eup %13829  ;;  %v11616_v42 = vor.u32 %v13353_v53, %v11615_v57  ;;  %v13271_v53 = vld [vmem:[#allocation5 + $0x404] sm:$0xf]  ;;  %v13341_v45 = vld [vmem:[#allocation5 + $0x62c] sm:$0xf0] }
 0x335   : >> { %v15011_v44 = vpop.eup %13831  ;;  %v15013_v40 = vadd.f32 1.0, %v13830_v27  ;;  %6116 = vmatpush.bf16.msrb.mxu1 %v11124_v20  ;;  %v13215_v27 = vld [vmem:[#allocation5 + $0x244] sm:$0xf] }
 0x336   : >> { %v4417_v38 = vmul.f32 %v15011_v44, %v15008_v39  ;;  %vm4422_vm7 = vweird.f32 %v15011_v44  ;;  %6075 = vmatpush.bf16.msra.mxu2 %v11616_v42  ;;  %v13206_v42 = vld [vmem:[#allocation5 + $0x1f4] sm:$0xf0] }
 0x337   : >> { %6107 = vmatpush.bf16.msrb.mxu0 %v10916_v22  ;;  %13833 = vrcp.f32 %v15013_v40  ;;  %v4197_v50 = vpop.f32.mrf.mxu0  ;;  %6145 = vmatpush.bf16.msrb.mxu3 %v11364_v11  ;;  %v4427_v22 = vand.u32 2147483648, %v15008_v39  ;;  %vm15030_vm9 = vmor %vm4421_vm6, %vm4422_vm7  ;;  %vm4526_vm11 = vweird.f32 %v15013_v40  ;;  %v4530_v23 = vand.u32 2147483647, %v15013_v40  ;;  %v11073_v11 = vld [vmem:[#allocation5 + $0x250] sm:$0xf0] }
 0x338   : >> { %v4418_v37 = vsub.f32 1.0, %v4417_v38  ;;  %v4198_v47 = vadd.f32 %v4197_v50, %v14480_v9  ;;  %v4211_v52 = vpop.f32.mrf.mxu1  ;;  %v4532_v19 = vand.u32 2147483648, %v15013_v40  ;;  %v4573_v50 = vld [vmem:[%s14831_s3 + $0x20] sm:$0xff] }
 0x339   : >> { %6117 = vmatpush.bf16.msrb.mxu1 %v11108_v21  ;;  %v4428_v43 = vor.u32 1.1754944e-38, %v4427_v22  ;;  %vm15063_vm0 = vcmp.eq.f32.partialorder %v4530_v23, 8.507059e+37 }
 0x33a   : >> { %v4419_v0 = vmul.f32 %v15011_v44, %v4418_v37  ;;  %v4212_v33 = vadd.f32 %v4211_v52, %v4198_v47  ;;  %11692 = vmatmul.msk.bf16.vlgmr.msra.gmra.mxu3 %vm14889_vm12, %v14230_v15  ;;  %6076 = vmatpush.bf16.msra.mxu2 %v11600_v62  ;;  %v11316_v37 = vor.u32 %v13275_v7, %v11313_v24  ;;  %v11567_v52 = vld [vmem:[#allocation5 + $0x620] sm:$0xf]  ;;  %v4533_v1 = vor.u32 1.1754944e-38, %v4532_v19  ;;  %v11041_v19 = vld [vmem:[#allocation5 + $0x210] sm:$0xf0] }
 0x33b   : >> { %6146 = vmatpush.bf16.msrb.mxu3 %v11348_v54  ;;  %v11076_v54 = vor.u32 %v13215_v27, %v11073_v11  ;;  %v11568_v51 = vor.u32 %v13341_v45, %v11567_v52  ;;  %v11015_v27 = vld [vmem:[#allocation5 + $0x1c8] sm:$0xf]  ;;  %v13327_v11 = vld [vmem:[#allocation5 + $0x5c4] sm:$0xf]  ;;  %v11265_v45 = vld [vmem:[#allocation5 + $0x3d0] sm:$0xf0] }
 0x33c   : >> { %v4420_v29 = vadd.f32 %v15011_v44, %v4419_v0  ;;  %v13263_v52 = vld [vmem:[#allocation5 + $0x3c4] sm:$0xf] }
 0x33d   : >> { %v15034_v18 = vpop.eup %13833  ;;  %6118 = vmatpush.bf16.msrb.mxu1 %v11092_v36 }
 0x33e   : >> { %v4522_v39 = vmul.f32 %v15034_v18, %v15013_v40  ;;  %v4424_v26 = vsel %vm15030_vm9, %v15011_v44, %v4420_v29  ;;  %vm4527_vm14 = vweird.f32 %v15034_v18  ;;  %6077 = vmatpush.bf16.msra.mxu2 %v11584_v41  ;;  %v13331_v29 = vld [vmem:[#allocation5 + $0x5e4] sm:$0xf] }
 0x33f   : >> { %v4225_v46 = vpop.f32.mrf.mxu2  ;;  %v4199_v57 = vpop.f32.mrf.mxu0  ;;  %6147 = vmatpush.bf16.msrb.mxu3 %v11332_v14  ;;  %v4429_v22 = vsel %vm15036_vm10, %v4428_v43, %v4424_v26  ;;  %vm15058_vm15 = vmor %vm4526_vm11, %vm4527_vm14  ;;  %v4580_v14 = vld [vmem:[%s14831_s3 + $0x58] sm:$0xff]  ;;  %v11032_v43 = vor.u32 %v13206_v42, %v11031_v49  ;;  %v11540_v16 = vor.u32 %v13331_v29, %v11537_v31 }
 0x340   : >> { %v4226_v13 = vadd.f32 %v4225_v46, %v4212_v33  ;;  %v4239_v30 = vpop.f32.mrf.mxu3  ;;  %v4523_v20 = vsub.f32 1.0, %v4522_v39  ;;  %v4200_v59 = vadd.f32 %v4199_v57, %v14480_v9  ;;  %v4213_v44 = vpop.f32.mrf.mxu1  ;;  %v11057_v33 = vld [vmem:[#allocation5 + $0x230] sm:$0xf0]  ;;  %v11300_v46 = vor.u32 %v13271_v53, %v11297_v60  ;;  %v11551_v39 = vld [vmem:[#allocation5 + $0x600] sm:$0xf] }
 0x341   : >> { %6119 = vmatpush.bf16.msrb.mxu1 %v11076_v54  ;;  %v11060_v40 = vor.u32 %v13211_v61, %v11057_v33  ;;  %vm4587_vm1 = vcmp.gt.f32.partialorder %v4429_v22, %v4573_v50  ;;  %v13202_v26 = vld [vmem:[#allocation5 + $0x1d4] sm:$0xf0]  ;;  %v13267_v57 = vld [vmem:[#allocation5 + $0x3e4] sm:$0xf]  ;;  %v11281_v53 = vld [vmem:[#allocation5 + $0x3f0] sm:$0xf0]  ;;  %v11268_v22 = vor.u32 %v13263_v52, %v11265_v45 }
 0x342   : >> { %v4240_v38 = vadd.f32 %v4239_v30, %v4226_v13  ;;  %v4524_v47 = vmul.f32 %v15034_v18, %v4523_v20  ;;  %v4214_v55 = vadd.f32 %v4213_v44, %v4200_v59  ;;  %v13337_v13 = vld [vmem:[#allocation5 + $0x60c] sm:$0xf0]  ;;  %v13207_v30 = vld [vmem:[#allocation5 + $0x204] sm:$0xf]  ;;  %6078 = vmatpush.bf16.msra.mxu2 %v11568_v51  ;;  %v11521_v20 = vld [vmem:[#allocation5 + $0x5d0] sm:$0xf0]  ;;  %v11016_v59 = vor.u32 %v13202_v26, %v11015_v27 }
 0x343   : >> { %6148 = vmatpush.bf16.msrb.mxu3 %v11316_v37  ;;  %v11552_v23 = vor.u32 %v13337_v13, %v11551_v39  ;;  %v11284_v44 = vor.u32 %v13267_v57, %v11281_v53  ;;  %v11524_v49 = vor.u32 %v13327_v11, %v11521_v20  ;;  %v10999_v50 = vld [vmem:[#allocation5 + $0x1a8] sm:$0xf]  ;;  %v13198_v42 = vld [vmem:[#allocation5 + $0x1b4] sm:$0xf0]  ;;  %v11489_v33 = vld [vmem:[#allocation5 + $0x590] sm:$0xf0] }
 0x344   : >> { %v10748_v21 = vmul.f32 -1.442695, %v4240_v38  ;;  %v4525_v62 = vadd.f32 %v15034_v18, %v4524_v47  ;;  %v11505_v47 = vld [vmem:[#allocation5 + $0x5b0] sm:$0xf0]  ;;  %v10983_v51 = vld [vmem:[#allocation5 + $0x188] sm:$0xf] }
 0x345   : >> { %6120 = vmatpush.bf16.msrb.mxu1 %v11060_v40  ;;  %v13194_v61 = vld [vmem:[#allocation5 + $0x194] sm:$0xf0]  ;;  %v11217_v57 = vld [vmem:[#allocation5 + $0x370] sm:$0xf0] }
 0x346   : >> { %13835 = vpow2.f32 %v10748_v21  ;;  %v4529_v25 = vsel %vm15058_vm15, %v15034_v18, %v4525_v62  ;;  %v11044_v18 = vor.u32 %v13207_v30, %v11041_v19  ;;  %6079 = vmatpush.bf16.msra.mxu2 %v11552_v23  ;;  %v13323_v21 = vld [vmem:[#allocation5 + $0x5a4] sm:$0xf]  ;;  %v10984_v40 = vor.u32 %v13194_v61, %v10983_v51  ;;  %v10951_v19 = vld [vmem:[#allocation5 + $0x148] sm:$0xf]  ;;  %v13186_v20 = vld [vmem:[#allocation5 + $0x154] sm:$0xf0] }
 0x347   : >> { %v4227_v36 = vpop.f32.mrf.mxu2  ;;  %v4534_v35 = vsel %vm15063_vm0, %v4533_v1, %v4529_v25  ;;  %6149 = vmatpush.bf16.msrb.mxu3 %v11300_v46  ;;  %v11508_v0 = vor.u32 %v13323_v21, %v11505_v47  ;;  %v13319_v1 = vld [vmem:[#allocation5 + $0x584] sm:$0xf]  ;;  %v13190_v46 = vld [vmem:[#allocation5 + $0x174] sm:$0xf0]  ;;  %v10935_v21 = vld [vmem:[#allocation5 + $0x128] sm:$0xf] }
 0x348   : >> { %v4228_v7 = vadd.f32 %v4227_v36, %v4214_v55  ;;  %v4241_v24 = vpop.f32.mrf.mxu3  ;;  %vm4594_vm2 = vcmp.gt.f32.partialorder %v4534_v35, %v4580_v14  ;;  %v11000_v55 = vor.u32 %v13198_v42, %v10999_v50  ;;  %v13259_v62 = vld [vmem:[#allocation5 + $0x3a4] sm:$0xf]  ;;  %v10967_v36 = vld [vmem:[#allocation5 + $0x168] sm:$0xf]  ;;  %v11473_v35 = vld [vmem:[#allocation5 + $0x570] sm:$0xf0]  ;;  %v10952_v42 = vor.u32 %v13186_v20, %v10951_v19 }
 0x349   : >> { %vm15074_vm3 = vmpackc.low %vm4594_vm2, %vm4587_vm1  ;;  %6121 = vmatpush.bf16.msrb.mxu1 %v11044_v18  ;;  %v11252_v29 = vor.u32 %v13259_v62, %v11249_v17  ;;  %v13255_v25 = vld [vmem:[#allocation5 + $0x384] sm:$0xf]  ;;  %v10968_v23 = vor.u32 %v13190_v46, %v10967_v36  ;;  %v13182_v47 = vld [vmem:[#allocation5 + $0x134] sm:$0xf0] }
 0x34a   : >> { %v4242_v41 = vadd.f32 %v4241_v24, %v4228_v7  ;;  %11686 = vmatmul.msk.bf16.vlgmr.msra.gmra.mxu0 %vm15074_vm3, %v14230_v15  ;;  %11700 = vmatmul.msk.bf16.vlgmr.msrb.gmra.mxu3 %vm15074_vm3, %v14230_v15  ;;  %v11492_v24 = vor.u32 %v13319_v1, %v11489_v33  ;;  %v13315_v30 = vld [vmem:[#allocation5 + $0x564] sm:$0xf]  ;;  %v11201_v51 = vld [vmem:[#allocation5 + $0x350] sm:$0xf0]  ;;  %v13178_v36 = vld [vmem:[#allocation5 + $0x114] sm:$0xf0] }
 0x34b   : >> { %6198 = vmatpush.bf16.msra.mxu3 %v11032_v43  ;;  %6156 = vmatpush.bf16.msra.mxu0 %v11540_v16  ;;  %v11233_v43 = vld [vmem:[#allocation5 + $0x390] sm:$0xf0]  ;;  %v11476_v11 = vor.u32 %v13315_v30, %v11473_v35  ;;  %v13251_v18 = vld [vmem:[#allocation5 + $0x364] sm:$0xf]  ;;  %v11143_v46 = vld [vmem:[#allocation5 + $0x2c8] sm:$0xf] }
 0x34c   : >> { %v13836_v60 = vpop.eup %13835  ;;  %v10755_v54 = vmul.f32 -1.442695, %v4242_v41  ;;  %6128 = vmatpush.bf16.msrb.mxu2 %v11284_v44  ;;  %v11236_v27 = vor.u32 %v13255_v25, %v11233_v43  ;;  %v15096_v44 = vld [vmem:[#allocation5 + $0x524] sm:$0xf]  ;;  %v11220_v50 = vor.u32 %v13251_v18, %v11217_v57  ;;  %v11425_v35 = vld [vmem:[#allocation5 + $0x510] sm:$0xf0] }
 0x34d   : >> { %v15081_v37 = vadd.f32 1.0, %v13836_v60  ;;  %v13311_v60 = vld [vmem:[#allocation5 + $0x544] sm:$0xf]  ;;  %v11543_v18 = vld [vmem:[#allocation5 + $0x5e8] sm:$0xf] }
 0x34e   : >> { %13837 = vpow2.f32 %v10755_v54  ;;  %v11457_v54 = vld [vmem:[#allocation5 + $0x550] sm:$0xf0]  ;;  %v13247_v1 = vld [vmem:[#allocation5 + $0x344] sm:$0xf]  ;;  %v13334_v57 = vld [vmem:[#allocation5 + $0x5f4] sm:$0xf0] }
 0x34f   : >> { %13839 = vrcp.f32 %v15081_v37  ;;  %6199 = vmatpush.bf16.msra.mxu3 %v11016_v59  ;;  %6157 = vmatpush.bf16.msra.mxu0 %v11524_v49  ;;  %v15098_v49 = vld [vmem:[#allocation5 + $0x530] sm:$0xf0]  ;;  %vm4436_vm4 = vweird.f32 %v15081_v37  ;;  %v4440_v52 = vand.u32 2147483647, %v15081_v37  ;;  %v13303_v30 = vld [vmem:[#allocation5 + $0x504] sm:$0xf] }
 0x350   : >> { %6129 = vmatpush.bf16.msrb.mxu2 %v11268_v22  ;;  %v11460_v22 = vor.u32 %v13311_v60, %v11457_v54  ;;  %v4574_v54 = vld [vmem:[%s14831_s3 + $0x28] sm:$0xff] }
 0x351   : >> { %vm15123_vm9 = vcmp.eq.f32.partialorder %v4440_v52, 8.507059e+37 }
 0x353   : >> { %6200 = vmatpush.bf16.msra.mxu3 %v11000_v55  ;;  %6158 = vmatpush.bf16.msra.mxu0 %v11508_v0  ;;  %v4442_v0 = vand.u32 2147483648, %v15081_v37 }
 0x354   : >> { %v13838_v31 = vpop.eup %13837  ;;  %6130 = vmatpush.bf16.msrb.mxu2 %v11252_v29 }
 0x355   : >> { %v15087_v14 = vpop.eup %13839  ;;  %v15089_v7 = vadd.f32 1.0, %v13838_v31  ;;  %v11444_v31 = vor.u32 %v15096_v44, %v15098_v49  ;;  %v13238_v44 = vld [vmem:[#allocation5 + $0x2f4] sm:$0xf0] }
 0x356   : >> { %v4432_v39 = vmul.f32 %v15087_v14, %v15081_v37  ;;  %vm4437_vm6 = vweird.f32 %v15087_v14  ;;  %v11511_v37 = vld [vmem:[#allocation5 + $0x5a8] sm:$0xf] }
 0x357   : >> { %v4253_v13 = vpop.f32.mrf.mxu0  ;;  %13841 = vrcp.f32 %v15089_v7  ;;  %6201 = vmatpush.bf16.msra.mxu3 %v10984_v40  ;;  %6159 = vmatpush.bf16.msra.mxu0 %v11492_v24  ;;  %v10919_v40 = vld [vmem:[#allocation5 + $0x108] sm:$0xf]  ;;  %vm15118_vm7 = vmor %vm4436_vm4, %vm4437_vm6  ;;  %v11204_v24 = vor.u32 %v13247_v1, %v11201_v51  ;;  %v4547_v19 = vand.u32 2147483648, %v15089_v7  ;;  %vm4541_vm11 = vweird.f32 %v15089_v7  ;;  %v13239_v51 = vld [vmem:[#allocation5 + $0x304] sm:$0xf] }
 0x358   : >> { %v4254_v16 = vadd.f32 %v4253_v13, %v14482_v10  ;;  %v4433_v26 = vsub.f32 1.0, %v4432_v39  ;;  %v4267_v41 = vpop.f32.mrf.mxu1  ;;  %6131 = vmatpush.bf16.msrb.mxu2 %v11236_v27  ;;  %v10936_v13 = vor.u32 %v13182_v47, %v10935_v21  ;;  %v11185_v27 = vld [vmem:[#allocation5 + $0x330] sm:$0xf0]  ;;  %v10920_v60 = vor.u32 %v13178_v36, %v10919_v40  ;;  %v13363_v21 = vld [vmem:[#allocation5 + $0x6e4] sm:$0xf] }
 0x359   : >> { %v11665_v47 = vld [vmem:[#allocation5 + $0x6f0] sm:$0xf0]  ;;  %v11544_v1 = vor.u32 %v13334_v57, %v11543_v18 }
 0x35a   : >> { %v4268_v53 = vadd.f32 %v4267_v41, %v4254_v16  ;;  %v4434_v59 = vmul.f32 %v15087_v14, %v4433_v26  ;;  %11694 = vmatmul.msk.bf16.vlgmr.msrb.gmra.mxu0 %vm14896_vm13, %v14230_v15  ;;  %v13243_v16 = vld [vmem:[#allocation5 + $0x324] sm:$0xf]  ;;  %v4443_v26 = vor.u32 1.1754944e-38, %v4442_v0  ;;  %v4548_v0 = vor.u32 1.1754944e-38, %v4547_v19  ;;  %v11633_v18 = vld [vmem:[#allocation5 + $0x6b0] sm:$0xf0] }
 0x35b   : >> { %6202 = vmatpush.bf16.msra.mxu3 %v10968_v23  ;;  %6160 = vmatpush.bf16.msra.mxu0 %v11476_v11  ;;  %v4545_v23 = vand.u32 2147483647, %v15089_v7  ;;  %v11188_v49 = vor.u32 %v13243_v16, %v11185_v27  ;;  %v11668_v36 = vor.u32 %v13363_v21, %v11665_v47 }
 0x35c   : >> { %v4435_v29 = vadd.f32 %v15087_v14, %v4434_v59  ;;  %6132 = vmatpush.bf16.msrb.mxu2 %v11220_v50  ;;  %v11159_v59 = vld [vmem:[#allocation5 + $0x2e8] sm:$0xf] }
 0x35d   : >> { %v15106_v45 = vpop.eup %13841  ;;  %vm4546_vm15 = vcmp.eq.f32.partialorder %v4545_v23, 8.507059e+37 }
 0x35e   : >> { %v4537_v61 = vmul.f32 %v15106_v45, %v15089_v7  ;;  %v4439_v11 = vsel %vm15118_vm7, %v15087_v14, %v4435_v29  ;;  %vm4542_vm10 = vweird.f32 %v15106_v45  ;;  %v4581_v14 = vld [vmem:[%s14831_s3 + $0x60] sm:$0xff]  ;;  %v11160_v7 = vor.u32 %v13238_v44, %v11159_v59  ;;  %v13330_v29 = vld [vmem:[#allocation5 + $0x5d4] sm:$0xf0]  ;;  %v11111_v44 = vld [vmem:[#allocation5 + $0x288] sm:$0xf] }
 0x35f   : >> { %v4281_v55 = vpop.f32.mrf.mxu2  ;;  %v4255_v17 = vpop.f32.mrf.mxu0  ;;  %6203 = vmatpush.bf16.msra.mxu3 %v10952_v42  ;;  %6161 = vmatpush.bf16.msra.mxu0 %v11460_v22  ;;  %v4444_v22 = vsel %vm15123_vm9, %v4443_v26, %v4439_v11  ;;  %vm4543_vm14 = vmor %vm4541_vm11, %vm4542_vm10  ;;  %v13326_v26 = vld [vmem:[#allocation5 + $0x5b4] sm:$0xf0] }
 0x360   : >> { %v4282_v33 = vadd.f32 %v4281_v55, %v4268_v53  ;;  %v4295_v62 = vpop.f32.mrf.mxu3  ;;  %v4538_v25 = vsub.f32 1.0, %v4537_v61  ;;  %v4256_v39 = vadd.f32 %v4255_v17, %v14482_v10  ;;  %v4269_v53 = vpop.f32.mrf.mxu1  ;;  %6133 = vmatpush.bf16.msrb.mxu2 %v11204_v24  ;;  %v11428_v55 = vor.u32 %v13303_v30, %v11425_v35  ;;  %v11169_v61 = vld [vmem:[#allocation5 + $0x310] sm:$0xf0]  ;;  %v11527_v17 = vld [vmem:[#allocation5 + $0x5c8] sm:$0xf] }
 0x361   : >> { %v13234_v24 = vld [vmem:[#allocation5 + $0x2d4] sm:$0xf0]  ;;  %vm4588_vm0 = vcmp.gt.f32.partialorder %v4444_v22, %v4574_v54  ;;  %v11528_v30 = vor.u32 %v13330_v29, %v11527_v17  ;;  %v11512_v57 = vor.u32 %v13326_v26, %v11511_v37  ;;  %v11601_v17 = vld [vmem:[#allocation5 + $0x670] sm:$0xf0] }
 0x362   : >> { %v4296_v43 = vadd.f32 %v4295_v62, %v4282_v33  ;;  %v4539_v20 = vmul.f32 %v15106_v45, %v4538_v25  ;;  %v4270_v50 = vadd.f32 %v4269_v53, %v4256_v39  ;;  %v11649_v39 = vld [vmem:[#allocation5 + $0x6d0] sm:$0xf0]  ;;  %v11144_v27 = vor.u32 %v13234_v24, %v11143_v46  ;;  %v13230_v11 = vld [vmem:[#allocation5 + $0x2b4] sm:$0xf0]  ;;  %v11463_v24 = vld [vmem:[#allocation5 + $0x548] sm:$0xf] }
 0x363   : >> { %6204 = vmatpush.bf16.msra.mxu3 %v10936_v13  ;;  %6162 = vmatpush.bf16.msra.mxu0 %v11444_v31  ;;  %v11172_v13 = vor.u32 %v13239_v51, %v11169_v61  ;;  %v13322_v54 = vld [vmem:[#allocation5 + $0x594] sm:$0xf0]  ;;  %v11095_v51 = vld [vmem:[#allocation5 + $0x268] sm:$0xf] }
 0x364   : >> { %v10749_v41 = vmul.f32 -1.442695, %v4296_v43  ;;  %v4540_v42 = vadd.f32 %v15106_v45, %v4539_v20  ;;  %6134 = vmatpush.bf16.msrb.mxu2 %v11188_v49  ;;  %v13359_v43 = vld [vmem:[#allocation5 + $0x6c4] sm:$0xf]  ;;  %v13226_v49 = vld [vmem:[#allocation5 + $0x294] sm:$0xf0] }
 0x365   : >> { %v11652_v19 = vor.u32 %v13359_v43, %v11649_v39  ;;  %v13355_v20 = vld [vmem:[#allocation5 + $0x6a4] sm:$0xf]  ;;  %v11112_v47 = vor.u32 %v13226_v49, %v11111_v44  ;;  %v13222_v61 = vld [vmem:[#allocation5 + $0x274] sm:$0xf0] }
 0x366   : >> { %13843 = vpow2.f32 %v10749_v41  ;;  %v4544_v62 = vsel %vm4543_vm14, %v15106_v45, %v4540_v42  ;;  %v11127_v41 = vld [vmem:[#allocation5 + $0x2a8] sm:$0xf]  ;;  %v11636_v59 = vor.u32 %v13355_v20, %v11633_v18  ;;  %v11617_v42 = vld [vmem:[#allocation5 + $0x690] sm:$0xf0]  ;;  %v11096_v46 = vor.u32 %v13222_v61, %v11095_v51 }
 0x367   : >> { %v4283_v52 = vpop.f32.mrf.mxu2  ;;  %v4549_v31 = vsel %vm4546_vm15, %v4548_v0, %v4544_v62  ;;  %6205 = vmatpush.bf16.msra.mxu3 %v10920_v60  ;;  %6163 = vmatpush.bf16.msra.mxu0 %v11428_v55  ;;  %v11128_v53 = vor.u32 %v13230_v11, %v11127_v41  ;;  %v11495_v60 = vld [vmem:[#allocation5 + $0x588] sm:$0xf]  ;;  %v13318_v55 = vld [vmem:[#allocation5 + $0x574] sm:$0xf0] }
 0x368   : >> { %v4284_v33 = vadd.f32 %v4283_v52, %v4270_v50  ;;  %v4297_v40 = vpop.f32.mrf.mxu3  ;;  %vm4595_vm1 = vcmp.gt.f32.partialorder %v4549_v31, %v4581_v14  ;;  %6135 = vmatpush.bf16.msrb.mxu2 %v11172_v13  ;;  %v13351_v50 = vld [vmem:[#allocation5 + $0x684] sm:$0xf]  ;;  %v11496_v14 = vor.u32 %v13322_v54, %v11495_v60  ;;  %v11479_v52 = vld [vmem:[#allocation5 + $0x568] sm:$0xf]  ;;  %v13310_v41 = vld [vmem:[#allocation5 + $0x534] sm:$0xf0] }
 0x369   : >> { %vm15143_vm2 = vmpackc.low %vm4595_vm1, %vm4588_vm0  ;;  %v11079_v13 = vld [vmem:[#allocation5 + $0x248] sm:$0xf]  ;;  %v13339_v60 = vld [vmem:[#allocation5 + $0x624] sm:$0xf] }
 0x36a   : >> { %v4298_v25 = vadd.f32 %v4297_v40, %v4284_v33  ;;  %11688 = vmatmul.msk.bf16.vlgmr.msra.gmra.mxu1 %vm15143_vm2, %v14230_v15  ;;  %11708 = vmatmul.msk.bf16.vlgmr.msra.gmra.mxu3 %vm14896_vm13, %v14230_v15  ;;  %v11480_v40 = vor.u32 %v13318_v55, %v11479_v52  ;;  %v11063_v18 = vld [vmem:[#allocation5 + $0x228] sm:$0xf]  ;;  %v11569_v54 = vld [vmem:[#allocation5 + $0x630] sm:$0xf0]  ;;  %v13335_v52 = vld [vmem:[#allocation5 + $0x604] sm:$0xf] }
 0x36b   : >> { %6254 = vmatpush.bf16.msrb.mxu3 %v11544_v1  ;;  %6212 = vmatpush.bf16.msrb.mxu0 %v11160_v7  ;;  %v11620_v1 = vor.u32 %v13351_v50, %v11617_v42  ;;  %v13347_v7 = vld [vmem:[#allocation5 + $0x664] sm:$0xf]  ;;  %v13210_v50 = vld [vmem:[#allocation5 + $0x214] sm:$0xf0]  ;;  %v11431_v42 = vld [vmem:[#allocation5 + $0x508] sm:$0xf]  ;;  %v11572_v61 = vor.u32 %v13339_v60, %v11569_v54 }
 0x36c   : >> { %v13844_v35 = vpop.eup %13843  ;;  %v10756_v16 = vmul.f32 -1.442695, %v4298_v25  ;;  %6170 = vmatpush.bf16.msra.mxu1 %v11668_v36  ;;  %11702 = vmatmul.msk.bf16.vlgmr.msra.gmra.mxu0 %vm15143_vm2, %v14230_v15  ;;  %v13314_v25 = vld [vmem:[#allocation5 + $0x554] sm:$0xf0]  ;;  %v11604_v39 = vor.u32 %v13347_v7, %v11601_v17  ;;  %v11553_v55 = vld [vmem:[#allocation5 + $0x610] sm:$0xf0] }
 0x36d   : >> { %v15150_v23 = vadd.f32 1.0, %v13844_v35  ;;  %v13343_v35 = vld [vmem:[#allocation5 + $0x644] sm:$0xf]  ;;  %v11464_v37 = vor.u32 %v13314_v25, %v11463_v24  ;;  %v13236_v7 = vld [vmem:[#allocation5 + $0x2ec] sm:$0xf] }
 0x36e   : >> { %13845 = vpow2.f32 %v10756_v16  ;;  %v11585_v16 = vld [vmem:[#allocation5 + $0x650] sm:$0xf0]  ;;  %v11161_v17 = vld [vmem:[#allocation5 + $0x2f8] sm:$0xf0]  ;;  %v13232_v54 = vld [vmem:[#allocation5 + $0x2cc] sm:$0xf] }
 0x36f   : >> { %13847 = vrcp.f32 %v15150_v23  ;;  %6255 = vmatpush.bf16.msrb.mxu3 %v11528_v30  ;;  %6213 = vmatpush.bf16.msrb.mxu0 %v11144_v27  ;;  %v13218_v30 = vld [vmem:[#allocation5 + $0x254] sm:$0xf0]  ;;  %v11588_v20 = vor.u32 %v13343_v35, %v11585_v16  ;;  %vm4451_vm6 = vweird.f32 %v15150_v23  ;;  %v4455_v51 = vand.u32 2147483647, %v15150_v23  ;;  %v4582_v35 = vld [vmem:[%s14831_s3 + $0x68] sm:$0xff] }
 0x370   : >> { %6171 = vmatpush.bf16.msra.mxu1 %v11652_v19  ;;  %v11080_v26 = vor.u32 %v13218_v30, %v11079_v13  ;;  %v11447_v19 = vld [vmem:[#allocation5 + $0x528] sm:$0xf]  ;;  %v13270_v30 = vld [vmem:[#allocation5 + $0x3f4] sm:$0xf0] }
 0x371   : >> { %v11448_v49 = vor.u32 %v13310_v41, %v11447_v19  ;;  %v11287_v13 = vld [vmem:[#allocation5 + $0x3e8] sm:$0xf]  ;;  %vm4456_vm10 = vcmp.eq.f32.partialorder %v4455_v51, 8.507059e+37  ;;  %v13228_v51 = vld [vmem:[#allocation5 + $0x2ac] sm:$0xf] }
 0x372   : >> { %v10903_v16 = vld [vmem:[#allocation5 + $0xe8] sm:$0xf]  ;;  %v11288_v60 = vor.u32 %v13270_v30, %v11287_v13  ;;  %v13258_v30 = vld [vmem:[#allocation5 + $0x394] sm:$0xf0] }
 0x373   : >> { %6256 = vmatpush.bf16.msrb.mxu3 %v11512_v57  ;;  %6214 = vmatpush.bf16.msrb.mxu0 %v11128_v53  ;;  %v13214_v57 = vld [vmem:[#allocation5 + $0x234] sm:$0xf0]  ;;  %v11239_v13 = vld [vmem:[#allocation5 + $0x388] sm:$0xf] }
 0x374   : >> { %v13846_v21 = vpop.eup %13845  ;;  %6172 = vmatpush.bf16.msra.mxu1 %v11636_v59  ;;  %v11047_v59 = vld [vmem:[#allocation5 + $0x208] sm:$0xf] }
 0x375   : >> { %v15159_v22 = vpop.eup %13847  ;;  %v15161_v0 = vadd.f32 1.0, %v13846_v21 }
 0x376   : >> { %v4447_v33 = vmul.f32 %v15159_v22, %v15150_v23  ;;  %vm4452_vm4 = vweird.f32 %v15159_v22 }
 0x377   : >> { %v5997_v62 = vpop.f32.mrf.mxu0  ;;  %13849 = vrcp.f32 %v15161_v0  ;;  %6257 = vmatpush.bf16.msrb.mxu3 %v11496_v14  ;;  %6215 = vmatpush.bf16.msrb.mxu0 %v11112_v47  ;;  %v4457_v14 = vand.u32 2147483648, %v15150_v23  ;;  %v11064_v47 = vor.u32 %v13214_v57, %v11063_v18  ;;  %vm15184_vm7 = vmor %vm4451_vm6, %vm4452_vm4  ;;  %v4560_v23 = vand.u32 2147483647, %v15161_v0  ;;  %v11655_v18 = vld [vmem:[#allocation5 + $0x6c8] sm:$0xf] }
 0x378   : >> { %v5998_v29 = vadd.f32 %v5997_v62, %v14535_v32  ;;  %v4448_v31 = vsub.f32 1.0, %v4447_v33  ;;  %v6011_v36 = vpop.f32.mrf.mxu1  ;;  %6173 = vmatpush.bf16.msra.mxu1 %v11620_v1  ;;  %v13306_v1 = vld [vmem:[#allocation5 + $0x514] sm:$0xf0]  ;;  %v4562_v62 = vand.u32 2147483648, %v15161_v0  ;;  %vm4556_vm11 = vweird.f32 %v15161_v0 }
 0x379   : >> { %v11432_v24 = vor.u32 %v13306_v1, %v11431_v42  ;;  %v4458_v25 = vor.u32 1.1754944e-38, %v4457_v14  ;;  %v13362_v57 = vld [vmem:[#allocation5 + $0x6d4] sm:$0xf0]  ;;  %vm4561_vm15 = vcmp.eq.f32.partialorder %v4560_v23, 8.507059e+37  ;;  %v10887_v42 = vld [vmem:[#allocation5 + $0xc8] sm:$0xf] }
 0x37a   : >> { %v15167_v43 = vadd.f32 %v6011_v36, %v5998_v29  ;;  %v4449_v27 = vmul.f32 %v15159_v22, %v4448_v31  ;;  %11696 = vmatmul.msk.bf16.vlgmr.msrb.gmra.mxu1 %vm14954_vm8, %v14230_v15  ;;  %v11671_v31 = vld [vmem:[#allocation5 + $0x6e8] sm:$0xf]  ;;  %v13366_v36 = vld [vmem:[#allocation5 + $0x6f4] sm:$0xf0]  ;;  %v4563_v41 = vor.u32 1.1754944e-38, %v4562_v62 }
 0x37b   : >> { %6258 = vmatpush.bf16.msrb.mxu3 %v11480_v40  ;;  %6216 = vmatpush.bf16.msrb.mxu0 %v11096_v46  ;;  %v11048_v46 = vor.u32 %v13210_v50, %v11047_v59  ;;  %v13266_v50 = vld [vmem:[#allocation5 + $0x3d4] sm:$0xf0]  ;;  %v11255_v62 = vld [vmem:[#allocation5 + $0x3a8] sm:$0xf] }
 0x37c   : >> { %6174 = vmatpush.bf16.msra.mxu1 %v11604_v39  ;;  %v4450_v44 = vadd.f32 %v15159_v22, %v4449_v27  ;;  %v4575_v39 = vld [vmem:[%s14831_s3 + $0x30] sm:$0xff]  ;;  %v13174_v27 = vld [vmem:[#allocation5 + $0xf4] sm:$0xf0] }
 0x37d   : >> { %v15173_v11 = vpop.eup %13849  ;;  %v13170_v14 = vld [vmem:[#allocation5 + $0xd4] sm:$0xf0] }
 0x37e   : >> { %v4552_v53 = vmul.f32 %v15173_v11, %v15161_v0  ;;  %v4454_v29 = vsel %vm15184_vm7, %v15159_v22, %v4450_v44  ;;  %vm4557_vm9 = vweird.f32 %v15173_v11  ;;  %v11145_v0 = vld [vmem:[#allocation5 + $0x2d8] sm:$0xf0]  ;;  %v10904_v44 = vor.u32 %v13174_v27, %v10903_v16  ;;  %v13358_v1 = vld [vmem:[#allocation5 + $0x6b4] sm:$0xf0] }
 0x37f   : >> { %6259 = vmatpush.bf16.msrb.mxu3 %v11464_v37  ;;  %6217 = vmatpush.bf16.msrb.mxu0 %v11080_v26  ;;  %v11164_v37 = vor.u32 %v13236_v7, %v11161_v17  ;;  %v11556_v26 = vor.u32 %v13335_v52, %v11553_v55  ;;  %v4459_v19 = vsel %vm4456_vm10, %v4458_v25, %v4454_v29  ;;  %vm4558_vm14 = vmor %vm4556_vm11, %vm4557_vm9  ;;  %v11639_v52 = vld [vmem:[#allocation5 + $0x6a8] sm:$0xf]  ;;  %v13262_v7 = vld [vmem:[#allocation5 + $0x3b4] sm:$0xf0] }
 0x380   : >> { %v4553_v21 = vsub.f32 1.0, %v4552_v53  ;;  %6175 = vmatpush.bf16.msra.mxu1 %v11588_v20  ;;  %v11672_v20 = vor.u32 %v13366_v36, %v11671_v31  ;;  %vm4589_vm0 = vcmp.gt.f32.partialorder %v4459_v19, %v4575_v39  ;;  %v10888_v33 = vor.u32 %v13170_v14, %v10887_v42  ;;  %v10871_v17 = vld [vmem:[#allocation5 + $0xa8] sm:$0xf]  ;;  %v13166_v29 = vld [vmem:[#allocation5 + $0xb4] sm:$0xf0] }
 0x381   : >> { %v11623_v31 = vld [vmem:[#allocation5 + $0x688] sm:$0xf]  ;;  %v11256_v36 = vor.u32 %v13262_v7, %v11255_v62  ;;  %v11113_v25 = vld [vmem:[#allocation5 + $0x298] sm:$0xf0]  ;;  %v10872_v39 = vor.u32 %v13166_v29, %v10871_v17  ;;  %v13350_v19 = vld [vmem:[#allocation5 + $0x674] sm:$0xf0] }
 0x382   : >> { %v4554_v40 = vmul.f32 %v15173_v11, %v4553_v21  ;;  %v13346_v14 = vld [vmem:[#allocation5 + $0x654] sm:$0xf0]  ;;  %v11575_v7 = vld [vmem:[#allocation5 + $0x628] sm:$0xf]  ;;  %v13212_v29 = vld [vmem:[#allocation5 + $0x22c] sm:$0xf] }
 0x383   : >> { %6260 = vmatpush.bf16.msrb.mxu3 %v11448_v49  ;;  %6218 = vmatpush.bf16.msrb.mxu0 %v11064_v47  ;;  %v11271_v49 = vld [vmem:[#allocation5 + $0x3c8] sm:$0xf]  ;;  %v11148_v47 = vor.u32 %v13232_v54, %v11145_v0  ;;  %v13158_v54 = vld [vmem:[#allocation5 + $0x74] sm:$0xf0] }
 0x384   : >> { %v4555_v22 = vadd.f32 %v15173_v11, %v4554_v40  ;;  %6176 = vmatpush.bf16.msra.mxu1 %v11572_v61  ;;  %v11272_v55 = vor.u32 %v13266_v50, %v11271_v49  ;;  %v11129_v61 = vld [vmem:[#allocation5 + $0x2b8] sm:$0xf0]  ;;  %v11640_v40 = vor.u32 %v13358_v1, %v11639_v52  ;;  %v11591_v49 = vld [vmem:[#allocation5 + $0x648] sm:$0xf]  ;;  %v13250_v1 = vld [vmem:[#allocation5 + $0x354] sm:$0xf0] }
 0x385   : >> { %v11132_v23 = vor.u32 %v13228_v51, %v11129_v61  ;;  %v10823_v51 = vld [vmem:[#allocation5 + $0x48] sm:$0xf]  ;;  %v13154_v61 = vld [vmem:[#allocation5 + $0x54] sm:$0xf0] }
 0x386   : >> { %v4559_v53 = vsel %vm4558_vm14, %v15173_v11, %v4555_v22  ;;  %v11656_v11 = vor.u32 %v13362_v57, %v11655_v18  ;;  %v10855_v22 = vld [vmem:[#allocation5 + $0x88] sm:$0xf]  ;;  %v13342_v17 = vld [vmem:[#allocation5 + $0x634] sm:$0xf0] }
 0x387   : >> { %6261 = vmatpush.bf16.msrb.mxu3 %v11432_v24  ;;  %v4564_v59 = vsel %vm4561_vm15, %v4563_v41, %v4559_v53  ;;  %6219 = vmatpush.bf16.msrb.mxu0 %v11048_v46  ;;  %v13354_v46 = vld [vmem:[#allocation5 + $0x694] sm:$0xf0]  ;;  %v13224_v24 = vld [vmem:[#allocation5 + $0x28c] sm:$0xf]  ;;  %v11223_v57 = vld [vmem:[#allocation5 + $0x368] sm:$0xf] }
 0x388   : >> { %vm4596_vm1 = vcmp.gt.f32.partialorder %v4564_v59, %v4582_v35  ;;  %6177 = vmatpush.bf16.msra.mxu1 %v11556_v26  ;;  %v13162_v35 = vld [vmem:[#allocation5 + $0x94] sm:$0xf0]  ;;  %v11624_v16 = vor.u32 %v13354_v46, %v11623_v31  ;;  %v11116_v27 = vor.u32 %v13224_v24, %v11113_v25  ;;  %v11240_v26 = vor.u32 %v13258_v30, %v11239_v13  ;;  %v13220_v41 = vld [vmem:[#allocation5 + $0x26c] sm:$0xf]  ;;  %v11191_v31 = vld [vmem:[#allocation5 + $0x328] sm:$0xf] }
 0x389   : >> { %vm15202_vm4 = vmpackc.low %vm4596_vm1, %vm4589_vm0  ;;  %v10856_v18 = vor.u32 %v13162_v35, %v10855_v22  ;;  %v13254_v53 = vld [vmem:[#allocation5 + $0x374] sm:$0xf0]  ;;  %v10807_v46 = vld [vmem:[#allocation5 + $0x28] sm:$0xf]  ;;  %v11576_v25 = vor.u32 %v13342_v17, %v11575_v7 }
 0x38a   : >> { %11690 = vmatmul.msk.bf16.vlgmr.msra.gmra.mxu2 %vm15202_vm4, %v14230_v15  ;;  %11710 = vmatmul.msk.bf16.vlgmr.msrb.gmra.mxu0 %vm14954_vm8, %v14230_v15  ;;  %v11224_v42 = vor.u32 %v13254_v53, %v11223_v57  ;;  %v13150_v24 = vld [vmem:[#allocation5 + $0x34] sm:$0xf0]  ;;  %v11175_v13 = vld [vmem:[#allocation5 + $0x308] sm:$0xf]  ;;  %v13172_v53 = vld [vmem:[#allocation5 + $0xec] sm:$0xf] }
 0x38b   : >> { %6310 = vmatpush.bf16.msra.mxu3 %v11164_v37  ;;  %6268 = vmatpush.bf16.msra.mxu0 %v11672_v20  ;;  %v11607_v37 = vld [vmem:[#allocation5 + $0x668] sm:$0xf]  ;;  %v11097_v20 = vld [vmem:[#allocation5 + $0x278] sm:$0xf0]  ;;  %v13298_v7 = vld [vmem:[#allocation5 + $0x4d4] sm:$0xf0] }
 0x38c   : >> { %6226 = vmatpush.bf16.msrb.mxu1 %v11288_v60  ;;  %6184 = vmatpush.bf16.msra.mxu2 %v10904_v44  ;;  %v10839_v60 = vld [vmem:[#allocation5 + $0x68] sm:$0xf]  ;;  %v11608_v59 = vor.u32 %v13350_v19, %v11607_v37  ;;  %v11100_v44 = vor.u32 %v13220_v41, %v11097_v20  ;;  %v13208_v37 = vld [vmem:[#allocation5 + $0x20c] sm:$0xf]  ;;  %v10808_v19 = vor.u32 %v13150_v24, %v10807_v46  ;;  %v13242_v41 = vld [vmem:[#allocation5 + $0x314] sm:$0xf0] }
 0x38d   : >> { %11716 = vmatmul.msk.bf16.vlgmr.msrb.gmra.mxu3 %vm15143_vm2, %v14230_v15  ;;  %11704 = vmatmul.msk.bf16.vlgmr.msra.gmra.mxu1 %vm15202_vm4, %v14230_v15  ;;  %v10840_v52 = vor.u32 %v13158_v54, %v10839_v60  ;;  %v11559_v30 = vld [vmem:[#allocation5 + $0x608] sm:$0xf]  ;;  %v13268_v20 = vld [vmem:[#allocation5 + $0x3ec] sm:$0xf]  ;;  %v10905_v60 = vld [vmem:[#allocation5 + $0xf8] sm:$0xf0] }
 0x38e   : >> { %v10791_v35 = vld [vmem:[#allocation5 + $0x8] sm:$0xf]  ;;  %v11657_v17 = vld [vmem:[#allocation5 + $0x6d8] sm:$0xf0] }
 0x38f   : >> { %6269 = vmatpush.bf16.msra.mxu0 %v11656_v11  ;;  %6311 = vmatpush.bf16.msra.mxu3 %v11148_v47  ;;  %v13216_v11 = vld [vmem:[#allocation5 + $0x24c] sm:$0xf]  ;;  %v11081_v47 = vld [vmem:[#allocation5 + $0x258] sm:$0xf0]  ;;  %v11415_v57 = vld [vmem:[#allocation5 + $0x4e8] sm:$0xf] }
 0x390   : >> { %6227 = vmatpush.bf16.msrb.mxu1 %v11272_v55  ;;  %6185 = vmatpush.bf16.msra.mxu2 %v10888_v33  ;;  %v11207_v55 = vld [vmem:[#allocation5 + $0x348] sm:$0xf]  ;;  %v11592_v33 = vor.u32 %v13346_v14, %v11591_v49  ;;  %v11084_v62 = vor.u32 %v13216_v11, %v11081_v47  ;;  %v11673_v49 = vld [vmem:[#allocation5 + $0x6f8] sm:$0xf0]  ;;  %v10908_v47 = vor.u32 %v13172_v53, %v10905_v60 }
 0x391   : >> { %v6025_v0 = vpop.f32.mrf.mxu2  ;;  %v10873_v24 = vld [vmem:[#allocation5 + $0xb8] sm:$0xf0] }
 0x392   : >> { %v15219_v50 = vadd.f32 %v6025_v0, %v15167_v43  ;;  %v11208_v43 = vor.u32 %v13250_v1, %v11207_v55  ;;  %v13168_v55 = vld [vmem:[#allocation5 + $0xcc] sm:$0xf]  ;;  %v11625_v53 = vld [vmem:[#allocation5 + $0x698] sm:$0xf0] }
 0x393   : >> { %6270 = vmatpush.bf16.msra.mxu0 %v11640_v40  ;;  %6312 = vmatpush.bf16.msra.mxu3 %v11132_v23  ;;  %v11065_v40 = vld [vmem:[#allocation5 + $0x238] sm:$0xf0]  ;;  %v10824_v23 = vor.u32 %v13154_v61, %v10823_v51 }
 0x394   : >> { %6228 = vmatpush.bf16.msrb.mxu1 %v11256_v36  ;;  %6186 = vmatpush.bf16.msra.mxu2 %v10872_v39  ;;  %v13246_v36 = vld [vmem:[#allocation5 + $0x334] sm:$0xf0]  ;;  %v11068_v39 = vor.u32 %v13212_v29, %v11065_v40  ;;  %v10889_v61 = vld [vmem:[#allocation5 + $0xd8] sm:$0xf0] }
 0x395   : >> { %v11192_v22 = vor.u32 %v13246_v36, %v11191_v31  ;;  %v10892_v29 = vor.u32 %v13168_v55, %v10889_v61  ;;  %v13164_v31 = vld [vmem:[#allocation5 + $0xac] sm:$0xf]  ;;  %v11609_v55 = vld [vmem:[#allocation5 + $0x678] sm:$0xf0] }
 0x397   : >> { %6271 = vmatpush.bf16.msra.mxu0 %v11624_v16  ;;  %6313 = vmatpush.bf16.msra.mxu3 %v11116_v27  ;;  %v13146_v16 = vld [vmem:[#allocation5 + $0x14] sm:$0xf0] }
 0x398   : >> { %6229 = vmatpush.bf16.msrb.mxu1 %v11240_v26  ;;  %6187 = vmatpush.bf16.msra.mxu2 %v10856_v18  ;;  %v13338_v27 = vld [vmem:[#allocation5 + $0x614] sm:$0xf0]  ;;  %v11049_v26 = vld [vmem:[#allocation5 + $0x218] sm:$0xf0]  ;;  %v10792_v11 = vor.u32 %v13146_v16, %v10791_v35  ;;  %v10876_v35 = vor.u32 %v13164_v31, %v10873_v24 }
 0x399   : >> { %v11289_v18 = vld [vmem:[#allocation5 + $0x3f8] sm:$0xf0]  ;;  %v11560_v54 = vor.u32 %v13338_v27, %v11559_v30  ;;  %v11052_v0 = vor.u32 %v13208_v37, %v11049_v26  ;;  %v13356_v30 = vld [vmem:[#allocation5 + $0x6ac] sm:$0xf]  ;;  %v11367_v27 = vld [vmem:[#allocation5 + $0x488] sm:$0xf] }
 0x39a   : >> { %11698 = vmatmul.msk.bf16.vlgmr.msrb.gmra.mxu2 %vm15001_vm5, %v14230_v15  ;;  %v11292_v14 = vor.u32 %v13268_v20, %v11289_v18  ;;  %v13160_v37 = vld [vmem:[#allocation5 + $0x8c] sm:$0xf]  ;;  %v11241_v18 = vld [vmem:[#allocation5 + $0x398] sm:$0xf0]  ;;  %v13282_v31 = vld [vmem:[#allocation5 + $0x454] sm:$0xf0] }
 0x39b   : >> { %6272 = vmatpush.bf16.msra.mxu0 %v11608_v59  ;;  %6314 = vmatpush.bf16.msra.mxu3 %v11100_v44  ;;  %v13302_v59 = vld [vmem:[#allocation5 + $0x4f4] sm:$0xf0]  ;;  %v13364_v44 = vld [vmem:[#allocation5 + $0x6ec] sm:$0xf] }
 0x39c   : >> { %6230 = vmatpush.bf16.msrb.mxu1 %v11224_v42  ;;  %6188 = vmatpush.bf16.msra.mxu2 %v10840_v52  ;;  %v11176_v42 = vor.u32 %v13242_v41, %v11175_v13  ;;  %v11399_v52 = vld [vmem:[#allocation5 + $0x4c8] sm:$0xf]  ;;  %v11416_v1 = vor.u32 %v13302_v59, %v11415_v57  ;;  %v11676_v51 = vor.u32 %v13364_v44, %v11673_v49  ;;  %v13294_v13 = vld [vmem:[#allocation5 + $0x4b4] sm:$0xf0]  ;;  %v10857_v41 = vld [vmem:[#allocation5 + $0x98] sm:$0xf0] }
 0x39d   : >> { %v11400_v36 = vor.u32 %v13298_v7, %v11399_v52  ;;  %v13256_v20 = vld [vmem:[#allocation5 + $0x38c] sm:$0xf]  ;;  %v13290_v57 = vld [vmem:[#allocation5 + $0x494] sm:$0xf0]  ;;  %v10860_v60 = vor.u32 %v13160_v37, %v10857_v41  ;;  %v11628_v49 = vor.u32 %v13352_v34, %v11625_v53 }
 0x39e   : >> { %v13156_v59 = vld [vmem:[#allocation5 + $0x6c] sm:$0xf]  ;;  %v11368_v44 = vor.u32 %v13290_v57, %v11367_v27  ;;  %v13278_v27 = vld [vmem:[#allocation5 + $0x434] sm:$0xf0] }
 0x39f   : >> { %6273 = vmatpush.bf16.msra.mxu0 %v11592_v33  ;;  %6315 = vmatpush.bf16.msra.mxu3 %v11084_v62  ;;  %v13264_v33 = vld [vmem:[#allocation5 + $0x3cc] sm:$0xf]  ;;  %v11273_v62 = vld [vmem:[#allocation5 + $0x3d8] sm:$0xf0] }
 0x3a0   : >> { %6231 = vmatpush.bf16.msrb.mxu1 %v11208_v43  ;;  %6189 = vmatpush.bf16.msra.mxu2 %v10824_v23  ;;  %v13360_v43 = vld [vmem:[#allocation5 + $0x6cc] sm:$0xf]  ;;  %v11276_v40 = vor.u32 %v13264_v33, %v11273_v62  ;;  %v11383_v23 = vld [vmem:[#allocation5 + $0x4a8] sm:$0xf] }
 0x3a1   : >> { %v11660_v46 = vor.u32 %v13360_v43, %v11657_v17  ;;  %v11384_v26 = vor.u32 %v13294_v13, %v11383_v23  ;;  %v13348_v52 = vld [vmem:[#allocation5 + $0x66c] sm:$0xf]  ;;  %v11335_v33 = vld [vmem:[#allocation5 + $0x448] sm:$0xf]  ;;  %v11209_v23 = vld [vmem:[#allocation5 + $0x358] sm:$0xf0] }
 0x3a2   : >> { %v13152_v62 = vld [vmem:[#allocation5 + $0x4c] sm:$0xf]  ;;  %v11612_v17 = vor.u32 %v13348_v52, %v11609_v55 }
 0x3a3   : >> { %6274 = vmatpush.bf16.msra.mxu0 %v11576_v25  ;;  %6316 = vmatpush.bf16.msra.mxu3 %v11068_v39  ;;  %v13260_v25 = vld [vmem:[#allocation5 + $0x3ac] sm:$0xf]  ;;  %v11257_v39 = vld [vmem:[#allocation5 + $0x3b8] sm:$0xf0] }
 0x3a4   : >> { %6232 = vmatpush.bf16.msrb.mxu1 %v11192_v22  ;;  %6190 = vmatpush.bf16.msra.mxu2 %v10808_v19  ;;  %v11641_v22 = vld [vmem:[#allocation5 + $0x6b8] sm:$0xf0]  ;;  %v11260_v16 = vor.u32 %v13260_v25, %v11257_v39  ;;  %v11319_v39 = vld [vmem:[#allocation5 + $0x428] sm:$0xf]  ;;  %v13148_v13 = vld [vmem:[#allocation5 + $0x2c] sm:$0xf] }
 0x3a5   : >> { %v11644_v19 = vor.u32 %v13356_v30, %v11641_v22  ;;  %v11336_v30 = vor.u32 %v13282_v31, %v11335_v33  ;;  %v13340_v37 = vld [vmem:[#allocation5 + $0x62c] sm:$0xf]  ;;  %v11320_v34 = vor.u32 %v13278_v27, %v11319_v39  ;;  %v6027_v27 = vpop.f32.mrf.mxu2 }
 0x3a6   : >> { %v13144_v57 = vld [vmem:[#allocation5 + $0xc] sm:$0xf] }
 0x3a7   : >> { %6275 = vmatpush.bf16.msra.mxu0 %v11560_v54  ;;  %6317 = vmatpush.bf16.msra.mxu3 %v11052_v0  ;;  %v11244_v54 = vor.u32 %v13256_v20, %v11241_v18  ;;  %v11351_v0 = vld [vmem:[#allocation5 + $0x468] sm:$0xf]  ;;  %v13274_v18 = vld [vmem:[#allocation5 + $0x414] sm:$0xf0]  ;;  %v13200_v33 = vld [vmem:[#allocation5 + $0x1cc] sm:$0xf] }
 0x3a8   : >> { %6233 = vmatpush.bf16.msrb.mxu1 %v11176_v42  ;;  %6191 = vmatpush.bf16.msra.mxu2 %v10792_v11  ;;  %v10841_v42 = vld [vmem:[#allocation5 + $0x78] sm:$0xf0]  ;;  %v11303_v20 = vld [vmem:[#allocation5 + $0x408] sm:$0xf]  ;;  %v13196_v31 = vld [vmem:[#allocation5 + $0x1ac] sm:$0xf] }
 0x3a9   : >> { %v11225_v11 = vld [vmem:[#allocation5 + $0x378] sm:$0xf0]  ;;  %v11304_v55 = vor.u32 %v13274_v18, %v11303_v20  ;;  %v13192_v39 = vld [vmem:[#allocation5 + $0x18c] sm:$0xf] }
 0x3aa   : >> { %11718 = vmatmul.msk.bf16.vlgmr.msra.gmra.mxu0 %vm15202_vm4, %v14230_v15  ;;  %11724 = vmatmul.msk.bf16.vlgmr.msra.gmra.mxu3 %vm14954_vm8, %v14230_v15  ;;  %v10988_v21 = vor.u32 %v13192_v39, %v10985_v2  ;;  %v10969_v20 = vld [vmem:[#allocation5 + $0x178] sm:$0xf0]  ;;  %v13284_v18 = vld [vmem:[#allocation5 + $0x46c] sm:$0xf] }
 0x3ab   : >> { %6324 = vmatpush.bf16.msrb.mxu0 %v11292_v14  ;;  %6366 = vmatpush.bf16.msrb.mxu3 %v11676_v51  ;;  %v13252_v14 = vld [vmem:[#allocation5 + $0x36c] sm:$0xf]  ;;  %v10844_v51 = vor.u32 %v13156_v59, %v10841_v42  ;;  %v11033_v42 = vld [vmem:[#allocation5 + $0x1f8] sm:$0xf0] }
 0x3ac   : >> { %6282 = vmatpush.bf16.msra.mxu1 %v10908_v47  ;;  %6240 = vmatpush.bf16.msrb.mxu2 %v11416_v1  ;;  %v13286_v47 = vld [vmem:[#allocation5 + $0x474] sm:$0xf0]  ;;  %v11228_v61 = vor.u32 %v13252_v14, %v11225_v11  ;;  %v13336_v59 = vld [vmem:[#allocation5 + $0x60c] sm:$0xf]  ;;  %v11417_v11 = vld [vmem:[#allocation5 + $0x4f8] sm:$0xf0] }
 0x3ad   : >> { %11712 = vmatmul.msk.bf16.vlgmr.msrb.gmra.mxu1 %vm15001_vm5, %v14230_v15  ;;  %11706 = vmatmul.msk.bf16.vlgmr.msra.gmra.mxu2 %vm14889_vm12, %v14230_v15  ;;  %v6039_v1 = vpop.f32.mrf.mxu3  ;;  %v11352_v43 = vor.u32 %v13286_v47, %v11351_v0  ;;  %v11177_v0 = vld [vmem:[#allocation5 + $0x318] sm:$0xf0]  ;;  %v13300_v14 = vld [vmem:[#allocation5 + $0x4ec] sm:$0xf] }
 0x3ae   : >> { %v15237_v7 = vadd.f32 %v6039_v1, %v15219_v50  ;;  %v10809_v50 = vld [vmem:[#allocation5 + $0x38] sm:$0xf0]  ;;  %v13328_v39 = vld [vmem:[#allocation5 + $0x5cc] sm:$0xf] }
 0x3af   : >> { %6325 = vmatpush.bf16.msrb.mxu0 %v11276_v40  ;;  %6367 = vmatpush.bf16.msrb.mxu3 %v11660_v46  ;;  %v13248_v40 = vld [vmem:[#allocation5 + $0x34c] sm:$0xf]  ;;  %v11593_v46 = vld [vmem:[#allocation5 + $0x658] sm:$0xf0] }
 0x3b0   : >> { %6283 = vmatpush.bf16.msra.mxu1 %v10892_v29  ;;  %6241 = vmatpush.bf16.msrb.mxu2 %v11400_v36  ;;  %v10825_v29 = vld [vmem:[#allocation5 + $0x58] sm:$0xf0]  ;;  %v13344_v36 = vld [vmem:[#allocation5 + $0x64c] sm:$0xf]  ;;  %v11212_v25 = vor.u32 %v13248_v40, %v11209_v23 }
 0x3b1   : >> { %v10828_v24 = vor.u32 %v13152_v62, %v10825_v29  ;;  %v11596_v22 = vor.u32 %v13344_v36, %v11593_v46  ;;  %v11017_v62 = vld [vmem:[#allocation5 + $0x1d8] sm:$0xf0]  ;;  %v5999_v29 = vpop.f32.mrf.mxu0  ;;  %v13292_v46 = vld [vmem:[#allocation5 + $0x4ac] sm:$0xf] }
 0x3b2   : >> { %v11020_v40 = vor.u32 %v13200_v33, %v11017_v62  ;;  %v11001_v36 = vld [vmem:[#allocation5 + $0x1b8] sm:$0xf0]  ;;  %v13176_v62 = vld [vmem:[#allocation5 + $0x10c] sm:$0xf] }
 0x3b3   : >> { %6326 = vmatpush.bf16.msrb.mxu0 %v11260_v16  ;;  %6368 = vmatpush.bf16.msrb.mxu3 %v11644_v19  ;;  %v11193_v16 = vld [vmem:[#allocation5 + $0x338] sm:$0xf0]  ;;  %v10812_v19 = vor.u32 %v13148_v13, %v10809_v50  ;;  %v6000_v13 = vadd.f32 %v5999_v29, %v14535_v32  ;;  %v13272_v29 = vld [vmem:[#allocation5 + $0x40c] sm:$0xf] }
 0x3b4   : >> { %6284 = vmatpush.bf16.msra.mxu1 %v10876_v35  ;;  %6242 = vmatpush.bf16.msrb.mxu2 %v11384_v26  ;;  %v13244_v35 = vld [vmem:[#allocation5 + $0x32c] sm:$0xf]  ;;  %v11577_v26 = vld [vmem:[#allocation5 + $0x638] sm:$0xf0] }
 0x3b5   : >> { %v11196_v41 = vor.u32 %v13244_v35, %v11193_v16  ;;  %v11580_v53 = vor.u32 %v13340_v37, %v11577_v26  ;;  %v6013_v35 = vpop.f32.mrf.mxu1  ;;  %v6041_v37 = vpop.f32.mrf.mxu3 }
 0x3b7   : >> { %6327 = vmatpush.bf16.msrb.mxu0 %v11244_v54  ;;  %6369 = vmatpush.bf16.msrb.mxu3 %v11628_v49  ;;  %v13240_v54 = vld [vmem:[#allocation5 + $0x30c] sm:$0xf] }
 0x3b8   : >> { %6285 = vmatpush.bf16.msra.mxu1 %v10860_v60  ;;  %6243 = vmatpush.bf16.msrb.mxu2 %v11368_v44  ;;  %v10793_v60 = vld [vmem:[#allocation5 + $0x18] sm:$0xf0]  ;;  %v13204_v49 = vld [vmem:[#allocation5 + $0x1ec] sm:$0xf]  ;;  %v11180_v52 = vor.u32 %v13240_v54, %v11177_v0 }
 0x3b9   : >> { %v11561_v44 = vld [vmem:[#allocation5 + $0x618] sm:$0xf0]  ;;  %v10796_v47 = vor.u32 %v13144_v57, %v10793_v60  ;;  %v13184_v54 = vld [vmem:[#allocation5 + $0x14c] sm:$0xf] }
 0x3ba   : >> { %v11564_v1 = vor.u32 %v13336_v59, %v11561_v44  ;;  %v11353_v57 = vld [vmem:[#allocation5 + $0x478] sm:$0xf0]  ;;  %v13280_v59 = vld [vmem:[#allocation5 + $0x44c] sm:$0xf] }
 0x3bb   : >> { %6328 = vmatpush.bf16.msrb.mxu0 %v11228_v61  ;;  %6370 = vmatpush.bf16.msrb.mxu3 %v11612_v17  ;;  %v11420_v61 = vor.u32 %v13300_v14, %v11417_v11  ;;  %v11401_v17 = vld [vmem:[#allocation5 + $0x4d8] sm:$0xf0]  ;;  %v11356_v60 = vor.u32 %v13284_v18, %v11353_v57  ;;  %v13312_v18 = vld [vmem:[#allocation5 + $0x54c] sm:$0xf] }
 0x3bc   : >> { %6286 = vmatpush.bf16.msra.mxu1 %v10844_v51  ;;  %6244 = vmatpush.bf16.msrb.mxu2 %v11352_v43  ;;  %v11036_v51 = vor.u32 %v13204_v49, %v11033_v42  ;;  %v13296_v43 = vld [vmem:[#allocation5 + $0x4cc] sm:$0xf]  ;;  %v11337_v44 = vld [vmem:[#allocation5 + $0x458] sm:$0xf0]  ;;  %v11468_v38 = vor.u32 %v13312_v18, %v11465_v58 }
 0x3bd   : >> { %v11404_v23 = vor.u32 %v13296_v43, %v11401_v17  ;;  %v11340_v11 = vor.u32 %v13280_v59, %v11337_v44  ;;  %v10921_v17 = vld [vmem:[#allocation5 + $0x118] sm:$0xf0] }
 0x3bf   : >> { %6329 = vmatpush.bf16.msrb.mxu0 %v11212_v25  ;;  %6371 = vmatpush.bf16.msrb.mxu3 %v11596_v22  ;;  %v11004_v25 = vor.u32 %v13196_v31, %v11001_v36  ;;  %v11369_v22 = vld [vmem:[#allocation5 + $0x498] sm:$0xf0]  ;;  %v13332_v31 = vld [vmem:[#allocation5 + $0x5ec] sm:$0xf] }
 0x3c0   : >> { %6287 = vmatpush.bf16.msra.mxu1 %v10828_v24  ;;  %6245 = vmatpush.bf16.msrb.mxu2 %v11336_v30  ;;  %v11385_v24 = vld [vmem:[#allocation5 + $0x4b8] sm:$0xf0]  ;;  %v13288_v30 = vld [vmem:[#allocation5 + $0x48c] sm:$0xf] }
 0x3c1   : >> { %v11388_v56 = vor.u32 %v13292_v46, %v11385_v24  ;;  %v11372_v26 = vor.u32 %v13288_v30, %v11369_v22  ;;  %v11545_v36 = vld [vmem:[#allocation5 + $0x5f8] sm:$0xf0]  ;;  %v10924_v24 = vor.u32 %v13176_v62, %v10921_v17  ;;  %v13324_v30 = vld [vmem:[#allocation5 + $0x5ac] sm:$0xf] }
 0x3c2   : >> { %v11513_v22 = vld [vmem:[#allocation5 + $0x5b8] sm:$0xf0] }
 0x3c3   : >> { %6330 = vmatpush.bf16.msrb.mxu0 %v11196_v41  ;;  %6372 = vmatpush.bf16.msrb.mxu3 %v11580_v53  ;;  %v6014_v41 = vadd.f32 %v6013_v35, %v6000_v13  ;;  %v11529_v13 = vld [vmem:[#allocation5 + $0x5d8] sm:$0xf0]  ;;  %v13320_v35 = vld [vmem:[#allocation5 + $0x58c] sm:$0xf] }
 0x3c4   : >> { %6288 = vmatpush.bf16.msra.mxu1 %v10812_v19  ;;  %6246 = vmatpush.bf16.msrb.mxu2 %v11320_v34  ;;  %v13188_v19 = vld [vmem:[#allocation5 + $0x16c] sm:$0xf]  ;;  %v11532_v2 = vor.u32 %v13328_v39, %v11529_v13 }
 0x3c5   : >> { %v6028_v34 = vadd.f32 %v6027_v27, %v6014_v41  ;;  %v10972_v53 = vor.u32 %v13188_v19, %v10969_v20  ;;  %v11497_v27 = vld [vmem:[#allocation5 + $0x598] sm:$0xf0]  ;;  %v13316_v19 = vld [vmem:[#allocation5 + $0x56c] sm:$0xf] }
 0x3c6   : >> { %v11481_v41 = vld [vmem:[#allocation5 + $0x578] sm:$0xf0] }
 0x3c7   : >> { %6331 = vmatpush.bf16.msrb.mxu0 %v11180_v52  ;;  %6373 = vmatpush.bf16.msrb.mxu3 %v11564_v1  ;;  %v6053_v50 = vpop.f32.mrf.mxu0  ;;  %v6042_v0 = vadd.f32 %v6041_v37, %v6028_v34  ;;  %v10937_v52 = vld [vmem:[#allocation5 + $0x138] sm:$0xf0]  ;;  %v11484_v20 = vor.u32 %v13316_v19, %v11481_v41 }
 0x3c8   : >> { %6289 = vmatpush.bf16.msra.mxu1 %v10796_v47  ;;  %6247 = vmatpush.bf16.msrb.mxu2 %v11304_v55  ;;  %v15253_v16 = vadd.f32 %v6053_v50, %v15237_v7  ;;  %v10953_v7 = vld [vmem:[#allocation5 + $0x158] sm:$0xf0]  ;;  %v13180_v47 = vld [vmem:[#allocation5 + $0x12c] sm:$0xf]  ;;  %v11516_v50 = vor.u32 %v13324_v30, %v11513_v22 }
 0x3c9   : >> { %v10956_v14 = vor.u32 %v13184_v54, %v10953_v7  ;;  %v13276_v55 = vld [vmem:[#allocation5 + $0x42c] sm:$0xf]  ;;  %v11321_v1 = vld [vmem:[#allocation5 + $0x438] sm:$0xf0] }
 0x3ca   : >> { %11726 = vmatmul.msk.bf16.vlgmr.msrb.gmra.mxu0 %vm15001_vm5, %v14230_v15  ;;  %11732 = vmatmul.msk.bf16.vlgmr.msrb.gmra.mxu3 %vm15202_vm4, %v14230_v15  ;;  %v11324_v33 = vor.u32 %v13276_v55, %v11321_v1  ;;  %v11433_v7 = vld [vmem:[#allocation5 + $0x518] sm:$0xf0] }
 0x3cb   : >> { %11720 = vmatmul.msk.bf16.vlgmr.msra.gmra.mxu1 %vm14889_vm12, %v14230_v15  ;;  %11714 = vmatmul.msk.bf16.vlgmr.msrb.gmra.mxu2 %vm15074_vm3, %v14230_v15 }
 0x3cc   : >> { %6296 = vmatpush.bf16.msra.mxu2 %v11036_v51  ;;  %6338 = vmatpush.bf16.msrb.mxu1 %v11420_v61  ;;  %v6095_v51 = vpop.f32.mrf.mxu3  ;;  %v10940_v61 = vor.u32 %v13180_v47, %v10937_v52 }
 0x3cd   : >> { %v6096_v43 = vadd.f32 %v6095_v51, %v14546_v63 }
 0x3cf   : >> { %v6055_v49 = vpop.f32.mrf.mxu0 }
 0x3d0   : >> { %6297 = vmatpush.bf16.msra.mxu2 %v11020_v40  ;;  %6339 = vmatpush.bf16.msrb.mxu1 %v11404_v23  ;;  %v6056_v42 = vadd.f32 %v6055_v49, %v6042_v0  ;;  %v11305_v40 = vld [vmem:[#allocation5 + $0x418] sm:$0xf0]  ;;  %v13304_v0 = vld [vmem:[#allocation5 + $0x50c] sm:$0xf] }
 0x3d1   : >> { %v11436_v44 = vor.u32 %v13304_v0, %v11433_v7 }
 0x3d4   : >> { %6298 = vmatpush.bf16.msra.mxu2 %v11004_v25  ;;  %6340 = vmatpush.bf16.msrb.mxu1 %v11388_v56  ;;  %v11308_v25 = vor.u32 %v13272_v29, %v11305_v40  ;;  %v11548_v56 = vor.u32 %v13332_v31, %v11545_v36 }
 0x3d7   : >> { %v6109_v23 = vpop.f32.mrf.mxu0 }
 0x3d8   : >> { %6299 = vmatpush.bf16.msra.mxu2 %v10988_v21  ;;  %6341 = vmatpush.bf16.msrb.mxu1 %v11372_v26  ;;  %v6110_v46 = vadd.f32 %v6109_v23, %v6096_v43  ;;  %v11500_v26 = vor.u32 %v13320_v35, %v11497_v27 }
 0x3dc   : >> { %6300 = vmatpush.bf16.msra.mxu2 %v10972_v53  ;;  %6342 = vmatpush.bf16.msrb.mxu1 %v11356_v60  ;;  %v13308_v53 = vld [vmem:[#allocation5 + $0x52c] sm:$0xf]  ;;  %v11449_v60 = vld [vmem:[#allocation5 + $0x538] sm:$0xf0] }
 0x3dd   : >> { %v11452_v54 = vor.u32 %v13308_v53, %v11449_v60 }
 0x3df   : >> { %v6111_v47 = vpop.f32.mrf.mxu0 }
 0x3e0   : >> { %6301 = vmatpush.bf16.msra.mxu2 %v10956_v14  ;;  %6343 = vmatpush.bf16.msrb.mxu1 %v11340_v11 }
 0x3e4   : >> { %6302 = vmatpush.bf16.msra.mxu2 %v10940_v61  ;;  %6344 = vmatpush.bf16.msrb.mxu1 %v11324_v33 }
 0x3e7   : >> { %v6067_v37 = vpop.f32.mrf.mxu1 }
 0x3e8   : >> { %6303 = vmatpush.bf16.msra.mxu2 %v10924_v24  ;;  %6345 = vmatpush.bf16.msrb.mxu1 %v11308_v25  ;;  %v6068_v21 = vadd.f32 %v6067_v37, %v15253_v16 }
 0x3e9   : >> { %v6165_v29 = vpop.f32.mrf.mxu0 }
 0x3eb   : >> { %11722 = vmatmul.msk.bf16.vlgmr.msra.gmra.mxu2 %vm14896_vm13, %v14230_v15  ;;  %11728 = vmatmul.msk.bf16.vlgmr.msrb.gmra.mxu1 %vm15074_vm3, %v14230_v15 }
 0x3ec   : >> { %6352 = vmatpush.bf16.msrb.mxu2 %v11548_v56 }
 0x3ef   : >> { %v6069_v57 = vpop.f32.mrf.mxu1 }
 0x3f0   : >> { %6353 = vmatpush.bf16.msrb.mxu2 %v11532_v2  ;;  %v6070_v34 = vadd.f32 %v6069_v57, %v6056_v42  ;;  %v6097_v42 = vpop.f32.mrf.mxu3 }
 0x3f1   : >> { %v6098_v45 = vadd.f32 %v6097_v42, %v14546_v63  ;;  %v12367_v63 = vld [vmem:[#allocation7 + $0x4d0] sm:$0xf] (%p2472_p4) }
 0x3f3   : >> { %v6112_v31 = vadd.f32 %v6111_v47, %v6098_v45 }
 0x3f4   : >> { %6354 = vmatpush.bf16.msrb.mxu2 %v11516_v50  ;;  %v6167_v50 = vpop.f32.mrf.mxu0 }
 0x3f7   : >> { %v6123_v59 = vpop.f32.mrf.mxu1 }
 0x3f8   : >> { %6355 = vmatpush.bf16.msrb.mxu2 %v11500_v26  ;;  %v6124_v16 = vadd.f32 %v6123_v59, %v6110_v46  ;;  %v6151_v33 = vpop.f32.mrf.mxu3 }
 0x3fc   : >> { %6356 = vmatpush.bf16.msrb.mxu2 %v11484_v20 }
 0x3ff   : >> { %v6125_v1 = vpop.f32.mrf.mxu1 }
 0x400   : >> { %6357 = vmatpush.bf16.msrb.mxu2 %v11468_v38  ;;  %v6126_v46 = vadd.f32 %v6125_v1, %v6112_v31  ;;  %v6153_v30 = vpop.f32.mrf.mxu3 }
 0x404   : >> { %6358 = vmatpush.bf16.msrb.mxu2 %v11452_v54 }
 0x408   : >> { %6359 = vmatpush.bf16.msrb.mxu2 %v11436_v44 }
 0x40a   : >> { %v6179_v40 = vpop.f32.mrf.mxu1 }
 0x40b   : >> { %11730 = vmatmul.msk.bf16.vlgmr.msrb.gmra.mxu2 %vm15143_vm2, %v14230_v15 }
 0x40d   : >> { %v6081_v49 = vpop.f32.mrf.mxu2 }
 0x40e   : >> { %v6082_v14 = vadd.f32 %v6081_v49, %v6068_v21 }
 0x410   : >> { %v11733_v11 = vmul.f32 -1.442695, %v6082_v14 }
 0x412   : >> { %13851 = vpow2.f32 %v11733_v11  ;;  %v6181_v37 = vpop.f32.mrf.mxu1 }
 0x415   : >> { %v6083_v52 = vpop.f32.mrf.mxu2 }
 0x416   : >> { %v6084_v55 = vadd.f32 %v6083_v52, %v6070_v34  ;;  %v10773_v52 = vld [vmem:[%s15276_s23 + $0x40] sm:$0xff] }
 0x418   : >> { %v11737_v51 = vmul.f32 -1.442695, %v6084_v55  ;;  %v13852_v61 = vpop.eup %13851 }
 0x419   : >> { %v6404_v62 = vadd.f32 1.0, %v13852_v61 }
 0x41a   : >> { %13853 = vpow2.f32 %v11737_v51 }
 0x41b   : >> { %13855 = vrcp.f32 %v6404_v62  ;;  %v6423_v54 = vand.u32 2147483648, %v6404_v62  ;;  %vm6417_vm13 = vweird.f32 %v6404_v62  ;;  %v6421_v7 = vand.u32 2147483647, %v6404_v62 }
 0x41d   : >> { %v6137_v43 = vpop.f32.mrf.mxu2  ;;  %v6424_v14 = vor.u32 1.1754944e-38, %v6423_v54  ;;  %vm6422_vm5 = vcmp.eq.f32.partialorder %v6421_v7, 8.507059e+37 }
 0x41e   : >> { %v6138_v17 = vadd.f32 %v6137_v43, %v6124_v16  ;;  %v10774_v43 = vld [vmem:[%s15276_s23 + $0x48] sm:$0xff] }
 0x420   : >> { %v6152_v15 = vadd.f32 %v6151_v33, %v6138_v17  ;;  %v13854_v23 = vpop.eup %13853 }
 0x421   : >> { %v15267_v25 = vadd.f32 1.0, %v13854_v23  ;;  %v13856_v2 = vpop.eup %13855 }
 0x422   : >> { %v6166_v36 = vadd.f32 %v6165_v29, %v6152_v15  ;;  %v6413_v35 = vmul.f32 %v13856_v2, %v6404_v62  ;;  %vm6418_vm12 = vweird.f32 %v13856_v2 }
 0x423   : >> { %vm6419_vm8 = vmor %vm6417_vm13, %vm6418_vm12  ;;  %v6481_v1 = vand.u32 2147483647, %v15267_v25  ;;  %vm6477_vm7 = vweird.f32 %v15267_v25  ;;  %v6483_v62 = vand.u32 2147483648, %v15267_v25 }
 0x424   : >> { %v6180_v24 = vadd.f32 %v6179_v40, %v6166_v36  ;;  %v6414_v19 = vsub.f32 1.0, %v6413_v35  ;;  %v14231_v36 = vmov 0.0   ;;  %v10778_v35 = vld [vmem:[%s15276_s23 + $0x68] sm:$0xff] }
 0x425   : >> { %v6139_v56 = vpop.f32.mrf.mxu2  ;;  %vm6482_vm15 = vcmp.eq.f32.partialorder %v6481_v1, 8.507059e+37 }
 0x426   : >> { %v11734_v39 = vmul.f32 -1.442695, %v6180_v24  ;;  %v6140_v13 = vadd.f32 %v6139_v56, %v6126_v46  ;;  %v6415_v58 = vmul.f32 %v13856_v2, %v6414_v19  ;;  %v6484_v24 = vor.u32 1.1754944e-38, %v6483_v62 }
 0x428   : >> { %13857 = vpow2.f32 %v11734_v39  ;;  %v6154_v22 = vadd.f32 %v6153_v30, %v6140_v13  ;;  %v6416_v38 = vadd.f32 %v13856_v2, %v6415_v58  ;;  %v10777_v30 = vld [vmem:[%s15276_s23 + $0x60] sm:$0xff] }
 0x429   : >> { %13859 = vrcp.f32 %v15267_v25 }
 0x42a   : >> { %v6168_v27 = vadd.f32 %v6167_v50, %v6154_v22  ;;  %v6420_v16 = vsel %vm6419_vm8, %v13856_v2, %v6416_v38 }
 0x42b   : >> { %v6425_v55 = vsel %vm6422_vm5, %v6424_v14, %v6420_v16 }
 0x42c   : >> { %v6182_v21 = vadd.f32 %v6181_v37, %v6168_v27  ;;  %vm6532_vm10 = vcmp.gt.f32.partialorder %v6425_v55, %v10773_v52 }
 0x42d   : >> { %v11741_v46 = vsel %vm6532_vm10, 1.0, %v14231_v36 }
 0x42e   : >> { %v13858_v26 = vpop.eup %13857  ;;  %v11738_v41 = vmul.f32 -1.442695, %v6182_v21 }
 0x42f   : >> { %v15270_v20 = vpop.eup %13859  ;;  %v6405_v18 = vadd.f32 1.0, %v13858_v26 }
 0x430   : >> { %13861 = vpow2.f32 %v11738_v41  ;;  %v6473_v57 = vmul.f32 %v15270_v20, %v15267_v25  ;;  %vm6478_vm2 = vweird.f32 %v15270_v20 }
 0x431   : >> { %13863 = vrcp.f32 %v6405_v18  ;;  %v6438_v11 = vand.u32 2147483648, %v6405_v18  ;;  %v6436_v47 = vand.u32 2147483647, %v6405_v18  ;;  %vm6432_vm6 = vweird.f32 %v6405_v18  ;;  %vm15286_vm14 = vmor %vm6477_vm7, %vm6478_vm2 }
 0x432   : >> { %v6474_v53 = vsub.f32 1.0, %v6473_v57  ;;  %v6221_v57 = vpop.f32.mrf.mxu0 }
 0x433   : >> { %v6439_v17 = vor.u32 1.1754944e-38, %v6438_v11  ;;  %vm6437_vm11 = vcmp.eq.f32.partialorder %v6436_v47, 8.507059e+37 }
 0x434   : >> { %v6475_v44 = vmul.f32 %v15270_v20, %v6474_v53  ;;  %v6235_v53 = vpop.f32.mrf.mxu1 }
 0x436   : >> { %v13862_v34 = vpop.eup %13861  ;;  %v6476_v51 = vadd.f32 %v15270_v20, %v6475_v44 }
 0x437   : >> { %v13864_v60 = vpop.eup %13863  ;;  %v6409_v0 = vadd.f32 1.0, %v13862_v34 }
 0x438   : >> { %v6428_v59 = vmul.f32 %v13864_v60, %v6405_v18  ;;  %vm6433_vm3 = vweird.f32 %v13864_v60  ;;  %v6480_v23 = vsel %vm15286_vm14, %v15270_v20, %v6476_v51  ;;  %v6207_v20 = vpop.f32.mrf.mxu3  ;;  %v6193_v18 = vpop.f32.mrf.mxu2 }
 0x439   : >> { %13865 = vrcp.f32 %v6409_v0  ;;  %vm6434_vm9 = vmor %vm6432_vm6, %vm6433_vm3  ;;  %v6498_v56 = vand.u32 2147483648, %v6409_v0  ;;  %v6496_v2 = vand.u32 2147483647, %v6409_v0  ;;  %v6485_v22 = vsel %vm6482_vm15, %v6484_v24, %v6480_v23 }
 0x43a   : >> { %v6429_v49 = vsub.f32 1.0, %v6428_v59  ;;  %vm6492_vm4 = vweird.f32 %v6409_v0  ;;  %vm6536_vm13 = vcmp.gt.f32.partialorder %v6485_v22, %v10777_v30  ;;  %v6194_v38 = vadd.f32 %v6193_v18, %v14589_v48  ;;  %v6223_v16 = vpop.f32.mrf.mxu0 }
 0x43b   : >> { %v6499_v27 = vor.u32 1.1754944e-38, %v6498_v56  ;;  %vm6497_vm8 = vcmp.eq.f32.partialorder %v6496_v2, 8.507059e+37  ;;  %v11745_v26 = vsel %vm6536_vm13, 1.0, %v14231_v36 }
 0x43c   : >> { %v6430_v42 = vmul.f32 %v13864_v60, %v6429_v49  ;;  %v6237_v14 = vpop.f32.mrf.mxu1 }
 0x43e   : >> { %v6431_v61 = vadd.f32 %v13864_v60, %v6430_v42 }
 0x43f   : >> { %v13866_v33 = vpop.eup %13865 }
 0x440   : >> { %v6435_v29 = vsel %vm6434_vm9, %v13864_v60, %v6431_v61  ;;  %v6488_v45 = vmul.f32 %v13866_v33, %v6409_v0  ;;  %vm6493_vm1 = vweird.f32 %v13866_v33  ;;  %v6209_v58 = vpop.f32.mrf.mxu3  ;;  %v6208_v60 = vadd.f32 %v6207_v20, %v6194_v38 }
 0x441   : >> { %v6440_v40 = vsel %vm6437_vm11, %v6439_v17, %v6435_v29  ;;  %vm6494_vm12 = vmor %vm6492_vm4, %vm6493_vm1 }
 0x442   : >> { %vm6533_vm0 = vcmp.gt.f32.partialorder %v6440_v40, %v10774_v43  ;;  %v6489_v31 = vsub.f32 1.0, %v6488_v45  ;;  %v6222_v59 = vadd.f32 %v6221_v57, %v6208_v60  ;;  %v6277_v52 = vpop.f32.mrf.mxu0 }
 0x443   : >> { %v11742_v25 = vsel %vm6533_vm0, 1.0, %v14231_v36 }
 0x444   : >> { %v15295_v34 = vpack.c.bf16 %v11742_v25, %v11741_v46   ;;  %v6490_v13 = vmul.f32 %v13866_v33, %v6489_v31  ;;  %v6236_v49 = vadd.f32 %v6235_v53, %v6222_v59 }
 0x446   : >> { %v15632_v39 = vmov %v15295_v34  ;;  %v6491_v50 = vadd.f32 %v13866_v33, %v6490_v13  ;;  %v6195_v34 = vpop.f32.mrf.mxu2 }
 0x447   : >> { %v6196_v7 = vadd.f32 %v6195_v34, %v14589_v48  ;;  %v13524_v48 = vld [vmem:[#allocation7 + $0x4e8] sm:$0xf0] (%p2472_p4) }
 0x448   : >> { %v6495_v37 = vsel %vm6494_vm12, %v13866_v33, %v6491_v50  ;;  %v6263_v54 = vpop.f32.mrf.mxu3  ;;  %v6291_v61 = vpop.f32.mrf.mxu1 }
 0x449   : >> { %v6500_v21 = vsel %vm6497_vm8, %v6499_v27, %v6495_v37  ;;  %v6210_v44 = vadd.f32 %v6209_v58, %v6196_v7  ;;  %v6292_v40 = vadd.f32 %v6291_v61, %v14594_v12 }
 0x44a   : >> { %vm6537_vm5 = vcmp.gt.f32.partialorder %v6500_v21, %v10778_v35  ;;  %v6279_v15 = vpop.f32.mrf.mxu0 }
 0x44b   : >> { %v11746_v19 = vsel %vm6537_vm5, 1.0, %v14231_v36 }
 0x44c   : >> { %v15301_v47 = vpack.c.bf16 %v11746_v19, %v11745_v26  }
 0x44e   : >> { %v15633_v41 = vmov %v15301_v47  ;;  %v6249_v0 = vpop.f32.mrf.mxu2  ;;  %v6224_v47 = vadd.f32 %v6223_v16, %v6210_v44 }
 0x44f   : >> { %v6250_v11 = vadd.f32 %v6249_v0, %v6236_v49 }
 0x450   : >> { %v6265_v42 = vpop.f32.mrf.mxu3  ;;  %v6238_v51 = vadd.f32 %v6237_v14, %v6224_v47  ;;  %v6293_v46 = vpop.f32.mrf.mxu1 }
 0x451   : >> { %v6264_v1 = vadd.f32 %v6263_v54, %v6250_v11  ;;  %v6294_v22 = vadd.f32 %v6293_v46, %v14594_v12  ;;  %v12591_v12 = vld [vmem:[#allocation7 + $0x690] sm:$0xf] (%p2472_p4) }
 0x452   : >> { %v6333_v13 = vpop.f32.mrf.mxu0 }
 0x453   : >> { %v6278_v33 = vadd.f32 %v6277_v52, %v6264_v1 }
 0x455   : >> { %v11735_v29 = vmul.f32 -1.442695, %v6278_v33 }
 0x456   : >> { %v6251_v55 = vpop.f32.mrf.mxu2 }
 0x457   : >> { %v6252_v62 = vadd.f32 %v6251_v55, %v6238_v51  ;;  %13867 = vpow2.f32 %v11735_v29 }
 0x458   : >> { %v6319_v43 = vpop.f32.mrf.mxu3 }
 0x459   : >> { %v6266_v45 = vadd.f32 %v6265_v42, %v6252_v62 }
 0x45a   : >> { %v6335_v57 = vpop.f32.mrf.mxu0 }
 0x45b   : >> { %v6280_v23 = vadd.f32 %v6279_v15, %v6266_v45 }
 0x45d   : >> { %v11739_v25 = vmul.f32 -1.442695, %v6280_v23  ;;  %v13868_v30 = vpop.eup %13867 }
 0x45e   : >> { %v6406_v27 = vadd.f32 1.0, %v13868_v30 }
 0x45f   : >> { %13869 = vpow2.f32 %v11739_v25 }
 0x460   : >> { %v6321_v24 = vpop.f32.mrf.mxu3  ;;  %13871 = vrcp.f32 %v6406_v27  ;;  %vm6447_vm2 = vweird.f32 %v6406_v27  ;;  %v6451_v45 = vand.u32 2147483647, %v6406_v27 }
 0x462   : >> { %vm6452_vm7 = vcmp.eq.f32.partialorder %v6451_v45, 8.507059e+37 }
 0x465   : >> { %v13870_v18 = vpop.eup %13869 }
 0x466   : >> { %v15307_v53 = vadd.f32 1.0, %v13870_v18  ;;  %v13872_v54 = vpop.eup %13871 }
 0x467   : >> { %v6443_v16 = vmul.f32 %v13872_v54, %v6406_v27  ;;  %vm6448_vm3 = vweird.f32 %v13872_v54 }
 0x468   : >> { %v6347_v37 = vpop.f32.mrf.mxu1  ;;  %v6375_v19 = vpop.f32.mrf.mxu3  ;;  %vm6449_vm6 = vmor %vm6447_vm2, %vm6448_vm3  ;;  %v6511_v30 = vand.u32 2147483647, %v15307_v53  ;;  %vm6507_vm14 = vweird.f32 %v15307_v53 }
 0x469   : >> { %v6444_v42 = vsub.f32 1.0, %v6443_v16 }
 0x46a   : >> { %vm6512_vm12 = vcmp.eq.f32.partialorder %v6511_v30, 8.507059e+37  ;;  %v13405_v30 = vld [vmem:[#allocation7 + $0x130] sm:$0xf0] (%p2472_p4) }
 0x46b   : >> { %v6445_v1 = vmul.f32 %v13872_v54, %v6444_v42 }
 0x46d   : >> { %v6446_v33 = vadd.f32 %v13872_v54, %v6445_v1  ;;  %v13419_v1 = vld [vmem:[#allocation7 + $0x1a0] sm:$0xf0] (%p2472_p4) }
 0x46e   : >> { %v6305_v17 = vpop.f32.mrf.mxu2 }
 0x46f   : >> { %v6306_v31 = vadd.f32 %v6305_v17, %v6292_v40  ;;  %v6453_v17 = vand.u32 2147483648, %v6406_v27  ;;  %v6450_v40 = vsel %vm6449_vm6, %v13872_v54, %v6446_v33  ;;  %v6513_v27 = vand.u32 2147483648, %v15307_v53 }
 0x470   : >> { %v6349_v0 = vpop.f32.mrf.mxu1  ;;  %v6377_v49 = vpop.f32.mrf.mxu3 }
 0x471   : >> { %v6320_v56 = vadd.f32 %v6319_v43, %v6306_v31  ;;  %v6454_v46 = vor.u32 1.1754944e-38, %v6453_v17  ;;  %v13531_v17 = vld [vmem:[#allocation7 + $0x520] sm:$0xf0] (%p2472_p4) }
 0x473   : >> { %v6334_v35 = vadd.f32 %v6333_v13, %v6320_v56  ;;  %v10775_v13 = vld [vmem:[%s15276_s23 + $0x50] sm:$0xff] }
 0x475   : >> { %v6348_v26 = vadd.f32 %v6347_v37, %v6334_v35  ;;  %v10776_v37 = vld [vmem:[%s15276_s23 + $0x58] sm:$0xff] }
 0x476   : >> { %v6307_v2 = vpop.f32.mrf.mxu2 }
 0x477   : >> { %v6308_v50 = vadd.f32 %v6307_v2, %v6294_v22  ;;  %v6455_v2 = vsel %vm6452_vm7, %v6454_v46, %v6450_v40  ;;  %v13587_v40 = vld [vmem:[#allocation7 + $0x6e0] sm:$0xf0] (%p2472_p4)  ;;  %v13412_v46 = vld [vmem:[#allocation7 + $0x168] sm:$0xf0] (%p2472_p4) }
 0x478   : >> { %vm6534_vm0 = vcmp.gt.f32.partialorder %v6455_v2, %v10775_v13  ;;  %v13580_v13 = vld [vmem:[#allocation7 + $0x6a8] sm:$0xf0] (%p2472_p4)  ;;  %v11891_v2 = vld [vmem:[#allocation7 + $0x118] sm:$0xf] (%p2472_p4) }
 0x479   : >> { %v6322_v21 = vadd.f32 %v6321_v24, %v6308_v50 }
 0x47b   : >> { %v6336_v38 = vadd.f32 %v6335_v57, %v6322_v21 }
 0x47d   : >> { %v6350_v7 = vadd.f32 %v6349_v0, %v6336_v38  ;;  %v11743_v38 = vsel %vm6534_vm0, 1.0, %v14231_v36 }
 0x48e   : >> { %v6361_v20 = vpop.f32.mrf.mxu2 }
 0x48f   : >> { %v6362_v58 = vadd.f32 %v6361_v20, %v6348_v26 }
 0x491   : >> { %v6376_v34 = vadd.f32 %v6375_v19, %v6362_v58 }
 0x493   : >> { %v11736_v60 = vmul.f32 -1.442695, %v6376_v34  ;;  %v6514_v34 = vor.u32 1.1754944e-38, %v6513_v27  ;;  %v12339_v27 = vld [vmem:[#allocation7 + $0x498] sm:$0xf] (%p2472_p4) }
 0x495   : >> { %13873 = vpow2.f32 %v11736_v60 }
 0x496   : >> { %13875 = vrcp.f32 %v15307_v53  ;;  %v6363_v59 = vpop.f32.mrf.mxu2 }
 0x497   : >> { %v6364_v44 = vadd.f32 %v6363_v59, %v6350_v7  ;;  %v10779_v59 = vld [vmem:[%s15276_s23 + $0x70] sm:$0xff] }
 0x499   : >> { %v6378_v14 = vadd.f32 %v6377_v49, %v6364_v44  ;;  %v10780_v49 = vld [vmem:[%s15276_s23 + $0x78] sm:$0xff] }
 0x49b   : >> { %v13874_v11 = vpop.eup %13873  ;;  %v11740_v47 = vmul.f32 -1.442695, %v6378_v14 }
 0x49c   : >> { %v13876_v52 = vpop.eup %13875  ;;  %v6407_v55 = vadd.f32 1.0, %v13874_v11 }
 0x49d   : >> { %13877 = vpow2.f32 %v11740_v47  ;;  %v6503_v51 = vmul.f32 %v13876_v52, %v15307_v53  ;;  %vm6508_vm10 = vweird.f32 %v13876_v52 }
 0x49e   : >> { %13879 = vrcp.f32 %v6407_v55  ;;  %v6468_v24 = vand.u32 2147483648, %v6407_v55  ;;  %v6466_v56 = vand.u32 2147483647, %v6407_v55  ;;  %vm6462_vm11 = vweird.f32 %v6407_v55  ;;  %vm15316_vm4 = vmor %vm6507_vm14, %vm6508_vm10 }
 0x49f   : >> { %v6504_v62 = vsub.f32 1.0, %v6503_v51  ;;  %v12171_v51 = vld [vmem:[#allocation7 + $0x348] sm:$0xf] (%p2472_p4) }
 0x4a0   : >> { %v6469_v21 = vor.u32 1.1754944e-38, %v6468_v24  ;;  %vm6467_vm1 = vcmp.eq.f32.partialorder %v6466_v56, 8.507059e+37  ;;  %v12143_v24 = vld [vmem:[#allocation7 + $0x310] sm:$0xf] (%p2472_p4) }
 0x4a1   : >> { %v6505_v23 = vmul.f32 %v13876_v52, %v6504_v62  ;;  %v13475_v62 = vld [vmem:[#allocation7 + $0x360] sm:$0xf0] (%p2472_p4) }
 0x4a3   : >> { %v13878_v61 = vpop.eup %13877  ;;  %v6506_v22 = vadd.f32 %v13876_v52, %v6505_v23  ;;  %v11919_v23 = vld [vmem:[#allocation7 + $0x150] sm:$0xf] (%p2472_p4) }
 0x4a4   : >> { %v13880_v43 = vpop.eup %13879  ;;  %v6411_v29 = vadd.f32 1.0, %v13878_v61  ;;  %v11920_v56 = vor.u32 (%p2472_p4), %v13412_v46, %v11919_v23  ;;  %v13440_v23 = vld [vmem:[#allocation7 + $0x248] sm:$0xf0] (%p2472_p4) }
 0x4a5   : >> { %v6458_v15 = vmul.f32 %v13880_v43, %v6407_v55  ;;  %vm6463_vm9 = vweird.f32 %v13880_v43  ;;  %v6510_v58 = vsel %vm15316_vm4, %v13876_v52, %v6506_v22  ;;  %v12592_v22 = vor.u32 (%p2472_p4), %v13580_v13, %v12591_v12  ;;  %v13496_v46 = vld [vmem:[#allocation7 + $0x408] sm:$0xf0] (%p2472_p4)  ;;  %v13377_v12 = vld [vmem:[#allocation7 + $0x50] sm:$0xf0] (%p2472_p4) }
 0x4a6   : >> { %13881 = vrcp.f32 %v6411_v29  ;;  %vm6464_vm15 = vmor %vm6462_vm11, %vm6463_vm9  ;;  %v6528_v60 = vand.u32 2147483648, %v6411_v29  ;;  %v6526_v7 = vand.u32 2147483647, %v6411_v29  ;;  %v6515_v16 = vsel %vm6512_vm12, %v6514_v34, %v6510_v58  ;;  %v11863_v58 = vld [vmem:[#allocation7 + $0xe0] sm:$0xf] (%p2472_p4) }
 0x4a7   : >> { %v6459_v31 = vsub.f32 1.0, %v6458_v15  ;;  %vm6522_vm5 = vweird.f32 %v6411_v29  ;;  %vm6538_vm2 = vcmp.gt.f32.partialorder %v6515_v16, %v10779_v59  ;;  %v15641_v34 = vmov %v15632_v39  ;;  %v12619_v15 = vld [vmem:[#allocation7 + $0x6c8] sm:$0xf] (%p2472_p4)  ;;  %v13566_v59 = vld [vmem:[#allocation7 + $0x638] sm:$0xf0] (%p2472_p4) }
 0x4a8   : >> { %v6529_v14 = vor.u32 1.1754944e-38, %v6528_v60  ;;  %vm6527_vm6 = vcmp.eq.f32.partialorder %v6526_v7, 8.507059e+37  ;;  %v11747_v47 = vsel %vm6538_vm2, 1.0, %v14231_v36  ;;  %v12087_v34 = vld [vmem:[#allocation7 + $0x2a0] sm:$0xf] (%p2472_p4) }
 0x4a9   : >> { %v6460_v25 = vmul.f32 %v13880_v43, %v6459_v31  ;;  %v12620_v31 = vor.u32 (%p2472_p4), %v13587_v40, %v12619_v15  ;;  %v12311_v60 = vld [vmem:[#allocation7 + $0x460] sm:$0xf] (%p2472_p4)  ;;  %v12031_v15 = vld [vmem:[#allocation7 + $0x230] sm:$0xf] (%p2472_p4) }
 0x4aa   : > { %v12535_v7 = vld [vmem:[#allocation7 + $0x620] sm:$0xf] (%p2472_p4) }
 0x4ab   : >> { %v6461_v50 = vadd.f32 %v13880_v43, %v6460_v25  ;;  %v13468_v25 = vld [vmem:[#allocation7 + $0x328] sm:$0xf0] (%p2472_p4)  ;;  %8030 = vmatpush.bf16.msra.mxu3 (%p2472_p4), %v12620_v31  ;;  %v12255_v31 = vld [vmem:[#allocation7 + $0x3f0] sm:$0xf] (%p2472_p4) }
 0x4ac   : >> { %v13882_v35 = vpop.eup %13881  ;;  %v12144_v32 = vor.u32 (%p2472_p4), %v13468_v25, %v12143_v24  ;;  %v12479_v24 = vld [vmem:[#allocation7 + $0x5b0] sm:$0xf] (%p2472_p4)  ;;  %v13552_v25 = vld [vmem:[#allocation7 + $0x5c8] sm:$0xf0] (%p2472_p4) }
 0x4ad   : >> { %v6465_v26 = vsel %vm6464_vm15, %v13880_v43, %v6461_v50  ;;  %v6518_v19 = vmul.f32 %v13882_v35, %v6411_v29  ;;  %vm6523_vm8 = vweird.f32 %v13882_v35  ;;  %v12395_v43 = vld [vmem:[#allocation7 + $0x508] sm:$0xf] (%p2472_p4)  ;;  %v12172_v29 = vor.u32 (%p2472_p4), %v13475_v62, %v12171_v51  ;;  %v12115_v50 = vld [vmem:[#allocation7 + $0x2d8] sm:$0xf] (%p2472_p4) }
 0x4ae   : >> { %v6470_v18 = vsel %vm6467_vm1, %v6469_v21, %v6465_v26  ;;  %vm6524_vm3 = vmor %vm6522_vm5, %vm6523_vm8  ;;  %v12396_v45 = vor.u32 (%p2472_p4), %v13531_v17, %v12395_v43  ;;  %v13517_v21 = vld [vmem:[#allocation7 + $0x4b0] sm:$0xf0] (%p2472_p4)  ;;  %v12563_v26 = vld [vmem:[#allocation7 + $0x658] sm:$0xf] (%p2472_p4)  ;;  %v12480_v13 = vor.u32 (%p2472_p4), %v13552_v25, %v12479_v24 }
 0x4af   : >> { %vm6535_vm13 = vcmp.gt.f32.partialorder %v6470_v18, %v10776_v37  ;;  %v6519_v57 = vsub.f32 1.0, %v6518_v19  ;;  %8002 = vmatpush.bf16.msra.mxu1 (%p2472_p4), %v12172_v29  ;;  %v11892_v37 = vor.u32 (%p2472_p4), %v13405_v30, %v11891_v2  ;;  %v13573_v19 = vld [vmem:[#allocation7 + $0x670] sm:$0xf0] (%p2472_p4)  ;;  %v12340_v18 = vor.u32 (%p2472_p4), %v13517_v21, %v12339_v27  ;;  %8031 = vmatpush.bf16.msra.mxu3 (%p2472_p4), %v12592_v22  ;;  %v12507_v51 = vld [vmem:[#allocation7 + $0x5e8] sm:$0xf] (%p2472_p4) }
 0x4b0   : >> { %v11744_v53 = vsel %vm6535_vm13, 1.0, %v14231_v36  ;;  %8016 = vmatpush.bf16.msra.mxu2 (%p2472_p4), %v12396_v45  ;;  %v11807_v29 = vld [vmem:[#allocation7 + $0x70] sm:$0xf] (%p2472_p4)  ;;  %v13384_v45 = vld [vmem:[#allocation7 + $0x88] sm:$0xf0] (%p2472_p4) }
 0x4b1   : >> { %v15324_v61 = vpack.c.bf16 %v11744_v53, %v11743_v38   ;;  %v6520_v0 = vmul.f32 %v13882_v35, %v6519_v57  ;;  %v13398_v57 = vld [vmem:[#allocation7 + $0xf8] sm:$0xf0] (%p2472_p4)  ;;  %v12564_v38 = vor.u32 (%p2472_p4), %v13573_v19, %v12563_v26  ;;  %v13433_v2 = vld [vmem:[#allocation7 + $0x210] sm:$0xf0] (%p2472_p4)  ;;  %v12227_v30 = vld [vmem:[#allocation7 + $0x3b8] sm:$0xf] (%p2472_p4) }
 0x4b2   : > { %v13454_v53 = vld [vmem:[#allocation7 + $0x2b8] sm:$0xf0] (%p2472_p4)  ;;  %v11864_v16 = vor.u32 (%p2472_p4), %v13398_v57, %v11863_v58  ;;  %v13489_v22 = vld [vmem:[#allocation7 + $0x3d0] sm:$0xf0] (%p2472_p4)  ;;  %v12199_v58 = vld [vmem:[#allocation7 + $0x380] sm:$0xf] (%p2472_p4) }
 0x4b3   : >> { %v15636_v54 = vmov %v15324_v61  ;;  %v6521_v44 = vadd.f32 %v13882_v35, %v6520_v0  ;;  %8003 = vmatpush.bf16.msra.mxu1 (%p2472_p4), %v12144_v32  ;;  %v13510_v0 = vld [vmem:[#allocation7 + $0x478] sm:$0xf0] (%p2472_p4)  ;;  %8032 = vmatpush.bf16.msra.mxu3 (%p2472_p4), %v12564_v38  ;;  %v12032_v32 = vor.u32 (%p2472_p4), %v13440_v23, %v12031_v15  ;;  %v12228_v19 = vor.u32 (%p2472_p4), %v13489_v22, %v12227_v30  ;;  %v12423_v38 = vld [vmem:[#allocation7 + $0x540] sm:$0xf] (%p2472_p4)  ;;  %v13409_v23 = vld [vmem:[#allocation7 + $0x154] sm:$0xf] (%p2472_p4) }
 0x4b4   : >> { %v15640_v61 = vmov %v15636_v54  ;;  %v13370_v21 = vld [vmem:[#allocation7 + $0x18] sm:$0xf0] (%p2472_p4)  ;;  %v12145_v25 = vld [vmem:[#allocation7 + $0x32c] sm:$0xf0] (%p2472_p4)  ;;  %v11893_v30 = vld [vmem:[#allocation7 + $0x134] sm:$0xf0] (%p2472_p4) }
 0x4b5   : >> { %v6525_v11 = vsel %vm6524_vm3, %v13882_v35, %v6521_v44  ;;  %v12368_v61 = vor.u32 (%p2472_p4), %v13524_v48, %v12367_v63  ;;  %v13461_v35 = vld [vmem:[#allocation7 + $0x2f0] sm:$0xf0] (%p2472_p4)  ;;  %v12088_v44 = vor.u32 (%p2472_p4), %v13454_v53, %v12087_v34  ;;  %v12256_v63 = vor.u32 (%p2472_p4), %v13496_v46, %v12255_v31  ;;  %v11779_v48 = vld [vmem:[#allocation7 + $0x38] sm:$0xf] (%p2472_p4)  ;;  %v13482_v34 = vld [vmem:[#allocation7 + $0x398] sm:$0xf0] (%p2472_p4) }
 0x4b6   : >> { %v6530_v42 = vsel %vm6527_vm6, %v6529_v14, %v6525_v11  ;;  %v12116_v20 = vor.u32 (%p2472_p4), %v13461_v35, %v12115_v50  ;;  %v11835_v14 = vld [vmem:[#allocation7 + $0xa8] sm:$0xf] (%p2472_p4)  ;;  %v13391_v11 = vld [vmem:[#allocation7 + $0xc0] sm:$0xf0] (%p2472_p4)  ;;  %v12451_v50 = vld [vmem:[#allocation7 + $0x578] sm:$0xf] (%p2472_p4)  ;;  %v11780_v27 = vor.u32 (%p2472_p4), %v13377_v12, %v11779_v48 }
 0x4b7   : >> { %vm6539_vm7 = vcmp.gt.f32.partialorder %v6530_v42, %v10780_v49  ;;  %8017 = vmatpush.bf16.msra.mxu2 (%p2472_p4), %v12368_v61  ;;  %v12059_v42 = vld [vmem:[#allocation7 + $0x268] sm:$0xf] (%p2472_p4)  ;;  %v11836_v62 = vor.u32 (%p2472_p4), %v13391_v11, %v11835_v14  ;;  %v12003_v61 = vld [vmem:[#allocation7 + $0x1f8] sm:$0xf] (%p2472_p4)  ;;  %v13545_v35 = vld [vmem:[#allocation7 + $0x590] sm:$0xf0] (%p2472_p4) }
 0x4b8   : >> { %v11748_v52 = vsel %vm6539_vm7, 1.0, %v14231_v36  ;;  %2474 = sbr.rel (!%p2472_p4) target bundleno = 504 (0x1f8), region = 153  ;;  %v11947_v36 = vld [vmem:[#allocation7 + $0x188] sm:$0xf] (%p2472_p4)  ;;  %8004 = vmatpush.bf16.msra.mxu1 (%p2472_p4), %v12116_v20  ;;  %v12004_v26 = vor.u32 (%p2472_p4), %v13433_v2, %v12003_v61  ;;  %v11975_v20 = vld [vmem:[#allocation7 + $0x1c0] sm:$0xf] (%p2472_p4)  ;;  %v12452_v57 = vor.u32 (%p2472_p4), %v13545_v35, %v12451_v50 }
 0x4b9   : >> { %v15330_v49 = vpack.c.bf16 %v11748_v52, %v11747_v47   ;;  %v15639_v47 = vmov %v15633_v41  ;;  %v11948_v33 = vor.u32 (%p2472_p4), %v13419_v1, %v11947_v36  ;;  %v13447_v52 = vld [vmem:[#allocation7 + $0x280] sm:$0xf0] (%p2472_p4)  ;;  %v12283_v36 = vld [vmem:[#allocation7 + $0x428] sm:$0xf] (%p2472_p4)  ;;  %v13538_v53 = vld [vmem:[#allocation7 + $0x558] sm:$0xf0] (%p2472_p4) }
 0x4ba   : > { %v12536_v47 = vor.u32 (%p2472_p4), %v13566_v59, %v12535_v7  ;;  %v13503_v1 = vld [vmem:[#allocation7 + $0x440] sm:$0xf0] (%p2472_p4)  ;;  %v12060_v43 = vor.u32 (%p2472_p4), %v13447_v52, %v12059_v42  ;;  %v13472_v7 = vld [vmem:[#allocation7 + $0x34c] sm:$0xf] (%p2472_p4)  ;;  %v6822_v59 = vunpack.c.l.b16 (%p2472_p4), %v15636_v54  ;;  %v12397_v14 = vld [vmem:[#allocation7 + $0x524] sm:$0xf0] (%p2472_p4)  ;;  %v6820_v42 = vunpack.c.l.b16 (%p2472_p4), %v15632_v39 }
 0x4bb   : >> { %v15637_v55 = vmov %v15330_v49  ;;  %7988 = vmatpush.bf16.msra.mxu0 (%p2472_p4), %v11948_v33  ;;  %8018 = vmatpush.bf16.msra.mxu2 (%p2472_p4), %v12340_v18  ;;  %v13559_v33 = vld [vmem:[#allocation7 + $0x600] sm:$0xf0] (%p2472_p4)  ;;  %v12284_v17 = vor.u32 (%p2472_p4), %v13503_v1, %v12283_v36  ;;  %v13426_v18 = vld [vmem:[#allocation7 + $0x1d8] sm:$0xf0] (%p2472_p4)  ;;  %v12200_v36 = vor.u32 (%p2472_p4), %v13482_v34, %v12199_v58  ;;  %v13584_v1 = vld [vmem:[#allocation7 + $0x6cc] sm:$0xf] (%p2472_p4) }
 0x4bc   : >> { %v15638_v49 = vmov %v15637_v55  ;;  %8005 = vmatpush.bf16.msra.mxu1 (%p2472_p4), %v12088_v44  ;;  %8033 = vmatpush.bf16.msra.mxu3 (%p2472_p4), %v12536_v47  ;;  %v12508_v40 = vor.u32 (%p2472_p4), %v13559_v33, %v12507_v51  ;;  %v12173_v44 = vld [vmem:[#allocation7 + $0x364] sm:$0xf0] (%p2472_p4)  ;;  %v6826_v11 = vunpack.c.l.b16 (%p2472_p4), %v15637_v55  ;;  %v6824_v47 = vunpack.c.l.b16 (%p2472_p4), %v15633_v41  ;;  %v11921_v31 = vld [vmem:[#allocation7 + $0x16c] sm:$0xf0] (%p2472_p4)  ;;  %v13465_v46 = vld [vmem:[#allocation7 + $0x314] sm:$0xf] (%p2472_p4) }
 0x4bd   : > { %v12312_v49 = vor.u32 %v13510_v0, %v12311_v60  ;;  %v13416_v60 = vld [vmem:[#allocation7 + $0x18c] sm:$0xf]  ;;  %v11949_v0 = vld [vmem:[#allocation7 + $0x1a4] sm:$0xf0]  ;;  %v11976_v52 = vor.u32 %v13426_v18, %v11975_v20  ;;  %v6823_v33 = vunpack.c.h.b16 %v15636_v54  ;;  %v12176_v15 = vor.u32 %v13472_v7, %v12173_v44  ;;  %v13402_v2 = vld [vmem:[#allocation7 + $0x11c] sm:$0xf] }
 0x4be   : > { %v12621_v51 = vld [vmem:[#allocation7 + $0x6e4] sm:$0xf0]  ;;  %v15355_v54 = vpack.c.b16 %v6826_v11, %v6822_v59  ;;  %v15357_v48 = vpack.c.b16 %v6824_v47, %v6820_v42  ;;  %v12148_v61 = vor.u32 %v13465_v46, %v12145_v25  ;;  %v13458_v22 = vld [vmem:[#allocation7 + $0x2dc] sm:$0xf]  ;;  %v12117_v35 = vld [vmem:[#allocation7 + $0x2f4] sm:$0xf0] }
 0x4bf   : > { %7989 = vmatpush.bf16.msra.mxu0 %v11920_v56  ;;  %8019 = vmatpush.bf16.msra.mxu2 %v12312_v49  ;;  %v11808_v56 = vor.u32 %v13384_v45, %v11807_v29  ;;  %v13528_v49 = vld [vmem:[#allocation7 + $0x50c] sm:$0xf]  ;;  %v6821_v29 = vunpack.c.h.b16 %v15632_v39  ;;  %v6825_v45 = vunpack.c.h.b16 %v15633_v41  ;;  %v12624_v24 = vor.u32 %v13584_v1, %v12621_v51  ;;  %v13395_v58 = vld [vmem:[#allocation7 + $0xe4] sm:$0xf]  ;;  %v12537_v59 = vld [vmem:[#allocation7 + $0x63c] sm:$0xf0] }
 0x4c0   : > { %8006 = vmatpush.bf16.msra.mxu1 %v12060_v43  ;;  %8034 = vmatpush.bf16.msra.mxu3 %v12508_v40  ;;  %v12424_v43 = vor.u32 %v13538_v53, %v12423_v38  ;;  %v12400_v40 = vor.u32 %v13528_v49, %v12397_v14  ;;  %v11924_v41 = vor.u32 %v13409_v23, %v11921_v31  ;;  %v13451_v34 = vld [vmem:[#allocation7 + $0x2a4] sm:$0xf]  ;;  %v12089_v53 = vld [vmem:[#allocation7 + $0x2bc] sm:$0xf0]  ;;  %v13388_v14 = vld [vmem:[#allocation7 + $0xac] sm:$0xf] }
 0x4c1   : > { %v15361_v12 = vpack.c.b16 %v6825_v45, %v6821_v29  ;;  %v12120_v20 = vor.u32 %v13458_v22, %v12117_v35  ;;  %v13563_v7 = vld [vmem:[#allocation7 + $0x624] sm:$0xf]  ;;  %v12092_v44 = vor.u32 %v13451_v34, %v12089_v53  ;;  %v11837_v11 = vld [vmem:[#allocation7 + $0xc4] sm:$0xf0]  ;;  %v13444_v42 = vld [vmem:[#allocation7 + $0x26c] sm:$0xf] }
 0x4c2   : > { %v12540_v47 = vor.u32 %v13563_v7, %v12537_v59  ;;  %v12285_v1 = vld [vmem:[#allocation7 + $0x444] sm:$0xf0]  ;;  %v13556_v51 = vld [vmem:[#allocation7 + $0x5ec] sm:$0xf]  ;;  %v13381_v29 = vld [vmem:[#allocation7 + $0x74] sm:$0xf] }
 0x4c3   : > { %7990 = vmatpush.bf16.msra.mxu0 %v11892_v37  ;;  %8020 = vmatpush.bf16.msra.mxu2 %v12284_v17  ;;  %v11751_v37 = vld [vmem:[#allocation7] sm:$0xf]  ;;  %v11952_v17 = vor.u32 %v13416_v60, %v11949_v0  ;;  %v13507_v60 = vld [vmem:[#allocation7 + $0x464] sm:$0xf]  ;;  %v11809_v45 = vld [vmem:[#allocation7 + $0x8c] sm:$0xf0] }
 0x4c4   : > { %8007 = vmatpush.bf16.msra.mxu1 %v12032_v32  ;;  %8035 = vmatpush.bf16.msra.mxu3 %v12480_v13  ;;  %v12369_v32 = vld [vmem:[#allocation7 + $0x4ec] sm:$0xf0]  ;;  %v12313_v0 = vld [vmem:[#allocation7 + $0x47c] sm:$0xf0]  ;;  %v13493_v31 = vld [vmem:[#allocation7 + $0x3f4] sm:$0xf] }
 0x4c5   : > { %v12316_v49 = vor.u32 %v13507_v60, %v12313_v0  ;;  %v12033_v23 = vld [vmem:[#allocation7 + $0x24c] sm:$0xf0]  ;;  %v12229_v22 = vld [vmem:[#allocation7 + $0x3d4] sm:$0xf0]  ;;  %v12201_v34 = vld [vmem:[#allocation7 + $0x39c] sm:$0xf0] }
 0x4c6   : > { %v12257_v46 = vld [vmem:[#allocation7 + $0x40c] sm:$0xf0]  ;;  %v12453_v35 = vld [vmem:[#allocation7 + $0x594] sm:$0xf0]  ;;  %v12425_v53 = vld [vmem:[#allocation7 + $0x55c] sm:$0xf0] }
 0x4c7   : > { %7991 = vmatpush.bf16.msra.mxu0 %v11864_v16  ;;  %8021 = vmatpush.bf16.msra.mxu2 %v12256_v63  ;;  %v11752_v16 = vor.u32 %v13370_v21, %v11751_v37  ;;  %v12593_v63 = vld [vmem:[#allocation7 + $0x6ac] sm:$0xf0]  ;;  %v12341_v37 = vld [vmem:[#allocation7 + $0x4b4] sm:$0xf0]  ;;  %v13570_v21 = vld [vmem:[#allocation7 + $0x65c] sm:$0xf] }
 0x4c8   : > { %8008 = vmatpush.bf16.msra.mxu1 %v12004_v26  ;;  %8036 = vmatpush.bf16.msra.mxu3 %v12452_v57  ;;  %v12565_v26 = vld [vmem:[#allocation7 + $0x674] sm:$0xf0]  ;;  %v11865_v57 = vld [vmem:[#allocation7 + $0xfc] sm:$0xf0]  ;;  %v12481_v25 = vld [vmem:[#allocation7 + $0x5cc] sm:$0xf0] }
 0x4c9   : > { %v12568_v38 = vor.u32 %v13570_v21, %v12565_v26  ;;  %v11753_v21 = vld [vmem:[#allocation7 + $0x1c] sm:$0xf0]  ;;  %v11955_v60 = vld [vmem:[#allocation7 + $0x190] sm:$0xf]  ;;  %v13420_v0 = vld [vmem:[#allocation7 + $0x1a8] sm:$0xf0] }
 0x4ca   : > { %v12179_v7 = vld [vmem:[#allocation7 + $0x350] sm:$0xf] }
 0x4cb   : > { %7992 = vmatpush.bf16.msra.mxu0 %v11836_v62  ;;  %8022 = vmatpush.bf16.msra.mxu2 %v12228_v19  ;;  %v6827_v62 = vunpack.c.h.b16 %v15637_v55  ;;  %v13577_v55 = vld [vmem:[#allocation7 + $0x694] sm:$0xf]  ;;  %v11896_v19 = vor.u32 %v13402_v2, %v11893_v30  ;;  %v12005_v2 = vld [vmem:[#allocation7 + $0x214] sm:$0xf0]  ;;  %v13486_v30 = vld [vmem:[#allocation7 + $0x3bc] sm:$0xf] }
 0x4cc   : > { %8009 = vmatpush.bf16.msra.mxu1 %v11976_v52  ;;  %8037 = vmatpush.bf16.msra.mxu3 %v12424_v43  ;;  %v12596_v50 = vor.u32 %v13577_v55, %v12593_v63  ;;  %v12061_v52 = vld [vmem:[#allocation7 + $0x284] sm:$0xf0]  ;;  %v12260_v55 = vor.u32 %v13493_v31, %v12257_v46  ;;  %v13374_v63 = vld [vmem:[#allocation7 + $0x3c] sm:$0xf] }
 0x4cd   : > { %v15359_v39 = vpack.c.b16 %v6827_v62, %v6823_v33  ;;  %v12509_v33 = vld [vmem:[#allocation7 + $0x604] sm:$0xf0]  ;;  %v11840_v62 = vor.u32 %v13388_v14, %v11837_v11  ;;  %v12064_v43 = vor.u32 %v13444_v42, %v12061_v52  ;;  %v12627_v42 = vld [vmem:[#allocation7 + $0x6d0] sm:$0xf] }
 0x4cf   : > { %7993 = vmatpush.bf16.msra.mxu0 %v11808_v56  ;;  %v13521_v56 = vld [vmem:[#allocation7 + $0x4d4] sm:$0xf]  ;;  %8023 = vmatpush.bf16.msra.mxu2 %v12200_v36  ;;  %v13500_v36 = vld [vmem:[#allocation7 + $0x42c] sm:$0xf] }
 0x4d0   : > { %8058 = vmatpush.bf16.msrb.mxu1 %v12176_v15  ;;  %v12372_v13 = vor.u32 %v13521_v56, %v12369_v32  ;;  %8086 = vmatpush.bf16.msrb.mxu3 %v12624_v24  ;;  %v13437_v15 = vld [vmem:[#allocation7 + $0x234] sm:$0xf]  ;;  %v11812_v56 = vor.u32 %v13381_v29, %v11809_v45  ;;  %v12375_v45 = vld [vmem:[#allocation7 + $0x4d8] sm:$0xf] }
 0x4d1   : > { %8038 = vmatmul.bf16.vlgmr.msra.gmra.mxu3 %v15359_v39  ;;  %8010 = vmatmul.bf16.vlgmr.msra.gmra.mxu1 %v15361_v12  ;;  %v13549_v24 = vld [vmem:[#allocation7 + $0x5b4] sm:$0xf]  ;;  %v12036_v32 = vor.u32 %v13437_v15, %v12033_v23 }
 0x4d2   : > { %8024 = vmatmul.bf16.vlgmr.msra.gmra.mxu2 %v15355_v54  ;;  %v13469_v29 = vld [vmem:[#allocation7 + $0x330] sm:$0xf0] }
 0x4d3   : > { %7994 = vmatpush.bf16.msra.mxu0 %v11780_v27  ;;  %8072 = vmatpush.bf16.msrb.mxu2 %v12400_v40  ;;  %v13514_v27 = vld [vmem:[#allocation7 + $0x49c] sm:$0xf]  ;;  %v12512_v40 = vor.u32 %v13556_v51, %v12509_v33  ;;  %v11927_v33 = vld [vmem:[#allocation7 + $0x158] sm:$0xf]  ;;  %v13525_v15 = vld [vmem:[#allocation7 + $0x4f0] sm:$0xf0] }
 0x4d4   : > { %8059 = vmatpush.bf16.msrb.mxu1 %v12148_v61  ;;  %v12344_v18 = vor.u32 %v13514_v27, %v12341_v37  ;;  %8087 = vmatpush.bf16.msrb.mxu3 %v12596_v50  ;;  %v13430_v61 = vld [vmem:[#allocation7 + $0x1fc] sm:$0xf]  ;;  %v13367_v37 = vld [vmem:[#allocation7 + $0x4] sm:$0xf]  ;;  %v13581_v23 = vld [vmem:[#allocation7 + $0x6b0] sm:$0xf0] }
 0x4d5   : > { %v13542_v50 = vld [vmem:[#allocation7 + $0x57c] sm:$0xf]  ;;  %v12008_v26 = vor.u32 %v13430_v61, %v12005_v2  ;;  %v11756_v59 = vor.u32 %v13367_v37, %v11753_v21  ;;  %v12095_v37 = vld [vmem:[#allocation7 + $0x2a8] sm:$0xf] }
 0x4d6   : > { %v13518_v61 = vld [vmem:[#allocation7 + $0x4b8] sm:$0xf0] }
 0x4d7   : > { %7995 = vmatpush.bf16.msra.mxu0 %v11752_v16  ;;  %8073 = vmatpush.bf16.msrb.mxu2 %v12372_v13  ;;  %v11868_v16 = vor.u32 %v13395_v58, %v11865_v57  ;;  %v12484_v13 = vor.u32 %v13549_v24, %v12481_v25  ;;  %v13479_v58 = vld [vmem:[#allocation7 + $0x384] sm:$0xf]  ;;  %v12456_v57 = vor.u32 %v13542_v50, %v12453_v35  ;;  %v11899_v25 = vld [vmem:[#allocation7 + $0x120] sm:$0xf]  ;;  %v13574_v2 = vld [vmem:[#allocation7 + $0x678] sm:$0xf0] }
 0x4d8   : > { %8060 = vmatpush.bf16.msrb.mxu1 %v12120_v20  ;;  %8088 = vmatpush.bf16.msrb.mxu3 %v12568_v38  ;;  %v13423_v20 = vld [vmem:[#allocation7 + $0x1c4] sm:$0xf]  ;;  %v12204_v11 = vor.u32 %v13479_v58, %v12201_v34  ;;  %v12376_v24 = vor.u32 %v13525_v15, %v12375_v45  ;;  %v11871_v35 = vld [vmem:[#allocation7 + $0xe8] sm:$0xf] }
 0x4d9   : > { %v13535_v38 = vld [vmem:[#allocation7 + $0x544] sm:$0xf] }
 0x4da   : > { %7996 = vmatmul.bf16.vlgmr.msra.gmra.mxu0 %v15357_v48  ;;  %v12428_v52 = vor.u32 %v13535_v38, %v12425_v53  ;;  %v13567_v58 = vld [vmem:[#allocation7 + $0x640] sm:$0xf0]  ;;  %v11843_v53 = vld [vmem:[#allocation7 + $0xb0] sm:$0xf] }
 0x4db   : > { %8044 = vmatpush.bf16.msrb.mxu0 %v11952_v17  ;;  %8074 = vmatpush.bf16.msrb.mxu2 %v12344_v18  ;;  %v12288_v17 = vor.u32 %v13500_v36, %v12285_v1  ;;  %v11977_v18 = vld [vmem:[#allocation7 + $0x1dc] sm:$0xf0]  ;;  %v11956_v36 = vor.u32 %v13420_v0, %v11955_v60  ;;  %v13392_v60 = vld [vmem:[#allocation7 + $0xc8] sm:$0xf0]  ;;  %v12067_v0 = vld [vmem:[#allocation7 + $0x270] sm:$0xf] }
 0x4dc   : > { %8061 = vmatpush.bf16.msrb.mxu1 %v12092_v44  ;;  %8089 = vmatpush.bf16.msrb.mxu3 %v12540_v47  ;;  %v12403_v44 = vld [vmem:[#allocation7 + $0x510] sm:$0xf]  ;;  %v11980_v14 = vor.u32 %v13423_v20, %v11977_v18  ;;  %v13588_v47 = vld [vmem:[#allocation7 + $0x6e8] sm:$0xf0]  ;;  %v13511_v20 = vld [vmem:[#allocation7 + $0x480] sm:$0xf0] }
 0x4dd   : > { %v12543_v18 = vld [vmem:[#allocation7 + $0x628] sm:$0xf] }
 0x4df   : > { %8045 = vmatpush.bf16.msrb.mxu0 %v11924_v41  ;;  %8075 = vmatpush.bf16.msrb.mxu2 %v12316_v49  ;;  %v11781_v41 = vld [vmem:[#allocation7 + $0x54] sm:$0xf0]  ;;  %v13532_v49 = vld [vmem:[#allocation7 + $0x528] sm:$0xf0] }
 0x4e0   : > { %8062 = vmatpush.bf16.msrb.mxu1 %v12064_v43  ;;  %8090 = vmatpush.bf16.msrb.mxu3 %v12512_v40  ;;  %v11784_v27 = vor.u32 %v13374_v63, %v11781_v41  ;;  %v12404_v51 = vor.u32 %v13532_v49, %v12403_v44  ;;  %v12151_v43 = vld [vmem:[#allocation7 + $0x318] sm:$0xf]  ;;  %v13462_v63 = vld [vmem:[#allocation7 + $0x2f8] sm:$0xf0]  ;;  %v12347_v41 = vld [vmem:[#allocation7 + $0x4a0] sm:$0xf] }
 0x4e1   : > { %v12599_v40 = vld [vmem:[#allocation7 + $0x698] sm:$0xf]  ;;  %v12152_v46 = vor.u32 %v13469_v29, %v12151_v43  ;;  %v12348_v50 = vor.u32 %v13518_v61, %v12347_v41  ;;  %v13504_v44 = vld [vmem:[#allocation7 + $0x448] sm:$0xf0]  ;;  %v12515_v49 = vld [vmem:[#allocation7 + $0x5f0] sm:$0xf] }
 0x4e2   : > { %v13497_v43 = vld [vmem:[#allocation7 + $0x410] sm:$0xf0]  ;;  %v11759_v61 = vld [vmem:[#allocation7 + $0x8] sm:$0xf] }
 0x4e3   : > { %8046 = vmatpush.bf16.msrb.mxu0 %v11896_v19  ;;  %8076 = vmatpush.bf16.msrb.mxu2 %v12288_v17  ;;  %v12232_v19 = vor.u32 %v13486_v30, %v12229_v22  ;;  %v12628_v17 = vor.u32 %v13588_v47, %v12627_v42  ;;  %v13553_v29 = vld [vmem:[#allocation7 + $0x5d0] sm:$0xf0] }
 0x4e4   : > { %8063 = vmatpush.bf16.msrb.mxu1 %v12036_v32  ;;  %8091 = vmatpush.bf16.msrb.mxu3 %v12484_v13  ;;  %v12123_v32 = vld [vmem:[#allocation7 + $0x2e0] sm:$0xf] }
 0x4e5   : > { %v12571_v13 = vld [vmem:[#allocation7 + $0x660] sm:$0xf]  ;;  %v12124_v22 = vor.u32 %v13462_v63, %v12123_v32  ;;  %v13490_v32 = vld [vmem:[#allocation7 + $0x3d8] sm:$0xf0] }
 0x4e6   : > { %v12572_v21 = vor.u32 %v13574_v2, %v12571_v13  ;;  %v13546_v63 = vld [vmem:[#allocation7 + $0x598] sm:$0xf0]  ;;  %v13371_v13 = vld [vmem:[#allocation7 + $0x20] sm:$0xf0] }
 0x4e7   : > { %8047 = vmatpush.bf16.msrb.mxu0 %v11868_v16  ;;  %8077 = vmatpush.bf16.msrb.mxu2 %v12260_v55  ;;  %v13476_v16 = vld [vmem:[#allocation7 + $0x368] sm:$0xf0]  ;;  %v12600_v55 = vor.u32 %v13581_v23, %v12599_v40  ;;  %v11787_v23 = vld [vmem:[#allocation7 + $0x40] sm:$0xf] }
 0x4e8   : > { %8064 = vmatpush.bf16.msrb.mxu1 %v12008_v26  ;;  %8092 = vmatpush.bf16.msrb.mxu3 %v12456_v57  ;;  %v12180_v1 = vor.u32 %v13476_v16, %v12179_v7  ;;  %v13455_v26 = vld [vmem:[#allocation7 + $0x2c0] sm:$0xf0]  ;;  %v12544_v7 = vor.u32 %v13567_v58, %v12543_v18  ;;  %v12291_v16 = vld [vmem:[#allocation7 + $0x430] sm:$0xf]  ;;  %v13473_v18 = vld [vmem:[#allocation7 + $0x354] sm:$0xf]  ;;  %v11760_v58 = vor.u32 %v13371_v13, %v11759_v61 }
 0x4e9   : > { %v12096_v34 = vor.u32 %v13455_v26, %v12095_v37  ;;  %v12292_v47 = vor.u32 %v13504_v44, %v12291_v16  ;;  %v13483_v37 = vld [vmem:[#allocation7 + $0x3a0] sm:$0xf0]  ;;  %v13452_v61 = vld [vmem:[#allocation7 + $0x2ac] sm:$0xf] }
 0x4ea   : > { %v13539_v26 = vld [vmem:[#allocation7 + $0x560] sm:$0xf0] }
 0x4eb   : > { %8048 = vmatpush.bf16.msrb.mxu0 %v11840_v62  ;;  %8078 = vmatpush.bf16.msrb.mxu2 %v12232_v19  ;;  %v13413_v62 = vld [vmem:[#allocation7 + $0x170] sm:$0xf0]  ;;  %v12319_v19 = vld [vmem:[#allocation7 + $0x468] sm:$0xf] }
 0x4ec   : > { %8065 = vmatpush.bf16.msrb.mxu1 %v11980_v14  ;;  %8093 = vmatpush.bf16.msrb.mxu3 %v12428_v52  ;;  %v11928_v31 = vor.u32 %v13413_v62, %v11927_v33  ;;  %v12320_v38 = vor.u32 %v13511_v20, %v12319_v19  ;;  %v13560_v14 = vld [vmem:[#allocation7 + $0x608] sm:$0xf0]  ;;  %v11815_v52 = vld [vmem:[#allocation7 + $0x78] sm:$0xf]  ;;  %v13441_v33 = vld [vmem:[#allocation7 + $0x250] sm:$0xf0] }
 0x4ed   : > { %v12263_v62 = vld [vmem:[#allocation7 + $0x3f8] sm:$0xf]  ;;  %v13417_v19 = vld [vmem:[#allocation7 + $0x194] sm:$0xf]  ;;  %v11957_v20 = vld [vmem:[#allocation7 + $0x1ac] sm:$0xf0] }
 0x4ee   : > { %v12264_v40 = vor.u32 %v13497_v43, %v12263_v62  ;;  %v11960_v16 = vor.u32 %v13417_v19, %v11957_v20  ;;  %v11845_v19 = vld [vmem:[#allocation7 + $0xcc] sm:$0xf0]  ;;  %v13445_v20 = vld [vmem:[#allocation7 + $0x274] sm:$0xf] }
 0x4ef   : > { %8049 = vmatpush.bf16.msrb.mxu0 %v11812_v56  ;;  %8079 = vmatpush.bf16.msrb.mxu2 %v12204_v11  ;;  %v13406_v56 = vld [vmem:[#allocation7 + $0x138] sm:$0xf0]  ;;  %v11844_v11 = vor.u32 %v13392_v60, %v11843_v53 }
 0x4f0   : > { %8114 = vmatpush.bf16.msra.mxu1 %v12180_v1  ;;  %8142 = vmatpush.bf16.msra.mxu3 %v12628_v17  ;;  %v11900_v30 = vor.u32 %v13406_v56, %v11899_v25  ;;  %v12039_v1 = vld [vmem:[#allocation7 + $0x238] sm:$0xf]  ;;  %v13434_v25 = vld [vmem:[#allocation7 + $0x218] sm:$0xf0]  ;;  %v12235_v56 = vld [vmem:[#allocation7 + $0x3c0] sm:$0xf] }
 0x4f1   : > { %8094 = vmatmul.bf16.vlgmr.msrb.gmra.mxu3 %v15359_v39  ;;  %8066 = vmatmul.bf16.vlgmr.msrb.gmra.mxu1 %v15361_v12  ;;  %v12487_v17 = vld [vmem:[#allocation7 + $0x5b8] sm:$0xf]  ;;  %v12040_v15 = vor.u32 %v13441_v33, %v12039_v1 }
 0x4f2   : > { %8080 = vmatmul.bf16.vlgmr.msrb.gmra.mxu2 %v15355_v54  ;;  %v12377_v1 = vld [vmem:[#allocation7 + $0x4f4] sm:$0xf0] }
 0x4f3   : > { %8050 = vmatpush.bf16.msrb.mxu0 %v11784_v27  ;;  %8128 = vmatpush.bf16.msra.mxu2 %v12404_v51  ;;  %v13399_v27 = vld [vmem:[#allocation7 + $0x100] sm:$0xf0]  ;;  %v12516_v51 = vor.u32 %v13560_v14, %v12515_v49  ;;  %v13410_v14 = vld [vmem:[#allocation7 + $0x15c] sm:$0xf]  ;;  %v12601_v33 = vld [vmem:[#allocation7 + $0x6b4] sm:$0xf0] }
 0x4f4   : > { %8115 = vmatpush.bf16.msra.mxu1 %v12152_v46  ;;  %8143 = vmatpush.bf16.msra.mxu3 %v12600_v55  ;;  %v11872_v57 = vor.u32 %v13399_v27, %v11871_v35  ;;  %v12011_v46 = vld [vmem:[#allocation7 + $0x200] sm:$0xf]  ;;  %v12207_v35 = vld [vmem:[#allocation7 + $0x388] sm:$0xf] }
 0x4f5   : > { %v12459_v55 = vld [vmem:[#allocation7 + $0x580] sm:$0xf]  ;;  %v12012_v2 = vor.u32 %v13434_v25, %v12011_v46  ;;  %v12208_v60 = vor.u32 %v13483_v37, %v12207_v35  ;;  %v12545_v35 = vld [vmem:[#allocation7 + $0x644] sm:$0xf0] }
 0x4f6   : > { %v12460_v27 = vor.u32 %v13546_v63, %v12459_v55  ;;  %v12349_v46 = vld [vmem:[#allocation7 + $0x4bc] sm:$0xf0]  ;;  %v13396_v63 = vld [vmem:[#allocation7 + $0xec] sm:$0xf] }
 0x4f7   : > { %8051 = vmatpush.bf16.msrb.mxu0 %v11756_v59  ;;  %8129 = vmatpush.bf16.msra.mxu2 %v12376_v24  ;;  %v13448_v59 = vld [vmem:[#allocation7 + $0x288] sm:$0xf0]  ;;  %v12488_v24 = vor.u32 %v13553_v29, %v12487_v17  ;;  %v13403_v29 = vld [vmem:[#allocation7 + $0x124] sm:$0xf]  ;;  %v12573_v25 = vld [vmem:[#allocation7 + $0x67c] sm:$0xf0] }
 0x4f8   : > { %8116 = vmatpush.bf16.msra.mxu1 %v12124_v22  ;;  %8144 = vmatpush.bf16.msra.mxu3 %v12572_v21  ;;  %v12068_v42 = vor.u32 %v13448_v59, %v12067_v0  ;;  %v11983_v22 = vld [vmem:[#allocation7 + $0x1c8] sm:$0xf]  ;;  %v13585_v0 = vld [vmem:[#allocation7 + $0x6d4] sm:$0xf] }
 0x4f9   : > { %v12431_v21 = vld [vmem:[#allocation7 + $0x548] sm:$0xf] }
 0x4fa   : > { %8052 = vmatmul.bf16.vlgmr.msrb.gmra.mxu0 %v15357_v48  ;;  %v12432_v59 = vor.u32 %v13539_v26, %v12431_v21  ;;  %v13389_v26 = vld [vmem:[#allocation7 + $0xb4] sm:$0xf] }
 0x4fb   : > { %8100 = vmatpush.bf16.msra.mxu0 %v11956_v36  ;;  %8130 = vmatpush.bf16.msra.mxu2 %v12348_v50  ;;  %v13385_v36 = vld [vmem:[#allocation7 + $0x90] sm:$0xf0]  ;;  %v13427_v50 = vld [vmem:[#allocation7 + $0x1e0] sm:$0xf0] }
 0x4fc   : > { %8117 = vmatpush.bf16.msra.mxu1 %v12096_v34  ;;  %8145 = vmatpush.bf16.msra.mxu3 %v12544_v7  ;;  %v11816_v45 = vor.u32 %v13385_v36, %v11815_v52  ;;  %v13529_v34 = vld [vmem:[#allocation7 + $0x514] sm:$0xf]  ;;  %v11984_v53 = vor.u32 %v13427_v50, %v11983_v22  ;;  %v12629_v7 = vld [vmem:[#allocation7 + $0x6ec] sm:$0xf0]  ;;  %v12153_v52 = vld [vmem:[#allocation7 + $0x334] sm:$0xf0] }
 0x4fd   : > { %v13522_v36 = vld [vmem:[#allocation7 + $0x4dc] sm:$0xf]  ;;  %v12321_v22 = vld [vmem:[#allocation7 + $0x484] sm:$0xf0]  ;;  %v13564_v50 = vld [vmem:[#allocation7 + $0x62c] sm:$0xf] }
 0x4fe   : > { %v12380_v17 = vor.u32 %v13522_v36, %v12377_v1 }
 0x4ff   : > { %8101 = vmatpush.bf16.msra.mxu0 %v11928_v31  ;;  %8131 = vmatpush.bf16.msra.mxu2 %v12320_v38  ;;  %v13378_v31 = vld [vmem:[#allocation7 + $0x58] sm:$0xf0]  ;;  %v12405_v38 = vld [vmem:[#allocation7 + $0x52c] sm:$0xf0] }
 0x500   : > { %8118 = vmatpush.bf16.msra.mxu1 %v12068_v42  ;;  %8146 = vmatpush.bf16.msra.mxu3 %v12516_v51  ;;  %v11788_v41 = vor.u32 %v13378_v31, %v11787_v23  ;;  %v12408_v49 = vor.u32 %v13529_v34, %v12405_v38  ;;  %v13466_v42 = vld [vmem:[#allocation7 + $0x31c] sm:$0xf]  ;;  %v12125_v23 = vld [vmem:[#allocation7 + $0x2fc] sm:$0xf0]  ;;  %v13515_v31 = vld [vmem:[#allocation7 + $0x4a4] sm:$0xf] }
 0x501   : > { %v13578_v51 = vld [vmem:[#allocation7 + $0x69c] sm:$0xf]  ;;  %v12156_v43 = vor.u32 %v13466_v42, %v12153_v52  ;;  %v12352_v55 = vor.u32 %v13515_v31, %v12349_v46  ;;  %v12293_v34 = vld [vmem:[#allocation7 + $0x44c] sm:$0xf0]  ;;  %v13557_v38 = vld [vmem:[#allocation7 + $0x5f4] sm:$0xf] }
 0x502   : > { %v12265_v42 = vld [vmem:[#allocation7 + $0x414] sm:$0xf0]  ;;  %v13368_v46 = vld [vmem:[#allocation7 + $0xc] sm:$0xf] }
 0x503   : > { %8102 = vmatpush.bf16.msra.mxu0 %v11900_v30  ;;  %8132 = vmatpush.bf16.msra.mxu2 %v12292_v47  ;;  %v12236_v30 = vor.u32 %v13490_v32, %v12235_v56  ;;  %v12632_v47 = vor.u32 %v13585_v0, %v12629_v7  ;;  %v12489_v52 = vld [vmem:[#allocation7 + $0x5d4] sm:$0xf0] }
 0x504   : > { %8119 = vmatpush.bf16.msra.mxu1 %v12040_v15  ;;  %8147 = vmatpush.bf16.msra.mxu3 %v12488_v24  ;;  %v13459_v15 = vld [vmem:[#allocation7 + $0x2e4] sm:$0xf] }
 0x505   : > { %v13571_v24 = vld [vmem:[#allocation7 + $0x664] sm:$0xf]  ;;  %v12128_v32 = vor.u32 %v13459_v15, %v12125_v23  ;;  %v12237_v15 = vld [vmem:[#allocation7 + $0x3dc] sm:$0xf0] }
 0x506   : > { %v12576_v13 = vor.u32 %v13571_v24, %v12573_v25  ;;  %v12461_v23 = vld [vmem:[#allocation7 + $0x59c] sm:$0xf0]  ;;  %v11761_v24 = vld [vmem:[#allocation7 + $0x24] sm:$0xf0] }
 0x507   : > { %8103 = vmatpush.bf16.msra.mxu0 %v11872_v57  ;;  %8133 = vmatpush.bf16.msra.mxu2 %v12264_v40  ;;  %v12181_v57 = vld [vmem:[#allocation7 + $0x36c] sm:$0xf0]  ;;  %v12604_v40 = vor.u32 %v13578_v51, %v12601_v33  ;;  %v13375_v33 = vld [vmem:[#allocation7 + $0x44] sm:$0xf] }
 0x508   : > { %8120 = vmatpush.bf16.msra.mxu1 %v12012_v2  ;;  %8148 = vmatpush.bf16.msra.mxu3 %v12460_v27  ;;  %v12184_v44 = vor.u32 %v13473_v18, %v12181_v57  ;;  %v12097_v2 = vld [vmem:[#allocation7 + $0x2c4] sm:$0xf0]  ;;  %v12548_v18 = vor.u32 %v13564_v50, %v12545_v35  ;;  %v13501_v57 = vld [vmem:[#allocation7 + $0x434] sm:$0xf]  ;;  %v12187_v50 = vld [vmem:[#allocation7 + $0x358] sm:$0xf]  ;;  %v11764_v35 = vor.u32 %v13368_v46, %v11761_v24 }
 0x509   : > { %v12100_v37 = vor.u32 %v13452_v61, %v12097_v2  ;;  %v12296_v7 = vor.u32 %v13501_v57, %v12293_v34  ;;  %v12209_v61 = vld [vmem:[#allocation7 + $0x3a4] sm:$0xf0]  ;;  %v12103_v46 = vld [vmem:[#allocation7 + $0x2b0] sm:$0xf] }
 0x50a   : > { %v12433_v2 = vld [vmem:[#allocation7 + $0x564] sm:$0xf0] }
 0x50b   : > { %8104 = vmatpush.bf16.msra.mxu0 %v11844_v11  ;;  %8134 = vmatpush.bf16.msra.mxu2 %v12236_v30  ;;  %v11929_v11 = vld [vmem:[#allocation7 + $0x174] sm:$0xf0]  ;;  %v13508_v30 = vld [vmem:[#allocation7 + $0x46c] sm:$0xf] }
 0x50c   : > { %8121 = vmatpush.bf16.msra.mxu1 %v11984_v53  ;;  %8149 = vmatpush.bf16.msra.mxu3 %v12432_v59  ;;  %v11932_v62 = vor.u32 %v13410_v14, %v11929_v11  ;;  %v12324_v21 = vor.u32 %v13508_v30, %v12321_v22  ;;  %v12517_v53 = vld [vmem:[#allocation7 + $0x60c] sm:$0xf0]  ;;  %v13382_v59 = vld [vmem:[#allocation7 + $0x7c] sm:$0xf]  ;;  %v12041_v14 = vld [vmem:[#allocation7 + $0x254] sm:$0xf0] }
 0x50d   : > { %v13494_v11 = vld [vmem:[#allocation7 + $0x3fc] sm:$0xf]  ;;  %v11963_v30 = vld [vmem:[#allocation7 + $0x198] sm:$0xf]  ;;  %v13421_v22 = vld [vmem:[#allocation7 + $0x1b0] sm:$0xf0] }
 0x50e   : > { %v12268_v51 = vor.u32 %v13494_v11, %v12265_v42  ;;  %v11964_v57 = vor.u32 %v13421_v22, %v11963_v30  ;;  %v13393_v30 = vld [vmem:[#allocation7 + $0xd0] sm:$0xf0]  ;;  %v12075_v22 = vld [vmem:[#allocation7 + $0x278] sm:$0xf] }
 0x50f   : > { %8105 = vmatpush.bf16.msra.mxu0 %v11816_v45  ;;  %8135 = vmatpush.bf16.msra.mxu2 %v12208_v60  ;;  %v11901_v45 = vld [vmem:[#allocation7 + $0x13c] sm:$0xf0]  ;;  %v11848_v60 = vor.u32 %v13389_v26, %v11845_v19 }
 0x510   : > { %8170 = vmatpush.bf16.msrb.mxu1 %v12184_v44  ;;  %8198 = vmatpush.bf16.msrb.mxu3 %v12632_v47  ;;  %v11904_v56 = vor.u32 %v13403_v29, %v11901_v45  ;;  %v13438_v44 = vld [vmem:[#allocation7 + $0x23c] sm:$0xf]  ;;  %v12013_v29 = vld [vmem:[#allocation7 + $0x21c] sm:$0xf0]  ;;  %v13487_v45 = vld [vmem:[#allocation7 + $0x3c4] sm:$0xf] }
 0x511   : > { %8150 = vmatmul.bf16.vlgmr.msra.gmra.mxu3 %v15359_v39  ;;  %8122 = vmatmul.bf16.vlgmr.msra.gmra.mxu1 %v15361_v12  ;;  %v13550_v47 = vld [vmem:[#allocation7 + $0x5bc] sm:$0xf]  ;;  %v12044_v1 = vor.u32 %v13438_v44, %v12041_v14 }
 0x512   : > { %8136 = vmatmul.bf16.vlgmr.msra.gmra.mxu2 %v15355_v54  ;;  %v13526_v44 = vld [vmem:[#allocation7 + $0x4f8] sm:$0xf0] }
 0x513   : > { %8106 = vmatpush.bf16.msra.mxu0 %v11788_v41  ;;  %8184 = vmatpush.bf16.msrb.mxu2 %v12408_v49  ;;  %v11873_v41 = vld [vmem:[#allocation7 + $0x104] sm:$0xf0]  ;;  %v12520_v49 = vor.u32 %v13557_v38, %v12517_v53  ;;  %v11935_v53 = vld [vmem:[#allocation7 + $0x160] sm:$0xf]  ;;  %v13582_v14 = vld [vmem:[#allocation7 + $0x6b8] sm:$0xf0] }
 0x514   : > { %8171 = vmatpush.bf16.msrb.mxu1 %v12156_v43  ;;  %8199 = vmatpush.bf16.msrb.mxu3 %v12604_v40  ;;  %v11876_v27 = vor.u32 %v13396_v63, %v11873_v41  ;;  %v13431_v43 = vld [vmem:[#allocation7 + $0x204] sm:$0xf]  ;;  %v13480_v63 = vld [vmem:[#allocation7 + $0x38c] sm:$0xf] }
 0x515   : > { %v13543_v40 = vld [vmem:[#allocation7 + $0x584] sm:$0xf]  ;;  %v12016_v25 = vor.u32 %v13431_v43, %v12013_v29  ;;  %v12212_v19 = vor.u32 %v13480_v63, %v12209_v61  ;;  %v13568_v63 = vld [vmem:[#allocation7 + $0x648] sm:$0xf0] }
 0x516   : > { %v12464_v41 = vor.u32 %v13543_v40, %v12461_v23  ;;  %v13519_v43 = vld [vmem:[#allocation7 + $0x4c0] sm:$0xf0]  ;;  %v11879_v23 = vld [vmem:[#allocation7 + $0xf0] sm:$0xf] }
 0x517   : > { %8107 = vmatpush.bf16.msra.mxu0 %v11760_v58  ;;  %8185 = vmatpush.bf16.msrb.mxu2 %v12380_v17  ;;  %v12069_v58 = vld [vmem:[#allocation7 + $0x28c] sm:$0xf0]  ;;  %v12492_v17 = vor.u32 %v13550_v47, %v12489_v52  ;;  %v11907_v52 = vld [vmem:[#allocation7 + $0x128] sm:$0xf]  ;;  %v13575_v29 = vld [vmem:[#allocation7 + $0x680] sm:$0xf0] }
 0x518   : > { %8172 = vmatpush.bf16.msrb.mxu1 %v12128_v32  ;;  %8200 = vmatpush.bf16.msrb.mxu3 %v12576_v13  ;;  %v12072_v0 = vor.u32 %v13445_v20, %v12069_v58  ;;  %v13424_v32 = vld [vmem:[#allocation7 + $0x1cc] sm:$0xf]  ;;  %v12635_v20 = vld [vmem:[#allocation7 + $0x6d8] sm:$0xf] }
 0x519   : > { %v13536_v13 = vld [vmem:[#allocation7 + $0x54c] sm:$0xf] }
 0x51a   : > { %8108 = vmatmul.bf16.vlgmr.msra.gmra.mxu0 %v15357_v48  ;;  %v12436_v58 = vor.u32 %v13536_v13, %v12433_v2  ;;  %v11851_v2 = vld [vmem:[#allocation7 + $0xb8] sm:$0xf] }
 0x51b   : > { %8156 = vmatpush.bf16.msrb.mxu0 %v11960_v16  ;;  %8186 = vmatpush.bf16.msrb.mxu2 %v12352_v55  ;;  %v11817_v16 = vld [vmem:[#allocation7 + $0x94] sm:$0xf0]  ;;  %v11985_v55 = vld [vmem:[#allocation7 + $0x1e4] sm:$0xf0] }
 0x51c   : > { %8173 = vmatpush.bf16.msrb.mxu1 %v12100_v37  ;;  %8201 = vmatpush.bf16.msrb.mxu3 %v12548_v18  ;;  %v11820_v36 = vor.u32 %v13382_v59, %v11817_v16  ;;  %v12411_v37 = vld [vmem:[#allocation7 + $0x518] sm:$0xf]  ;;  %v11988_v26 = vor.u32 %v13424_v32, %v11985_v55  ;;  %v13589_v18 = vld [vmem:[#allocation7 + $0x6f0] sm:$0xf0]  ;;  %v13470_v59 = vld [vmem:[#allocation7 + $0x338] sm:$0xf0] }
 0x51d   : > { %v12383_v16 = vld [vmem:[#allocation7 + $0x4e0] sm:$0xf]  ;;  %v13512_v32 = vld [vmem:[#allocation7 + $0x488] sm:$0xf0]  ;;  %v12551_v55 = vld [vmem:[#allocation7 + $0x630] sm:$0xf] }
 0x51e   : > { %v12384_v47 = vor.u32 %v13526_v44, %v12383_v16 }
 0x51f   : > { %8157 = vmatpush.bf16.msrb.mxu0 %v11932_v62  ;;  %8187 = vmatpush.bf16.msrb.mxu2 %v12324_v21  ;;  %v11789_v62 = vld [vmem:[#allocation7 + $0x5c] sm:$0xf0]  ;;  %v13533_v21 = vld [vmem:[#allocation7 + $0x530] sm:$0xf0] }
 0x520   : > { %8174 = vmatpush.bf16.msrb.mxu1 %v12072_v0  ;;  %8202 = vmatpush.bf16.msrb.mxu3 %v12520_v49  ;;  %v11792_v31 = vor.u32 %v13375_v33, %v11789_v62  ;;  %v12412_v38 = vor.u32 %v13533_v21, %v12411_v37  ;;  %v12159_v0 = vld [vmem:[#allocation7 + $0x320] sm:$0xf]  ;;  %v13463_v33 = vld [vmem:[#allocation7 + $0x300] sm:$0xf0]  ;;  %v12355_v62 = vld [vmem:[#allocation7 + $0x4a8] sm:$0xf] }
 0x521   : > { %v12607_v49 = vld [vmem:[#allocation7 + $0x6a0] sm:$0xf]  ;;  %v12160_v42 = vor.u32 %v13470_v59, %v12159_v0  ;;  %v12356_v40 = vor.u32 %v13519_v43, %v12355_v62  ;;  %v13505_v37 = vld [vmem:[#allocation7 + $0x450] sm:$0xf0]  ;;  %v12523_v21 = vld [vmem:[#allocation7 + $0x5f8] sm:$0xf] }
 0x522   : > { %v13498_v0 = vld [vmem:[#allocation7 + $0x418] sm:$0xf0]  ;;  %v11767_v43 = vld [vmem:[#allocation7 + $0x10] sm:$0xf] }
 0x523   : > { %8158 = vmatpush.bf16.msrb.mxu0 %v11904_v56  ;;  %8188 = vmatpush.bf16.msrb.mxu2 %v12296_v7  ;;  %v12240_v56 = vor.u32 %v13487_v45, %v12237_v15  ;;  %v12636_v7 = vor.u32 %v13589_v18, %v12635_v20  ;;  %v13554_v59 = vld [vmem:[#allocation7 + $0x5d8] sm:$0xf0] }
 0x524   : > { %8175 = vmatpush.bf16.msrb.mxu1 %v12044_v1  ;;  %8203 = vmatpush.bf16.msrb.mxu3 %v12492_v17  ;;  %v12131_v1 = vld [vmem:[#allocation7 + $0x2e8] sm:$0xf] }
 0x525   : > { %v12579_v17 = vld [vmem:[#allocation7 + $0x668] sm:$0xf]  ;;  %v12132_v15 = vor.u32 %v13463_v33, %v12131_v1  ;;  %v13491_v1 = vld [vmem:[#allocation7 + $0x3e0] sm:$0xf0] }
 0x526   : > { %v12580_v24 = vor.u32 %v13575_v29, %v12579_v17  ;;  %v13547_v33 = vld [vmem:[#allocation7 + $0x5a0] sm:$0xf0]  ;;  %v13372_v17 = vld [vmem:[#allocation7 + $0x28] sm:$0xf0] }
 0x527   : > { %8159 = vmatpush.bf16.msrb.mxu0 %v11876_v27  ;;  %8189 = vmatpush.bf16.msrb.mxu2 %v12268_v51  ;;  %v13477_v27 = vld [vmem:[#allocation7 + $0x370] sm:$0xf0]  ;;  %v12608_v51 = vor.u32 %v13582_v14, %v12607_v49  ;;  %v11795_v14 = vld [vmem:[#allocation7 + $0x48] sm:$0xf] }
 0x528   : > { %8176 = vmatpush.bf16.msrb.mxu1 %v12016_v25  ;;  %8204 = vmatpush.bf16.msrb.mxu3 %v12464_v41  ;;  %v12188_v34 = vor.u32 %v13477_v27, %v12187_v50  ;;  %v13456_v25 = vld [vmem:[#allocation7 + $0x2c8] sm:$0xf0]  ;;  %v12552_v50 = vor.u32 %v13568_v63, %v12551_v55  ;;  %v12299_v27 = vld [vmem:[#allocation7 + $0x438] sm:$0xf]  ;;  %v13474_v55 = vld [vmem:[#allocation7 + $0x35c] sm:$0xf]  ;;  %v11768_v63 = vor.u32 %v13372_v17, %v11767_v43 }
 0x529   : > { %v12104_v61 = vor.u32 %v13456_v25, %v12103_v46  ;;  %v12300_v18 = vor.u32 %v13505_v37, %v12299_v27  ;;  %v13484_v46 = vld [vmem:[#allocation7 + $0x3a8] sm:$0xf0]  ;;  %v13453_v43 = vld [vmem:[#allocation7 + $0x2b4] sm:$0xf] }
 0x52a   : > { %v13540_v25 = vld [vmem:[#allocation7 + $0x568] sm:$0xf0] }
 0x52b   : > { %8160 = vmatpush.bf16.msrb.mxu0 %v11848_v60  ;;  %8190 = vmatpush.bf16.msrb.mxu2 %v12240_v56  ;;  %v13414_v60 = vld [vmem:[#allocation7 + $0x178] sm:$0xf0]  ;;  %v12327_v56 = vld [vmem:[#allocation7 + $0x470] sm:$0xf] }
 0x52c   : > { %8177 = vmatpush.bf16.msrb.mxu1 %v11988_v26  ;;  %8205 = vmatpush.bf16.msrb.mxu3 %v12436_v58  ;;  %v11936_v11 = vor.u32 %v13414_v60, %v11935_v53  ;;  %v12328_v13 = vor.u32 %v13512_v32, %v12327_v56  ;;  %v13561_v26 = vld [vmem:[#allocation7 + $0x610] sm:$0xf0]  ;;  %v11823_v58 = vld [vmem:[#allocation7 + $0x80] sm:$0xf]  ;;  %v13442_v53 = vld [vmem:[#allocation7 + $0x258] sm:$0xf0] }
 0x52d   : > { %v12271_v60 = vld [vmem:[#allocation7 + $0x400] sm:$0xf]  ;;  %v13418_v56 = vld [vmem:[#allocation7 + $0x19c] sm:$0xf]  ;;  %v11965_v32 = vld [vmem:[#allocation7 + $0x1b4] sm:$0xf0] }
 0x52e   : > { %v12272_v49 = vor.u32 %v13498_v0, %v12271_v60  ;;  %v11968_v27 = vor.u32 %v13418_v56, %v11965_v32  ;;  %v13390_v56 = vld [vmem:[#allocation7 + $0xbc] sm:$0xf]  ;;  %v11853_v32 = vld [vmem:[#allocation7 + $0xd4] sm:$0xf0] }
 0x52f   : > { %8161 = vmatpush.bf16.msrb.mxu0 %v11820_v36  ;;  %8191 = vmatpush.bf16.msrb.mxu2 %v12212_v19  ;;  %v13407_v36 = vld [vmem:[#allocation7 + $0x140] sm:$0xf0]  ;;  %v11852_v19 = vor.u32 %v13393_v30, %v11851_v2 }
 0x530   : > { %8226 = vmatpush.bf16.msra.mxu1 %v12188_v34  ;;  %8254 = vmatpush.bf16.msra.mxu3 %v12636_v7  ;;  %v11908_v45 = vor.u32 %v13407_v36, %v11907_v52  ;;  %v12047_v34 = vld [vmem:[#allocation7 + $0x240] sm:$0xf]  ;;  %v13435_v52 = vld [vmem:[#allocation7 + $0x220] sm:$0xf0]  ;;  %v12243_v36 = vld [vmem:[#allocation7 + $0x3c8] sm:$0xf] }
 0x531   : > { %8206 = vmatmul.bf16.vlgmr.msrb.gmra.mxu3 %v15359_v39  ;;  %8178 = vmatmul.bf16.vlgmr.msrb.gmra.mxu1 %v15361_v12  ;;  %v12495_v7 = vld [vmem:[#allocation7 + $0x5c0] sm:$0xf]  ;;  %v12048_v44 = vor.u32 %v13442_v53, %v12047_v34 }
 0x532   : > { %8192 = vmatmul.bf16.vlgmr.msrb.gmra.mxu2 %v15355_v54  ;;  %v12385_v34 = vld [vmem:[#allocation7 + $0x4fc] sm:$0xf0] }
 0x533   : > { %8162 = vmatpush.bf16.msrb.mxu0 %v11792_v31  ;;  %8240 = vmatpush.bf16.msra.mxu2 %v12412_v38  ;;  %v13400_v31 = vld [vmem:[#allocation7 + $0x108] sm:$0xf0]  ;;  %v12524_v38 = vor.u32 %v13561_v26, %v12523_v21  ;;  %v13411_v26 = vld [vmem:[#allocation7 + $0x164] sm:$0xf]  ;;  %v12609_v53 = vld [vmem:[#allocation7 + $0x6bc] sm:$0xf0] }
 0x534   : > { %8227 = vmatpush.bf16.msra.mxu1 %v12160_v42  ;;  %8255 = vmatpush.bf16.msra.mxu3 %v12608_v51  ;;  %v11880_v41 = vor.u32 %v13400_v31, %v11879_v23  ;;  %v12019_v42 = vld [vmem:[#allocation7 + $0x208] sm:$0xf]  ;;  %v12215_v23 = vld [vmem:[#allocation7 + $0x390] sm:$0xf] }
 0x535   : > { %v12467_v51 = vld [vmem:[#allocation7 + $0x588] sm:$0xf]  ;;  %v12020_v29 = vor.u32 %v13435_v52, %v12019_v42  ;;  %v12216_v30 = vor.u32 %v13484_v46, %v12215_v23  ;;  %v12553_v23 = vld [vmem:[#allocation7 + $0x64c] sm:$0xf0] }
 0x536   : > { %v12468_v31 = vor.u32 %v13547_v33, %v12467_v51  ;;  %v12357_v42 = vld [vmem:[#allocation7 + $0x4c4] sm:$0xf0]  ;;  %v13397_v33 = vld [vmem:[#allocation7 + $0xf4] sm:$0xf] }
 0x537   : > { %8163 = vmatpush.bf16.msrb.mxu0 %v11764_v35  ;;  %8241 = vmatpush.bf16.msra.mxu2 %v12384_v47  ;;  %v13449_v35 = vld [vmem:[#allocation7 + $0x290] sm:$0xf0]  ;;  %v12496_v47 = vor.u32 %v13554_v59, %v12495_v7  ;;  %v13404_v59 = vld [vmem:[#allocation7 + $0x12c] sm:$0xf]  ;;  %v12581_v52 = vld [vmem:[#allocation7 + $0x684] sm:$0xf0] }
 0x538   : > { %8228 = vmatpush.bf16.msra.mxu1 %v12132_v15  ;;  %8256 = vmatpush.bf16.msra.mxu3 %v12580_v24  ;;  %v12076_v20 = vor.u32 %v13449_v35, %v12075_v22  ;;  %v11991_v15 = vld [vmem:[#allocation7 + $0x1d0] sm:$0xf]  ;;  %v13586_v22 = vld [vmem:[#allocation7 + $0x6dc] sm:$0xf] }
 0x539   : > { %v12439_v24 = vld [vmem:[#allocation7 + $0x550] sm:$0xf] }
 0x53a   : > { %8164 = vmatmul.bf16.vlgmr.msrb.gmra.mxu0 %v15357_v48  ;;  %v12440_v35 = vor.u32 %v13540_v25, %v12439_v24 }
 0x53b   : > { %8212 = vmatpush.bf16.msra.mxu0 %v11964_v57  ;;  %8242 = vmatpush.bf16.msra.mxu2 %v12356_v40  ;;  %v13386_v57 = vld [vmem:[#allocation7 + $0x98] sm:$0xf0]  ;;  %v13428_v40 = vld [vmem:[#allocation7 + $0x1e8] sm:$0xf0] }
 0x53c   : > { %8229 = vmatpush.bf16.msra.mxu1 %v12104_v61  ;;  %8257 = vmatpush.bf16.msra.mxu3 %v12552_v50  ;;  %v11824_v16 = vor.u32 %v13386_v57, %v11823_v58  ;;  %v13530_v61 = vld [vmem:[#allocation7 + $0x51c] sm:$0xf]  ;;  %v11992_v2 = vor.u32 %v13428_v40, %v11991_v15  ;;  %v12637_v50 = vld [vmem:[#allocation7 + $0x6f4] sm:$0xf0]  ;;  %v12161_v58 = vld [vmem:[#allocation7 + $0x33c] sm:$0xf0] }
 0x53d   : > { %v13523_v57 = vld [vmem:[#allocation7 + $0x4e4] sm:$0xf]  ;;  %v12329_v15 = vld [vmem:[#allocation7 + $0x48c] sm:$0xf0]  ;;  %v13565_v40 = vld [vmem:[#allocation7 + $0x634] sm:$0xf] }
 0x53e   : > { %v12388_v7 = vor.u32 %v13523_v57, %v12385_v34  ;;  %v12049_v57 = vld [vmem:[#allocation7 + $0x25c] sm:$0xf0]  ;;  %v13495_v34 = vld [vmem:[#allocation7 + $0x404] sm:$0xf] }
 0x53f   : > { %8213 = vmatpush.bf16.msra.mxu0 %v11936_v11  ;;  %8243 = vmatpush.bf16.msra.mxu2 %v12328_v13  ;;  %v13379_v11 = vld [vmem:[#allocation7 + $0x60] sm:$0xf0]  ;;  %v12413_v13 = vld [vmem:[#allocation7 + $0x534] sm:$0xf0] }
 0x540   : > { %8230 = vmatpush.bf16.msra.mxu1 %v12076_v20  ;;  %8258 = vmatpush.bf16.msra.mxu3 %v12524_v38  ;;  %v11796_v62 = vor.u32 %v13379_v11, %v11795_v14  ;;  %v12416_v21 = vor.u32 %v13530_v61, %v12413_v13  ;;  %v13467_v20 = vld [vmem:[#allocation7 + $0x324] sm:$0xf]  ;;  %v12133_v14 = vld [vmem:[#allocation7 + $0x304] sm:$0xf0]  ;;  %v13516_v11 = vld [vmem:[#allocation7 + $0x4ac] sm:$0xf]  ;;  %v12556_v61 = vor.u32 %v13565_v40, %v12553_v23 }
 0x541   : > { %v13579_v38 = vld [vmem:[#allocation7 + $0x6a4] sm:$0xf]  ;;  %v12164_v0 = vor.u32 %v13467_v20, %v12161_v58  ;;  %v12360_v51 = vor.u32 %v13516_v11, %v12357_v42  ;;  %v12077_v13 = vld [vmem:[#allocation7 + $0x294] sm:$0xf0]  ;;  %v11797_v42 = vld [vmem:[#allocation7 + $0x64] sm:$0xf0] }
 0x542   : > { %v13439_v20 = vld [vmem:[#allocation7 + $0x244] sm:$0xf]  ;;  %v13369_v40 = vld [vmem:[#allocation7 + $0x14] sm:$0xf]  ;;  %v11769_v23 = vld [vmem:[#allocation7 + $0x2c] sm:$0xf0] }
 0x543   : > { %8214 = vmatpush.bf16.msra.mxu0 %v11908_v45  ;;  %8244 = vmatpush.bf16.msra.mxu2 %v12300_v18  ;;  %v12244_v45 = vor.u32 %v13491_v1, %v12243_v36  ;;  %v12640_v18 = vor.u32 %v13586_v22, %v12637_v50  ;;  %v13558_v22 = vld [vmem:[#allocation7 + $0x5fc] sm:$0xf]  ;;  %v12525_v50 = vld [vmem:[#allocation7 + $0x614] sm:$0xf0] }
 0x544   : > { %8231 = vmatpush.bf16.msra.mxu1 %v12048_v44  ;;  %8259 = vmatpush.bf16.msra.mxu3 %v12496_v47  ;;  %v13460_v44 = vld [vmem:[#allocation7 + $0x2ec] sm:$0xf]  ;;  %v12528_v58 = vor.u32 %v13558_v22, %v12525_v50  ;;  %v12195_v22 = vld [vmem:[#allocation7 + $0x360] sm:$0xf]  ;;  %v11772_v50 = vor.u32 %v13369_v40, %v11769_v23 }
 0x545   : > { %v13572_v47 = vld [vmem:[#allocation7 + $0x66c] sm:$0xf]  ;;  %v12136_v1 = vor.u32 %v13460_v44, %v12133_v14  ;;  %v12052_v14 = vor.u32 %v13439_v20, %v12049_v57  ;;  %v12643_v20 = vld [vmem:[#allocation7 + $0x6e0] sm:$0xf] }
 0x546   : > { %v12584_v17 = vor.u32 %v13572_v47, %v12581_v52  ;;  %v13432_v47 = vld [vmem:[#allocation7 + $0x20c] sm:$0xf]  ;;  %v12021_v52 = vld [vmem:[#allocation7 + $0x224] sm:$0xf0] }
 0x547   : > { %8215 = vmatpush.bf16.msra.mxu0 %v11880_v41  ;;  %8245 = vmatpush.bf16.msra.mxu2 %v12272_v49  ;;  %v12189_v41 = vld [vmem:[#allocation7 + $0x374] sm:$0xf0]  ;;  %v12612_v49 = vor.u32 %v13579_v38, %v12609_v53  ;;  %v12273_v38 = vld [vmem:[#allocation7 + $0x41c] sm:$0xf0]  ;;  %v13576_v40 = vld [vmem:[#allocation7 + $0x688] sm:$0xf0] }
 0x548   : > { %8232 = vmatpush.bf16.msra.mxu1 %v12020_v29  ;;  %8260 = vmatpush.bf16.msra.mxu3 %v12468_v31  ;;  %v12192_v37 = vor.u32 %v13474_v55, %v12189_v41  ;;  %v12105_v29 = vld [vmem:[#allocation7 + $0x2cc] sm:$0xf0]  ;;  %v13446_v55 = vld [vmem:[#allocation7 + $0x27c] sm:$0xf]  ;;  %v12276_v11 = vor.u32 %v13495_v34, %v12273_v38 }
 0x549   : > { %v12108_v24 = vor.u32 %v13453_v43, %v12105_v29  ;;  %v12469_v29 = vld [vmem:[#allocation7 + $0x5a4] sm:$0xf0] }
 0x54b   : > { %8216 = vmatpush.bf16.msra.mxu0 %v11852_v19  ;;  %8246 = vmatpush.bf16.msra.mxu2 %v12244_v45  ;;  %v11937_v19 = vld [vmem:[#allocation7 + $0x17c] sm:$0xf0]  ;;  %v13509_v45 = vld [vmem:[#allocation7 + $0x474] sm:$0xf] }
 0x54c   : > { %8233 = vmatpush.bf16.msra.mxu1 %v11992_v2  ;;  %8261 = vmatpush.bf16.msra.mxu3 %v12440_v35  ;;  %v11940_v60 = vor.u32 %v13411_v26, %v11937_v19  ;;  %v12332_v25 = vor.u32 %v13509_v45, %v12329_v15  ;;  %v13502_v2 = vld [vmem:[#allocation7 + $0x43c] sm:$0xf]  ;;  %v13383_v26 = vld [vmem:[#allocation7 + $0x84] sm:$0xf]  ;;  %v11825_v19 = vld [vmem:[#allocation7 + $0x9c] sm:$0xf0] }
 0x54e   : > { %v8011_v41 = vpop.f32.mrf.mxu1 }
 0x54f   : > { %8217 = vmatpush.bf16.msra.mxu0 %v11824_v16  ;;  %8247 = vmatpush.bf16.msra.mxu2 %v12216_v30  ;;  %v11909_v16 = vld [vmem:[#allocation7 + $0x144] sm:$0xf0]  ;;  %v12301_v30 = vld [vmem:[#allocation7 + $0x454] sm:$0xf0] }
 0x550   : > { %8282 = vmatpush.bf16.msrb.mxu1 %v12192_v37  ;;  %8310 = vmatpush.bf16.msrb.mxu3 %v12640_v18  ;;  %v11912_v36 = vor.u32 %v13404_v59, %v11909_v16  ;;  %v12080_v37 = vor.u32 %v13446_v55, %v12077_v13  ;;  %v11828_v59 = vor.u32 %v13383_v26, %v11825_v19  ;;  %v13376_v16 = vld [vmem:[#allocation7 + $0x4c] sm:$0xf]  ;;  %v12217_v55 = vld [vmem:[#allocation7 + $0x3ac] sm:$0xf0] }
 0x551   : > { %8262 = vmatmul.bf16.vlgmr.msra.gmra.mxu3 %v15359_v39  ;;  %8234 = vmatmul.bf16.vlgmr.msra.gmra.mxu1 %v15361_v12  ;;  %v11800_v15 = vor.u32 %v13376_v16, %v11797_v42  ;;  %v12167_v16 = vld [vmem:[#allocation7 + $0x328] sm:$0xf] }
 0x552   : > { %8248 = vmatmul.bf16.vlgmr.msra.gmra.mxu2 %v15355_v54  ;;  %v12615_v42 = vld [vmem:[#allocation7 + $0x6a8] sm:$0xf] }
 0x553   : > { %8218 = vmatpush.bf16.msra.mxu0 %v11796_v62  ;;  %8296 = vmatpush.bf16.msrb.mxu2 %v12416_v21  ;;  %v11881_v62 = vld [vmem:[#allocation7 + $0x10c] sm:$0xf0]  ;;  %v12304_v21 = vor.u32 %v13502_v2, %v12301_v30  ;;  %v11971_v2 = vld [vmem:[#allocation7 + $0x1a0] sm:$0xf]  ;;  %v13422_v30 = vld [vmem:[#allocation7 + $0x1b8] sm:$0xf0] }
 0x554   : > { %8283 = vmatpush.bf16.msrb.mxu1 %v12164_v0  ;;  %8311 = vmatpush.bf16.msrb.mxu3 %v12612_v49  ;;  %v11884_v31 = vor.u32 %v13397_v33, %v11881_v62  ;;  %v13551_v0 = vld [vmem:[#allocation7 + $0x5c4] sm:$0xf]  ;;  %v13488_v33 = vld [vmem:[#allocation7 + $0x3cc] sm:$0xf]  ;;  %v12245_v62 = vld [vmem:[#allocation7 + $0x3e4] sm:$0xf0]  ;;  %v11972_v34 = vor.u32 %v13422_v30, %v11971_v2 }
 0x555   : > { %v8025_v18 = vpop.f32.mrf.mxu2  ;;  %v13513_v2 = vld [vmem:[#allocation7 + $0x490] sm:$0xf0]  ;;  %v12559_v30 = vld [vmem:[#allocation7 + $0x638] sm:$0xf] }
 0x557   : > { %8219 = vmatpush.bf16.msra.mxu0 %v11768_v63  ;;  %8297 = vmatpush.bf16.msrb.mxu2 %v12388_v7  ;;  %v7997_v46 = vpop.f32.mrf.mxu0  ;;  %v12497_v7 = vld [vmem:[#allocation7 + $0x5dc] sm:$0xf0] }
 0x558   : > { %8284 = vmatpush.bf16.msrb.mxu1 %v12136_v1  ;;  %v7998_v63 = vadd.f32 %v7997_v46, %v14470_v3  ;;  %8312 = vmatpush.bf16.msrb.mxu3 %v12584_v17  ;;  %v8013_v1 = vpop.f32.mrf.mxu1  ;;  %v13544_v17 = vld [vmem:[#allocation7 + $0x58c] sm:$0xf]  ;;  %v12248_v46 = vor.u32 %v13488_v33, %v12245_v62  ;;  %v12139_v62 = vld [vmem:[#allocation7 + $0x2f0] sm:$0xf] }
 0x559   : > { %v13408_v33 = vld [vmem:[#allocation7 + $0x148] sm:$0xf0] }
 0x55a   : > { %8220 = vmatmul.bf16.vlgmr.msra.gmra.mxu0 %v15357_v48  ;;  %v8012_v35 = vadd.f32 %v8011_v41, %v7998_v63  ;;  %v13537_v63 = vld [vmem:[#allocation7 + $0x554] sm:$0xf]  ;;  %v12441_v41 = vld [vmem:[#allocation7 + $0x56c] sm:$0xf0] }
 0x55b   : > { %8268 = vmatpush.bf16.msrb.mxu0 %v11968_v27  ;;  %8298 = vmatpush.bf16.msrb.mxu2 %v12360_v51  ;;  %v11856_v27 = vor.u32 %v13390_v56, %v11853_v32  ;;  %v12500_v51 = vor.u32 %v13551_v0, %v12497_v7  ;;  %v12472_v32 = vor.u32 %v13544_v17, %v12469_v29  ;;  %v13464_v17 = vld [vmem:[#allocation7 + $0x308] sm:$0xf0]  ;;  %v12363_v29 = vld [vmem:[#allocation7 + $0x4b0] sm:$0xf] }
 0x55c   : > { %8285 = vmatpush.bf16.msrb.mxu1 %v12108_v24  ;;  %8313 = vmatpush.bf16.msrb.mxu3 %v12556_v61  ;;  %v8026_v53 = vadd.f32 %v8025_v18, %v8012_v35  ;;  %v13425_v24 = vld [vmem:[#allocation7 + $0x1d4] sm:$0xf]  ;;  %v13478_v35 = vld [vmem:[#allocation7 + $0x378] sm:$0xf0]  ;;  %v12444_v57 = vor.u32 %v13537_v63, %v12441_v41 }
 0x55d   : > { %v8027_v56 = vpop.f32.mrf.mxu2  ;;  %v13590_v18 = vld [vmem:[#allocation7 + $0x6f8] sm:$0xf0]  ;;  %v12196_v0 = vor.u32 %v13478_v35, %v12195_v22  ;;  %v13457_v63 = vld [vmem:[#allocation7 + $0x2d0] sm:$0xf0] }
 0x55e   : > { %v13569_v35 = vld [vmem:[#allocation7 + $0x650] sm:$0xf0] }
 0x55f   : > { %8269 = vmatpush.bf16.msrb.mxu0 %v11940_v60  ;;  %8299 = vmatpush.bf16.msrb.mxu2 %v12332_v25  ;;  %v8039_v60 = vpop.f32.mrf.mxu3  ;;  %v7999_v49 = vpop.f32.mrf.mxu0  ;;  %v13481_v25 = vld [vmem:[#allocation7 + $0x394] sm:$0xf] }
 0x560   : > { %v8040_v44 = vadd.f32 %v8039_v60, %v8026_v53  ;;  %8286 = vmatpush.bf16.msrb.mxu1 %v12080_v37  ;;  %8314 = vmatpush.bf16.msrb.mxu3 %v12528_v58  ;;  %v13534_v37 = vld [vmem:[#allocation7 + $0x538] sm:$0xf0]  ;;  %v12220_v19 = vor.u32 %v13481_v25, %v12217_v55  ;;  %v11943_v53 = vld [vmem:[#allocation7 + $0x168] sm:$0xf]  ;;  %v12111_v55 = vld [vmem:[#allocation7 + $0x2b8] sm:$0xf] }
 0x562   : > { %v12645_v43 = vmul.f32 -1.442695, %v8040_v44  ;;  %v12644_v44 = vor.u32 %v13590_v18, %v12643_v20  ;;  %v12112_v20 = vor.u32 %v13457_v63, %v12111_v55 }
 0x563   : > { %8270 = vmatpush.bf16.msrb.mxu0 %v11912_v36  ;;  %8300 = vmatpush.bf16.msrb.mxu2 %v12304_v21  ;;  %v8000_v36 = vadd.f32 %v7999_v49, %v14470_v3  ;;  %v11993_v3 = vld [vmem:[#allocation7 + $0x1ec] sm:$0xf0]  ;;  %v13471_v49 = vld [vmem:[#allocation7 + $0x340] sm:$0xf0] }
 0x564   : > { %13883 = vpow2.f32 %v12645_v43  ;;  %8287 = vmatpush.bf16.msrb.mxu1 %v12052_v14  ;;  %8315 = vmatpush.bf16.msrb.mxu3 %v12500_v51  ;;  %v11996_v26 = vor.u32 %v13425_v24, %v11993_v3  ;;  %v12391_v14 = vld [vmem:[#allocation7 + $0x4e8] sm:$0xf]  ;;  %v11915_v51 = vld [vmem:[#allocation7 + $0x130] sm:$0xf]  ;;  %v13401_v24 = vld [vmem:[#allocation7 + $0x110] sm:$0xf0] }
 0x565   : > { %v8014_v45 = vadd.f32 %v8013_v1, %v8000_v36  ;;  %v12168_v36 = vor.u32 %v13471_v49, %v12167_v16  ;;  %v12531_v16 = vld [vmem:[#allocation7 + $0x600] sm:$0xf] }
 0x567   : > { %8271 = vmatpush.bf16.msrb.mxu0 %v11884_v31  ;;  %8301 = vmatpush.bf16.msrb.mxu2 %v12276_v11  ;;  %v12024_v31 = vor.u32 %v13432_v47, %v12021_v52  ;;  %v8028_v61 = vadd.f32 %v8027_v56, %v8014_v45  ;;  %v8041_v13 = vpop.f32.mrf.mxu3  ;;  %v13527_v11 = vld [vmem:[#allocation7 + $0x500] sm:$0xf0]  ;;  %v13520_v45 = vld [vmem:[#allocation7 + $0x4c8] sm:$0xf0]  ;;  %v12140_v56 = vor.u32 %v13464_v17, %v12139_v62  ;;  %v12055_v17 = vld [vmem:[#allocation7 + $0x248] sm:$0xf] }
 0x568   : > { %8316 = vmatpush.bf16.msrb.mxu3 %v12472_v32  ;;  %v13583_v47 = vld [vmem:[#allocation7 + $0x6c0] sm:$0xf0]  ;;  %v12392_v1 = vor.u32 %v13527_v11, %v12391_v14  ;;  %v12364_v32 = vor.u32 %v13520_v45, %v12363_v29  ;;  %v15413_v11 = vld [vmem:[#allocation7 + $0x88] sm:$0xf] }
 0x569   : > { %v8042_v21 = vadd.f32 %v8041_v13, %v8028_v61  ;;  %8288 = vmatpush.bf16.msrb.mxu1 %v12024_v31  ;;  %v12616_v43 = vor.u32 %v13583_v47, %v12615_v42  ;;  %v11916_v31 = vor.u32 %v13408_v33, %v11915_v51  ;;  %v12335_v13 = vld [vmem:[#allocation7 + $0x478] sm:$0xf]  ;;  %v13387_v42 = vld [vmem:[#allocation7 + $0xa0] sm:$0xf0] }
 0x56a   : > { %v13884_v58 = vpop.eup %13883  ;;  %v12336_v18 = vor.u32 %v13513_v2, %v12335_v13  ;;  %v13443_v29 = vld [vmem:[#allocation7 + $0x260] sm:$0xf0]  ;;  %v11803_v13 = vld [vmem:[#allocation7 + $0x50] sm:$0xf]  ;;  %v13380_v2 = vld [vmem:[#allocation7 + $0x68] sm:$0xf0] }
 0x56b   : > { %8272 = vmatpush.bf16.msrb.mxu0 %v11856_v27  ;;  %v12419_v27 = vld [vmem:[#allocation7 + $0x520] sm:$0xf]  ;;  %8302 = vmatpush.bf16.msrb.mxu2 %v12248_v46  ;;  %v12652_v38 = vmul.f32 -1.442695, %v8042_v21  ;;  %v15385_v60 = vadd.f32 1.0, %v13884_v58  ;;  %v11804_v49 = vor.u32 %v13380_v2, %v11803_v13 }
 0x56c   : > { %v12420_v7 = vor.u32 %v13534_v37, %v12419_v27  ;;  %8317 = vmatpush.bf16.msrb.mxu3 %v12444_v57  ;;  %v11887_v46 = vld [vmem:[#allocation7 + $0xf8] sm:$0xf]  ;;  %v11859_v27 = vld [vmem:[#allocation7 + $0xc0] sm:$0xf]  ;;  %v13450_v57 = vld [vmem:[#allocation7 + $0x298] sm:$0xf0] }
 0x56d   : > { %13885 = vpow2.f32 %v12652_v38  ;;  %8289 = vmatpush.bf16.msrb.mxu1 %v11996_v26  ;;  %v8447_v22 = vand.u32 2147483648, %v15385_v60  ;;  %vm8441_vm9 = vweird.f32 %v15385_v60  ;;  %v8445_v21 = vand.u32 2147483647, %v15385_v60  ;;  %v13394_v26 = vld [vmem:[#allocation7 + $0xd8] sm:$0xf0] }
 0x56e   : > { %13887 = vrcp.f32 %v15385_v60  ;;  %v12083_v58 = vld [vmem:[#allocation7 + $0x280] sm:$0xf] }
 0x56f   : > { %8273 = vmatpush.bf16.msrb.mxu0 %v11828_v59  ;;  %v13415_v59 = vld [vmem:[#allocation7 + $0x180] sm:$0xf0]  ;;  %8303 = vmatpush.bf16.msrb.mxu2 %v12220_v19  ;;  %v8448_v14 = vor.u32 1.1754944e-38, %v8447_v22  ;;  %vm15416_vm14 = vcmp.eq.f32.partialorder %v8445_v21, 8.507059e+37  ;;  %v12084_v33 = vor.u32 %v13450_v57, %v12083_v58  ;;  %v13436_v21 = vld [vmem:[#allocation7 + $0x228] sm:$0xf0] }
 0x570   : > { %v11944_v52 = vor.u32 %v13415_v59, %v11943_v53  ;;  %8366 = vmatpush.bf16.msra.mxu3 %v12644_v44  ;;  %8290 = vmatmul.bf16.vlgmr.msrb.gmra.mxu1 %v15361_v12  ;;  %v8067_v53 = vpop.f32.mrf.mxu1  ;;  %v13506_v59 = vld [vmem:[#allocation7 + $0x458] sm:$0xf0]  ;;  %v12251_v58 = vld [vmem:[#allocation7 + $0x3d0] sm:$0xf]  ;;  %v13492_v57 = vld [vmem:[#allocation7 + $0x3e8] sm:$0xf0] }
 0x571   : > { %8338 = vmatpush.bf16.msra.mxu1 %v12196_v0  ;;  %8318 = vmatmul.bf16.vlgmr.msrb.gmra.mxu3 %v15359_v39  ;;  %v13562_v44 = vld [vmem:[#allocation7 + $0x618] sm:$0xf0] }
 0x572   : > { %8304 = vmatmul.bf16.vlgmr.msrb.gmra.mxu2 %v15355_v54 }
 0x573   : > { %8274 = vmatpush.bf16.msrb.mxu0 %v11800_v15  ;;  %8352 = vmatpush.bf16.msra.mxu2 %v12420_v7  ;;  %v12587_v15 = vld [vmem:[#allocation7 + $0x670] sm:$0xf]  ;;  %v13886_v23 = vpop.eup %13885  ;;  %v12560_v7 = vor.u32 %v13569_v35, %v12559_v30  ;;  %v12056_v35 = vor.u32 %v13443_v29, %v12055_v17 }
 0x574   : > { %v15392_v3 = vpop.eup %13887  ;;  %v15394_v25 = vadd.f32 1.0, %v13886_v23  ;;  %8367 = vmatpush.bf16.msra.mxu3 %v12616_v43  ;;  %v12588_v61 = vor.u32 %v13576_v40, %v12587_v15  ;;  %v12532_v43 = vor.u32 %v13562_v44, %v12531_v16  ;;  %v11832_v23 = vor.u32 %v13387_v42, %v15413_v11  ;;  %v12666_v44 = vld [vmem:[%s14621_s12 + $0x1f8] sm:$0xff] }
 0x575   : > { %8339 = vmatpush.bf16.msra.mxu1 %v12168_v36  ;;  %v8437_v41 = vmul.f32 %v15392_v3, %v15385_v60  ;;  %vm8442_vm10 = vweird.f32 %v15392_v3  ;;  %v12659_v60 = vld [vmem:[%s14621_s12 + $0x1c0] sm:$0xff]  ;;  %v8081_v45 = vpop.f32.mrf.mxu2  ;;  %v11775_v11 = vld [vmem:[#allocation7 + $0x18] sm:$0xf]  ;;  %v13373_v42 = vld [vmem:[#allocation7 + $0x30] sm:$0xf0] }
 0x576   : > { %13889 = vrcp.f32 %v15394_v25  ;;  %vm15409_vm11 = vmor %vm8441_vm9, %vm8442_vm10  ;;  %vm8546_vm15 = vweird.f32 %v15394_v25  ;;  %v8550_v63 = vand.u32 2147483647, %v15394_v25 }
 0x577   : > { %8275 = vmatpush.bf16.msrb.mxu0 %v11772_v50  ;;  %8353 = vmatpush.bf16.msra.mxu2 %v12392_v1  ;;  %v11888_v50 = vor.u32 %v13401_v24, %v11887_v46  ;;  %v8438_v37 = vsub.f32 1.0, %v8437_v41  ;;  %v8053_v19 = vpop.f32.mrf.mxu0  ;;  %v11860_v1 = vor.u32 %v13394_v26, %v11859_v27  ;;  %v13499_v46 = vld [vmem:[#allocation7 + $0x420] sm:$0xf0]  ;;  %v12503_v24 = vld [vmem:[#allocation7 + $0x5c8] sm:$0xf] }
 0x578   : > { %v8054_v38 = vadd.f32 %v8053_v19, %v14472_v4  ;;  %8368 = vmatpush.bf16.msra.mxu3 %v12588_v61  ;;  %v13555_v41 = vld [vmem:[#allocation7 + $0x5e0] sm:$0xf0]  ;;  %v8069_v19 = vpop.f32.mrf.mxu1  ;;  %vm15448_vm12 = vcmp.eq.f32.partialorder %v8550_v63, 8.507059e+37 }
 0x579   : > { %8340 = vmatpush.bf16.msra.mxu1 %v12140_v56  ;;  %v8439_v0 = vmul.f32 %v15392_v3, %v8438_v37  ;;  %v12027_v37 = vld [vmem:[#allocation7 + $0x210] sm:$0xf] }
 0x57a   : > { %8276 = vmatmul.bf16.vlgmr.msrb.gmra.mxu0 %v15357_v48  ;;  %v8068_v47 = vadd.f32 %v8067_v53, %v8054_v38 }
 0x57b   : > { %8324 = vmatpush.bf16.msra.mxu0 %v11972_v34  ;;  %8354 = vmatpush.bf16.msra.mxu2 %v12364_v32  ;;  %v12307_v34 = vld [vmem:[#allocation7 + $0x440] sm:$0xf]  ;;  %v8095_v32 = vpop.f32.mrf.mxu3 }
 0x57c   : > { %v15420_v51 = vpop.eup %13889  ;;  %v12308_v62 = vor.u32 %v13506_v59, %v12307_v34  ;;  %8369 = vmatpush.bf16.msra.mxu3 %v12560_v7  ;;  %v8082_v56 = vadd.f32 %v8081_v45, %v8068_v47  ;;  %v11999_v47 = vld [vmem:[#allocation7 + $0x1d8] sm:$0xf] }
 0x57d   : > { %8341 = vmatpush.bf16.msra.mxu1 %v12112_v20  ;;  %v8542_v40 = vmul.f32 %v15420_v51, %v15394_v25  ;;  %vm8547_vm1 = vweird.f32 %v15420_v51  ;;  %v12447_v45 = vld [vmem:[#allocation7 + $0x558] sm:$0xf] }
 0x57e   : > { %v8096_v30 = vadd.f32 %v8095_v32, %v8082_v56  ;;  %vm15443_vm4 = vmor %vm8546_vm15, %vm8547_vm1 }
 0x57f   : > { %8325 = vmatpush.bf16.msra.mxu0 %v11944_v52  ;;  %v8440_v52 = vadd.f32 %v15392_v3, %v8439_v0  ;;  %8355 = vmatpush.bf16.msra.mxu2 %v12336_v18  ;;  %v8543_v61 = vsub.f32 1.0, %v8542_v40  ;;  %v8055_v22 = vpop.f32.mrf.mxu0  ;;  %v12504_v18 = vor.u32 %v13555_v41, %v12503_v24  ;;  %v13548_v0 = vld [vmem:[#allocation7 + $0x5a8] sm:$0xf0]  ;;  %v11776_v40 = vor.u32 %v13373_v42, %v11775_v11 }
 0x580   : > { %v8056_v26 = vadd.f32 %v8055_v22, %v14472_v4  ;;  %8370 = vmatpush.bf16.msra.mxu3 %v12532_v43  ;;  %v12646_v34 = vmul.f32 -1.442695, %v8096_v30  ;;  %v12475_v4 = vld [vmem:[#allocation7 + $0x590] sm:$0xf] }
 0x581   : > { %v8444_v15 = vsel %vm15409_vm11, %v15392_v3, %v8440_v52  ;;  %v8552_v3 = vand.u32 2147483648, %v15394_v25  ;;  %8342 = vmatpush.bf16.msra.mxu1 %v12084_v33  ;;  %v8544_v20 = vmul.f32 %v15420_v51, %v8543_v61  ;;  %v12028_v25 = vor.u32 %v13436_v21, %v12027_v37  ;;  %v8083_v52 = vpop.f32.mrf.mxu2  ;;  %v12223_v33 = vld [vmem:[#allocation7 + $0x398] sm:$0xf]  ;;  %v12667_v11 = vld [vmem:[%s14621_s12 + $0x200] sm:$0xff] }
 0x582   : > { %v8449_v55 = vsel %vm15416_vm14, %v8448_v14, %v8444_v15  ;;  %v8070_v7 = vadd.f32 %v8069_v19, %v8056_v26  ;;  %13891 = vpow2.f32 %v12646_v34  ;;  %v12252_v14 = vor.u32 %v13492_v57, %v12251_v58  ;;  %v13541_v15 = vld [vmem:[#allocation7 + $0x570] sm:$0xf0] }
 0x583   : > { %8326 = vmatpush.bf16.msra.mxu0 %v11916_v31  ;;  %v12279_v31 = vld [vmem:[#allocation7 + $0x408] sm:$0xf]  ;;  %vm8661_vm0 = vcmp.gt.f32.partialorder %v8449_v55, %v12659_v60  ;;  %8356 = vmatpush.bf16.msra.mxu2 %v12308_v62  ;;  %v8553_v53 = vor.u32 1.1754944e-38, %v8552_v3  ;;  %v8545_v59 = vadd.f32 %v15420_v51, %v8544_v20  ;;  %v13429_v60 = vld [vmem:[#allocation7 + $0x1f0] sm:$0xf0]  ;;  %v8097_v17 = vpop.f32.mrf.mxu3  ;;  %v12448_v56 = vor.u32 %v13541_v15, %v12447_v45 }
 0x584   : > { %v12280_v27 = vor.u32 %v13499_v46, %v12279_v31  ;;  %8371 = vmatpush.bf16.msra.mxu3 %v12504_v18  ;;  %v13485_v62 = vld [vmem:[#allocation7 + $0x3b0] sm:$0xf0]  ;;  %v8084_v43 = vadd.f32 %v8083_v52, %v8070_v7 }
 0x585   : > { %8343 = vmatpush.bf16.msra.mxu1 %v12056_v35  ;;  %v8549_v36 = vsel %vm15443_vm4, %v15420_v51, %v8545_v59  ;;  %v12000_v51 = vor.u32 %v13429_v60, %v11999_v47  ;;  %v12224_v46 = vor.u32 %v13485_v62, %v12223_v33  ;;  %v12660_v37 = vld [vmem:[%s14621_s12 + $0x1c8] sm:$0xff] }
 0x586   : > { %v8554_v29 = vsel %vm15448_vm12, %v8553_v53, %v8549_v36 }
 0x587   : > { %8327 = vmatpush.bf16.msra.mxu0 %v11888_v50  ;;  %v12673_v50 = vsel %vm8661_vm0, 1.0, %v14229_v28  ;;  %8357 = vmatpush.bf16.msra.mxu2 %v12280_v27  ;;  %vm8668_vm13 = vcmp.gt.f32.partialorder %v8554_v29, %v12666_v44 }
 0x588   : > { %8703 = vst [vmem:[%s14625_s17] sm:$0xff] %v12673_v50  ;;  %v12680_v31 = vsel %vm8668_vm13, 1.0, %v14229_v28  ;;  %v13892_v24 = vpop.eup %13891 }
 0x589   : > { %8344 = vmatpush.bf16.msra.mxu1 %v12028_v25  ;;  %8710 = vst [vmem:[%s14625_s17 + $0x38] sm:$0xff] %v12680_v31  ;;  %v8423_v55 = vadd.f32 1.0, %v13892_v24 }
 0x58b   : > { %8328 = vmatpush.bf16.msra.mxu0 %v11860_v1  ;;  %v12476_v1 = vor.u32 %v13548_v0, %v12475_v4  ;;  %8358 = vmatpush.bf16.msra.mxu2 %v12252_v14  ;;  %v8462_v13 = vand.u32 2147483648, %v8423_v55  ;;  %vm8456_vm8 = vweird.f32 %v8423_v55  ;;  %v8460_v30 = vand.u32 2147483647, %v8423_v55 }
 0x58d   : > { %8372 = vmatpush.bf16.msra.mxu3 %v12476_v1  ;;  %8345 = vmatpush.bf16.msra.mxu1 %v12000_v51  ;;  %vm8461_vm2 = vcmp.eq.f32.partialorder %v8460_v30, 8.507059e+37 }
 0x58e   : > { %v8123_v50 = vpop.f32.mrf.mxu1 }
 0x58f   : > { %8329 = vmatpush.bf16.msra.mxu0 %v11832_v23  ;;  %v8098_v23 = vadd.f32 %v8097_v17, %v8084_v43  ;;  %8359 = vmatpush.bf16.msra.mxu2 %v12224_v46 }
 0x590   : > { %8346 = vmatmul.bf16.vlgmr.msra.gmra.mxu1 %v15361_v12 }
 0x591   : > { %v12653_v32 = vmul.f32 -1.442695, %v8098_v23  ;;  %8373 = vmatpush.bf16.msra.mxu3 %v12448_v56 }
 0x592   : > { %8360 = vmatmul.bf16.vlgmr.msra.gmra.mxu2 %v15355_v54  ;;  %v8463_v54 = vor.u32 1.1754944e-38, %v8462_v13 }
 0x593   : > { %8330 = vmatpush.bf16.msra.mxu0 %v11804_v49  ;;  %13893 = vpow2.f32 %v12653_v32 }
 0x594   : > { %13895 = vrcp.f32 %v8423_v55  ;;  %8374 = vmatmul.bf16.vlgmr.msra.gmra.mxu3 %v15359_v39  ;;  %v8151_v18 = vpop.f32.mrf.mxu3 }
 0x595   : > { %v8137_v21 = vpop.f32.mrf.mxu2 }
 0x596   : > { %v8125_v59 = vpop.f32.mrf.mxu1 }
 0x597   : > { %8331 = vmatpush.bf16.msra.mxu0 %v11776_v40  ;;  %v8109_v22 = vpop.f32.mrf.mxu0 }
 0x599   : > { %v13894_v63 = vpop.eup %13893 }
 0x59a   : > { %8332 = vmatmul.bf16.vlgmr.msra.gmra.mxu0 %v15357_v48  ;;  %v13896_v3 = vpop.eup %13895  ;;  %v8430_v41 = vadd.f32 1.0, %v13894_v63  ;;  %v8110_v48 = vadd.f32 %v8109_v22, %v14474_v5 }
 0x59b   : > { %v8452_v61 = vmul.f32 %v13896_v3, %v8423_v55  ;;  %vm8457_vm5 = vweird.f32 %v13896_v3 }
 0x59c   : > { %13897 = vrcp.f32 %v8430_v41  ;;  %vm8458_vm3 = vmor %vm8456_vm8, %vm8457_vm5  ;;  %v8124_v35 = vadd.f32 %v8123_v50, %v8110_v48  ;;  %vm8561_vm6 = vweird.f32 %v8430_v41  ;;  %v8565_v57 = vand.u32 2147483647, %v8430_v41  ;;  %v8153_v36 = vpop.f32.mrf.mxu3 }
 0x59d   : > { %v8453_v2 = vsub.f32 1.0, %v8452_v61  ;;  %v8567_v34 = vand.u32 2147483648, %v8430_v41  ;;  %v8139_v42 = vpop.f32.mrf.mxu2 }
 0x59e   : > { %v8138_v20 = vadd.f32 %v8137_v21, %v8124_v35  ;;  %vm8566_vm11 = vcmp.eq.f32.partialorder %v8565_v57, 8.507059e+37  ;;  %v12668_v57 = vld [vmem:[%s14621_s12 + $0x208] sm:$0xff] }
 0x59f   : > { %v8454_v12 = vmul.f32 %v13896_v3, %v8453_v2  ;;  %v8111_v4 = vpop.f32.mrf.mxu0  ;;  %v8568_v49 = vor.u32 1.1754944e-38, %v8567_v34 }
 0x5a0   : > { %v8152_v53 = vadd.f32 %v8151_v18, %v8138_v20  ;;  %v8112_v7 = vadd.f32 %v8111_v4, %v14474_v5 }
 0x5a1   : > { %v8455_v39 = vadd.f32 %v13896_v3, %v8454_v12 }
 0x5a2   : > { %v13898_v27 = vpop.eup %13897  ;;  %v12647_v44 = vmul.f32 -1.442695, %v8152_v53  ;;  %v8126_v25 = vadd.f32 %v8125_v59, %v8112_v7 }
 0x5a3   : > { %v8459_v26 = vsel %vm8458_vm3, %v13896_v3, %v8455_v39  ;;  %v8557_v19 = vmul.f32 %v13898_v27, %v8430_v41  ;;  %vm8562_vm9 = vweird.f32 %v13898_v27  ;;  %v12661_v41 = vld [vmem:[%s14621_s12 + $0x1d0] sm:$0xff] }
 0x5a4   : > { %v8464_v58 = vsel %vm8461_vm2, %v8463_v54, %v8459_v26  ;;  %vm8563_vm10 = vmor %vm8561_vm6, %vm8562_vm9  ;;  %13899 = vpow2.f32 %v12647_v44  ;;  %v8140_v52 = vadd.f32 %v8139_v42, %v8126_v25 }
 0x5a5   : > { %vm8662_vm7 = vcmp.gt.f32.partialorder %v8464_v58, %v12660_v37  ;;  %v8558_v38 = vsub.f32 1.0, %v8557_v19 }
 0x5a6   : > { %v12674_v0 = vsel %vm8662_vm7, 1.0, %v14229_v28  ;;  %v8154_v60 = vadd.f32 %v8153_v36, %v8140_v52 }
 0x5a7   : > { %8704 = vst [vmem:[%s14625_s17 + $0x8] sm:$0xff] %v12674_v0  ;;  %v8559_v16 = vmul.f32 %v13898_v27, %v8558_v38 }
 0x5a8   : > { %v12654_v62 = vmul.f32 -1.442695, %v8154_v60 }
 0x5a9   : > { %v8560_v14 = vadd.f32 %v13898_v27, %v8559_v16 }
 0x5aa   : > { %v13900_v33 = vpop.eup %13899  ;;  %13901 = vpow2.f32 %v12654_v62 }
 0x5ab   : > { %v8564_v47 = vsel %vm8563_vm10, %v13898_v27, %v8560_v14  ;;  %v8424_v43 = vadd.f32 1.0, %v13900_v33 }
 0x5ac   : > { %v8569_v1 = vsel %vm8566_vm11, %v8568_v49, %v8564_v47 }
 0x5ad   : > { %vm8669_vm14 = vcmp.gt.f32.partialorder %v8569_v1, %v12667_v11  ;;  %13903 = vrcp.f32 %v8424_v43  ;;  %v8477_v40 = vand.u32 2147483648, %v8424_v43  ;;  %vm8471_vm15 = vweird.f32 %v8424_v43 }
 0x5ae   : > { %v12681_v5 = vsel %vm8669_vm14, 1.0, %v14229_v28  ;;  %v8475_v31 = vand.u32 2147483647, %v8424_v43  ;;  %v8179_v24 = vpop.f32.mrf.mxu1 }
 0x5af   : > { %8711 = vst [vmem:[%s14625_s17 + $0x40] sm:$0xff] %v12681_v5  ;;  %v8478_v32 = vor.u32 1.1754944e-38, %v8477_v40 }
 0x5b0   : > { %v13902_v17 = vpop.eup %13901  ;;  %vm8476_vm4 = vcmp.eq.f32.partialorder %v8475_v31, 8.507059e+37 }
 0x5b1   : > { %v8431_v45 = vadd.f32 1.0, %v13902_v17 }
 0x5b3   : > { %v13904_v29 = vpop.eup %13903  ;;  %13905 = vrcp.f32 %v8431_v45  ;;  %vm8576_vm12 = vweird.f32 %v8431_v45  ;;  %v8580_v50 = vand.u32 2147483647, %v8431_v45  ;;  %v8582_v12 = vand.u32 2147483648, %v8431_v45 }
 0x5b4   : > { %v8467_v15 = vmul.f32 %v13904_v29, %v8424_v43  ;;  %vm8472_vm0 = vweird.f32 %v13904_v29  ;;  %v8207_v22 = vpop.f32.mrf.mxu3 }
 0x5b5   : > { %vm8473_vm1 = vmor %vm8471_vm15, %vm8472_vm0  ;;  %v8193_v61 = vpop.f32.mrf.mxu2  ;;  %v8583_v20 = vor.u32 1.1754944e-38, %v8582_v12  ;;  %vm8581_vm3 = vcmp.eq.f32.partialorder %v8580_v50, 8.507059e+37 }
 0x5b6   : > { %v8468_v23 = vsub.f32 1.0, %v8467_v15  ;;  %v8181_v21 = vpop.f32.mrf.mxu1 }
 0x5b7   : > { %v8165_v51 = vpop.f32.mrf.mxu0 }
 0x5b8   : > { %v8166_v46 = vadd.f32 %v8165_v51, %v14476_v6  ;;  %v8469_v56 = vmul.f32 %v13904_v29, %v8468_v23 }
 0x5b9   : > { %v13906_v3 = vpop.eup %13905 }
 0x5ba   : > { %v8180_v55 = vadd.f32 %v8179_v24, %v8166_v46  ;;  %v8470_v63 = vadd.f32 %v13904_v29, %v8469_v56  ;;  %v8572_v2 = vmul.f32 %v13906_v3, %v8431_v45  ;;  %vm8577_vm8 = vweird.f32 %v13906_v3 }
 0x5bb   : > { %vm8578_vm5 = vmor %vm8576_vm12, %vm8577_vm8 }
 0x5bc   : > { %v8474_v13 = vsel %vm8473_vm1, %v13904_v29, %v8470_v63  ;;  %v8194_v30 = vadd.f32 %v8193_v61, %v8180_v55  ;;  %v8573_v54 = vsub.f32 1.0, %v8572_v2  ;;  %v8209_v4 = vpop.f32.mrf.mxu3  ;;  %v12662_v29 = vld [vmem:[%s14621_s12 + $0x1d8] sm:$0xff] }
 0x5bd   : > { %v8479_v48 = vsel %vm8476_vm4, %v8478_v32, %v8474_v13  ;;  %v8195_v34 = vpop.f32.mrf.mxu2 }
 0x5be   : > { %vm8663_vm13 = vcmp.gt.f32.partialorder %v8479_v48, %v12661_v41  ;;  %v8208_v35 = vadd.f32 %v8207_v22, %v8194_v30  ;;  %v8574_v26 = vmul.f32 %v13906_v3, %v8573_v54  ;;  %v12669_v48 = vld [vmem:[%s14621_s12 + $0x210] sm:$0xff] }
 0x5bf   : > { %v8167_v39 = vpop.f32.mrf.mxu0  ;;  %v12675_v27 = vsel %vm8663_vm13, 1.0, %v14229_v28 }
 0x5c0   : > { %v8168_v37 = vadd.f32 %v8167_v39, %v14476_v6  ;;  %8705 = vst [vmem:[%s14625_s17 + $0x10] sm:$0xff] %v12675_v27  ;;  %v12648_v19 = vmul.f32 -1.442695, %v8208_v35  ;;  %v8575_v58 = vadd.f32 %v13906_v3, %v8574_v26 }
 0x5c2   : > { %v8182_v18 = vadd.f32 %v8181_v21, %v8168_v37  ;;  %13907 = vpow2.f32 %v12648_v19  ;;  %v8579_v38 = vsel %vm8578_vm5, %v13906_v3, %v8575_v58 }
 0x5c3   : > { %v8584_v0 = vsel %vm8581_vm3, %v8583_v20, %v8579_v38 }
 0x5c4   : > { %v8196_v53 = vadd.f32 %v8195_v34, %v8182_v18  ;;  %vm8670_vm2 = vcmp.gt.f32.partialorder %v8584_v0, %v12668_v57 }
 0x5c5   : > { %v12682_v6 = vsel %vm8670_vm2, 1.0, %v14229_v28 }
 0x5c6   : > { %v8210_v7 = vadd.f32 %v8209_v4, %v8196_v53  ;;  %8712 = vst [vmem:[%s14625_s17 + $0x48] sm:$0xff] %v12682_v6 }
 0x5c8   : > { %v13908_v59 = vpop.eup %13907  ;;  %v12655_v16 = vmul.f32 -1.442695, %v8210_v7 }
 0x5c9   : > { %v8425_v44 = vadd.f32 1.0, %v13908_v59 }
 0x5ca   : > { %13909 = vpow2.f32 %v12655_v16 }
 0x5cb   : > { %13911 = vrcp.f32 %v8425_v44  ;;  %v8492_v42 = vand.u32 2147483648, %v8425_v44  ;;  %vm8486_vm6 = vweird.f32 %v8425_v44  ;;  %v8490_v52 = vand.u32 2147483647, %v8425_v44 }
 0x5cd   : > { %v8493_v33 = vor.u32 1.1754944e-38, %v8492_v42  ;;  %vm8491_vm10 = vcmp.eq.f32.partialorder %v8490_v52, 8.507059e+37 }
 0x5ce   : > { %v8235_v60 = vpop.f32.mrf.mxu1 }
 0x5d0   : > { %v13910_v49 = vpop.eup %13909 }
 0x5d1   : > { %v13912_v25 = vpop.eup %13911  ;;  %v8432_v14 = vadd.f32 1.0, %v13910_v49  ;;  %v12663_v49 = vld [vmem:[%s14621_s12 + $0x1e0] sm:$0xff] }
 0x5d2   : > { %v8482_v11 = vmul.f32 %v13912_v25, %v8425_v44  ;;  %vm8487_vm7 = vweird.f32 %v13912_v25 }
 0x5d3   : > { %13913 = vrcp.f32 %v8432_v14  ;;  %vm8488_vm9 = vmor %vm8486_vm6, %vm8487_vm7  ;;  %vm8591_vm11 = vweird.f32 %v8432_v14  ;;  %v8595_v46 = vand.u32 2147483647, %v8432_v14  ;;  %v8597_v24 = vand.u32 2147483648, %v8432_v14 }
 0x5d4   : > { %v8483_v47 = vsub.f32 1.0, %v8482_v11  ;;  %v8263_v31 = vpop.f32.mrf.mxu3 }
 0x5d5   : > { %v8249_v45 = vpop.f32.mrf.mxu2  ;;  %v8598_v2 = vor.u32 1.1754944e-38, %v8597_v24  ;;  %vm8596_vm1 = vcmp.eq.f32.partialorder %v8595_v46, 8.507059e+37 }
 0x5d6   : > { %v8484_v5 = vmul.f32 %v13912_v25, %v8483_v47  ;;  %v8237_v41 = vpop.f32.mrf.mxu1 }
 0x5d7   : > { %v8221_v36 = vpop.f32.mrf.mxu0 }
 0x5d8   : > { %v8222_v1 = vadd.f32 %v8221_v36, %v14478_v8  ;;  %v8485_v43 = vadd.f32 %v13912_v25, %v8484_v5 }
 0x5d9   : > { %v13914_v17 = vpop.eup %13913 }
 0x5da   : > { %v8236_v62 = vadd.f32 %v8235_v60, %v8222_v1  ;;  %v8489_v15 = vsel %vm8488_vm9, %v13912_v25, %v8485_v43  ;;  %v8587_v40 = vmul.f32 %v13914_v17, %v8432_v14  ;;  %vm8592_vm15 = vweird.f32 %v13914_v17 }
 0x5db   : > { %v8494_v51 = vsel %vm8491_vm10, %v8493_v33, %v8489_v15  ;;  %vm8593_vm0 = vmor %vm8591_vm11, %vm8592_vm15 }
 0x5dc   : > { %v8250_v23 = vadd.f32 %v8249_v45, %v8236_v62  ;;  %vm8664_vm14 = vcmp.gt.f32.partialorder %v8494_v51, %v12662_v29  ;;  %v8588_v56 = vsub.f32 1.0, %v8587_v40  ;;  %v8265_v35 = vpop.f32.mrf.mxu3 }
 0x5dd   : > { %v12676_v63 = vsel %vm8664_vm14, 1.0, %v14229_v28  ;;  %v8251_v50 = vpop.f32.mrf.mxu2 }
 0x5de   : > { %v8264_v32 = vadd.f32 %v8263_v31, %v8250_v23  ;;  %8706 = vst [vmem:[%s14625_s17 + $0x18] sm:$0xff] %v12676_v63  ;;  %v8589_v61 = vmul.f32 %v13914_v17, %v8588_v56  ;;  %v12670_v31 = vld [vmem:[%s14621_s12 + $0x218] sm:$0xff] }
 0x5df   : > { %v8223_v55 = vpop.f32.mrf.mxu0 }
 0x5e0   : > { %v8224_v3 = vadd.f32 %v8223_v55, %v14478_v8  ;;  %v12649_v13 = vmul.f32 -1.442695, %v8264_v32  ;;  %v8590_v22 = vadd.f32 %v13914_v17, %v8589_v61 }
 0x5e2   : > { %v8238_v30 = vadd.f32 %v8237_v41, %v8224_v3  ;;  %13915 = vpow2.f32 %v12649_v13  ;;  %v8594_v12 = vsel %vm8593_vm0, %v13914_v17, %v8590_v22 }
 0x5e3   : > { %v8599_v39 = vsel %vm8596_vm1, %v8598_v2, %v8594_v12 }
 0x5e4   : > { %v8252_v54 = vadd.f32 %v8251_v50, %v8238_v30  ;;  %vm8671_vm4 = vcmp.gt.f32.partialorder %v8599_v39, %v12669_v48 }
 0x5e5   : > { %v12683_v8 = vsel %vm8671_vm4, 1.0, %v14229_v28 }
 0x5e6   : > { %v8266_v27 = vadd.f32 %v8265_v35, %v8252_v54  ;;  %8713 = vst [vmem:[%s14625_s17 + $0x50] sm:$0xff] %v12683_v8 }
 0x5e8   : > { %v13916_v37 = vpop.eup %13915  ;;  %v12656_v21 = vmul.f32 -1.442695, %v8266_v27 }
 0x5e9   : > { %v8426_v26 = vadd.f32 1.0, %v13916_v37 }
 0x5ea   : > { %13917 = vpow2.f32 %v12656_v21 }
 0x5eb   : > { %13919 = vrcp.f32 %v8426_v26  ;;  %v8507_v57 = vand.u32 2147483648, %v8426_v26  ;;  %vm8501_vm12 = vweird.f32 %v8426_v26  ;;  %v8505_v38 = vand.u32 2147483647, %v8426_v26 }
 0x5ed   : > { %v8291_v0 = vpop.f32.mrf.mxu1  ;;  %v8508_v6 = vor.u32 1.1754944e-38, %v8507_v57  ;;  %vm8506_vm5 = vcmp.eq.f32.partialorder %v8505_v38, 8.507059e+37 }
 0x5f0   : > { %v13918_v19 = vpop.eup %13917 }
 0x5f1   : > { %v13920_v20 = vpop.eup %13919  ;;  %v8433_v18 = vadd.f32 1.0, %v13918_v19 }
 0x5f2   : > { %v8497_v58 = vmul.f32 %v13920_v20, %v8426_v26  ;;  %vm8502_vm13 = vweird.f32 %v13920_v20  ;;  %v12664_v26 = vld [vmem:[%s14621_s12 + $0x1e8] sm:$0xff] }
 0x5f3   : > { %13921 = vrcp.f32 %v8433_v18  ;;  %vm8503_vm8 = vmor %vm8501_vm12, %vm8502_vm13  ;;  %vm8606_vm3 = vweird.f32 %v8433_v18  ;;  %v8610_v36 = vand.u32 2147483647, %v8433_v18  ;;  %v8612_v1 = vand.u32 2147483648, %v8433_v18 }
 0x5f4   : > { %v8498_v34 = vsub.f32 1.0, %v8497_v58  ;;  %v8319_v47 = vpop.f32.mrf.mxu3 }
 0x5f5   : > { %v8305_v25 = vpop.f32.mrf.mxu2  ;;  %v8293_v17 = vpop.f32.mrf.mxu1  ;;  %v8613_v15 = vor.u32 1.1754944e-38, %v8612_v1  ;;  %vm8611_vm9 = vcmp.eq.f32.partialorder %v8610_v36, 8.507059e+37 }
 0x5f6   : > { %v8499_v7 = vmul.f32 %v13920_v20, %v8498_v34 }
 0x5f7   : > { %v8277_v53 = vpop.f32.mrf.mxu0 }
 0x5f8   : > { %v8278_v4 = vadd.f32 %v8277_v53, %v14480_v9  ;;  %v8500_v16 = vadd.f32 %v13920_v20, %v8499_v7 }
 0x5f9   : > { %v13922_v44 = vpop.eup %13921 }
 0x5fa   : > { %v8292_v59 = vadd.f32 %v8291_v0, %v8278_v4  ;;  %v8504_v14 = vsel %vm8503_vm8, %v13920_v20, %v8500_v16  ;;  %v8602_v11 = vmul.f32 %v13922_v44, %v8433_v18  ;;  %vm8607_vm6 = vweird.f32 %v13922_v44 }
 0x5fb   : > { %v8509_v52 = vsel %vm8506_vm5, %v8508_v6, %v8504_v14  ;;  %vm8608_vm7 = vmor %vm8606_vm3, %vm8607_vm6 }
 0x5fc   : > { %v8306_v42 = vadd.f32 %v8305_v25, %v8292_v59  ;;  %vm8665_vm2 = vcmp.gt.f32.partialorder %v8509_v52, %v12663_v49  ;;  %v8603_v60 = vsub.f32 1.0, %v8602_v11  ;;  %v8321_v56 = vpop.f32.mrf.mxu3 }
 0x5fd   : > { %v12677_v62 = vsel %vm8665_vm2, 1.0, %v14229_v28  ;;  %v8307_v51 = vpop.f32.mrf.mxu2 }
 0x5fe   : > { %v8320_v5 = vadd.f32 %v8319_v47, %v8306_v42  ;;  %8707 = vst [vmem:[%s14625_s17 + $0x20] sm:$0xff] %v12677_v62  ;;  %v8604_v29 = vmul.f32 %v13922_v44, %v8603_v60  ;;  %v12671_v42 = vld [vmem:[%s14621_s12 + $0x220] sm:$0xff] }
 0x5ff   : > { %v8279_v33 = vpop.f32.mrf.mxu0 }
 0x600   : > { %v8280_v43 = vadd.f32 %v8279_v33, %v14480_v9  ;;  %v12650_v45 = vmul.f32 -1.442695, %v8320_v5  ;;  %v8605_v23 = vadd.f32 %v13922_v44, %v8604_v29 }
 0x602   : > { %v8294_v40 = vadd.f32 %v8293_v17, %v8280_v43  ;;  %13923 = vpow2.f32 %v12650_v45  ;;  %v8609_v46 = vsel %vm8608_vm7, %v13922_v44, %v8605_v23 }
 0x603   : > { %v8614_v32 = vsel %vm8611_vm9, %v8613_v15, %v8609_v46 }
 0x604   : > { %v8308_v24 = vadd.f32 %v8307_v51, %v8294_v40  ;;  %vm8672_vm10 = vcmp.gt.f32.partialorder %v8614_v32, %v12670_v31  ;;  %v12665_v32 = vld [vmem:[%s14621_s12 + $0x1f0] sm:$0xff] }
 0x605   : > { %v12684_v9 = vsel %vm8672_vm10, 1.0, %v14229_v28 }
 0x606   : > { %v8322_v55 = vadd.f32 %v8321_v56, %v8308_v24  ;;  %8714 = vst [vmem:[%s14625_s17 + $0x58] sm:$0xff] %v12684_v9 }
 0x608   : > { %v13924_v63 = vpop.eup %13923  ;;  %v12657_v3 = vmul.f32 -1.442695, %v8322_v55 }
 0x609   : > { %v8427_v41 = vadd.f32 1.0, %v13924_v63 }
 0x60a   : > { %13925 = vpow2.f32 %v12657_v3 }
 0x60b   : > { %13927 = vrcp.f32 %v8427_v41  ;;  %vm8516_vm11 = vweird.f32 %v8427_v41  ;;  %v8522_v48 = vand.u32 2147483648, %v8427_v41  ;;  %v8520_v12 = vand.u32 2147483647, %v8427_v41 }
 0x60d   : > { %v8347_v35 = vpop.f32.mrf.mxu1  ;;  %v8523_v8 = vor.u32 1.1754944e-38, %v8522_v48  ;;  %vm8521_vm0 = vcmp.eq.f32.partialorder %v8520_v12, 8.507059e+37  ;;  %v12672_v48 = vld [vmem:[%s14621_s12 + $0x228] sm:$0xff] }
 0x610   : > { %v13926_v61 = vpop.eup %13925 }
 0x611   : > { %v13928_v13 = vpop.eup %13927  ;;  %v8434_v2 = vadd.f32 1.0, %v13926_v61 }
 0x612   : > { %v8512_v30 = vmul.f32 %v13928_v13, %v8427_v41  ;;  %vm8517_vm14 = vweird.f32 %v13928_v13 }
 0x613   : > { %13929 = vrcp.f32 %v8434_v2  ;;  %vm8518_vm15 = vmor %vm8516_vm11, %vm8517_vm14  ;;  %v8627_v6 = vand.u32 2147483648, %v8434_v2  ;;  %v8625_v16 = vand.u32 2147483647, %v8434_v2  ;;  %vm8621_vm12 = vweird.f32 %v8434_v2 }
 0x614   : > { %v8513_v50 = vsub.f32 1.0, %v8512_v30 }
 0x615   : > { %v8361_v19 = vpop.f32.mrf.mxu2  ;;  %v8349_v49 = vpop.f32.mrf.mxu1  ;;  %v8628_v11 = vor.u32 1.1754944e-38, %v8627_v6  ;;  %vm8626_vm8 = vcmp.eq.f32.partialorder %v8625_v16, 8.507059e+37 }
 0x616   : > { %v8514_v39 = vmul.f32 %v13928_v13, %v8513_v50 }
 0x617   : > { %v8333_v22 = vpop.f32.mrf.mxu0  ;;  %v8375_v57 = vpop.f32.mrf.mxu3 }
 0x618   : > { %v8334_v54 = vadd.f32 %v8333_v22, %v14482_v10  ;;  %v8515_v37 = vadd.f32 %v13928_v13, %v8514_v39 }
 0x619   : > { %v13930_v21 = vpop.eup %13929 }
 0x61a   : > { %v8348_v27 = vadd.f32 %v8347_v35, %v8334_v54  ;;  %v8519_v20 = vsel %vm8518_vm15, %v13928_v13, %v8515_v37  ;;  %v8617_v18 = vmul.f32 %v13930_v21, %v8434_v2  ;;  %vm8622_vm4 = vweird.f32 %v13930_v21 }
 0x61b   : > { %v8524_v38 = vsel %vm8521_vm0, %v8523_v8, %v8519_v20  ;;  %vm8623_vm13 = vmor %vm8621_vm12, %vm8622_vm4 }
 0x61c   : > { %v8362_v58 = vadd.f32 %v8361_v19, %v8348_v27  ;;  %vm8666_vm1 = vcmp.gt.f32.partialorder %v8524_v38, %v12664_v26  ;;  %v8618_v53 = vsub.f32 1.0, %v8617_v18 }
 0x61d   : > { %v12678_v7 = vsel %vm8666_vm1, 1.0, %v14229_v28  ;;  %v8363_v47 = vpop.f32.mrf.mxu2 }
 0x61e   : > { %v8376_v4 = vadd.f32 %v8375_v57, %v8362_v58  ;;  %8708 = vst [vmem:[%s14625_s17 + $0x28] sm:$0xff] %v12678_v7  ;;  %v8619_v59 = vmul.f32 %v13930_v21, %v8618_v53 }
 0x61f   : > { %v8335_v34 = vpop.f32.mrf.mxu0  ;;  %v8377_v1 = vpop.f32.mrf.mxu3 }
 0x620   : > { %v8336_v0 = vadd.f32 %v8335_v34, %v14482_v10  ;;  %v12651_v44 = vmul.f32 -1.442695, %v8376_v4  ;;  %v8620_v25 = vadd.f32 %v13930_v21, %v8619_v59 }
 0x622   : > { %13931 = vpow2.f32 %v12651_v44  ;;  %v8350_v14 = vadd.f32 %v8349_v49, %v8336_v0  ;;  %v8624_v52 = vsel %vm8623_vm13, %v13930_v21, %v8620_v25 }
 0x623   : > { %v8629_v36 = vsel %vm8626_vm8, %v8628_v11, %v8624_v52 }
 0x624   : > { %v8364_v10 = vadd.f32 %v8363_v47, %v8350_v14  ;;  %vm8673_vm5 = vcmp.gt.f32.partialorder %v8629_v36, %v12671_v42 }
 0x625   : > { %v12685_v5 = vsel %vm8673_vm5, 1.0, %v14229_v28 }
 0x626   : > { %v8378_v60 = vadd.f32 %v8377_v1, %v8364_v10  ;;  %8715 = vst [vmem:[%s14625_s17 + $0x60] sm:$0xff] %v12685_v5 }
 0x628   : > { %v13932_v33 = vpop.eup %13931  ;;  %v12658_v62 = vmul.f32 -1.442695, %v8378_v60 }
 0x629   : > { %v8428_v43 = vadd.f32 1.0, %v13932_v33 }
 0x62a   : > { %13933 = vpow2.f32 %v12658_v62 }
 0x62b   : > { %13935 = vrcp.f32 %v8428_v43  ;;  %v8537_v23 = vand.u32 2147483648, %v8428_v43  ;;  %v8535_v51 = vand.u32 2147483647, %v8428_v43  ;;  %vm8531_vm2 = vweird.f32 %v8428_v43 }
 0x62d   : > { %v8538_v56 = vor.u32 1.1754944e-38, %v8537_v23  ;;  %vm8536_vm7 = vcmp.eq.f32.partialorder %v8535_v51, 8.507059e+37 }
 0x630   : > { %v13934_v17 = vpop.eup %13933 }
 0x631   : > { %v13936_v29 = vpop.eup %13935  ;;  %v8435_v45 = vadd.f32 1.0, %v13934_v17 }
 0x632   : > { %v8527_v15 = vmul.f32 %v13936_v29, %v8428_v43  ;;  %vm8532_vm3 = vweird.f32 %v13936_v29 }
 0x633   : > { %13937 = vrcp.f32 %v8435_v45  ;;  %vm8533_vm6 = vmor %vm8531_vm2, %vm8532_vm3  ;;  %v8642_v61 = vand.u32 2147483648, %v8435_v45  ;;  %v8640_v2 = vand.u32 2147483647, %v8435_v45  ;;  %vm8636_vm11 = vweird.f32 %v8435_v45 }
 0x634   : > { %v8528_v40 = vsub.f32 1.0, %v8527_v15 }
 0x635   : > { %v8643_v22 = vor.u32 1.1754944e-38, %v8642_v61  ;;  %vm8641_vm15 = vcmp.eq.f32.partialorder %v8640_v2, 8.507059e+37 }
 0x636   : > { %v8529_v31 = vmul.f32 %v13936_v29, %v8528_v40 }
 0x638   : > { %v8530_v46 = vadd.f32 %v13936_v29, %v8529_v31 }
 0x639   : > { %v13938_v24 = vpop.eup %13937 }
 0x63a   : > { %v8534_v55 = vsel %vm8533_vm6, %v13936_v29, %v8530_v46  ;;  %v8632_v9 = vmul.f32 %v13938_v24, %v8435_v45  ;;  %vm8637_vm10 = vweird.f32 %v13938_v24 }
 0x63b   : > { %v8539_v63 = vsel %vm8536_vm7, %v8538_v56, %v8534_v55  ;;  %vm8638_vm14 = vmor %vm8636_vm11, %vm8637_vm10 }
 0x63c   : > { %vm8667_vm9 = vcmp.gt.f32.partialorder %v8539_v63, %v12665_v32  ;;  %v8633_v3 = vsub.f32 1.0, %v8632_v9 }
 0x63d   : > { %v12679_v41 = vsel %vm8667_vm9, 1.0, %v14229_v28 }
 0x63e   : > { %8709 = vst [vmem:[%s14625_s17 + $0x30] sm:$0xff] %v12679_v41  ;;  %v8634_v13 = vmul.f32 %v13938_v24, %v8633_v3 }
 0x640   : > { %v8635_v30 = vadd.f32 %v13938_v24, %v8634_v13 }
 0x642   : > { %v8639_v50 = vsel %vm8638_vm14, %v13938_v24, %v8635_v30 }
 0x643   : > { %v8644_v12 = vsel %vm8641_vm15, %v8643_v22, %v8639_v50 }
 0x644   : > { %vm8674_vm0 = vcmp.gt.f32.partialorder %v8644_v12, %v12672_v48 }
 0x645   : > { %v12686_v54 = vsel %vm8674_vm0, 1.0, %v14229_v28 }
 0x646   : > { %8716 = vst [vmem:[%s14625_s17 + $0x68] sm:$0xff] %v12686_v54 }
 0x647   : > { %14114 = shalt.err (!%p14111_p9)
}
 0x648   : > { %s14232_s10 = smov 896   ;;  %s14233_s17 = smov 56  }
 0x649   : > { %13636 = dma.vmem_to_hbm [thread:$0]  (%p14326_p11), %s8732_s28, 1792, %s8734_s21, %s8718_s18, %s14232_s10, %s14232_s10, %s14233_s17  }
 0x64a PF: > { %s8748_s3 = sand.u32 1, %s14173_s24   ;;  %p13652_p10 = pnand %p8916_p2, %p14330_p12 }
 0x64b   : > { %s8749_s16 = scalar_lea.sflag [#allocation4], %s8748_s3 }
 0x64c   : > { %p13653_p1 = pneg %p13652_p10 }
 0x64e   : > { %14168 = dma.done.wait (%p13653_p1), %s8749_s16, 1792  }
 0x64f   : > { %14170 = vsyncadd (%p13653_p1), %s8749_s16, 4294965504  ;;  %s15651_s27 = sld [smem:[#allocation26_spill]]  ;;  %s15653_s24 = smov %s14177_s25 }
 0x650   : > { %s15652_s23 = sld [smem:[#allocation27_spill]]  ;;  %s15654_s25 = smov %s14181_s26 }
 0x655   : > { %p25_p0 = scmp.ge.s32.totalorder %s15651_s27, 4  }
 0x656   : > { %s15655_s26 = smov %s15652_s23 }
 0x657   :  { %27 = sbr.rel (!%p25_p0) target bundleno = 12 (0xc), region = 164 }
 0x65c   :  { %8755 = vsyncpa [#allocation3], 1 }
 0x65d   :  { %8757 = vsyncpa [#allocation3 + $0x1], 1 }
 0x65e   :  { %8758 = vsyncpa [#allocation6], 1 }
 0x65f   :  { %8759 = vsyncpa [#allocation9], 1 }
 0x660   :  { %8760 = vsyncpa [#allocation12], 1 }
 0x661   :  { %8762 = vsyncpa [#allocation12 + $0x1], 1 }
 0x662   :  { %8763 = vsyncpa [#allocation4], 1 }
 0x663   :  { %8765 = vsyncpa [#allocation4 + $0x1], 1 }

</bundles_post_ra>
